<compile_context>
chip_gen: v7x
topology: tpu7x:2x2x1
jax: 0.10.0
libtpu: 0.0.40
codegen_flags: <defaults>
</compile_context>

<pallas_src>
import functools

import jax
import jax.numpy as jnp
from jax import lax
from jax.experimental import pallas as pl
from jax.experimental.pallas import tpu as pltpu


def _apply_activation(y, activation, alpha):
    if activation == "identity":
        return y
    if activation == "relu":
        return jnp.maximum(y, 0.0)
    if activation == "tanh":
        return jnp.tanh(y)
    if activation in ("prelu", "leaky_relu"):
        # TODO(synk): per-channel PReLU alpha would need a (Cout, 1) operand.
        return jnp.where(y > 0, y, alpha * y)
    raise ValueError(f"unsupported activation: {activation}")


def _conv3d_block_kernel(*refs, K, Td, Cin, Wp, HWo, activation, alpha):
    # refs = (x_0 ... x_{Td+K-2}, w, b, out, col_scratch)
    #   x_refs[j] : (Cin, Lflat) bf16 -- padded depth slice t*Td + j, plane
    #               flattened to (Hp+1)*Wp so the plane is lane-dense.
    #   w_ref     : (Cout, K^3*Cin) f32 -- resident (constant index_map)
    #   b_ref     : (Cout, 1)       f32 -- resident
    #   o_ref     : (Cout, Td, HWo) f32 -- lane-dense output block
    #   col_ref   : (K^3*Cin, HWo)  f32 -- im2col strip scratch
    n_slices = Td + K - 1
    x_refs = refs[:n_slices]
    w_ref, b_ref, o_ref, col_ref = refs[n_slices:]

    w = w_ref[...]
    bias = b_ref[...]

    for dd in range(Td):                           # output depth slices (unrolled)
        # Assemble the im2col strip: rows [t*Cin, (t+1)*Cin) hold tap t's
        # lane-shifted window of the padded input plane.
        for kd in range(K):                        # depth taps
            xs = x_refs[dd + kd][...].astype(jnp.float32)     # (Cin, Lflat)
            for kh in range(K):
                for kw in range(K):
                    t = (kd * K + kh) * K + kw
                    shift = kh * Wp + kw           # in-plane tap == lane shift
                    col_ref[t * Cin:(t + 1) * Cin, :] = xs[:, shift:shift + HWo]
        # One MXU GEMM: (Cout, K^3*Cin) x (K^3*Cin, HWo) -> (Cout, HWo)
        acc = jnp.dot(w, col_ref[...], preferred_element_type=jnp.float32)
        acc = acc + bias
        acc = _apply_activation(acc, activation, alpha)
        o_ref[:, dd, :] = acc.astype(o_ref.dtype)


def conv_block_3d(x, weight, bias, *, stride=1, batch_norm=False,
                  activation="identity", alpha=0.25):
    """Forward of ConvolutionalBlock3d (defaults: no batch-norm, identity act).

    x      : (N, Cin, D, H, W) float32
    weight : (Cout, Cin, K, K, K)
    bias   : (Cout,)
    returns: (N, Cout, D, H, W) float32
    """
    assert stride == 1, "only stride=1 is implemented"
    # TODO(synk): batch_norm=True (nn.BatchNorm3d) is not translated; fold its
    # eval-mode affine into weight/bias before calling if needed.
    assert not batch_norm

    N, Cin, D, H, W = x.shape
    Cout, Cin_w, K, K2, K3 = weight.shape
    assert Cin_w == Cin and K == K2 == K3
    assert K % 2 == 1, "padding = K // 2 only gives 'same' output for odd K"
    pad = K // 2
    Dp, Hp, Wp = D + 2 * pad, H + 2 * pad, W + 2 * pad
    HWo = H * Wp                  # output row length in padded-width coordinates
    Lflat = (Hp + 1) * Wp         # +1 zero row so the largest tap shift is in-bounds
    Kc = K * K * K * Cin

    # Depth blocking: Td output slices per grid step.  Td must be a multiple of
    # 8 or equal to D so the (Td, HWo) output block satisfies the (8, 128)
    # block-shape rule.  TODO(synk): for large D not divisible by 8, pad D to a
    # multiple of 8 instead of taking the whole depth in one block.
    Td = 8 if D % 8 == 0 else D
    n_slices = Td + K - 1

    # Input: (N, Dp, Cin, Lflat) bf16 -- depth-major (one contiguous DMA per
    # slice), Cin on sublanes, flattened padded plane (lane-dense) on lanes.
    xt = jnp.transpose(x, (0, 2, 1, 3, 4))                        # (N, D, Cin, H, W)
    xp = jnp.pad(xt, ((0, 0), (pad, pad), (0, 0), (pad, pad + 1), (pad, pad)))
    xp = xp.reshape(N, Dp, Cin, Lflat).astype(jnp.bfloat16)

    # Weight as a single (Cout, K^3*Cin) GEMM operand; row order matches the
    # im2col strip: ((kd*K + kh)*K + kw)*Cin + c.
    w_mat = jnp.transpose(weight, (0, 2, 3, 4, 1)).reshape(Cout, Kc)
    w_mat = w_mat.astype(jnp.float32)
    b2 = bias.reshape(Cout, 1).astype(jnp.float32)

    kernel = functools.partial(
        _conv3d_block_kernel, K=K, Td=Td, Cin=Cin, Wp=Wp, HWo=HWo,
        activation=activation, alpha=float(alpha))

    def x_slice_spec(j):
        return pl.BlockSpec((None, None, Cin, Lflat),
                            lambda n, t, j=j: (n, t * Td + j, 0, 0))

    in_specs = [x_slice_spec(j) for j in range(n_slices)]
    in_specs.append(pl.BlockSpec((Cout, Kc), lambda n, t: (0, 0)))  # resident weight
    in_specs.append(pl.BlockSpec((Cout, 1), lambda n, t: (0, 0)))   # resident bias

    # Per-step VMEM footprint is a few hundred KB at these sizes; no explicit
    # vmem_limit_bytes needed.  For much larger H*W, also tile H (Th-row strips)
    # to stay inside v7x's 64 MiB.  On v7x, CORE_PARALLEL on the N axis would
    # shard the grid across the 2 TensorCores.
    y = pl.pallas_call(
        kernel,
        out_shape=jax.ShapeDtypeStruct((N, Cout, D, HWo), jnp.float32),
        grid_spec=pltpu.PrefetchScalarGridSpec(
            num_scalar_prefetch=0,
            grid=(N, D // Td),
            in_specs=in_specs,
            out_specs=pl.BlockSpec((None, Cout, Td, HWo),
                                   lambda n, t: (n, 0, t, 0)),
            scratch_shapes=[pltpu.VMEM((Kc, HWo), jnp.float32)],
        ),
        compiler_params=pltpu.CompilerParams(
            dimension_semantics=("parallel", "parallel")),
    )(*([xp] * n_slices), w_mat, b2)

    # (N, Cout, D, H*Wp) -> (N, Cout, D, H, W): drop the padded-width columns.
    y = y.reshape(N, Cout, D, H, Wp)
    return y[..., :W]


# -------------------- pure-JAX reference for verification --------------------
def _reference(x, weight, bias):
    K = weight.shape[-1]
    pad = K // 2
    out = lax.conv_general_dilated(
        x, weight,
        window_strides=(1, 1, 1),
        padding=((pad, pad),) * 3,
        dimension_numbers=("NCDHW", "OIDHW", "NCDHW"),
    )
    return out + bias[None, :, None, None, None]


if __name__ == "__main__":
    # Small shapes consistent with the module: Conv3d(in=4, out=8, k=3, pad=1).
    N, Cin, Cout, K = 2, 4, 8, 3
    D = H = W = 16

    key = jax.random.PRNGKey(0)
    kx, kw_, kb = jax.random.split(key, 3)
    fan_in = Cin * K ** 3
    bound = 1.0 / (fan_in ** 0.5)
    x = jax.random.normal(kx, (N, Cin, D, H, W), jnp.float32)
    weight = jax.random.uniform(kw_, (Cout, Cin, K, K, K), jnp.float32, -bound, bound)
    bias = jax.random.uniform(kb, (Cout,), jnp.float32, -bound, bound)

    fwd = jax.jit(conv_block_3d)
    out = jax.block_until_ready(fwd(x, weight, bias))
    assert out.shape == (N, Cout, D, H, W), out.shape

    ref = jax.block_until_ready(_reference(x, weight, bias))
    # Only the input is rounded to bf16 (DMA-byte savings); im2col/GEMM are f32.
    assert bool(jnp.allclose(out, ref, atol=1e-2, rtol=1e-2)), (
        "max abs err: " + str(float(jnp.max(jnp.abs(out - ref)))))

    print("KERNEL_OK")
</pallas_src>

<mosaic_0001>
module attributes {stable_mosaic.version = 11 : i64} {
  func.func @_conv3d_block_kernel(%arg0: i32, %arg1: i32, %arg2: memref<1x1x4x342xbf16, #tpu.memory_space<vmem>>, %arg3: memref<1x1x4x342xbf16, #tpu.memory_space<vmem>>, %arg4: memref<1x1x4x342xbf16, #tpu.memory_space<vmem>>, %arg5: memref<1x1x4x342xbf16, #tpu.memory_space<vmem>>, %arg6: memref<1x1x4x342xbf16, #tpu.memory_space<vmem>>, %arg7: memref<1x1x4x342xbf16, #tpu.memory_space<vmem>>, %arg8: memref<1x1x4x342xbf16, #tpu.memory_space<vmem>>, %arg9: memref<1x1x4x342xbf16, #tpu.memory_space<vmem>>, %arg10: memref<1x1x4x342xbf16, #tpu.memory_space<vmem>>, %arg11: memref<1x1x4x342xbf16, #tpu.memory_space<vmem>>, %arg12: memref<8x108xf32, #tpu.memory_space<vmem>>, %arg13: memref<8x1xf32, #tpu.memory_space<vmem>>, %arg14: memref<1x8x8x288xf32, #tpu.memory_space<vmem>>, %arg15: memref<108x288xf32, #tpu.memory_space<vmem>>) attributes {dimension_semantics = [#tpu.dimension_semantics<parallel>, #tpu.dimension_semantics<parallel>], iteration_bounds = array<i64: 2, 2>, scalar_prefetch = 0 : i64, scratch_operands = 1 : i64, tpu.core_type = #tpu.core_type<tc>, window_params = [{transform_indices = @transform_0, window_bounds = array<i64: 1, 1, 4, 342>}, {transform_indices = @transform_1, window_bounds = array<i64: 1, 1, 4, 342>}, {transform_indices = @transform_2, window_bounds = array<i64: 1, 1, 4, 342>}, {transform_indices = @transform_3, window_bounds = array<i64: 1, 1, 4, 342>}, {transform_indices = @transform_4, window_bounds = array<i64: 1, 1, 4, 342>}, {transform_indices = @transform_5, window_bounds = array<i64: 1, 1, 4, 342>}, {transform_indices = @transform_6, window_bounds = array<i64: 1, 1, 4, 342>}, {transform_indices = @transform_7, window_bounds = array<i64: 1, 1, 4, 342>}, {transform_indices = @transform_8, window_bounds = array<i64: 1, 1, 4, 342>}, {transform_indices = @transform_9, window_bounds = array<i64: 1, 1, 4, 342>}, {pipeline_mode = #tpu.pipeline_mode<synchronous>, transform_indices = @transform_10, window_bounds = array<i64: 8, 108>}, {pipeline_mode = #tpu.pipeline_mode<synchronous>, transform_indices = @transform_11, window_bounds = array<i64: 8, 1>}, {transform_indices = @transform_12, window_bounds = array<i64: 1, 8, 8, 288>}]} {
    %c0 = arith.constant 0 : index
    %c0_0 = arith.constant 0 : index
    %0 = vector.load %arg12[%c0, %c0_0] : memref<8x108xf32, #tpu.memory_space<vmem>>, vector<8x108xf32>
    %c0_1 = arith.constant 0 : index
    %c0_2 = arith.constant 0 : index
    %1 = vector.load %arg13[%c0_1, %c0_2] : memref<8x1xf32, #tpu.memory_space<vmem>>, vector<8x1xf32>
    %c0_3 = arith.constant 0 : index
    %c0_4 = arith.constant 0 : index
    %c0_5 = arith.constant 0 : index
    %c0_6 = arith.constant 0 : index
    %2 = vector.load %arg2[%c0_3, %c0_4, %c0_5, %c0_6] : memref<1x1x4x342xbf16, #tpu.memory_space<vmem>>, vector<1x1x4x342xbf16>
    %3 = vector.shape_cast %2 : vector<1x1x4x342xbf16> to vector<4x342xbf16>
    %4 = arith.extf %3 : vector<4x342xbf16> to vector<4x342xf32>
    %5 = vector.extract_strided_slice %4 {offsets = [0, 0], sizes = [4, 288], strides = [1, 1]} : vector<4x342xf32> to vector<4x288xf32>
    %c0_7 = arith.constant 0 : index
    %c0_8 = arith.constant 0 : index
    %6 = vector.load %arg15[%c0_7, %c0_8] : memref<108x288xf32, #tpu.memory_space<vmem>>, vector<4x288xf32>
    tpu.vector_store %arg15[%c0_7, %c0_8], %5 {strides = array<i32>} : memref<108x288xf32, #tpu.memory_space<vmem>>, vector<4x288xf32>,
    %7 = vector.extract_strided_slice %4 {offsets = [0, 1], sizes = [4, 288], strides = [1, 1]} : vector<4x342xf32> to vector<4x288xf32>
    %c4 = arith.constant 4 : index
    %c0_9 = arith.constant 0 : index
    %8 = vector.load %arg15[%c4, %c0_9] : memref<108x288xf32, #tpu.memory_space<vmem>>, vector<4x288xf32>
    tpu.vector_store %arg15[%c4, %c0_9], %7 {strides = array<i32>} : memref<108x288xf32, #tpu.memory_space<vmem>>, vector<4x288xf32>,
    %9 = vector.extract_strided_slice %4 {offsets = [0, 2], sizes = [4, 288], strides = [1, 1]} : vector<4x342xf32> to vector<4x288xf32>
    %c8 = arith.constant 8 : index
    %c0_10 = arith.constant 0 : index
    %10 = vector.load %arg15[%c8, %c0_10] : memref<108x288xf32, #tpu.memory_space<vmem>>, vector<4x288xf32>
    tpu.vector_store %arg15[%c8, %c0_10], %9 {strides = array<i32>} : memref<108x288xf32, #tpu.memory_space<vmem>>, vector<4x288xf32>,
    %11 = vector.extract_strided_slice %4 {offsets = [0, 18], sizes = [4, 288], strides = [1, 1]} : vector<4x342xf32> to vector<4x288xf32>
    %c12 = arith.constant 12 : index
    %c0_11 = arith.constant 0 : index
    %12 = vector.load %arg15[%c12, %c0_11] : memref<108x288xf32, #tpu.memory_space<vmem>>, vector<4x288xf32>
    tpu.vector_store %arg15[%c12, %c0_11], %11 {strides = array<i32>} : memref<108x288xf32, #tpu.memory_space<vmem>>, vector<4x288xf32>,
    %13 = vector.extract_strided_slice %4 {offsets = [0, 19], sizes = [4, 288], strides = [1, 1]} : vector<4x342xf32> to vector<4x288xf32>
    %c16 = arith.constant 16 : index
    %c0_12 = arith.constant 0 : index
    %14 = vector.load %arg15[%c16, %c0_12] : memref<108x288xf32, #tpu.memory_space<vmem>>, vector<4x288xf32>
    tpu.vector_store %arg15[%c16, %c0_12], %13 {strides = array<i32>} : memref<108x288xf32, #tpu.memory_space<vmem>>, vector<4x288xf32>,
    %15 = vector.extract_strided_slice %4 {offsets = [0, 20], sizes = [4, 288], strides = [1, 1]} : vector<4x342xf32> to vector<4x288xf32>
    %c20 = arith.constant 20 : index
    %c0_13 = arith.constant 0 : index
    %16 = vector.load %arg15[%c20, %c0_13] : memref<108x288xf32, #tpu.memory_space<vmem>>, vector<4x288xf32>
    tpu.vector_store %arg15[%c20, %c0_13], %15 {strides = array<i32>} : memref<108x288xf32, #tpu.memory_space<vmem>>, vector<4x288xf32>,
    %17 = vector.extract_strided_slice %4 {offsets = [0, 36], sizes = [4, 288], strides = [1, 1]} : vector<4x342xf32> to vector<4x288xf32>
    %c24 = arith.constant 24 : index
    %c0_14 = arith.constant 0 : index
    %18 = vector.load %arg15[%c24, %c0_14] : memref<108x288xf32, #tpu.memory_space<vmem>>, vector<4x288xf32>
    tpu.vector_store %arg15[%c24, %c0_14], %17 {strides = array<i32>} : memref<108x288xf32, #tpu.memory_space<vmem>>, vector<4x288xf32>,
    %19 = vector.extract_strided_slice %4 {offsets = [0, 37], sizes = [4, 288], strides = [1, 1]} : vector<4x342xf32> to vector<4x288xf32>
    %c28 = arith.constant 28 : index
    %c0_15 = arith.constant 0 : index
    %20 = vector.load %arg15[%c28, %c0_15] : memref<108x288xf32, #tpu.memory_space<vmem>>, vector<4x288xf32>
    tpu.vector_store %arg15[%c28, %c0_15], %19 {strides = array<i32>} : memref<108x288xf32, #tpu.memory_space<vmem>>, vector<4x288xf32>,
    %21 = vector.extract_strided_slice %4 {offsets = [0, 38], sizes = [4, 288], strides = [1, 1]} : vector<4x342xf32> to vector<4x288xf32>
    %c32 = arith.constant 32 : index
    %c0_16 = arith.constant 0 : index
    %22 = vector.load %arg15[%c32, %c0_16] : memref<108x288xf32, #tpu.memory_space<vmem>>, vector<4x288xf32>
    tpu.vector_store %arg15[%c32, %c0_16], %21 {strides = array<i32>} : memref<108x288xf32, #tpu.memory_space<vmem>>, vector<4x288xf32>,
    %c0_17 = arith.constant 0 : index
    %c0_18 = arith.constant 0 : index
    %c0_19 = arith.constant 0 : index
    %c0_20 = arith.constant 0 : index
    %23 = vector.load %arg3[%c0_17, %c0_18, %c0_19, %c0_20] : memref<1x1x4x342xbf16, #tpu.memory_space<vmem>>, vector<1x1x4x342xbf16>
    %24 = vector.shape_cast %23 : vector<1x1x4x342xbf16> to vector<4x342xbf16>
    %25 = arith.extf %24 : vector<4x342xbf16> to vector<4x342xf32>
    %26 = vector.extract_strided_slice %25 {offsets = [0, 0], sizes = [4, 288], strides = [1, 1]} : vector<4x342xf32> to vector<4x288xf32>
    %c36 = arith.constant 36 : index
    %c0_21 = arith.constant 0 : index
    %27 = vector.load %arg15[%c36, %c0_21] : memref<108x288xf32, #tpu.memory_space<vmem>>, vector<4x288xf32>
    tpu.vector_store %arg15[%c36, %c0_21], %26 {strides = array<i32>} : memref<108x288xf32, #tpu.memory_space<vmem>>, vector<4x288xf32>,
    %28 = vector.extract_strided_slice %25 {offsets = [0, 1], sizes = [4, 288], strides = [1, 1]} : vector<4x342xf32> to vector<4x288xf32>
    %c40 = arith.constant 40 : index
    %c0_22 = arith.constant 0 : index
    %29 = vector.load %arg15[%c40, %c0_22] : memref<108x288xf32, #tpu.memory_space<vmem>>, vector<4x288xf32>
    tpu.vector_store %arg15[%c40, %c0_22], %28 {strides = array<i32>} : memref<108x288xf32, #tpu.memory_space<vmem>>, vector<4x288xf32>,
    %30 = vector.extract_strided_slice %25 {offsets = [0, 2], sizes = [4, 288], strides = [1, 1]} : vector<4x342xf32> to vector<4x288xf32>
    %c44 = arith.constant 44 : index
    %c0_23 = arith.constant 0 : index
    %31 = vector.load %arg15[%c44, %c0_23] : memref<108x288xf32, #tpu.memory_space<vmem>>, vector<4x288xf32>
    tpu.vector_store %arg15[%c44, %c0_23], %30 {strides = array<i32>} : memref<108x288xf32, #tpu.memory_space<vmem>>, vector<4x288xf32>,
    %32 = vector.extract_strided_slice %25 {offsets = [0, 18], sizes = [4, 288], strides = [1, 1]} : vector<4x342xf32> to vector<4x288xf32>
    %c48 = arith.constant 48 : index
    %c0_24 = arith.constant 0 : index
    %33 = vector.load %arg15[%c48, %c0_24] : memref<108x288xf32, #tpu.memory_space<vmem>>, vector<4x288xf32>
    tpu.vector_store %arg15[%c48, %c0_24], %32 {strides = array<i32>} : memref<108x288xf32, #tpu.memory_space<vmem>>, vector<4x288xf32>,
    %34 = vector.extract_strided_slice %25 {offsets = [0, 19], sizes = [4, 288], strides = [1, 1]} : vector<4x342xf32> to vector<4x288xf32>
    %c52 = arith.constant 52 : index
    %c0_25 = arith.constant 0 : index
    %35 = vector.load %arg15[%c52, %c0_25] : memref<108x288xf32, #tpu.memory_space<vmem>>, vector<4x288xf32>
    tpu.vector_store %arg15[%c52, %c0_25], %34 {strides = array<i32>} : memref<108x288xf32, #tpu.memory_space<vmem>>, vector<4x288xf32>,
    %36 = vector.extract_strided_slice %25 {offsets = [0, 20], sizes = [4, 288], strides = [1, 1]} : vector<4x342xf32> to vector<4x288xf32>
    %c56 = arith.constant 56 : index
    %c0_26 = arith.constant 0 : index
    %37 = vector.load %arg15[%c56, %c0_26] : memref<108x288xf32, #tpu.memory_space<vmem>>, vector<4x288xf32>
    tpu.vector_store %arg15[%c56, %c0_26], %36 {strides = array<i32>} : memref<108x288xf32, #tpu.memory_space<vmem>>, vector<4x288xf32>,
    %38 = vector.extract_strided_slice %25 {offsets = [0, 36], sizes = [4, 288], strides = [1, 1]} : vector<4x342xf32> to vector<4x288xf32>
    %c60 = arith.constant 60 : index
    %c0_27 = arith.constant 0 : index
    %39 = vector.load %arg15[%c60, %c0_27] : memref<108x288xf32, #tpu.memory_space<vmem>>, vector<4x288xf32>
    tpu.vector_store %arg15[%c60, %c0_27], %38 {strides = array<i32>} : memref<108x288xf32, #tpu.memory_space<vmem>>, vector<4x288xf32>,
    %40 = vector.extract_strided_slice %25 {offsets = [0, 37], sizes = [4, 288], strides = [1, 1]} : vector<4x342xf32> to vector<4x288xf32>
    %c64 = arith.constant 64 : index
    %c0_28 = arith.constant 0 : index
    %41 = vector.load %arg15[%c64, %c0_28] : memref<108x288xf32, #tpu.memory_space<vmem>>, vector<4x288xf32>
    tpu.vector_store %arg15[%c64, %c0_28], %40 {strides = array<i32>} : memref<108x288xf32, #tpu.memory_space<vmem>>, vector<4x288xf32>,
    %42 = vector.extract_strided_slice %25 {offsets = [0, 38], sizes = [4, 288], strides = [1, 1]} : vector<4x342xf32> to vector<4x288xf32>
    %c68 = arith.constant 68 : index
    %c0_29 = arith.constant 0 : index
    %43 = vector.load %arg15[%c68, %c0_29] : memref<108x288xf32, #tpu.memory_space<vmem>>, vector<4x288xf32>
    tpu.vector_store %arg15[%c68, %c0_29], %42 {strides = array<i32>} : memref<108x288xf32, #tpu.memory_space<vmem>>, vector<4x288xf32>,
    %c0_30 = arith.constant 0 : index
    %c0_31 = arith.constant 0 : index
    %c0_32 = arith.constant 0 : index
    %c0_33 = arith.constant 0 : index
    %44 = vector.load %arg4[%c0_30, %c0_31, %c0_32, %c0_33] : memref<1x1x4x342xbf16, #tpu.memory_space<vmem>>, vector<1x1x4x342xbf16>
    %45 = vector.shape_cast %44 : vector<1x1x4x342xbf16> to vector<4x342xbf16>
    %46 = arith.extf %45 : vector<4x342xbf16> to vector<4x342xf32>
    %47 = vector.extract_strided_slice %46 {offsets = [0, 0], sizes = [4, 288], strides = [1, 1]} : vector<4x342xf32> to vector<4x288xf32>
    %c72 = arith.constant 72 : index
    %c0_34 = arith.constant 0 : index
    %48 = vector.load %arg15[%c72, %c0_34] : memref<108x288xf32, #tpu.memory_space<vmem>>, vector<4x288xf32>
    tpu.vector_store %arg15[%c72, %c0_34], %47 {strides = array<i32>} : memref<108x288xf32, #tpu.memory_space<vmem>>, vector<4x288xf32>,
    %49 = vector.extract_strided_slice %46 {offsets = [0, 1], sizes = [4, 288], strides = [1, 1]} : vector<4x342xf32> to vector<4x288xf32>
    %c76 = arith.constant 76 : index
    %c0_35 = arith.constant 0 : index
    %50 = vector.load %arg15[%c76, %c0_35] : memref<108x288xf32, #tpu.memory_space<vmem>>, vector<4x288xf32>
    tpu.vector_store %arg15[%c76, %c0_35], %49 {strides = array<i32>} : memref<108x288xf32, #tpu.memory_space<vmem>>, vector<4x288xf32>,
    %51 = vector.extract_strided_slice %46 {offsets = [0, 2], sizes = [4, 288], strides = [1, 1]} : vector<4x342xf32> to vector<4x288xf32>
    %c80 = arith.constant 80 : index
    %c0_36 = arith.constant 0 : index
    %52 = vector.load %arg15[%c80, %c0_36] : memref<108x288xf32, #tpu.memory_space<vmem>>, vector<4x288xf32>
    tpu.vector_store %arg15[%c80, %c0_36], %51 {strides = array<i32>} : memref<108x288xf32, #tpu.memory_space<vmem>>, vector<4x288xf32>,
    %53 = vector.extract_strided_slice %46 {offsets = [0, 18], sizes = [4, 288], strides = [1, 1]} : vector<4x342xf32> to vector<4x288xf32>
    %c84 = arith.constant 84 : index
    %c0_37 = arith.constant 0 : index
    %54 = vector.load %arg15[%c84, %c0_37] : memref<108x288xf32, #tpu.memory_space<vmem>>, vector<4x288xf32>
    tpu.vector_store %arg15[%c84, %c0_37], %53 {strides = array<i32>} : memref<108x288xf32, #tpu.memory_space<vmem>>, vector<4x288xf32>,
    %55 = vector.extract_strided_slice %46 {offsets = [0, 19], sizes = [4, 288], strides = [1, 1]} : vector<4x342xf32> to vector<4x288xf32>
    %c88 = arith.constant 88 : index
    %c0_38 = arith.constant 0 : index
    %56 = vector.load %arg15[%c88, %c0_38] : memref<108x288xf32, #tpu.memory_space<vmem>>, vector<4x288xf32>
    tpu.vector_store %arg15[%c88, %c0_38], %55 {strides = array<i32>} : memref<108x288xf32, #tpu.memory_space<vmem>>, vector<4x288xf32>,
    %57 = vector.extract_strided_slice %46 {offsets = [0, 20], sizes = [4, 288], strides = [1, 1]} : vector<4x342xf32> to vector<4x288xf32>
    %c92 = arith.constant 92 : index
    %c0_39 = arith.constant 0 : index
    %58 = vector.load %arg15[%c92, %c0_39] : memref<108x288xf32, #tpu.memory_space<vmem>>, vector<4x288xf32>
    tpu.vector_store %arg15[%c92, %c0_39], %57 {strides = array<i32>} : memref<108x288xf32, #tpu.memory_space<vmem>>, vector<4x288xf32>,
    %59 = vector.extract_strided_slice %46 {offsets = [0, 36], sizes = [4, 288], strides = [1, 1]} : vector<4x342xf32> to vector<4x288xf32>
    %c96 = arith.constant 96 : index
    %c0_40 = arith.constant 0 : index
    %60 = vector.load %arg15[%c96, %c0_40] : memref<108x288xf32, #tpu.memory_space<vmem>>, vector<4x288xf32>
    tpu.vector_store %arg15[%c96, %c0_40], %59 {strides = array<i32>} : memref<108x288xf32, #tpu.memory_space<vmem>>, vector<4x288xf32>,
    %61 = vector.extract_strided_slice %46 {offsets = [0, 37], sizes = [4, 288], strides = [1, 1]} : vector<4x342xf32> to vector<4x288xf32>
    %c100 = arith.constant 100 : index
    %c0_41 = arith.constant 0 : index
    %62 = vector.load %arg15[%c100, %c0_41] : memref<108x288xf32, #tpu.memory_space<vmem>>, vector<4x288xf32>
    tpu.vector_store %arg15[%c100, %c0_41], %61 {strides = array<i32>} : memref<108x288xf32, #tpu.memory_space<vmem>>, vector<4x288xf32>,
    %63 = vector.extract_strided_slice %46 {offsets = [0, 38], sizes = [4, 288], strides = [1, 1]} : vector<4x342xf32> to vector<4x288xf32>
    %c104 = arith.constant 104 : index
    %c0_42 = arith.constant 0 : index
    %64 = vector.load %arg15[%c104, %c0_42] : memref<108x288xf32, #tpu.memory_space<vmem>>, vector<4x288xf32>
    tpu.vector_store %arg15[%c104, %c0_42], %63 {strides = array<i32>} : memref<108x288xf32, #tpu.memory_space<vmem>>, vector<4x288xf32>,
    %c0_43 = arith.constant 0 : index
    %c0_44 = arith.constant 0 : index
    %65 = vector.load %arg15[%c0_43, %c0_44] : memref<108x288xf32, #tpu.memory_space<vmem>>, vector<108x288xf32>
    %cst = arith.constant dense<0.000000e+00> : vector<8x288xf32>
    %66 = tpu.matmul %0, %65, %cst {dimension_numbers = #tpu.dot_dimension_numbers<[1], [0], [0], [1], [0, 0, 1, 1], [], []>} : vector<8x108xf32>, vector<108x288xf32>, vector<8x288xf32> -> vector<8x288xf32>
    %67 = vector.broadcast %1 : vector<8x1xf32> to vector<8x288xf32>
    %68 = arith.addf %66, %67 : vector<8x288xf32>
    %c0_45 = arith.constant 0 : index
    %c0_46 = arith.constant 0 : index
    %c0_47 = arith.constant 0 : index
    %c0_48 = arith.constant 0 : index
    %69 = vector.load %arg14[%c0_45, %c0_46, %c0_47, %c0_48] : memref<1x8x8x288xf32, #tpu.memory_space<vmem>>, vector<1x8x1x288xf32>
    %70 = vector.shape_cast %69 : vector<1x8x1x288xf32> to vector<8x288xf32>
    %71 = vector.shape_cast %68 : vector<8x288xf32> to vector<1x8x1x288xf32>
    tpu.vector_store %arg14[%c0_45, %c0_46, %c0_47, %c0_48], %71 {strides = array<i32>} : memref<1x8x8x288xf32, #tpu.memory_space<vmem>>, vector<1x8x1x288xf32>,
    %c0_49 = arith.constant 0 : index
    %c0_50 = arith.constant 0 : index
    %c0_51 = arith.constant 0 : index
    %c0_52 = arith.constant 0 : index
    %72 = vector.load %arg3[%c0_49, %c0_50, %c0_51, %c0_52] : memref<1x1x4x342xbf16, #tpu.memory_space<vmem>>, vector<1x1x4x342xbf16>
    %73 = vector.shape_cast %72 : vector<1x1x4x342xbf16> to vector<4x342xbf16>
    %74 = arith.extf %73 : vector<4x342xbf16> to vector<4x342xf32>
    %75 = vector.extract_strided_slice %74 {offsets = [0, 0], sizes = [4, 288], strides = [1, 1]} : vector<4x342xf32> to vector<4x288xf32>
    %c0_53 = arith.constant 0 : index
    %c0_54 = arith.constant 0 : index
    %76 = vector.load %arg15[%c0_53, %c0_54] : memref<108x288xf32, #tpu.memory_space<vmem>>, vector<4x288xf32>
    tpu.vector_store %arg15[%c0_53, %c0_54], %75 {strides = array<i32>} : memref<108x288xf32, #tpu.memory_space<vmem>>, vector<4x288xf32>,
    %77 = vector.extract_strided_slice %74 {offsets = [0, 1], sizes = [4, 288], strides = [1, 1]} : vector<4x342xf32> to vector<4x288xf32>
    %c4_55 = arith.constant 4 : index
    %c0_56 = arith.constant 0 : index
    %78 = vector.load %arg15[%c4_55, %c0_56] : memref<108x288xf32, #tpu.memory_space<vmem>>, vector<4x288xf32>
    tpu.vector_store %arg15[%c4_55, %c0_56], %77 {strides = array<i32>} : memref<108x288xf32, #tpu.memory_space<vmem>>, vector<4x288xf32>,
    %79 = vector.extract_strided_slice %74 {offsets = [0, 2], sizes = [4, 288], strides = [1, 1]} : vector<4x342xf32> to vector<4x288xf32>
    %c8_57 = arith.constant 8 : index
    %c0_58 = arith.constant 0 : index
    %80 = vector.load %arg15[%c8_57, %c0_58] : memref<108x288xf32, #tpu.memory_space<vmem>>, vector<4x288xf32>
    tpu.vector_store %arg15[%c8_57, %c0_58], %79 {strides = array<i32>} : memref<108x288xf32, #tpu.memory_space<vmem>>, vector<4x288xf32>,
    %81 = vector.extract_strided_slice %74 {offsets = [0, 18], sizes = [4, 288], strides = [1, 1]} : vector<4x342xf32> to vector<4x288xf32>
    %c12_59 = arith.constant 12 : index
    %c0_60 = arith.constant 0 : index
    %82 = vector.load %arg15[%c12_59, %c0_60] : memref<108x288xf32, #tpu.memory_space<vmem>>, vector<4x288xf32>
    tpu.vector_store %arg15[%c12_59, %c0_60], %81 {strides = array<i32>} : memref<108x288xf32, #tpu.memory_space<vmem>>, vector<4x288xf32>,
    %83 = vector.extract_strided_slice %74 {offsets = [0, 19], sizes = [4, 288], strides = [1, 1]} : vector<4x342xf32> to vector<4x288xf32>
    %c16_61 = arith.constant 16 : index
    %c0_62 = arith.constant 0 : index
    %84 = vector.load %arg15[%c16_61, %c0_62] : memref<108x288xf32, #tpu.memory_space<vmem>>, vector<4x288xf32>
    tpu.vector_store %arg15[%c16_61, %c0_62], %83 {strides = array<i32>} : memref<108x288xf32, #tpu.memory_space<vmem>>, vector<4x288xf32>,
    %85 = vector.extract_strided_slice %74 {offsets = [0, 20], sizes = [4, 288], strides = [1, 1]} : vector<4x342xf32> to vector<4x288xf32>
    %c20_63 = arith.constant 20 : index
    %c0_64 = arith.constant 0 : index
    %86 = vector.load %arg15[%c20_63, %c0_64] : memref<108x288xf32, #tpu.memory_space<vmem>>, vector<4x288xf32>
    tpu.vector_store %arg15[%c20_63, %c0_64], %85 {strides = array<i32>} : memref<108x288xf32, #tpu.memory_space<vmem>>, vector<4x288xf32>,
    %87 = vector.extract_strided_slice %74 {offsets = [0, 36], sizes = [4, 288], strides = [1, 1]} : vector<4x342xf32> to vector<4x288xf32>
    %c24_65 = arith.constant 24 : index
    %c0_66 = arith.constant 0 : index
    %88 = vector.load %arg15[%c24_65, %c0_66] : memref<108x288xf32, #tpu.memory_space<vmem>>, vector<4x288xf32>
    tpu.vector_store %arg15[%c24_65, %c0_66], %87 {strides = array<i32>} : memref<108x288xf32, #tpu.memory_space<vmem>>, vector<4x288xf32>,
    %89 = vector.extract_strided_slice %74 {offsets = [0, 37], sizes = [4, 288], strides = [1, 1]} : vector<4x342xf32> to vector<4x288xf32>
    %c28_67 = arith.constant 28 : index
    %c0_68 = arith.constant 0 : index
    %90 = vector.load %arg15[%c28_67, %c0_68] : memref<108x288xf32, #tpu.memory_space<vmem>>, vector<4x288xf32>
    tpu.vector_store %arg15[%c28_67, %c0_68], %89 {strides = array<i32>} : memref<108x288xf32, #tpu.memory_space<vmem>>, vector<4x288xf32>,
    %91 = vector.extract_strided_slice %74 {offsets = [0, 38], sizes = [4, 288], strides = [1, 1]} : vector<4x342xf32> to vector<4x288xf32>
    %c32_69 = arith.constant 32 : index
    %c0_70 = arith.constant 0 : index
    %92 = vector.load %arg15[%c32_69, %c0_70] : memref<108x288xf32, #tpu.memory_space<vmem>>, vector<4x288xf32>
    tpu.vector_store %arg15[%c32_69, %c0_70], %91 {strides = array<i32>} : memref<108x288xf32, #tpu.memory_space<vmem>>, vector<4x288xf32>,
    %c0_71 = arith.constant 0 : index
    %c0_72 = arith.constant 0 : index
    %c0_73 = arith.constant 0 : index
    %c0_74 = arith.constant 0 : index
    %93 = vector.load %arg4[%c0_71, %c0_72, %c0_73, %c0_74] : memref<1x1x4x342xbf16, #tpu.memory_space<vmem>>, vector<1x1x4x342xbf16>
    %94 = vector.shape_cast %93 : vector<1x1x4x342xbf16> to vector<4x342xbf16>
    %95 = arith.extf %94 : vector<4x342xbf16> to vector<4x342xf32>
    %96 = vector.extract_strided_slice %95 {offsets = [0, 0], sizes = [4, 288], strides = [1, 1]} : vector<4x342xf32> to vector<4x288xf32>
    %c36_75 = arith.constant 36 : index
    %c0_76 = arith.constant 0 : index
    %97 = vector.load %arg15[%c36_75, %c0_76] : memref<108x288xf32, #tpu.memory_space<vmem>>, vector<4x288xf32>
    tpu.vector_store %arg15[%c36_75, %c0_76], %96 {strides = array<i32>} : memref<108x288xf32, #tpu.memory_space<vmem>>, vector<4x288xf32>,
    %98 = vector.extract_strided_slice %95 {offsets = [0, 1], sizes = [4, 288], strides = [1, 1]} : vector<4x342xf32> to vector<4x288xf32>
    %c40_77 = arith.constant 40 : index
    %c0_78 = arith.constant 0 : index
    %99 = vector.load %arg15[%c40_77, %c0_78] : memref<108x288xf32, #tpu.memory_space<vmem>>, vector<4x288xf32>
    tpu.vector_store %arg15[%c40_77, %c0_78], %98 {strides = array<i32>} : memref<108x288xf32, #tpu.memory_space<vmem>>, vector<4x288xf32>,
    %100 = vector.extract_strided_slice %95 {offsets = [0, 2], sizes = [4, 288], strides = [1, 1]} : vector<4x342xf32> to vector<4x288xf32>
    %c44_79 = arith.constant 44 : index
    %c0_80 = arith.constant 0 : index
    %101 = vector.load %arg15[%c44_79, %c0_80] : memref<108x288xf32, #tpu.memory_space<vmem>>, vector<4x288xf32>
    tpu.vector_store %arg15[%c44_79, %c0_80], %100 {strides = array<i32>} : memref<108x288xf32, #tpu.memory_space<vmem>>, vector<4x288xf32>,
    %102 = vector.extract_strided_slice %95 {offsets = [0, 18], sizes = [4, 288], strides = [1, 1]} : vector<4x342xf32> to vector<4x288xf32>
    %c48_81 = arith.constant 48 : index
    %c0_82 = arith.constant 0 : index
    %103 = vector.load %arg15[%c48_81, %c0_82] : memref<108x288xf32, #tpu.memory_space<vmem>>, vector<4x288xf32>
    tpu.vector_store %arg15[%c48_81, %c0_82], %102 {strides = array<i32>} : memref<108x288xf32, #tpu.memory_space<vmem>>, vector<4x288xf32>,
    %104 = vector.extract_strided_slice %95 {offsets = [0, 19], sizes = [4, 288], strides = [1, 1]} : vector<4x342xf32> to vector<4x288xf32>
    %c52_83 = arith.constant 52 : index
    %c0_84 = arith.constant 0 : index
    %105 = vector.load %arg15[%c52_83, %c0_84] : memref<108x288xf32, #tpu.memory_space<vmem>>, vector<4x288xf32>
    tpu.vector_store %arg15[%c52_83, %c0_84], %104 {strides = array<i32>} : memref<108x288xf32, #tpu.memory_space<vmem>>, vector<4x288xf32>,
    %106 = vector.extract_strided_slice %95 {offsets = [0, 20], sizes = [4, 288], strides = [1, 1]} : vector<4x342xf32> to vector<4x288xf32>
    %c56_85 = arith.constant 56 : index
    %c0_86 = arith.constant 0 : index
    %107 = vector.load %arg15[%c56_85, %c0_86] : memref<108x288xf32, #tpu.memory_space<vmem>>, vector<4x288xf32>
    tpu.vector_store %arg15[%c56_85, %c0_86], %106 {strides = array<i32>} : memref<108x288xf32, #tpu.memory_space<vmem>>, vector<4x288xf32>,
    %108 = vector.extract_strided_slice %95 {offsets = [0, 36], sizes = [4, 288], strides = [1, 1]} : vector<4x342xf32> to vector<4x288xf32>
    %c60_87 = arith.constant 60 : index
    %c0_88 = arith.constant 0 : index
    %109 = vector.load %arg15[%c60_87, %c0_88] : memref<108x288xf32, #tpu.memory_space<vmem>>, vector<4x288xf32>
    tpu.vector_store %arg15[%c60_87, %c0_88], %108 {strides = array<i32>} : memref<108x288xf32, #tpu.memory_space<vmem>>, vector<4x288xf32>,
    %110 = vector.extract_strided_slice %95 {offsets = [0, 37], sizes = [4, 288], strides = [1, 1]} : vector<4x342xf32> to vector<4x288xf32>
    %c64_89 = arith.constant 64 : index
    %c0_90 = arith.constant 0 : index
    %111 = vector.load %arg15[%c64_89, %c0_90] : memref<108x288xf32, #tpu.memory_space<vmem>>, vector<4x288xf32>
    tpu.vector_store %arg15[%c64_89, %c0_90], %110 {strides = array<i32>} : memref<108x288xf32, #tpu.memory_space<vmem>>, vector<4x288xf32>,
    %112 = vector.extract_strided_slice %95 {offsets = [0, 38], sizes = [4, 288], strides = [1, 1]} : vector<4x342xf32> to vector<4x288xf32>
    %c68_91 = arith.constant 68 : index
    %c0_92 = arith.constant 0 : index
    %113 = vector.load %arg15[%c68_91, %c0_92] : memref<108x288xf32, #tpu.memory_space<vmem>>, vector<4x288xf32>
    tpu.vector_store %arg15[%c68_91, %c0_92], %112 {strides = array<i32>} : memref<108x288xf32, #tpu.memory_space<vmem>>, vector<4x288xf32>,
    %c0_93 = arith.constant 0 : index
    %c0_94 = arith.constant 0 : index
    %c0_95 = arith.constant 0 : index
    %c0_96 = arith.constant 0 : index
    %114 = vector.load %arg5[%c0_93, %c0_94, %c0_95, %c0_96] : memref<1x1x4x342xbf16, #tpu.memory_space<vmem>>, vector<1x1x4x342xbf16>
    %115 = vector.shape_cast %114 : vector<1x1x4x342xbf16> to vector<4x342xbf16>
    %116 = arith.extf %115 : vector<4x342xbf16> to vector<4x342xf32>
    %117 = vector.extract_strided_slice %116 {offsets = [0, 0], sizes = [4, 288], strides = [1, 1]} : vector<4x342xf32> to vector<4x288xf32>
    %c72_97 = arith.constant 72 : index
    %c0_98 = arith.constant 0 : index
    %118 = vector.load %arg15[%c72_97, %c0_98] : memref<108x288xf32, #tpu.memory_space<vmem>>, vector<4x288xf32>
    tpu.vector_store %arg15[%c72_97, %c0_98], %117 {strides = array<i32>} : memref<108x288xf32, #tpu.memory_space<vmem>>, vector<4x288xf32>,
    %119 = vector.extract_strided_slice %116 {offsets = [0, 1], sizes = [4, 288], strides = [1, 1]} : vector<4x342xf32> to vector<4x288xf32>
    %c76_99 = arith.constant 76 : index
    %c0_100 = arith.constant 0 : index
    %120 = vector.load %arg15[%c76_99, %c0_100] : memref<108x288xf32, #tpu.memory_space<vmem>>, vector<4x288xf32>
    tpu.vector_store %arg15[%c76_99, %c0_100], %119 {strides = array<i32>} : memref<108x288xf32, #tpu.memory_space<vmem>>, vector<4x288xf32>,
    %121 = vector.extract_strided_slice %116 {offsets = [0, 2], sizes = [4, 288], strides = [1, 1]} : vector<4x342xf32> to vector<4x288xf32>
    %c80_101 = arith.constant 80 : index
    %c0_102 = arith.constant 0 : index
    %122 = vector.load %arg15[%c80_101, %c0_102] : memref<108x288xf32, #tpu.memory_space<vmem>>, vector<4x288xf32>
    tpu.vector_store %arg15[%c80_101, %c0_102], %121 {strides = array<i32>} : memref<108x288xf32, #tpu.memory_space<vmem>>, vector<4x288xf32>,
    %123 = vector.extract_strided_slice %116 {offsets = [0, 18], sizes = [4, 288], strides = [1, 1]} : vector<4x342xf32> to vector<4x288xf32>
    %c84_103 = arith.constant 84 : index
    %c0_104 = arith.constant 0 : index
    %124 = vector.load %arg15[%c84_103, %c0_104] : memref<108x288xf32, #tpu.memory_space<vmem>>, vector<4x288xf32>
    tpu.vector_store %arg15[%c84_103, %c0_104], %123 {strides = array<i32>} : memref<108x288xf32, #tpu.memory_space<vmem>>, vector<4x288xf32>,
    %125 = vector.extract_strided_slice %116 {offsets = [0, 19], sizes = [4, 288], strides = [1, 1]} : vector<4x342xf32> to vector<4x288xf32>
    %c88_105 = arith.constant 88 : index
    %c0_106 = arith.constant 0 : index
    %126 = vector.load %arg15[%c88_105, %c0_106] : memref<108x288xf32, #tpu.memory_space<vmem>>, vector<4x288xf32>
    tpu.vector_store %arg15[%c88_105, %c0_106], %125 {strides = array<i32>} : memref<108x288xf32, #tpu.memory_space<vmem>>, vector<4x288xf32>,
    %127 = vector.extract_strided_slice %116 {offsets = [0, 20], sizes = [4, 288], strides = [1, 1]} : vector<4x342xf32> to vector<4x288xf32>
    %c92_107 = arith.constant 92 : index
    %c0_108 = arith.constant 0 : index
    %128 = vector.load %arg15[%c92_107, %c0_108] : memref<108x288xf32, #tpu.memory_space<vmem>>, vector<4x288xf32>
    tpu.vector_store %arg15[%c92_107, %c0_108], %127 {strides = array<i32>} : memref<108x288xf32, #tpu.memory_space<vmem>>, vector<4x288xf32>,
    %129 = vector.extract_strided_slice %116 {offsets = [0, 36], sizes = [4, 288], strides = [1, 1]} : vector<4x342xf32> to vector<4x288xf32>
    %c96_109 = arith.constant 96 : index
    %c0_110 = arith.constant 0 : index
    %130 = vector.load %arg15[%c96_109, %c0_110] : memref<108x288xf32, #tpu.memory_space<vmem>>, vector<4x288xf32>
    tpu.vector_store %arg15[%c96_109, %c0_110], %129 {strides = array<i32>} : memref<108x288xf32, #tpu.memory_space<vmem>>, vector<4x288xf32>,
    %131 = vector.extract_strided_slice %116 {offsets = [0, 37], sizes = [4, 288], strides = [1, 1]} : vector<4x342xf32> to vector<4x288xf32>
    %c100_111 = arith.constant 100 : index
    %c0_112 = arith.constant 0 : index
    %132 = vector.load %arg15[%c100_111, %c0_112] : memref<108x288xf32, #tpu.memory_space<vmem>>, vector<4x288xf32>
    tpu.vector_store %arg15[%c100_111, %c0_112], %131 {strides = array<i32>} : memref<108x288xf32, #tpu.memory_space<vmem>>, vector<4x288xf32>,
    %133 = vector.extract_strided_slice %116 {offsets = [0, 38], sizes = [4, 288], strides = [1, 1]} : vector<4x342xf32> to vector<4x288xf32>
    %c104_113 = arith.constant 104 : index
    %c0_114 = arith.constant 0 : index
    %134 = vector.load %arg15[%c104_113, %c0_114] : memref<108x288xf32, #tpu.memory_space<vmem>>, vector<4x288xf32>
    tpu.vector_store %arg15[%c104_113, %c0_114], %133 {strides = array<i32>} : memref<108x288xf32, #tpu.memory_space<vmem>>, vector<4x288xf32>,
    %c0_115 = arith.constant 0 : index
    %c0_116 = arith.constant 0 : index
    %135 = vector.load %arg15[%c0_115, %c0_116] : memref<108x288xf32, #tpu.memory_space<vmem>>, vector<108x288xf32>
    %cst_117 = arith.constant dense<0.000000e+00> : vector<8x288xf32>
    %136 = tpu.matmul %0, %135, %cst_117 {dimension_numbers = #tpu.dot_dimension_numbers<[1], [0], [0], [1], [0, 0, 1, 1], [], []>} : vector<8x108xf32>, vector<108x288xf32>, vector<8x288xf32> -> vector<8x288xf32>
    %137 = vector.broadcast %1 : vector<8x1xf32> to vector<8x288xf32>
    %138 = arith.addf %136, %137 : vector<8x288xf32>
    %c0_118 = arith.constant 0 : index
    %c0_119 = arith.constant 0 : index
    %c1 = arith.constant 1 : index
    %c0_120 = arith.constant 0 : index
    %139 = vector.load %arg14[%c0_118, %c0_119, %c1, %c0_120] : memref<1x8x8x288xf32, #tpu.memory_space<vmem>>, vector<1x8x1x288xf32>
    %140 = vector.shape_cast %139 : vector<1x8x1x288xf32> to vector<8x288xf32>
    %141 = vector.shape_cast %138 : vector<8x288xf32> to vector<1x8x1x288xf32>
    tpu.vector_store %arg14[%c0_118, %c0_119, %c1, %c0_120], %141 {strides = array<i32>} : memref<1x8x8x288xf32, #tpu.memory_space<vmem>>, vector<1x8x1x288xf32>,
    %c0_121 = arith.constant 0 : index
    %c0_122 = arith.constant 0 : index
    %c0_123 = arith.constant 0 : index
    %c0_124 = arith.constant 0 : index
    %142 = vector.load %arg4[%c0_121, %c0_122, %c0_123, %c0_124] : memref<1x1x4x342xbf16, #tpu.memory_space<vmem>>, vector<1x1x4x342xbf16>
    %143 = vector.shape_cast %142 : vector<1x1x4x342xbf16> to vector<4x342xbf16>
    %144 = arith.extf %143 : vector<4x342xbf16> to vector<4x342xf32>
    %145 = vector.extract_strided_slice %144 {offsets = [0, 0], sizes = [4, 288], strides = [1, 1]} : vector<4x342xf32> to vector<4x288xf32>
    %c0_125 = arith.constant 0 : index
    %c0_126 = arith.constant 0 : index
    %146 = vector.load %arg15[%c0_125, %c0_126] : memref<108x288xf32, #tpu.memory_space<vmem>>, vector<4x288xf32>
    tpu.vector_store %arg15[%c0_125, %c0_126], %145 {strides = array<i32>} : memref<108x288xf32, #tpu.memory_space<vmem>>, vector<4x288xf32>,
    %147 = vector.extract_strided_slice %144 {offsets = [0, 1], sizes = [4, 288], strides = [1, 1]} : vector<4x342xf32> to vector<4x288xf32>
    %c4_127 = arith.constant 4 : index
    %c0_128 = arith.constant 0 : index
    %148 = vector.load %arg15[%c4_127, %c0_128] : memref<108x288xf32, #tpu.memory_space<vmem>>, vector<4x288xf32>
    tpu.vector_store %arg15[%c4_127, %c0_128], %147 {strides = array<i32>} : memref<108x288xf32, #tpu.memory_space<vmem>>, vector<4x288xf32>,
    %149 = vector.extract_strided_slice %144 {offsets = [0, 2], sizes = [4, 288], strides = [1, 1]} : vector<4x342xf32> to vector<4x288xf32>
    %c8_129 = arith.constant 8 : index
    %c0_130 = arith.constant 0 : index
    %150 = vector.load %arg15[%c8_129, %c0_130] : memref<108x288xf32, #tpu.memory_space<vmem>>, vector<4x288xf32>
    tpu.vector_store %arg15[%c8_129, %c0_130], %149 {strides = array<i32>} : memref<108x288xf32, #tpu.memory_space<vmem>>, vector<4x288xf32>,
    %151 = vector.extract_strided_slice %144 {offsets = [0, 18], sizes = [4, 288], strides = [1, 1]} : vector<4x342xf32> to vector<4x288xf32>
    %c12_131 = arith.constant 12 : index
    %c0_132 = arith.constant 0 : index
    %152 = vector.load %arg15[%c12_131, %c0_132] : memref<108x288xf32, #tpu.memory_space<vmem>>, vector<4x288xf32>
    tpu.vector_store %arg15[%c12_131, %c0_132], %151 {strides = array<i32>} : memref<108x288xf32, #tpu.memory_space<vmem>>, vector<4x288xf32>,
    %153 = vector.extract_strided_slice %144 {offsets = [0, 19], sizes = [4, 288], strides = [1, 1]} : vector<4x342xf32> to vector<4x288xf32>
    %c16_133 = arith.constant 16 : index
    %c0_134 = arith.constant 0 : index
    %154 = vector.load %arg15[%c16_133, %c0_134] : memref<108x288xf32, #tpu.memory_space<vmem>>, vector<4x288xf32>
    tpu.vector_store %arg15[%c16_133, %c0_134], %153 {strides = array<i32>} : memref<108x288xf32, #tpu.memory_space<vmem>>, vector<4x288xf32>,
    %155 = vector.extract_strided_slice %144 {offsets = [0, 20], sizes = [4, 288], strides = [1, 1]} : vector<4x342xf32> to vector<4x288xf32>
    %c20_135 = arith.constant 20 : index
    %c0_136 = arith.constant 0 : index
    %156 = vector.load %arg15[%c20_135, %c0_136] : memref<108x288xf32, #tpu.memory_space<vmem>>, vector<4x288xf32>
    tpu.vector_store %arg15[%c20_135, %c0_136], %155 {strides = array<i32>} : memref<108x288xf32, #tpu.memory_space<vmem>>, vector<4x288xf32>,
    %157 = vector.extract_strided_slice %144 {offsets = [0, 36], sizes = [4, 288], strides = [1, 1]} : vector<4x342xf32> to vector<4x288xf32>
    %c24_137 = arith.constant 24 : index
    %c0_138 = arith.constant 0 : index
    %158 = vector.load %arg15[%c24_137, %c0_138] : memref<108x288xf32, #tpu.memory_space<vmem>>, vector<4x288xf32>
    tpu.vector_store %arg15[%c24_137, %c0_138], %157 {strides = array<i32>} : memref<108x288xf32, #tpu.memory_space<vmem>>, vector<4x288xf32>,
    %159 = vector.extract_strided_slice %144 {offsets = [0, 37], sizes = [4, 288], strides = [1, 1]} : vector<4x342xf32> to vector<4x288xf32>
    %c28_139 = arith.constant 28 : index
    %c0_140 = arith.constant 0 : index
    %160 = vector.load %arg15[%c28_139, %c0_140] : memref<108x288xf32, #tpu.memory_space<vmem>>, vector<4x288xf32>
    tpu.vector_store %arg15[%c28_139, %c0_140], %159 {strides = array<i32>} : memref<108x288xf32, #tpu.memory_space<vmem>>, vector<4x288xf32>,
    %161 = vector.extract_strided_slice %144 {offsets = [0, 38], sizes = [4, 288], strides = [1, 1]} : vector<4x342xf32> to vector<4x288xf32>
    %c32_141 = arith.constant 32 : index
    %c0_142 = arith.constant 0 : index
    %162 = vector.load %arg15[%c32_141, %c0_142] : memref<108x288xf32, #tpu.memory_space<vmem>>, vector<4x288xf32>
    tpu.vector_store %arg15[%c32_141, %c0_142], %161 {strides = array<i32>} : memref<108x288xf32, #tpu.memory_space<vmem>>, vector<4x288xf32>,
    %c0_143 = arith.constant 0 : index
    %c0_144 = arith.constant 0 : index
    %c0_145 = arith.constant 0 : index
    %c0_146 = arith.constant 0 : index
    %163 = vector.load %arg5[%c0_143, %c0_144, %c0_145, %c0_146] : memref<1x1x4x342xbf16, #tpu.memory_space<vmem>>, vector<1x1x4x342xbf16>
    %164 = vector.shape_cast %163 : vector<1x1x4x342xbf16> to vector<4x342xbf16>
    %165 = arith.extf %164 : vector<4x342xbf16> to vector<4x342xf32>
    %166 = vector.extract_strided_slice %165 {offsets = [0, 0], sizes = [4, 288], strides = [1, 1]} : vector<4x342xf32> to vector<4x288xf32>
    %c36_147 = arith.constant 36 : index
    %c0_148 = arith.constant 0 : index
    %167 = vector.load %arg15[%c36_147, %c0_148] : memref<108x288xf32, #tpu.memory_space<vmem>>, vector<4x288xf32>
    tpu.vector_store %arg15[%c36_147, %c0_148], %166 {strides = array<i32>} : memref<108x288xf32, #tpu.memory_space<vmem>>, vector<4x288xf32>,
    %168 = vector.extract_strided_slice %165 {offsets = [0, 1], sizes = [4, 288], strides = [1, 1]} : vector<4x342xf32> to vector<4x288xf32>
    %c40_149 = arith.constant 40 : index
    %c0_150 = arith.constant 0 : index
    %169 = vector.load %arg15[%c40_149, %c0_150] : memref<108x288xf32, #tpu.memory_space<vmem>>, vector<4x288xf32>
    tpu.vector_store %arg15[%c40_149, %c0_150], %168 {strides = array<i32>} : memref<108x288xf32, #tpu.memory_space<vmem>>, vector<4x288xf32>,
    %170 = vector.extract_strided_slice %165 {offsets = [0, 2], sizes = [4, 288], strides = [1, 1]} : vector<4x342xf32> to vector<4x288xf32>
    %c44_151 = arith.constant 44 : index
    %c0_152 = arith.constant 0 : index
    %171 = vector.load %arg15[%c44_151, %c0_152] : memref<108x288xf32, #tpu.memory_space<vmem>>, vector<4x288xf32>
    tpu.vector_store %arg15[%c44_151, %c0_152], %170 {strides = array<i32>} : memref<108x288xf32, #tpu.memory_space<vmem>>, vector<4x288xf32>,
    %172 = vector.extract_strided_slice %165 {offsets = [0, 18], sizes = [4, 288], strides = [1, 1]} : vector<4x342xf32> to vector<4x288xf32>
    %c48_153 = arith.constant 48 : index
    %c0_154 = arith.constant 0 : index
    %173 = vector.load %arg15[%c48_153, %c0_154] : memref<108x288xf32, #tpu.memory_space<vmem>>, vector<4x288xf32>
    tpu.vector_store %arg15[%c48_153, %c0_154], %172 {strides = array<i32>} : memref<108x288xf32, #tpu.memory_space<vmem>>, vector<4x288xf32>,
    %174 = vector.extract_strided_slice %165 {offsets = [0, 19], sizes = [4, 288], strides = [1, 1]} : vector<4x342xf32> to vector<4x288xf32>
    %c52_155 = arith.constant 52 : index
    %c0_156 = arith.constant 0 : index
    %175 = vector.load %arg15[%c52_155, %c0_156] : memref<108x288xf32, #tpu.memory_space<vmem>>, vector<4x288xf32>
    tpu.vector_store %arg15[%c52_155, %c0_156], %174 {strides = array<i32>} : memref<108x288xf32, #tpu.memory_space<vmem>>, vector<4x288xf32>,
    %176 = vector.extract_strided_slice %165 {offsets = [0, 20], sizes = [4, 288], strides = [1, 1]} : vector<4x342xf32> to vector<4x288xf32>
    %c56_157 = arith.constant 56 : index
    %c0_158 = arith.constant 0 : index
    %177 = vector.load %arg15[%c56_157, %c0_158] : memref<108x288xf32, #tpu.memory_space<vmem>>, vector<4x288xf32>
    tpu.vector_store %arg15[%c56_157, %c0_158], %176 {strides = array<i32>} : memref<108x288xf32, #tpu.memory_space<vmem>>, vector<4x288xf32>,
    %178 = vector.extract_strided_slice %165 {offsets = [0, 36], sizes = [4, 288], strides = [1, 1]} : vector<4x342xf32> to vector<4x288xf32>
    %c60_159 = arith.constant 60 : index
    %c0_160 = arith.constant 0 : index
    %179 = vector.load %arg15[%c60_159, %c0_160] : memref<108x288xf32, #tpu.memory_space<vmem>>, vector<4x288xf32>
    tpu.vector_store %arg15[%c60_159, %c0_160], %178 {strides = array<i32>} : memref<108x288xf32, #tpu.memory_space<vmem>>, vector<4x288xf32>,
    %180 = vector.extract_strided_slice %165 {offsets = [0, 37], sizes = [4, 288], strides = [1, 1]} : vector<4x342xf32> to vector<4x288xf32>
    %c64_161 = arith.constant 64 : index
    %c0_162 = arith.constant 0 : index
    %181 = vector.load %arg15[%c64_161, %c0_162] : memref<108x288xf32, #tpu.memory_space<vmem>>, vector<4x288xf32>
    tpu.vector_store %arg15[%c64_161, %c0_162], %180 {strides = array<i32>} : memref<108x288xf32, #tpu.memory_space<vmem>>, vector<4x288xf32>,
    %182 = vector.extract_strided_slice %165 {offsets = [0, 38], sizes = [4, 288], strides = [1, 1]} : vector<4x342xf32> to vector<4x288xf32>
    %c68_163 = arith.constant 68 : index
    %c0_164 = arith.constant 0 : index
    %183 = vector.load %arg15[%c68_163, %c0_164] : memref<108x288xf32, #tpu.memory_space<vmem>>, vector<4x288xf32>
    tpu.vector_store %arg15[%c68_163, %c0_164], %182 {strides = array<i32>} : memref<108x288xf32, #tpu.memory_space<vmem>>, vector<4x288xf32>,
    %c0_165 = arith.constant 0 : index
    %c0_166 = arith.constant 0 : index
    %c0_167 = arith.constant 0 : index
    %c0_168 = arith.constant 0 : index
    %184 = vector.load %arg6[%c0_165, %c0_166, %c0_167, %c0_168] : memref<1x1x4x342xbf16, #tpu.memory_space<vmem>>, vector<1x1x4x342xbf16>
    %185 = vector.shape_cast %184 : vector<1x1x4x342xbf16> to vector<4x342xbf16>
    %186 = arith.extf %185 : vector<4x342xbf16> to vector<4x342xf32>
    %187 = vector.extract_strided_slice %186 {offsets = [0, 0], sizes = [4, 288], strides = [1, 1]} : vector<4x342xf32> to vector<4x288xf32>
    %c72_169 = arith.constant 72 : index
    %c0_170 = arith.constant 0 : index
    %188 = vector.load %arg15[%c72_169, %c0_170] : memref<108x288xf32, #tpu.memory_space<vmem>>, vector<4x288xf32>
    tpu.vector_store %arg15[%c72_169, %c0_170], %187 {strides = array<i32>} : memref<108x288xf32, #tpu.memory_space<vmem>>, vector<4x288xf32>,
    %189 = vector.extract_strided_slice %186 {offsets = [0, 1], sizes = [4, 288], strides = [1, 1]} : vector<4x342xf32> to vector<4x288xf32>
    %c76_171 = arith.constant 76 : index
    %c0_172 = arith.constant 0 : index
    %190 = vector.load %arg15[%c76_171, %c0_172] : memref<108x288xf32, #tpu.memory_space<vmem>>, vector<4x288xf32>
    tpu.vector_store %arg15[%c76_171, %c0_172], %189 {strides = array<i32>} : memref<108x288xf32, #tpu.memory_space<vmem>>, vector<4x288xf32>,
    %191 = vector.extract_strided_slice %186 {offsets = [0, 2], sizes = [4, 288], strides = [1, 1]} : vector<4x342xf32> to vector<4x288xf32>
    %c80_173 = arith.constant 80 : index
    %c0_174 = arith.constant 0 : index
    %192 = vector.load %arg15[%c80_173, %c0_174] : memref<108x288xf32, #tpu.memory_space<vmem>>, vector<4x288xf32>
    tpu.vector_store %arg15[%c80_173, %c0_174], %191 {strides = array<i32>} : memref<108x288xf32, #tpu.memory_space<vmem>>, vector<4x288xf32>,
    %193 = vector.extract_strided_slice %186 {offsets = [0, 18], sizes = [4, 288], strides = [1, 1]} : vector<4x342xf32> to vector<4x288xf32>
    %c84_175 = arith.constant 84 : index
    %c0_176 = arith.constant 0 : index
    %194 = vector.load %arg15[%c84_175, %c0_176] : memref<108x288xf32, #tpu.memory_space<vmem>>, vector<4x288xf32>
    tpu.vector_store %arg15[%c84_175, %c0_176], %193 {strides = array<i32>} : memref<108x288xf32, #tpu.memory_space<vmem>>, vector<4x288xf32>,
    %195 = vector.extract_strided_slice %186 {offsets = [0, 19], sizes = [4, 288], strides = [1, 1]} : vector<4x342xf32> to vector<4x288xf32>
    %c88_177 = arith.constant 88 : index
    %c0_178 = arith.constant 0 : index
    %196 = vector.load %arg15[%c88_177, %c0_178] : memref<108x288xf32, #tpu.memory_space<vmem>>, vector<4x288xf32>
    tpu.vector_store %arg15[%c88_177, %c0_178], %195 {strides = array<i32>} : memref<108x288xf32, #tpu.memory_space<vmem>>, vector<4x288xf32>,
    %197 = vector.extract_strided_slice %186 {offsets = [0, 20], sizes = [4, 288], strides = [1, 1]} : vector<4x342xf32> to vector<4x288xf32>
    %c92_179 = arith.constant 92 : index
    %c0_180 = arith.constant 0 : index
    %198 = vector.load %arg15[%c92_179, %c0_180] : memref<108x288xf32, #tpu.memory_space<vmem>>, vector<4x288xf32>
    tpu.vector_store %arg15[%c92_179, %c0_180], %197 {strides = array<i32>} : memref<108x288xf32, #tpu.memory_space<vmem>>, vector<4x288xf32>,
    %199 = vector.extract_strided_slice %186 {offsets = [0, 36], sizes = [4, 288], strides = [1, 1]} : vector<4x342xf32> to vector<4x288xf32>
    %c96_181 = arith.constant 96 : index
    %c0_182 = arith.constant 0 : index
    %200 = vector.load %arg15[%c96_181, %c0_182] : memref<108x288xf32, #tpu.memory_space<vmem>>, vector<4x288xf32>
    tpu.vector_store %arg15[%c96_181, %c0_182], %199 {strides = array<i32>} : memref<108x288xf32, #tpu.memory_space<vmem>>, vector<4x288xf32>,
    %201 = vector.extract_strided_slice %186 {offsets = [0, 37], sizes = [4, 288], strides = [1, 1]} : vector<4x342xf32> to vector<4x288xf32>
    %c100_183 = arith.constant 100 : index
    %c0_184 = arith.constant 0 : index
    %202 = vector.load %arg15[%c100_183, %c0_184] : memref<108x288xf32, #tpu.memory_space<vmem>>, vector<4x288xf32>
    tpu.vector_store %arg15[%c100_183, %c0_184], %201 {strides = array<i32>} : memref<108x288xf32, #tpu.memory_space<vmem>>, vector<4x288xf32>,
    %203 = vector.extract_strided_slice %186 {offsets = [0, 38], sizes = [4, 288], strides = [1, 1]} : vector<4x342xf32> to vector<4x288xf32>
    %c104_185 = arith.constant 104 : index
    %c0_186 = arith.constant 0 : index
    %204 = vector.load %arg15[%c104_185, %c0_186] : memref<108x288xf32, #tpu.memory_space<vmem>>, vector<4x288xf32>
    tpu.vector_store %arg15[%c104_185, %c0_186], %203 {strides = array<i32>} : memref<108x288xf32, #tpu.memory_space<vmem>>, vector<4x288xf32>,
    %c0_187 = arith.constant 0 : index
    %c0_188 = arith.constant 0 : index
    %205 = vector.load %arg15[%c0_187, %c0_188] : memref<108x288xf32, #tpu.memory_space<vmem>>, vector<108x288xf32>
    %cst_189 = arith.constant dense<0.000000e+00> : vector<8x288xf32>
    %206 = tpu.matmul %0, %205, %cst_189 {dimension_numbers = #tpu.dot_dimension_numbers<[1], [0], [0], [1], [0, 0, 1, 1], [], []>} : vector<8x108xf32>, vector<108x288xf32>, vector<8x288xf32> -> vector<8x288xf32>
    %207 = vector.broadcast %1 : vector<8x1xf32> to vector<8x288xf32>
    %208 = arith.addf %206, %207 : vector<8x288xf32>
    %c0_190 = arith.constant 0 : index
    %c0_191 = arith.constant 0 : index
    %c2 = arith.constant 2 : index
    %c0_192 = arith.constant 0 : index
    %209 = vector.load %arg14[%c0_190, %c0_191, %c2, %c0_192] : memref<1x8x8x288xf32, #tpu.memory_space<vmem>>, vector<1x8x1x288xf32>
    %210 = vector.shape_cast %209 : vector<1x8x1x288xf32> to vector<8x288xf32>
    %211 = vector.shape_cast %208 : vector<8x288xf32> to vector<1x8x1x288xf32>
    tpu.vector_store %arg14[%c0_190, %c0_191, %c2, %c0_192], %211 {strides = array<i32>} : memref<1x8x8x288xf32, #tpu.memory_space<vmem>>, vector<1x8x1x288xf32>,
    %c0_193 = arith.constant 0 : index
    %c0_194 = arith.constant 0 : index
    %c0_195 = arith.constant 0 : index
    %c0_196 = arith.constant 0 : index
    %212 = vector.load %arg5[%c0_193, %c0_194, %c0_195, %c0_196] : memref<1x1x4x342xbf16, #tpu.memory_space<vmem>>, vector<1x1x4x342xbf16>
    %213 = vector.shape_cast %212 : vector<1x1x4x342xbf16> to vector<4x342xbf16>
    %214 = arith.extf %213 : vector<4x342xbf16> to vector<4x342xf32>
    %215 = vector.extract_strided_slice %214 {offsets = [0, 0], sizes = [4, 288], strides = [1, 1]} : vector<4x342xf32> to vector<4x288xf32>
    %c0_197 = arith.constant 0 : index
    %c0_198 = arith.constant 0 : index
    %216 = vector.load %arg15[%c0_197, %c0_198] : memref<108x288xf32, #tpu.memory_space<vmem>>, vector<4x288xf32>
    tpu.vector_store %arg15[%c0_197, %c0_198], %215 {strides = array<i32>} : memref<108x288xf32, #tpu.memory_space<vmem>>, vector<4x288xf32>,
    %217 = vector.extract_strided_slice %214 {offsets = [0, 1], sizes = [4, 288], strides = [1, 1]} : vector<4x342xf32> to vector<4x288xf32>
    %c4_199 = arith.constant 4 : index
    %c0_200 = arith.constant 0 : index
    %218 = vector.load %arg15[%c4_199, %c0_200] : memref<108x288xf32, #tpu.memory_space<vmem>>, vector<4x288xf32>
    tpu.vector_store %arg15[%c4_199, %c0_200], %217 {strides = array<i32>} : memref<108x288xf32, #tpu.memory_space<vmem>>, vector<4x288xf32>,
    %219 = vector.extract_strided_slice %214 {offsets = [0, 2], sizes = [4, 288], strides = [1, 1]} : vector<4x342xf32> to vector<4x288xf32>
    %c8_201 = arith.constant 8 : index
    %c0_202 = arith.constant 0 : index
    %220 = vector.load %arg15[%c8_201, %c0_202] : memref<108x288xf32, #tpu.memory_space<vmem>>, vector<4x288xf32>
    tpu.vector_store %arg15[%c8_201, %c0_202], %219 {strides = array<i32>} : memref<108x288xf32, #tpu.memory_space<vmem>>, vector<4x288xf32>,
    %221 = vector.extract_strided_slice %214 {offsets = [0, 18], sizes = [4, 288], strides = [1, 1]} : vector<4x342xf32> to vector<4x288xf32>
    %c12_203 = arith.constant 12 : index
    %c0_204 = arith.constant 0 : index
    %222 = vector.load %arg15[%c12_203, %c0_204] : memref<108x288xf32, #tpu.memory_space<vmem>>, vector<4x288xf32>
    tpu.vector_store %arg15[%c12_203, %c0_204], %221 {strides = array<i32>} : memref<108x288xf32, #tpu.memory_space<vmem>>, vector<4x288xf32>,
    %223 = vector.extract_strided_slice %214 {offsets = [0, 19], sizes = [4, 288], strides = [1, 1]} : vector<4x342xf32> to vector<4x288xf32>
    %c16_205 = arith.constant 16 : index
    %c0_206 = arith.constant 0 : index
    %224 = vector.load %arg15[%c16_205, %c0_206] : memref<108x288xf32, #tpu.memory_space<vmem>>, vector<4x288xf32>
    tpu.vector_store %arg15[%c16_205, %c0_206], %223 {strides = array<i32>} : memref<108x288xf32, #tpu.memory_space<vmem>>, vector<4x288xf32>,
    %225 = vector.extract_strided_slice %214 {offsets = [0, 20], sizes = [4, 288], strides = [1, 1]} : vector<4x342xf32> to vector<4x288xf32>
    %c20_207 = arith.constant 20 : index
    %c0_208 = arith.constant 0 : index
    %226 = vector.load %arg15[%c20_207, %c0_208] : memref<108x288xf32, #tpu.memory_space<vmem>>, vector<4x288xf32>
    tpu.vector_store %arg15[%c20_207, %c0_208], %225 {strides = array<i32>} : memref<108x288xf32, #tpu.memory_space<vmem>>, vector<4x288xf32>,
    %227 = vector.extract_strided_slice %214 {offsets = [0, 36], sizes = [4, 288], strides = [1, 1]} : vector<4x342xf32> to vector<4x288xf32>
    %c24_209 = arith.constant 24 : index
    %c0_210 = arith.constant 0 : index
    %228 = vector.load %arg15[%c24_209, %c0_210] : memref<108x288xf32, #tpu.memory_space<vmem>>, vector<4x288xf32>
    tpu.vector_store %arg15[%c24_209, %c0_210], %227 {strides = array<i32>} : memref<108x288xf32, #tpu.memory_space<vmem>>, vector<4x288xf32>,
    %229 = vector.extract_strided_slice %214 {offsets = [0, 37], sizes = [4, 288], strides = [1, 1]} : vector<4x342xf32> to vector<4x288xf32>
    %c28_211 = arith.constant 28 : index
    %c0_212 = arith.constant 0 : index
    %230 = vector.load %arg15[%c28_211, %c0_212] : memref<108x288xf32, #tpu.memory_space<vmem>>, vector<4x288xf32>
    tpu.vector_store %arg15[%c28_211, %c0_212], %229 {strides = array<i32>} : memref<108x288xf32, #tpu.memory_space<vmem>>, vector<4x288xf32>,
    %231 = vector.extract_strided_slice %214 {offsets = [0, 38], sizes = [4, 288], strides = [1, 1]} : vector<4x342xf32> to vector<4x288xf32>
    %c32_213 = arith.constant 32 : index
    %c0_214 = arith.constant 0 : index
    %232 = vector.load %arg15[%c32_213, %c0_214] : memref<108x288xf32, #tpu.memory_space<vmem>>, vector<4x288xf32>
    tpu.vector_store %arg15[%c32_213, %c0_214], %231 {strides = array<i32>} : memref<108x288xf32, #tpu.memory_space<vmem>>, vector<4x288xf32>,
    %c0_215 = arith.constant 0 : index
    %c0_216 = arith.constant 0 : index
    %c0_217 = arith.constant 0 : index
    %c0_218 = arith.constant 0 : index
    %233 = vector.load %arg6[%c0_215, %c0_216, %c0_217, %c0_218] : memref<1x1x4x342xbf16, #tpu.memory_space<vmem>>, vector<1x1x4x342xbf16>
    %234 = vector.shape_cast %233 : vector<1x1x4x342xbf16> to vector<4x342xbf16>
    %235 = arith.extf %234 : vector<4x342xbf16> to vector<4x342xf32>
    %236 = vector.extract_strided_slice %235 {offsets = [0, 0], sizes = [4, 288], strides = [1, 1]} : vector<4x342xf32> to vector<4x288xf32>
    %c36_219 = arith.constant 36 : index
    %c0_220 = arith.constant 0 : index
    %237 = vector.load %arg15[%c36_219, %c0_220] : memref<108x288xf32, #tpu.memory_space<vmem>>, vector<4x288xf32>
    tpu.vector_store %arg15[%c36_219, %c0_220], %236 {strides = array<i32>} : memref<108x288xf32, #tpu.memory_space<vmem>>, vector<4x288xf32>,
    %238 = vector.extract_strided_slice %235 {offsets = [0, 1], sizes = [4, 288], strides = [1, 1]} : vector<4x342xf32> to vector<4x288xf32>
    %c40_221 = arith.constant 40 : index
    %c0_222 = arith.constant 0 : index
    %239 = vector.load %arg15[%c40_221, %c0_222] : memref<108x288xf32, #tpu.memory_space<vmem>>, vector<4x288xf32>
    tpu.vector_store %arg15[%c40_221, %c0_222], %238 {strides = array<i32>} : memref<108x288xf32, #tpu.memory_space<vmem>>, vector<4x288xf32>,
    %240 = vector.extract_strided_slice %235 {offsets = [0, 2], sizes = [4, 288], strides = [1, 1]} : vector<4x342xf32> to vector<4x288xf32>
    %c44_223 = arith.constant 44 : index
    %c0_224 = arith.constant 0 : index
    %241 = vector.load %arg15[%c44_223, %c0_224] : memref<108x288xf32, #tpu.memory_space<vmem>>, vector<4x288xf32>
    tpu.vector_store %arg15[%c44_223, %c0_224], %240 {strides = array<i32>} : memref<108x288xf32, #tpu.memory_space<vmem>>, vector<4x288xf32>,
    %242 = vector.extract_strided_slice %235 {offsets = [0, 18], sizes = [4, 288], strides = [1, 1]} : vector<4x342xf32> to vector<4x288xf32>
    %c48_225 = arith.constant 48 : index
    %c0_226 = arith.constant 0 : index
    %243 = vector.load %arg15[%c48_225, %c0_226] : memref<108x288xf32, #tpu.memory_space<vmem>>, vector<4x288xf32>
    tpu.vector_store %arg15[%c48_225, %c0_226], %242 {strides = array<i32>} : memref<108x288xf32, #tpu.memory_space<vmem>>, vector<4x288xf32>,
    %244 = vector.extract_strided_slice %235 {offsets = [0, 19], sizes = [4, 288], strides = [1, 1]} : vector<4x342xf32> to vector<4x288xf32>
    %c52_227 = arith.constant 52 : index
    %c0_228 = arith.constant 0 : index
    %245 = vector.load %arg15[%c52_227, %c0_228] : memref<108x288xf32, #tpu.memory_space<vmem>>, vector<4x288xf32>
    tpu.vector_store %arg15[%c52_227, %c0_228], %244 {strides = array<i32>} : memref<108x288xf32, #tpu.memory_space<vmem>>, vector<4x288xf32>,
    %246 = vector.extract_strided_slice %235 {offsets = [0, 20], sizes = [4, 288], strides = [1, 1]} : vector<4x342xf32> to vector<4x288xf32>
    %c56_229 = arith.constant 56 : index
    %c0_230 = arith.constant 0 : index
    %247 = vector.load %arg15[%c56_229, %c0_230] : memref<108x288xf32, #tpu.memory_space<vmem>>, vector<4x288xf32>
    tpu.vector_store %arg15[%c56_229, %c0_230], %246 {strides = array<i32>} : memref<108x288xf32, #tpu.memory_space<vmem>>, vector<4x288xf32>,
    %248 = vector.extract_strided_slice %235 {offsets = [0, 36], sizes = [4, 288], strides = [1, 1]} : vector<4x342xf32> to vector<4x288xf32>
    %c60_231 = arith.constant 60 : index
    %c0_232 = arith.constant 0 : index
    %249 = vector.load %arg15[%c60_231, %c0_232] : memref<108x288xf32, #tpu.memory_space<vmem>>, vector<4x288xf32>
    tpu.vector_store %arg15[%c60_231, %c0_232], %248 {strides = array<i32>} : memref<108x288xf32, #tpu.memory_space<vmem>>, vector<4x288xf32>,
    %250 = vector.extract_strided_slice %235 {offsets = [0, 37], sizes = [4, 288], strides = [1, 1]} : vector<4x342xf32> to vector<4x288xf32>
    %c64_233 = arith.constant 64 : index
    %c0_234 = arith.constant 0 : index
    %251 = vector.load %arg15[%c64_233, %c0_234] : memref<108x288xf32, #tpu.memory_space<vmem>>, vector<4x288xf32>
    tpu.vector_store %arg15[%c64_233, %c0_234], %250 {strides = array<i32>} : memref<108x288xf32, #tpu.memory_space<vmem>>, vector<4x288xf32>,
    %252 = vector.extract_strided_slice %235 {offsets = [0, 38], sizes = [4, 288], strides = [1, 1]} : vector<4x342xf32> to vector<4x288xf32>
    %c68_235 = arith.constant 68 : index
    %c0_236 = arith.constant 0 : index
    %253 = vector.load %arg15[%c68_235, %c0_236] : memref<108x288xf32, #tpu.memory_space<vmem>>, vector<4x288xf32>
    tpu.vector_store %arg15[%c68_235, %c0_236], %252 {strides = array<i32>} : memref<108x288xf32, #tpu.memory_space<vmem>>, vector<4x288xf32>,
    %c0_237 = arith.constant 0 : index
    %c0_238 = arith.constant 0 : index
    %c0_239 = arith.constant 0 : index
    %c0_240 = arith.constant 0 : index
    %254 = vector.load %arg7[%c0_237, %c0_238, %c0_239, %c0_240] : memref<1x1x4x342xbf16, #tpu.memory_space<vmem>>, vector<1x1x4x342xbf16>
    %255 = vector.shape_cast %254 : vector<1x1x4x342xbf16> to vector<4x342xbf16>
    %256 = arith.extf %255 : vector<4x342xbf16> to vector<4x342xf32>
    %257 = vector.extract_strided_slice %256 {offsets = [0, 0], sizes = [4, 288], strides = [1, 1]} : vector<4x342xf32> to vector<4x288xf32>
    %c72_241 = arith.constant 72 : index
    %c0_242 = arith.constant 0 : index
    %258 = vector.load %arg15[%c72_241, %c0_242] : memref<108x288xf32, #tpu.memory_space<vmem>>, vector<4x288xf32>
    tpu.vector_store %arg15[%c72_241, %c0_242], %257 {strides = array<i32>} : memref<108x288xf32, #tpu.memory_space<vmem>>, vector<4x288xf32>,
    %259 = vector.extract_strided_slice %256 {offsets = [0, 1], sizes = [4, 288], strides = [1, 1]} : vector<4x342xf32> to vector<4x288xf32>
    %c76_243 = arith.constant 76 : index
    %c0_244 = arith.constant 0 : index
    %260 = vector.load %arg15[%c76_243, %c0_244] : memref<108x288xf32, #tpu.memory_space<vmem>>, vector<4x288xf32>
    tpu.vector_store %arg15[%c76_243, %c0_244], %259 {strides = array<i32>} : memref<108x288xf32, #tpu.memory_space<vmem>>, vector<4x288xf32>,
    %261 = vector.extract_strided_slice %256 {offsets = [0, 2], sizes = [4, 288], strides = [1, 1]} : vector<4x342xf32> to vector<4x288xf32>
    %c80_245 = arith.constant 80 : index
    %c0_246 = arith.constant 0 : index
    %262 = vector.load %arg15[%c80_245, %c0_246] : memref<108x288xf32, #tpu.memory_space<vmem>>, vector<4x288xf32>
    tpu.vector_store %arg15[%c80_245, %c0_246], %261 {strides = array<i32>} : memref<108x288xf32, #tpu.memory_space<vmem>>, vector<4x288xf32>,
    %263 = vector.extract_strided_slice %256 {offsets = [0, 18], sizes = [4, 288], strides = [1, 1]} : vector<4x342xf32> to vector<4x288xf32>
    %c84_247 = arith.constant 84 : index
    %c0_248 = arith.constant 0 : index
    %264 = vector.load %arg15[%c84_247, %c0_248] : memref<108x288xf32, #tpu.memory_space<vmem>>, vector<4x288xf32>
    tpu.vector_store %arg15[%c84_247, %c0_248], %263 {strides = array<i32>} : memref<108x288xf32, #tpu.memory_space<vmem>>, vector<4x288xf32>,
    %265 = vector.extract_strided_slice %256 {offsets = [0, 19], sizes = [4, 288], strides = [1, 1]} : vector<4x342xf32> to vector<4x288xf32>
    %c88_249 = arith.constant 88 : index
    %c0_250 = arith.constant 0 : index
    %266 = vector.load %arg15[%c88_249, %c0_250] : memref<108x288xf32, #tpu.memory_space<vmem>>, vector<4x288xf32>
    tpu.vector_store %arg15[%c88_249, %c0_250], %265 {strides = array<i32>} : memref<108x288xf32, #tpu.memory_space<vmem>>, vector<4x288xf32>,
    %267 = vector.extract_strided_slice %256 {offsets = [0, 20], sizes = [4, 288], strides = [1, 1]} : vector<4x342xf32> to vector<4x288xf32>
    %c92_251 = arith.constant 92 : index
    %c0_252 = arith.constant 0 : index
    %268 = vector.load %arg15[%c92_251, %c0_252] : memref<108x288xf32, #tpu.memory_space<vmem>>, vector<4x288xf32>
    tpu.vector_store %arg15[%c92_251, %c0_252], %267 {strides = array<i32>} : memref<108x288xf32, #tpu.memory_space<vmem>>, vector<4x288xf32>,
    %269 = vector.extract_strided_slice %256 {offsets = [0, 36], sizes = [4, 288], strides = [1, 1]} : vector<4x342xf32> to vector<4x288xf32>
    %c96_253 = arith.constant 96 : index
    %c0_254 = arith.constant 0 : index
    %270 = vector.load %arg15[%c96_253, %c0_254] : memref<108x288xf32, #tpu.memory_space<vmem>>, vector<4x288xf32>
    tpu.vector_store %arg15[%c96_253, %c0_254], %269 {strides = array<i32>} : memref<108x288xf32, #tpu.memory_space<vmem>>, vector<4x288xf32>,
    %271 = vector.extract_strided_slice %256 {offsets = [0, 37], sizes = [4, 288], strides = [1, 1]} : vector<4x342xf32> to vector<4x288xf32>
    %c100_255 = arith.constant 100 : index
    %c0_256 = arith.constant 0 : index
    %272 = vector.load %arg15[%c100_255, %c0_256] : memref<108x288xf32, #tpu.memory_space<vmem>>, vector<4x288xf32>
    tpu.vector_store %arg15[%c100_255, %c0_256], %271 {strides = array<i32>} : memref<108x288xf32, #tpu.memory_space<vmem>>, vector<4x288xf32>,
    %273 = vector.extract_strided_slice %256 {offsets = [0, 38], sizes = [4, 288], strides = [1, 1]} : vector<4x342xf32> to vector<4x288xf32>
    %c104_257 = arith.constant 104 : index
    %c0_258 = arith.constant 0 : index
    %274 = vector.load %arg15[%c104_257, %c0_258] : memref<108x288xf32, #tpu.memory_space<vmem>>, vector<4x288xf32>
    tpu.vector_store %arg15[%c104_257, %c0_258], %273 {strides = array<i32>} : memref<108x288xf32, #tpu.memory_space<vmem>>, vector<4x288xf32>,
    %c0_259 = arith.constant 0 : index
    %c0_260 = arith.constant 0 : index
    %275 = vector.load %arg15[%c0_259, %c0_260] : memref<108x288xf32, #tpu.memory_space<vmem>>, vector<108x288xf32>
    %cst_261 = arith.constant dense<0.000000e+00> : vector<8x288xf32>
    %276 = tpu.matmul %0, %275, %cst_261 {dimension_numbers = #tpu.dot_dimension_numbers<[1], [0], [0], [1], [0, 0, 1, 1], [], []>} : vector<8x108xf32>, vector<108x288xf32>, vector<8x288xf32> -> vector<8x288xf32>
    %277 = vector.broadcast %1 : vector<8x1xf32> to vector<8x288xf32>
    %278 = arith.addf %276, %277 : vector<8x288xf32>
    %c0_262 = arith.constant 0 : index
    %c0_263 = arith.constant 0 : index
    %c3 = arith.constant 3 : index
    %c0_264 = arith.constant 0 : index
    %279 = vector.load %arg14[%c0_262, %c0_263, %c3, %c0_264] : memref<1x8x8x288xf32, #tpu.memory_space<vmem>>, vector<1x8x1x288xf32>
    %280 = vector.shape_cast %279 : vector<1x8x1x288xf32> to vector<8x288xf32>
    %281 = vector.shape_cast %278 : vector<8x288xf32> to vector<1x8x1x288xf32>
    tpu.vector_store %arg14[%c0_262, %c0_263, %c3, %c0_264], %281 {strides = array<i32>} : memref<1x8x8x288xf32, #tpu.memory_space<vmem>>, vector<1x8x1x288xf32>,
    %c0_265 = arith.constant 0 : index
    %c0_266 = arith.constant 0 : index
    %c0_267 = arith.constant 0 : index
    %c0_268 = arith.constant 0 : index
    %282 = vector.load %arg6[%c0_265, %c0_266, %c0_267, %c0_268] : memref<1x1x4x342xbf16, #tpu.memory_space<vmem>>, vector<1x1x4x342xbf16>
    %283 = vector.shape_cast %282 : vector<1x1x4x342xbf16> to vector<4x342xbf16>
    %284 = arith.extf %283 : vector<4x342xbf16> to vector<4x342xf32>
    %285 = vector.extract_strided_slice %284 {offsets = [0, 0], sizes = [4, 288], strides = [1, 1]} : vector<4x342xf32> to vector<4x288xf32>
    %c0_269 = arith.constant 0 : index
    %c0_270 = arith.constant 0 : index
    %286 = vector.load %arg15[%c0_269, %c0_270] : memref<108x288xf32, #tpu.memory_space<vmem>>, vector<4x288xf32>
    tpu.vector_store %arg15[%c0_269, %c0_270], %285 {strides = array<i32>} : memref<108x288xf32, #tpu.memory_space<vmem>>, vector<4x288xf32>,
    %287 = vector.extract_strided_slice %284 {offsets = [0, 1], sizes = [4, 288], strides = [1, 1]} : vector<4x342xf32> to vector<4x288xf32>
    %c4_271 = arith.constant 4 : index
    %c0_272 = arith.constant 0 : index
    %288 = vector.load %arg15[%c4_271, %c0_272] : memref<108x288xf32, #tpu.memory_space<vmem>>, vector<4x288xf32>
    tpu.vector_store %arg15[%c4_271, %c0_272], %287 {strides = array<i32>} : memref<108x288xf32, #tpu.memory_space<vmem>>, vector<4x288xf32>,
    %289 = vector.extract_strided_slice %284 {offsets = [0, 2], sizes = [4, 288], strides = [1, 1]} : vector<4x342xf32> to vector<4x288xf32>
    %c8_273 = arith.constant 8 : index
    %c0_274 = arith.constant 0 : index
    %290 = vector.load %arg15[%c8_273, %c0_274] : memref<108x288xf32, #tpu.memory_space<vmem>>, vector<4x288xf32>
    tpu.vector_store %arg15[%c8_273, %c0_274], %289 {strides = array<i32>} : memref<108x288xf32, #tpu.memory_space<vmem>>, vector<4x288xf32>,
    %291 = vector.extract_strided_slice %284 {offsets = [0, 18], sizes = [4, 288], strides = [1, 1]} : vector<4x342xf32> to vector<4x288xf32>
    %c12_275 = arith.constant 12 : index
    %c0_276 = arith.constant 0 : index
    %292 = vector.load %arg15[%c12_275, %c0_276] : memref<108x288xf32, #tpu.memory_space<vmem>>, vector<4x288xf32>
    tpu.vector_store %arg15[%c12_275, %c0_276], %291 {strides = array<i32>} : memref<108x288xf32, #tpu.memory_space<vmem>>, vector<4x288xf32>,
    %293 = vector.extract_strided_slice %284 {offsets = [0, 19], sizes = [4, 288], strides = [1, 1]} : vector<4x342xf32> to vector<4x288xf32>
    %c16_277 = arith.constant 16 : index
    %c0_278 = arith.constant 0 : index
    %294 = vector.load %arg15[%c16_277, %c0_278] : memref<108x288xf32, #tpu.memory_space<vmem>>, vector<4x288xf32>
    tpu.vector_store %arg15[%c16_277, %c0_278], %293 {strides = array<i32>} : memref<108x288xf32, #tpu.memory_space<vmem>>, vector<4x288xf32>,
    %295 = vector.extract_strided_slice %284 {offsets = [0, 20], sizes = [4, 288], strides = [1, 1]} : vector<4x342xf32> to vector<4x288xf32>
    %c20_279 = arith.constant 20 : index
    %c0_280 = arith.constant 0 : index
    %296 = vector.load %arg15[%c20_279, %c0_280] : memref<108x288xf32, #tpu.memory_space<vmem>>, vector<4x288xf32>
    tpu.vector_store %arg15[%c20_279, %c0_280], %295 {strides = array<i32>} : memref<108x288xf32, #tpu.memory_space<vmem>>, vector<4x288xf32>,
    %297 = vector.extract_strided_slice %284 {offsets = [0, 36], sizes = [4, 288], strides = [1, 1]} : vector<4x342xf32> to vector<4x288xf32>
    %c24_281 = arith.constant 24 : index
    %c0_282 = arith.constant 0 : index
    %298 = vector.load %arg15[%c24_281, %c0_282] : memref<108x288xf32, #tpu.memory_space<vmem>>, vector<4x288xf32>
    tpu.vector_store %arg15[%c24_281, %c0_282], %297 {strides = array<i32>} : memref<108x288xf32, #tpu.memory_space<vmem>>, vector<4x288xf32>,
    %299 = vector.extract_strided_slice %284 {offsets = [0, 37], sizes = [4, 288], strides = [1, 1]} : vector<4x342xf32> to vector<4x288xf32>
    %c28_283 = arith.constant 28 : index
    %c0_284 = arith.constant 0 : index
    %300 = vector.load %arg15[%c28_283, %c0_284] : memref<108x288xf32, #tpu.memory_space<vmem>>, vector<4x288xf32>
    tpu.vector_store %arg15[%c28_283, %c0_284], %299 {strides = array<i32>} : memref<108x288xf32, #tpu.memory_space<vmem>>, vector<4x288xf32>,
    %301 = vector.extract_strided_slice %284 {offsets = [0, 38], sizes = [4, 288], strides = [1, 1]} : vector<4x342xf32> to vector<4x288xf32>
    %c32_285 = arith.constant 32 : index
    %c0_286 = arith.constant 0 : index
    %302 = vector.load %arg15[%c32_285, %c0_286] : memref<108x288xf32, #tpu.memory_space<vmem>>, vector<4x288xf32>
    tpu.vector_store %arg15[%c32_285, %c0_286], %301 {strides = array<i32>} : memref<108x288xf32, #tpu.memory_space<vmem>>, vector<4x288xf32>,
    %c0_287 = arith.constant 0 : index
    %c0_288 = arith.constant 0 : index
    %c0_289 = arith.constant 0 : index
    %c0_290 = arith.constant 0 : index
    %303 = vector.load %arg7[%c0_287, %c0_288, %c0_289, %c0_290] : memref<1x1x4x342xbf16, #tpu.memory_space<vmem>>, vector<1x1x4x342xbf16>
    %304 = vector.shape_cast %303 : vector<1x1x4x342xbf16> to vector<4x342xbf16>
    %305 = arith.extf %304 : vector<4x342xbf16> to vector<4x342xf32>
    %306 = vector.extract_strided_slice %305 {offsets = [0, 0], sizes = [4, 288], strides = [1, 1]} : vector<4x342xf32> to vector<4x288xf32>
    %c36_291 = arith.constant 36 : index
    %c0_292 = arith.constant 0 : index
    %307 = vector.load %arg15[%c36_291, %c0_292] : memref<108x288xf32, #tpu.memory_space<vmem>>, vector<4x288xf32>
    tpu.vector_store %arg15[%c36_291, %c0_292], %306 {strides = array<i32>} : memref<108x288xf32, #tpu.memory_space<vmem>>, vector<4x288xf32>,
    %308 = vector.extract_strided_slice %305 {offsets = [0, 1], sizes = [4, 288], strides = [1, 1]} : vector<4x342xf32> to vector<4x288xf32>
    %c40_293 = arith.constant 40 : index
    %c0_294 = arith.constant 0 : index
    %309 = vector.load %arg15[%c40_293, %c0_294] : memref<108x288xf32, #tpu.memory_space<vmem>>, vector<4x288xf32>
    tpu.vector_store %arg15[%c40_293, %c0_294], %308 {strides = array<i32>} : memref<108x288xf32, #tpu.memory_space<vmem>>, vector<4x288xf32>,
    %310 = vector.extract_strided_slice %305 {offsets = [0, 2], sizes = [4, 288], strides = [1, 1]} : vector<4x342xf32> to vector<4x288xf32>
    %c44_295 = arith.constant 44 : index
    %c0_296 = arith.constant 0 : index
    %311 = vector.load %arg15[%c44_295, %c0_296] : memref<108x288xf32, #tpu.memory_space<vmem>>, vector<4x288xf32>
    tpu.vector_store %arg15[%c44_295, %c0_296], %310 {strides = array<i32>} : memref<108x288xf32, #tpu.memory_space<vmem>>, vector<4x288xf32>,
    %312 = vector.extract_strided_slice %305 {offsets = [0, 18], sizes = [4, 288], strides = [1, 1]} : vector<4x342xf32> to vector<4x288xf32>
    %c48_297 = arith.constant 48 : index
    %c0_298 = arith.constant 0 : index
    %313 = vector.load %arg15[%c48_297, %c0_298] : memref<108x288xf32, #tpu.memory_space<vmem>>, vector<4x288xf32>
    tpu.vector_store %arg15[%c48_297, %c0_298], %312 {strides = array<i32>} : memref<108x288xf32, #tpu.memory_space<vmem>>, vector<4x288xf32>,
    %314 = vector.extract_strided_slice %305 {offsets = [0, 19], sizes = [4, 288], strides = [1, 1]} : vector<4x342xf32> to vector<4x288xf32>
    %c52_299 = arith.constant 52 : index
    %c0_300 = arith.constant 0 : index
    %315 = vector.load %arg15[%c52_299, %c0_300] : memref<108x288xf32, #tpu.memory_space<vmem>>, vector<4x288xf32>
    tpu.vector_store %arg15[%c52_299, %c0_300], %314 {strides = array<i32>} : memref<108x288xf32, #tpu.memory_space<vmem>>, vector<4x288xf32>,
    %316 = vector.extract_strided_slice %305 {offsets = [0, 20], sizes = [4, 288], strides = [1, 1]} : vector<4x342xf32> to vector<4x288xf32>
    %c56_301 = arith.constant 56 : index
    %c0_302 = arith.constant 0 : index
    %317 = vector.load %arg15[%c56_301, %c0_302] : memref<108x288xf32, #tpu.memory_space<vmem>>, vector<4x288xf32>
    tpu.vector_store %arg15[%c56_301, %c0_302], %316 {strides = array<i32>} : memref<108x288xf32, #tpu.memory_space<vmem>>, vector<4x288xf32>,
    %318 = vector.extract_strided_slice %305 {offsets = [0, 36], sizes = [4, 288], strides = [1, 1]} : vector<4x342xf32> to vector<4x288xf32>
    %c60_303 = arith.constant 60 : index
    %c0_304 = arith.constant 0 : index
    %319 = vector.load %arg15[%c60_303, %c0_304] : memref<108x288xf32, #tpu.memory_space<vmem>>, vector<4x288xf32>
    tpu.vector_store %arg15[%c60_303, %c0_304], %318 {strides = array<i32>} : memref<108x288xf32, #tpu.memory_space<vmem>>, vector<4x288xf32>,
    %320 = vector.extract_strided_slice %305 {offsets = [0, 37], sizes = [4, 288], strides = [1, 1]} : vector<4x342xf32> to vector<4x288xf32>
    %c64_305 = arith.constant 64 : index
    %c0_306 = arith.constant 0 : index
    %321 = vector.load %arg15[%c64_305, %c0_306] : memref<108x288xf32, #tpu.memory_space<vmem>>, vector<4x288xf32>
    tpu.vector_store %arg15[%c64_305, %c0_306], %320 {strides = array<i32>} : memref<108x288xf32, #tpu.memory_space<vmem>>, vector<4x288xf32>,
    %322 = vector.extract_strided_slice %305 {offsets = [0, 38], sizes = [4, 288], strides = [1, 1]} : vector<4x342xf32> to vector<4x288xf32>
    %c68_307 = arith.constant 68 : index
    %c0_308 = arith.constant 0 : index
    %323 = vector.load %arg15[%c68_307, %c0_308] : memref<108x288xf32, #tpu.memory_space<vmem>>, vector<4x288xf32>
    tpu.vector_store %arg15[%c68_307, %c0_308], %322 {strides = array<i32>} : memref<108x288xf32, #tpu.memory_space<vmem>>, vector<4x288xf32>,
    %c0_309 = arith.constant 0 : index
    %c0_310 = arith.constant 0 : index
    %c0_311 = arith.constant 0 : index
    %c0_312 = arith.constant 0 : index
    %324 = vector.load %arg8[%c0_309, %c0_310, %c0_311, %c0_312] : memref<1x1x4x342xbf16, #tpu.memory_space<vmem>>, vector<1x1x4x342xbf16>
    %325 = vector.shape_cast %324 : vector<1x1x4x342xbf16> to vector<4x342xbf16>
    %326 = arith.extf %325 : vector<4x342xbf16> to vector<4x342xf32>
    %327 = vector.extract_strided_slice %326 {offsets = [0, 0], sizes = [4, 288], strides = [1, 1]} : vector<4x342xf32> to vector<4x288xf32>
    %c72_313 = arith.constant 72 : index
    %c0_314 = arith.constant 0 : index
    %328 = vector.load %arg15[%c72_313, %c0_314] : memref<108x288xf32, #tpu.memory_space<vmem>>, vector<4x288xf32>
    tpu.vector_store %arg15[%c72_313, %c0_314], %327 {strides = array<i32>} : memref<108x288xf32, #tpu.memory_space<vmem>>, vector<4x288xf32>,
    %329 = vector.extract_strided_slice %326 {offsets = [0, 1], sizes = [4, 288], strides = [1, 1]} : vector<4x342xf32> to vector<4x288xf32>
    %c76_315 = arith.constant 76 : index
    %c0_316 = arith.constant 0 : index
    %330 = vector.load %arg15[%c76_315, %c0_316] : memref<108x288xf32, #tpu.memory_space<vmem>>, vector<4x288xf32>
    tpu.vector_store %arg15[%c76_315, %c0_316], %329 {strides = array<i32>} : memref<108x288xf32, #tpu.memory_space<vmem>>, vector<4x288xf32>,
    %331 = vector.extract_strided_slice %326 {offsets = [0, 2], sizes = [4, 288], strides = [1, 1]} : vector<4x342xf32> to vector<4x288xf32>
    %c80_317 = arith.constant 80 : index
    %c0_318 = arith.constant 0 : index
    %332 = vector.load %arg15[%c80_317, %c0_318] : memref<108x288xf32, #tpu.memory_space<vmem>>, vector<4x288xf32>
    tpu.vector_store %arg15[%c80_317, %c0_318], %331 {strides = array<i32>} : memref<108x288xf32, #tpu.memory_space<vmem>>, vector<4x288xf32>,
    %333 = vector.extract_strided_slice %326 {offsets = [0, 18], sizes = [4, 288], strides = [1, 1]} : vector<4x342xf32> to vector<4x288xf32>
    %c84_319 = arith.constant 84 : index
    %c0_320 = arith.constant 0 : index
    %334 = vector.load %arg15[%c84_319, %c0_320] : memref<108x288xf32, #tpu.memory_space<vmem>>, vector<4x288xf32>
    tpu.vector_store %arg15[%c84_319, %c0_320], %333 {strides = array<i32>} : memref<108x288xf32, #tpu.memory_space<vmem>>, vector<4x288xf32>,
    %335 = vector.extract_strided_slice %326 {offsets = [0, 19], sizes = [4, 288], strides = [1, 1]} : vector<4x342xf32> to vector<4x288xf32>
    %c88_321 = arith.constant 88 : index
    %c0_322 = arith.constant 0 : index
    %336 = vector.load %arg15[%c88_321, %c0_322] : memref<108x288xf32, #tpu.memory_space<vmem>>, vector<4x288xf32>
    tpu.vector_store %arg15[%c88_321, %c0_322], %335 {strides = array<i32>} : memref<108x288xf32, #tpu.memory_space<vmem>>, vector<4x288xf32>,
    %337 = vector.extract_strided_slice %326 {offsets = [0, 20], sizes = [4, 288], strides = [1, 1]} : vector<4x342xf32> to vector<4x288xf32>
    %c92_323 = arith.constant 92 : index
    %c0_324 = arith.constant 0 : index
    %338 = vector.load %arg15[%c92_323, %c0_324] : memref<108x288xf32, #tpu.memory_space<vmem>>, vector<4x288xf32>
    tpu.vector_store %arg15[%c92_323, %c0_324], %337 {strides = array<i32>} : memref<108x288xf32, #tpu.memory_space<vmem>>, vector<4x288xf32>,
    %339 = vector.extract_strided_slice %326 {offsets = [0, 36], sizes = [4, 288], strides = [1, 1]} : vector<4x342xf32> to vector<4x288xf32>
    %c96_325 = arith.constant 96 : index
    %c0_326 = arith.constant 0 : index
    %340 = vector.load %arg15[%c96_325, %c0_326] : memref<108x288xf32, #tpu.memory_space<vmem>>, vector<4x288xf32>
    tpu.vector_store %arg15[%c96_325, %c0_326], %339 {strides = array<i32>} : memref<108x288xf32, #tpu.memory_space<vmem>>, vector<4x288xf32>,
    %341 = vector.extract_strided_slice %326 {offsets = [0, 37], sizes = [4, 288], strides = [1, 1]} : vector<4x342xf32> to vector<4x288xf32>
    %c100_327 = arith.constant 100 : index
    %c0_328 = arith.constant 0 : index
    %342 = vector.load %arg15[%c100_327, %c0_328] : memref<108x288xf32, #tpu.memory_space<vmem>>, vector<4x288xf32>
    tpu.vector_store %arg15[%c100_327, %c0_328], %341 {strides = array<i32>} : memref<108x288xf32, #tpu.memory_space<vmem>>, vector<4x288xf32>,
    %343 = vector.extract_strided_slice %326 {offsets = [0, 38], sizes = [4, 288], strides = [1, 1]} : vector<4x342xf32> to vector<4x288xf32>
    %c104_329 = arith.constant 104 : index
    %c0_330 = arith.constant 0 : index
    %344 = vector.load %arg15[%c104_329, %c0_330] : memref<108x288xf32, #tpu.memory_space<vmem>>, vector<4x288xf32>
    tpu.vector_store %arg15[%c104_329, %c0_330], %343 {strides = array<i32>} : memref<108x288xf32, #tpu.memory_space<vmem>>, vector<4x288xf32>,
    %c0_331 = arith.constant 0 : index
    %c0_332 = arith.constant 0 : index
    %345 = vector.load %arg15[%c0_331, %c0_332] : memref<108x288xf32, #tpu.memory_space<vmem>>, vector<108x288xf32>
    %cst_333 = arith.constant dense<0.000000e+00> : vector<8x288xf32>
    %346 = tpu.matmul %0, %345, %cst_333 {dimension_numbers = #tpu.dot_dimension_numbers<[1], [0], [0], [1], [0, 0, 1, 1], [], []>} : vector<8x108xf32>, vector<108x288xf32>, vector<8x288xf32> -> vector<8x288xf32>
    %347 = vector.broadcast %1 : vector<8x1xf32> to vector<8x288xf32>
    %348 = arith.addf %346, %347 : vector<8x288xf32>
    %c0_334 = arith.constant 0 : index
    %c0_335 = arith.constant 0 : index
    %c4_336 = arith.constant 4 : index
    %c0_337 = arith.constant 0 : index
    %349 = vector.load %arg14[%c0_334, %c0_335, %c4_336, %c0_337] : memref<1x8x8x288xf32, #tpu.memory_space<vmem>>, vector<1x8x1x288xf32>
    %350 = vector.shape_cast %349 : vector<1x8x1x288xf32> to vector<8x288xf32>
    %351 = vector.shape_cast %348 : vector<8x288xf32> to vector<1x8x1x288xf32>
    tpu.vector_store %arg14[%c0_334, %c0_335, %c4_336, %c0_337], %351 {strides = array<i32>} : memref<1x8x8x288xf32, #tpu.memory_space<vmem>>, vector<1x8x1x288xf32>,
    %c0_338 = arith.constant 0 : index
    %c0_339 = arith.constant 0 : index
    %c0_340 = arith.constant 0 : index
    %c0_341 = arith.constant 0 : index
    %352 = vector.load %arg7[%c0_338, %c0_339, %c0_340, %c0_341] : memref<1x1x4x342xbf16, #tpu.memory_space<vmem>>, vector<1x1x4x342xbf16>
    %353 = vector.shape_cast %352 : vector<1x1x4x342xbf16> to vector<4x342xbf16>
    %354 = arith.extf %353 : vector<4x342xbf16> to vector<4x342xf32>
    %355 = vector.extract_strided_slice %354 {offsets = [0, 0], sizes = [4, 288], strides = [1, 1]} : vector<4x342xf32> to vector<4x288xf32>
    %c0_342 = arith.constant 0 : index
    %c0_343 = arith.constant 0 : index
    %356 = vector.load %arg15[%c0_342, %c0_343] : memref<108x288xf32, #tpu.memory_space<vmem>>, vector<4x288xf32>
    tpu.vector_store %arg15[%c0_342, %c0_343], %355 {strides = array<i32>} : memref<108x288xf32, #tpu.memory_space<vmem>>, vector<4x288xf32>,
    %357 = vector.extract_strided_slice %354 {offsets = [0, 1], sizes = [4, 288], strides = [1, 1]} : vector<4x342xf32> to vector<4x288xf32>
    %c4_344 = arith.constant 4 : index
    %c0_345 = arith.constant 0 : index
    %358 = vector.load %arg15[%c4_344, %c0_345] : memref<108x288xf32, #tpu.memory_space<vmem>>, vector<4x288xf32>
    tpu.vector_store %arg15[%c4_344, %c0_345], %357 {strides = array<i32>} : memref<108x288xf32, #tpu.memory_space<vmem>>, vector<4x288xf32>,
    %359 = vector.extract_strided_slice %354 {offsets = [0, 2], sizes = [4, 288], strides = [1, 1]} : vector<4x342xf32> to vector<4x288xf32>
    %c8_346 = arith.constant 8 : index
    %c0_347 = arith.constant 0 : index
    %360 = vector.load %arg15[%c8_346, %c0_347] : memref<108x288xf32, #tpu.memory_space<vmem>>, vector<4x288xf32>
    tpu.vector_store %arg15[%c8_346, %c0_347], %359 {strides = array<i32>} : memref<108x288xf32, #tpu.memory_space<vmem>>, vector<4x288xf32>,
    %361 = vector.extract_strided_slice %354 {offsets = [0, 18], sizes = [4, 288], strides = [1, 1]} : vector<4x342xf32> to vector<4x288xf32>
    %c12_348 = arith.constant 12 : index
    %c0_349 = arith.constant 0 : index
    %362 = vector.load %arg15[%c12_348, %c0_349] : memref<108x288xf32, #tpu.memory_space<vmem>>, vector<4x288xf32>
    tpu.vector_store %arg15[%c12_348, %c0_349], %361 {strides = array<i32>} : memref<108x288xf32, #tpu.memory_space<vmem>>, vector<4x288xf32>,
    %363 = vector.extract_strided_slice %354 {offsets = [0, 19], sizes = [4, 288], strides = [1, 1]} : vector<4x342xf32> to vector<4x288xf32>
    %c16_350 = arith.constant 16 : index
    %c0_351 = arith.constant 0 : index
    %364 = vector.load %arg15[%c16_350, %c0_351] : memref<108x288xf32, #tpu.memory_space<vmem>>, vector<4x288xf32>
    tpu.vector_store %arg15[%c16_350, %c0_351], %363 {strides = array<i32>} : memref<108x288xf32, #tpu.memory_space<vmem>>, vector<4x288xf32>,
    %365 = vector.extract_strided_slice %354 {offsets = [0, 20], sizes = [4, 288], strides = [1, 1]} : vector<4x342xf32> to vector<4x288xf32>
    %c20_352 = arith.constant 20 : index
    %c0_353 = arith.constant 0 : index
    %366 = vector.load %arg15[%c20_352, %c0_353] : memref<108x288xf32, #tpu.memory_space<vmem>>, vector<4x288xf32>
    tpu.vector_store %arg15[%c20_352, %c0_353], %365 {strides = array<i32>} : memref<108x288xf32, #tpu.memory_space<vmem>>, vector<4x288xf32>,
    %367 = vector.extract_strided_slice %354 {offsets = [0, 36], sizes = [4, 288], strides = [1, 1]} : vector<4x342xf32> to vector<4x288xf32>
    %c24_354 = arith.constant 24 : index
    %c0_355 = arith.constant 0 : index
    %368 = vector.load %arg15[%c24_354, %c0_355] : memref<108x288xf32, #tpu.memory_space<vmem>>, vector<4x288xf32>
    tpu.vector_store %arg15[%c24_354, %c0_355], %367 {strides = array<i32>} : memref<108x288xf32, #tpu.memory_space<vmem>>, vector<4x288xf32>,
    %369 = vector.extract_strided_slice %354 {offsets = [0, 37], sizes = [4, 288], strides = [1, 1]} : vector<4x342xf32> to vector<4x288xf32>
    %c28_356 = arith.constant 28 : index
    %c0_357 = arith.constant 0 : index
    %370 = vector.load %arg15[%c28_356, %c0_357] : memref<108x288xf32, #tpu.memory_space<vmem>>, vector<4x288xf32>
    tpu.vector_store %arg15[%c28_356, %c0_357], %369 {strides = array<i32>} : memref<108x288xf32, #tpu.memory_space<vmem>>, vector<4x288xf32>,
    %371 = vector.extract_strided_slice %354 {offsets = [0, 38], sizes = [4, 288], strides = [1, 1]} : vector<4x342xf32> to vector<4x288xf32>
    %c32_358 = arith.constant 32 : index
    %c0_359 = arith.constant 0 : index
    %372 = vector.load %arg15[%c32_358, %c0_359] : memref<108x288xf32, #tpu.memory_space<vmem>>, vector<4x288xf32>
    tpu.vector_store %arg15[%c32_358, %c0_359], %371 {strides = array<i32>} : memref<108x288xf32, #tpu.memory_space<vmem>>, vector<4x288xf32>,
    %c0_360 = arith.constant 0 : index
    %c0_361 = arith.constant 0 : index
    %c0_362 = arith.constant 0 : index
    %c0_363 = arith.constant 0 : index
    %373 = vector.load %arg8[%c0_360, %c0_361, %c0_362, %c0_363] : memref<1x1x4x342xbf16, #tpu.memory_space<vmem>>, vector<1x1x4x342xbf16>
    %374 = vector.shape_cast %373 : vector<1x1x4x342xbf16> to vector<4x342xbf16>
    %375 = arith.extf %374 : vector<4x342xbf16> to vector<4x342xf32>
    %376 = vector.extract_strided_slice %375 {offsets = [0, 0], sizes = [4, 288], strides = [1, 1]} : vector<4x342xf32> to vector<4x288xf32>
    %c36_364 = arith.constant 36 : index
    %c0_365 = arith.constant 0 : index
    %377 = vector.load %arg15[%c36_364, %c0_365] : memref<108x288xf32, #tpu.memory_space<vmem>>, vector<4x288xf32>
    tpu.vector_store %arg15[%c36_364, %c0_365], %376 {strides = array<i32>} : memref<108x288xf32, #tpu.memory_space<vmem>>, vector<4x288xf32>,
    %378 = vector.extract_strided_slice %375 {offsets = [0, 1], sizes = [4, 288], strides = [1, 1]} : vector<4x342xf32> to vector<4x288xf32>
    %c40_366 = arith.constant 40 : index
    %c0_367 = arith.constant 0 : index
    %379 = vector.load %arg15[%c40_366, %c0_367] : memref<108x288xf32, #tpu.memory_space<vmem>>, vector<4x288xf32>
    tpu.vector_store %arg15[%c40_366, %c0_367], %378 {strides = array<i32>} : memref<108x288xf32, #tpu.memory_space<vmem>>, vector<4x288xf32>,
    %380 = vector.extract_strided_slice %375 {offsets = [0, 2], sizes = [4, 288], strides = [1, 1]} : vector<4x342xf32> to vector<4x288xf32>
    %c44_368 = arith.constant 44 : index
    %c0_369 = arith.constant 0 : index
    %381 = vector.load %arg15[%c44_368, %c0_369] : memref<108x288xf32, #tpu.memory_space<vmem>>, vector<4x288xf32>
    tpu.vector_store %arg15[%c44_368, %c0_369], %380 {strides = array<i32>} : memref<108x288xf32, #tpu.memory_space<vmem>>, vector<4x288xf32>,
    %382 = vector.extract_strided_slice %375 {offsets = [0, 18], sizes = [4, 288], strides = [1, 1]} : vector<4x342xf32> to vector<4x288xf32>
    %c48_370 = arith.constant 48 : index
    %c0_371 = arith.constant 0 : index
    %383 = vector.load %arg15[%c48_370, %c0_371] : memref<108x288xf32, #tpu.memory_space<vmem>>, vector<4x288xf32>
    tpu.vector_store %arg15[%c48_370, %c0_371], %382 {strides = array<i32>} : memref<108x288xf32, #tpu.memory_space<vmem>>, vector<4x288xf32>,
    %384 = vector.extract_strided_slice %375 {offsets = [0, 19], sizes = [4, 288], strides = [1, 1]} : vector<4x342xf32> to vector<4x288xf32>
    %c52_372 = arith.constant 52 : index
    %c0_373 = arith.constant 0 : index
    %385 = vector.load %arg15[%c52_372, %c0_373] : memref<108x288xf32, #tpu.memory_space<vmem>>, vector<4x288xf32>
    tpu.vector_store %arg15[%c52_372, %c0_373], %384 {strides = array<i32>} : memref<108x288xf32, #tpu.memory_space<vmem>>, vector<4x288xf32>,
    %386 = vector.extract_strided_slice %375 {offsets = [0, 20], sizes = [4, 288], strides = [1, 1]} : vector<4x342xf32> to vector<4x288xf32>
    %c56_374 = arith.constant 56 : index
    %c0_375 = arith.constant 0 : index
    %387 = vector.load %arg15[%c56_374, %c0_375] : memref<108x288xf32, #tpu.memory_space<vmem>>, vector<4x288xf32>
    tpu.vector_store %arg15[%c56_374, %c0_375], %386 {strides = array<i32>} : memref<108x288xf32, #tpu.memory_space<vmem>>, vector<4x288xf32>,
    %388 = vector.extract_strided_slice %375 {offsets = [0, 36], sizes = [4, 288], strides = [1, 1]} : vector<4x342xf32> to vector<4x288xf32>
    %c60_376 = arith.constant 60 : index
    %c0_377 = arith.constant 0 : index
    %389 = vector.load %arg15[%c60_376, %c0_377] : memref<108x288xf32, #tpu.memory_space<vmem>>, vector<4x288xf32>
    tpu.vector_store %arg15[%c60_376, %c0_377], %388 {strides = array<i32>} : memref<108x288xf32, #tpu.memory_space<vmem>>, vector<4x288xf32>,
    %390 = vector.extract_strided_slice %375 {offsets = [0, 37], sizes = [4, 288], strides = [1, 1]} : vector<4x342xf32> to vector<4x288xf32>
    %c64_378 = arith.constant 64 : index
    %c0_379 = arith.constant 0 : index
    %391 = vector.load %arg15[%c64_378, %c0_379] : memref<108x288xf32, #tpu.memory_space<vmem>>, vector<4x288xf32>
    tpu.vector_store %arg15[%c64_378, %c0_379], %390 {strides = array<i32>} : memref<108x288xf32, #tpu.memory_space<vmem>>, vector<4x288xf32>,
    %392 = vector.extract_strided_slice %375 {offsets = [0, 38], sizes = [4, 288], strides = [1, 1]} : vector<4x342xf32> to vector<4x288xf32>
    %c68_380 = arith.constant 68 : index
    %c0_381 = arith.constant 0 : index
    %393 = vector.load %arg15[%c68_380, %c0_381] : memref<108x288xf32, #tpu.memory_space<vmem>>, vector<4x288xf32>
    tpu.vector_store %arg15[%c68_380, %c0_381], %392 {strides = array<i32>} : memref<108x288xf32, #tpu.memory_space<vmem>>, vector<4x288xf32>,
    %c0_382 = arith.constant 0 : index
    %c0_383 = arith.constant 0 : index
    %c0_384 = arith.constant 0 : index
    %c0_385 = arith.constant 0 : index
    %394 = vector.load %arg9[%c0_382, %c0_383, %c0_384, %c0_385] : memref<1x1x4x342xbf16, #tpu.memory_space<vmem>>, vector<1x1x4x342xbf16>
    %395 = vector.shape_cast %394 : vector<1x1x4x342xbf16> to vector<4x342xbf16>
    %396 = arith.extf %395 : vector<4x342xbf16> to vector<4x342xf32>
    %397 = vector.extract_strided_slice %396 {offsets = [0, 0], sizes = [4, 288], strides = [1, 1]} : vector<4x342xf32> to vector<4x288xf32>
    %c72_386 = arith.constant 72 : index
    %c0_387 = arith.constant 0 : index
    %398 = vector.load %arg15[%c72_386, %c0_387] : memref<108x288xf32, #tpu.memory_space<vmem>>, vector<4x288xf32>
    tpu.vector_store %arg15[%c72_386, %c0_387], %397 {strides = array<i32>} : memref<108x288xf32, #tpu.memory_space<vmem>>, vector<4x288xf32>,
    %399 = vector.extract_strided_slice %396 {offsets = [0, 1], sizes = [4, 288], strides = [1, 1]} : vector<4x342xf32> to vector<4x288xf32>
    %c76_388 = arith.constant 76 : index
    %c0_389 = arith.constant 0 : index
    %400 = vector.load %arg15[%c76_388, %c0_389] : memref<108x288xf32, #tpu.memory_space<vmem>>, vector<4x288xf32>
    tpu.vector_store %arg15[%c76_388, %c0_389], %399 {strides = array<i32>} : memref<108x288xf32, #tpu.memory_space<vmem>>, vector<4x288xf32>,
    %401 = vector.extract_strided_slice %396 {offsets = [0, 2], sizes = [4, 288], strides = [1, 1]} : vector<4x342xf32> to vector<4x288xf32>
    %c80_390 = arith.constant 80 : index
    %c0_391 = arith.constant 0 : index
    %402 = vector.load %arg15[%c80_390, %c0_391] : memref<108x288xf32, #tpu.memory_space<vmem>>, vector<4x288xf32>
    tpu.vector_store %arg15[%c80_390, %c0_391], %401 {strides = array<i32>} : memref<108x288xf32, #tpu.memory_space<vmem>>, vector<4x288xf32>,
    %403 = vector.extract_strided_slice %396 {offsets = [0, 18], sizes = [4, 288], strides = [1, 1]} : vector<4x342xf32> to vector<4x288xf32>
    %c84_392 = arith.constant 84 : index
    %c0_393 = arith.constant 0 : index
    %404 = vector.load %arg15[%c84_392, %c0_393] : memref<108x288xf32, #tpu.memory_space<vmem>>, vector<4x288xf32>
    tpu.vector_store %arg15[%c84_392, %c0_393], %403 {strides = array<i32>} : memref<108x288xf32, #tpu.memory_space<vmem>>, vector<4x288xf32>,
    %405 = vector.extract_strided_slice %396 {offsets = [0, 19], sizes = [4, 288], strides = [1, 1]} : vector<4x342xf32> to vector<4x288xf32>
    %c88_394 = arith.constant 88 : index
    %c0_395 = arith.constant 0 : index
    %406 = vector.load %arg15[%c88_394, %c0_395] : memref<108x288xf32, #tpu.memory_space<vmem>>, vector<4x288xf32>
    tpu.vector_store %arg15[%c88_394, %c0_395], %405 {strides = array<i32>} : memref<108x288xf32, #tpu.memory_space<vmem>>, vector<4x288xf32>,
    %407 = vector.extract_strided_slice %396 {offsets = [0, 20], sizes = [4, 288], strides = [1, 1]} : vector<4x342xf32> to vector<4x288xf32>
    %c92_396 = arith.constant 92 : index
    %c0_397 = arith.constant 0 : index
    %408 = vector.load %arg15[%c92_396, %c0_397] : memref<108x288xf32, #tpu.memory_space<vmem>>, vector<4x288xf32>
    tpu.vector_store %arg15[%c92_396, %c0_397], %407 {strides = array<i32>} : memref<108x288xf32, #tpu.memory_space<vmem>>, vector<4x288xf32>,
    %409 = vector.extract_strided_slice %396 {offsets = [0, 36], sizes = [4, 288], strides = [1, 1]} : vector<4x342xf32> to vector<4x288xf32>
    %c96_398 = arith.constant 96 : index
    %c0_399 = arith.constant 0 : index
    %410 = vector.load %arg15[%c96_398, %c0_399] : memref<108x288xf32, #tpu.memory_space<vmem>>, vector<4x288xf32>
    tpu.vector_store %arg15[%c96_398, %c0_399], %409 {strides = array<i32>} : memref<108x288xf32, #tpu.memory_space<vmem>>, vector<4x288xf32>,
    %411 = vector.extract_strided_slice %396 {offsets = [0, 37], sizes = [4, 288], strides = [1, 1]} : vector<4x342xf32> to vector<4x288xf32>
    %c100_400 = arith.constant 100 : index
    %c0_401 = arith.constant 0 : index
    %412 = vector.load %arg15[%c100_400, %c0_401] : memref<108x288xf32, #tpu.memory_space<vmem>>, vector<4x288xf32>
    tpu.vector_store %arg15[%c100_400, %c0_401], %411 {strides = array<i32>} : memref<108x288xf32, #tpu.memory_space<vmem>>, vector<4x288xf32>,
    %413 = vector.extract_strided_slice %396 {offsets = [0, 38], sizes = [4, 288], strides = [1, 1]} : vector<4x342xf32> to vector<4x288xf32>
    %c104_402 = arith.constant 104 : index
    %c0_403 = arith.constant 0 : index
    %414 = vector.load %arg15[%c104_402, %c0_403] : memref<108x288xf32, #tpu.memory_space<vmem>>, vector<4x288xf32>
    tpu.vector_store %arg15[%c104_402, %c0_403], %413 {strides = array<i32>} : memref<108x288xf32, #tpu.memory_space<vmem>>, vector<4x288xf32>,
    %c0_404 = arith.constant 0 : index
    %c0_405 = arith.constant 0 : index
    %415 = vector.load %arg15[%c0_404, %c0_405] : memref<108x288xf32, #tpu.memory_space<vmem>>, vector<108x288xf32>
    %cst_406 = arith.constant dense<0.000000e+00> : vector<8x288xf32>
    %416 = tpu.matmul %0, %415, %cst_406 {dimension_numbers = #tpu.dot_dimension_numbers<[1], [0], [0], [1], [0, 0, 1, 1], [], []>} : vector<8x108xf32>, vector<108x288xf32>, vector<8x288xf32> -> vector<8x288xf32>
    %417 = vector.broadcast %1 : vector<8x1xf32> to vector<8x288xf32>
    %418 = arith.addf %416, %417 : vector<8x288xf32>
    %c0_407 = arith.constant 0 : index
    %c0_408 = arith.constant 0 : index
    %c5 = arith.constant 5 : index
    %c0_409 = arith.constant 0 : index
    %419 = vector.load %arg14[%c0_407, %c0_408, %c5, %c0_409] : memref<1x8x8x288xf32, #tpu.memory_space<vmem>>, vector<1x8x1x288xf32>
    %420 = vector.shape_cast %419 : vector<1x8x1x288xf32> to vector<8x288xf32>
    %421 = vector.shape_cast %418 : vector<8x288xf32> to vector<1x8x1x288xf32>
    tpu.vector_store %arg14[%c0_407, %c0_408, %c5, %c0_409], %421 {strides = array<i32>} : memref<1x8x8x288xf32, #tpu.memory_space<vmem>>, vector<1x8x1x288xf32>,
    %c0_410 = arith.constant 0 : index
    %c0_411 = arith.constant 0 : index
    %c0_412 = arith.constant 0 : index
    %c0_413 = arith.constant 0 : index
    %422 = vector.load %arg8[%c0_410, %c0_411, %c0_412, %c0_413] : memref<1x1x4x342xbf16, #tpu.memory_space<vmem>>, vector<1x1x4x342xbf16>
    %423 = vector.shape_cast %422 : vector<1x1x4x342xbf16> to vector<4x342xbf16>
    %424 = arith.extf %423 : vector<4x342xbf16> to vector<4x342xf32>
    %425 = vector.extract_strided_slice %424 {offsets = [0, 0], sizes = [4, 288], strides = [1, 1]} : vector<4x342xf32> to vector<4x288xf32>
    %c0_414 = arith.constant 0 : index
    %c0_415 = arith.constant 0 : index
    %426 = vector.load %arg15[%c0_414, %c0_415] : memref<108x288xf32, #tpu.memory_space<vmem>>, vector<4x288xf32>
    tpu.vector_store %arg15[%c0_414, %c0_415], %425 {strides = array<i32>} : memref<108x288xf32, #tpu.memory_space<vmem>>, vector<4x288xf32>,
    %427 = vector.extract_strided_slice %424 {offsets = [0, 1], sizes = [4, 288], strides = [1, 1]} : vector<4x342xf32> to vector<4x288xf32>
    %c4_416 = arith.constant 4 : index
    %c0_417 = arith.constant 0 : index
    %428 = vector.load %arg15[%c4_416, %c0_417] : memref<108x288xf32, #tpu.memory_space<vmem>>, vector<4x288xf32>
    tpu.vector_store %arg15[%c4_416, %c0_417], %427 {strides = array<i32>} : memref<108x288xf32, #tpu.memory_space<vmem>>, vector<4x288xf32>,
    %429 = vector.extract_strided_slice %424 {offsets = [0, 2], sizes = [4, 288], strides = [1, 1]} : vector<4x342xf32> to vector<4x288xf32>
    %c8_418 = arith.constant 8 : index
    %c0_419 = arith.constant 0 : index
    %430 = vector.load %arg15[%c8_418, %c0_419] : memref<108x288xf32, #tpu.memory_space<vmem>>, vector<4x288xf32>
    tpu.vector_store %arg15[%c8_418, %c0_419], %429 {strides = array<i32>} : memref<108x288xf32, #tpu.memory_space<vmem>>, vector<4x288xf32>,
    %431 = vector.extract_strided_slice %424 {offsets = [0, 18], sizes = [4, 288], strides = [1, 1]} : vector<4x342xf32> to vector<4x288xf32>
    %c12_420 = arith.constant 12 : index
    %c0_421 = arith.constant 0 : index
    %432 = vector.load %arg15[%c12_420, %c0_421] : memref<108x288xf32, #tpu.memory_space<vmem>>, vector<4x288xf32>
    tpu.vector_store %arg15[%c12_420, %c0_421], %431 {strides = array<i32>} : memref<108x288xf32, #tpu.memory_space<vmem>>, vector<4x288xf32>,
    %433 = vector.extract_strided_slice %424 {offsets = [0, 19], sizes = [4, 288], strides = [1, 1]} : vector<4x342xf32> to vector<4x288xf32>
    %c16_422 = arith.constant 16 : index
    %c0_423 = arith.constant 0 : index
    %434 = vector.load %arg15[%c16_422, %c0_423] : memref<108x288xf32, #tpu.memory_space<vmem>>, vector<4x288xf32>
    tpu.vector_store %arg15[%c16_422, %c0_423], %433 {strides = array<i32>} : memref<108x288xf32, #tpu.memory_space<vmem>>, vector<4x288xf32>,
    %435 = vector.extract_strided_slice %424 {offsets = [0, 20], sizes = [4, 288], strides = [1, 1]} : vector<4x342xf32> to vector<4x288xf32>
    %c20_424 = arith.constant 20 : index
    %c0_425 = arith.constant 0 : index
    %436 = vector.load %arg15[%c20_424, %c0_425] : memref<108x288xf32, #tpu.memory_space<vmem>>, vector<4x288xf32>
    tpu.vector_store %arg15[%c20_424, %c0_425], %435 {strides = array<i32>} : memref<108x288xf32, #tpu.memory_space<vmem>>, vector<4x288xf32>,
    %437 = vector.extract_strided_slice %424 {offsets = [0, 36], sizes = [4, 288], strides = [1, 1]} : vector<4x342xf32> to vector<4x288xf32>
    %c24_426 = arith.constant 24 : index
    %c0_427 = arith.constant 0 : index
    %438 = vector.load %arg15[%c24_426, %c0_427] : memref<108x288xf32, #tpu.memory_space<vmem>>, vector<4x288xf32>
    tpu.vector_store %arg15[%c24_426, %c0_427], %437 {strides = array<i32>} : memref<108x288xf32, #tpu.memory_space<vmem>>, vector<4x288xf32>,
    %439 = vector.extract_strided_slice %424 {offsets = [0, 37], sizes = [4, 288], strides = [1, 1]} : vector<4x342xf32> to vector<4x288xf32>
    %c28_428 = arith.constant 28 : index
    %c0_429 = arith.constant 0 : index
    %440 = vector.load %arg15[%c28_428, %c0_429] : memref<108x288xf32, #tpu.memory_space<vmem>>, vector<4x288xf32>
    tpu.vector_store %arg15[%c28_428, %c0_429], %439 {strides = array<i32>} : memref<108x288xf32, #tpu.memory_space<vmem>>, vector<4x288xf32>,
    %441 = vector.extract_strided_slice %424 {offsets = [0, 38], sizes = [4, 288], strides = [1, 1]} : vector<4x342xf32> to vector<4x288xf32>
    %c32_430 = arith.constant 32 : index
    %c0_431 = arith.constant 0 : index
    %442 = vector.load %arg15[%c32_430, %c0_431] : memref<108x288xf32, #tpu.memory_space<vmem>>, vector<4x288xf32>
    tpu.vector_store %arg15[%c32_430, %c0_431], %441 {strides = array<i32>} : memref<108x288xf32, #tpu.memory_space<vmem>>, vector<4x288xf32>,
    %c0_432 = arith.constant 0 : index
    %c0_433 = arith.constant 0 : index
    %c0_434 = arith.constant 0 : index
    %c0_435 = arith.constant 0 : index
    %443 = vector.load %arg9[%c0_432, %c0_433, %c0_434, %c0_435] : memref<1x1x4x342xbf16, #tpu.memory_space<vmem>>, vector<1x1x4x342xbf16>
    %444 = vector.shape_cast %443 : vector<1x1x4x342xbf16> to vector<4x342xbf16>
    %445 = arith.extf %444 : vector<4x342xbf16> to vector<4x342xf32>
    %446 = vector.extract_strided_slice %445 {offsets = [0, 0], sizes = [4, 288], strides = [1, 1]} : vector<4x342xf32> to vector<4x288xf32>
    %c36_436 = arith.constant 36 : index
    %c0_437 = arith.constant 0 : index
    %447 = vector.load %arg15[%c36_436, %c0_437] : memref<108x288xf32, #tpu.memory_space<vmem>>, vector<4x288xf32>
    tpu.vector_store %arg15[%c36_436, %c0_437], %446 {strides = array<i32>} : memref<108x288xf32, #tpu.memory_space<vmem>>, vector<4x288xf32>,
    %448 = vector.extract_strided_slice %445 {offsets = [0, 1], sizes = [4, 288], strides = [1, 1]} : vector<4x342xf32> to vector<4x288xf32>
    %c40_438 = arith.constant 40 : index
    %c0_439 = arith.constant 0 : index
    %449 = vector.load %arg15[%c40_438, %c0_439] : memref<108x288xf32, #tpu.memory_space<vmem>>, vector<4x288xf32>
    tpu.vector_store %arg15[%c40_438, %c0_439], %448 {strides = array<i32>} : memref<108x288xf32, #tpu.memory_space<vmem>>, vector<4x288xf32>,
    %450 = vector.extract_strided_slice %445 {offsets = [0, 2], sizes = [4, 288], strides = [1, 1]} : vector<4x342xf32> to vector<4x288xf32>
    %c44_440 = arith.constant 44 : index
    %c0_441 = arith.constant 0 : index
    %451 = vector.load %arg15[%c44_440, %c0_441] : memref<108x288xf32, #tpu.memory_space<vmem>>, vector<4x288xf32>
    tpu.vector_store %arg15[%c44_440, %c0_441], %450 {strides = array<i32>} : memref<108x288xf32, #tpu.memory_space<vmem>>, vector<4x288xf32>,
    %452 = vector.extract_strided_slice %445 {offsets = [0, 18], sizes = [4, 288], strides = [1, 1]} : vector<4x342xf32> to vector<4x288xf32>
    %c48_442 = arith.constant 48 : index
    %c0_443 = arith.constant 0 : index
    %453 = vector.load %arg15[%c48_442, %c0_443] : memref<108x288xf32, #tpu.memory_space<vmem>>, vector<4x288xf32>
    tpu.vector_store %arg15[%c48_442, %c0_443], %452 {strides = array<i32>} : memref<108x288xf32, #tpu.memory_space<vmem>>, vector<4x288xf32>,
    %454 = vector.extract_strided_slice %445 {offsets = [0, 19], sizes = [4, 288], strides = [1, 1]} : vector<4x342xf32> to vector<4x288xf32>
    %c52_444 = arith.constant 52 : index
    %c0_445 = arith.constant 0 : index
    %455 = vector.load %arg15[%c52_444, %c0_445] : memref<108x288xf32, #tpu.memory_space<vmem>>, vector<4x288xf32>
    tpu.vector_store %arg15[%c52_444, %c0_445], %454 {strides = array<i32>} : memref<108x288xf32, #tpu.memory_space<vmem>>, vector<4x288xf32>,
    %456 = vector.extract_strided_slice %445 {offsets = [0, 20], sizes = [4, 288], strides = [1, 1]} : vector<4x342xf32> to vector<4x288xf32>
    %c56_446 = arith.constant 56 : index
    %c0_447 = arith.constant 0 : index
    %457 = vector.load %arg15[%c56_446, %c0_447] : memref<108x288xf32, #tpu.memory_space<vmem>>, vector<4x288xf32>
    tpu.vector_store %arg15[%c56_446, %c0_447], %456 {strides = array<i32>} : memref<108x288xf32, #tpu.memory_space<vmem>>, vector<4x288xf32>,
    %458 = vector.extract_strided_slice %445 {offsets = [0, 36], sizes = [4, 288], strides = [1, 1]} : vector<4x342xf32> to vector<4x288xf32>
    %c60_448 = arith.constant 60 : index
    %c0_449 = arith.constant 0 : index
    %459 = vector.load %arg15[%c60_448, %c0_449] : memref<108x288xf32, #tpu.memory_space<vmem>>, vector<4x288xf32>
    tpu.vector_store %arg15[%c60_448, %c0_449], %458 {strides = array<i32>} : memref<108x288xf32, #tpu.memory_space<vmem>>, vector<4x288xf32>,
    %460 = vector.extract_strided_slice %445 {offsets = [0, 37], sizes = [4, 288], strides = [1, 1]} : vector<4x342xf32> to vector<4x288xf32>
    %c64_450 = arith.constant 64 : index
    %c0_451 = arith.constant 0 : index
    %461 = vector.load %arg15[%c64_450, %c0_451] : memref<108x288xf32, #tpu.memory_space<vmem>>, vector<4x288xf32>
    tpu.vector_store %arg15[%c64_450, %c0_451], %460 {strides = array<i32>} : memref<108x288xf32, #tpu.memory_space<vmem>>, vector<4x288xf32>,
    %462 = vector.extract_strided_slice %445 {offsets = [0, 38], sizes = [4, 288], strides = [1, 1]} : vector<4x342xf32> to vector<4x288xf32>
    %c68_452 = arith.constant 68 : index
    %c0_453 = arith.constant 0 : index
    %463 = vector.load %arg15[%c68_452, %c0_453] : memref<108x288xf32, #tpu.memory_space<vmem>>, vector<4x288xf32>
    tpu.vector_store %arg15[%c68_452, %c0_453], %462 {strides = array<i32>} : memref<108x288xf32, #tpu.memory_space<vmem>>, vector<4x288xf32>,
    %c0_454 = arith.constant 0 : index
    %c0_455 = arith.constant 0 : index
    %c0_456 = arith.constant 0 : index
    %c0_457 = arith.constant 0 : index
    %464 = vector.load %arg10[%c0_454, %c0_455, %c0_456, %c0_457] : memref<1x1x4x342xbf16, #tpu.memory_space<vmem>>, vector<1x1x4x342xbf16>
    %465 = vector.shape_cast %464 : vector<1x1x4x342xbf16> to vector<4x342xbf16>
    %466 = arith.extf %465 : vector<4x342xbf16> to vector<4x342xf32>
    %467 = vector.extract_strided_slice %466 {offsets = [0, 0], sizes = [4, 288], strides = [1, 1]} : vector<4x342xf32> to vector<4x288xf32>
    %c72_458 = arith.constant 72 : index
    %c0_459 = arith.constant 0 : index
    %468 = vector.load %arg15[%c72_458, %c0_459] : memref<108x288xf32, #tpu.memory_space<vmem>>, vector<4x288xf32>
    tpu.vector_store %arg15[%c72_458, %c0_459], %467 {strides = array<i32>} : memref<108x288xf32, #tpu.memory_space<vmem>>, vector<4x288xf32>,
    %469 = vector.extract_strided_slice %466 {offsets = [0, 1], sizes = [4, 288], strides = [1, 1]} : vector<4x342xf32> to vector<4x288xf32>
    %c76_460 = arith.constant 76 : index
    %c0_461 = arith.constant 0 : index
    %470 = vector.load %arg15[%c76_460, %c0_461] : memref<108x288xf32, #tpu.memory_space<vmem>>, vector<4x288xf32>
    tpu.vector_store %arg15[%c76_460, %c0_461], %469 {strides = array<i32>} : memref<108x288xf32, #tpu.memory_space<vmem>>, vector<4x288xf32>,
    %471 = vector.extract_strided_slice %466 {offsets = [0, 2], sizes = [4, 288], strides = [1, 1]} : vector<4x342xf32> to vector<4x288xf32>
    %c80_462 = arith.constant 80 : index
    %c0_463 = arith.constant 0 : index
    %472 = vector.load %arg15[%c80_462, %c0_463] : memref<108x288xf32, #tpu.memory_space<vmem>>, vector<4x288xf32>
    tpu.vector_store %arg15[%c80_462, %c0_463], %471 {strides = array<i32>} : memref<108x288xf32, #tpu.memory_space<vmem>>, vector<4x288xf32>,
    %473 = vector.extract_strided_slice %466 {offsets = [0, 18], sizes = [4, 288], strides = [1, 1]} : vector<4x342xf32> to vector<4x288xf32>
    %c84_464 = arith.constant 84 : index
    %c0_465 = arith.constant 0 : index
    %474 = vector.load %arg15[%c84_464, %c0_465] : memref<108x288xf32, #tpu.memory_space<vmem>>, vector<4x288xf32>
    tpu.vector_store %arg15[%c84_464, %c0_465], %473 {strides = array<i32>} : memref<108x288xf32, #tpu.memory_space<vmem>>, vector<4x288xf32>,
    %475 = vector.extract_strided_slice %466 {offsets = [0, 19], sizes = [4, 288], strides = [1, 1]} : vector<4x342xf32> to vector<4x288xf32>
    %c88_466 = arith.constant 88 : index
    %c0_467 = arith.constant 0 : index
    %476 = vector.load %arg15[%c88_466, %c0_467] : memref<108x288xf32, #tpu.memory_space<vmem>>, vector<4x288xf32>
    tpu.vector_store %arg15[%c88_466, %c0_467], %475 {strides = array<i32>} : memref<108x288xf32, #tpu.memory_space<vmem>>, vector<4x288xf32>,
    %477 = vector.extract_strided_slice %466 {offsets = [0, 20], sizes = [4, 288], strides = [1, 1]} : vector<4x342xf32> to vector<4x288xf32>
    %c92_468 = arith.constant 92 : index
    %c0_469 = arith.constant 0 : index
    %478 = vector.load %arg15[%c92_468, %c0_469] : memref<108x288xf32, #tpu.memory_space<vmem>>, vector<4x288xf32>
    tpu.vector_store %arg15[%c92_468, %c0_469], %477 {strides = array<i32>} : memref<108x288xf32, #tpu.memory_space<vmem>>, vector<4x288xf32>,
    %479 = vector.extract_strided_slice %466 {offsets = [0, 36], sizes = [4, 288], strides = [1, 1]} : vector<4x342xf32> to vector<4x288xf32>
    %c96_470 = arith.constant 96 : index
    %c0_471 = arith.constant 0 : index
    %480 = vector.load %arg15[%c96_470, %c0_471] : memref<108x288xf32, #tpu.memory_space<vmem>>, vector<4x288xf32>
    tpu.vector_store %arg15[%c96_470, %c0_471], %479 {strides = array<i32>} : memref<108x288xf32, #tpu.memory_space<vmem>>, vector<4x288xf32>,
    %481 = vector.extract_strided_slice %466 {offsets = [0, 37], sizes = [4, 288], strides = [1, 1]} : vector<4x342xf32> to vector<4x288xf32>
    %c100_472 = arith.constant 100 : index
    %c0_473 = arith.constant 0 : index
    %482 = vector.load %arg15[%c100_472, %c0_473] : memref<108x288xf32, #tpu.memory_space<vmem>>, vector<4x288xf32>
    tpu.vector_store %arg15[%c100_472, %c0_473], %481 {strides = array<i32>} : memref<108x288xf32, #tpu.memory_space<vmem>>, vector<4x288xf32>,
    %483 = vector.extract_strided_slice %466 {offsets = [0, 38], sizes = [4, 288], strides = [1, 1]} : vector<4x342xf32> to vector<4x288xf32>
    %c104_474 = arith.constant 104 : index
    %c0_475 = arith.constant 0 : index
    %484 = vector.load %arg15[%c104_474, %c0_475] : memref<108x288xf32, #tpu.memory_space<vmem>>, vector<4x288xf32>
    tpu.vector_store %arg15[%c104_474, %c0_475], %483 {strides = array<i32>} : memref<108x288xf32, #tpu.memory_space<vmem>>, vector<4x288xf32>,
    %c0_476 = arith.constant 0 : index
    %c0_477 = arith.constant 0 : index
    %485 = vector.load %arg15[%c0_476, %c0_477] : memref<108x288xf32, #tpu.memory_space<vmem>>, vector<108x288xf32>
    %cst_478 = arith.constant dense<0.000000e+00> : vector<8x288xf32>
    %486 = tpu.matmul %0, %485, %cst_478 {dimension_numbers = #tpu.dot_dimension_numbers<[1], [0], [0], [1], [0, 0, 1, 1], [], []>} : vector<8x108xf32>, vector<108x288xf32>, vector<8x288xf32> -> vector<8x288xf32>
    %487 = vector.broadcast %1 : vector<8x1xf32> to vector<8x288xf32>
    %488 = arith.addf %486, %487 : vector<8x288xf32>
    %c0_479 = arith.constant 0 : index
    %c0_480 = arith.constant 0 : index
    %c6 = arith.constant 6 : index
    %c0_481 = arith.constant 0 : index
    %489 = vector.load %arg14[%c0_479, %c0_480, %c6, %c0_481] : memref<1x8x8x288xf32, #tpu.memory_space<vmem>>, vector<1x8x1x288xf32>
    %490 = vector.shape_cast %489 : vector<1x8x1x288xf32> to vector<8x288xf32>
    %491 = vector.shape_cast %488 : vector<8x288xf32> to vector<1x8x1x288xf32>
    tpu.vector_store %arg14[%c0_479, %c0_480, %c6, %c0_481], %491 {strides = array<i32>} : memref<1x8x8x288xf32, #tpu.memory_space<vmem>>, vector<1x8x1x288xf32>,
    %c0_482 = arith.constant 0 : index
    %c0_483 = arith.constant 0 : index
    %c0_484 = arith.constant 0 : index
    %c0_485 = arith.constant 0 : index
    %492 = vector.load %arg9[%c0_482, %c0_483, %c0_484, %c0_485] : memref<1x1x4x342xbf16, #tpu.memory_space<vmem>>, vector<1x1x4x342xbf16>
    %493 = vector.shape_cast %492 : vector<1x1x4x342xbf16> to vector<4x342xbf16>
    %494 = arith.extf %493 : vector<4x342xbf16> to vector<4x342xf32>
    %495 = vector.extract_strided_slice %494 {offsets = [0, 0], sizes = [4, 288], strides = [1, 1]} : vector<4x342xf32> to vector<4x288xf32>
    %c0_486 = arith.constant 0 : index
    %c0_487 = arith.constant 0 : index
    %496 = vector.load %arg15[%c0_486, %c0_487] : memref<108x288xf32, #tpu.memory_space<vmem>>, vector<4x288xf32>
    tpu.vector_store %arg15[%c0_486, %c0_487], %495 {strides = array<i32>} : memref<108x288xf32, #tpu.memory_space<vmem>>, vector<4x288xf32>,
    %497 = vector.extract_strided_slice %494 {offsets = [0, 1], sizes = [4, 288], strides = [1, 1]} : vector<4x342xf32> to vector<4x288xf32>
    %c4_488 = arith.constant 4 : index
    %c0_489 = arith.constant 0 : index
    %498 = vector.load %arg15[%c4_488, %c0_489] : memref<108x288xf32, #tpu.memory_space<vmem>>, vector<4x288xf32>
    tpu.vector_store %arg15[%c4_488, %c0_489], %497 {strides = array<i32>} : memref<108x288xf32, #tpu.memory_space<vmem>>, vector<4x288xf32>,
    %499 = vector.extract_strided_slice %494 {offsets = [0, 2], sizes = [4, 288], strides = [1, 1]} : vector<4x342xf32> to vector<4x288xf32>
    %c8_490 = arith.constant 8 : index
    %c0_491 = arith.constant 0 : index
    %500 = vector.load %arg15[%c8_490, %c0_491] : memref<108x288xf32, #tpu.memory_space<vmem>>, vector<4x288xf32>
    tpu.vector_store %arg15[%c8_490, %c0_491], %499 {strides = array<i32>} : memref<108x288xf32, #tpu.memory_space<vmem>>, vector<4x288xf32>,
    %501 = vector.extract_strided_slice %494 {offsets = [0, 18], sizes = [4, 288], strides = [1, 1]} : vector<4x342xf32> to vector<4x288xf32>
    %c12_492 = arith.constant 12 : index
    %c0_493 = arith.constant 0 : index
    %502 = vector.load %arg15[%c12_492, %c0_493] : memref<108x288xf32, #tpu.memory_space<vmem>>, vector<4x288xf32>
    tpu.vector_store %arg15[%c12_492, %c0_493], %501 {strides = array<i32>} : memref<108x288xf32, #tpu.memory_space<vmem>>, vector<4x288xf32>,
    %503 = vector.extract_strided_slice %494 {offsets = [0, 19], sizes = [4, 288], strides = [1, 1]} : vector<4x342xf32> to vector<4x288xf32>
    %c16_494 = arith.constant 16 : index
    %c0_495 = arith.constant 0 : index
    %504 = vector.load %arg15[%c16_494, %c0_495] : memref<108x288xf32, #tpu.memory_space<vmem>>, vector<4x288xf32>
    tpu.vector_store %arg15[%c16_494, %c0_495], %503 {strides = array<i32>} : memref<108x288xf32, #tpu.memory_space<vmem>>, vector<4x288xf32>,
    %505 = vector.extract_strided_slice %494 {offsets = [0, 20], sizes = [4, 288], strides = [1, 1]} : vector<4x342xf32> to vector<4x288xf32>
    %c20_496 = arith.constant 20 : index
    %c0_497 = arith.constant 0 : index
    %506 = vector.load %arg15[%c20_496, %c0_497] : memref<108x288xf32, #tpu.memory_space<vmem>>, vector<4x288xf32>
    tpu.vector_store %arg15[%c20_496, %c0_497], %505 {strides = array<i32>} : memref<108x288xf32, #tpu.memory_space<vmem>>, vector<4x288xf32>,
    %507 = vector.extract_strided_slice %494 {offsets = [0, 36], sizes = [4, 288], strides = [1, 1]} : vector<4x342xf32> to vector<4x288xf32>
    %c24_498 = arith.constant 24 : index
    %c0_499 = arith.constant 0 : index
    %508 = vector.load %arg15[%c24_498, %c0_499] : memref<108x288xf32, #tpu.memory_space<vmem>>, vector<4x288xf32>
    tpu.vector_store %arg15[%c24_498, %c0_499], %507 {strides = array<i32>} : memref<108x288xf32, #tpu.memory_space<vmem>>, vector<4x288xf32>,
    %509 = vector.extract_strided_slice %494 {offsets = [0, 37], sizes = [4, 288], strides = [1, 1]} : vector<4x342xf32> to vector<4x288xf32>
    %c28_500 = arith.constant 28 : index
    %c0_501 = arith.constant 0 : index
    %510 = vector.load %arg15[%c28_500, %c0_501] : memref<108x288xf32, #tpu.memory_space<vmem>>, vector<4x288xf32>
    tpu.vector_store %arg15[%c28_500, %c0_501], %509 {strides = array<i32>} : memref<108x288xf32, #tpu.memory_space<vmem>>, vector<4x288xf32>,
    %511 = vector.extract_strided_slice %494 {offsets = [0, 38], sizes = [4, 288], strides = [1, 1]} : vector<4x342xf32> to vector<4x288xf32>
    %c32_502 = arith.constant 32 : index
    %c0_503 = arith.constant 0 : index
    %512 = vector.load %arg15[%c32_502, %c0_503] : memref<108x288xf32, #tpu.memory_space<vmem>>, vector<4x288xf32>
    tpu.vector_store %arg15[%c32_502, %c0_503], %511 {strides = array<i32>} : memref<108x288xf32, #tpu.memory_space<vmem>>, vector<4x288xf32>,
    %c0_504 = arith.constant 0 : index
    %c0_505 = arith.constant 0 : index
    %c0_506 = arith.constant 0 : index
    %c0_507 = arith.constant 0 : index
    %513 = vector.load %arg10[%c0_504, %c0_505, %c0_506, %c0_507] : memref<1x1x4x342xbf16, #tpu.memory_space<vmem>>, vector<1x1x4x342xbf16>
    %514 = vector.shape_cast %513 : vector<1x1x4x342xbf16> to vector<4x342xbf16>
    %515 = arith.extf %514 : vector<4x342xbf16> to vector<4x342xf32>
    %516 = vector.extract_strided_slice %515 {offsets = [0, 0], sizes = [4, 288], strides = [1, 1]} : vector<4x342xf32> to vector<4x288xf32>
    %c36_508 = arith.constant 36 : index
    %c0_509 = arith.constant 0 : index
    %517 = vector.load %arg15[%c36_508, %c0_509] : memref<108x288xf32, #tpu.memory_space<vmem>>, vector<4x288xf32>
    tpu.vector_store %arg15[%c36_508, %c0_509], %516 {strides = array<i32>} : memref<108x288xf32, #tpu.memory_space<vmem>>, vector<4x288xf32>,
    %518 = vector.extract_strided_slice %515 {offsets = [0, 1], sizes = [4, 288], strides = [1, 1]} : vector<4x342xf32> to vector<4x288xf32>
    %c40_510 = arith.constant 40 : index
    %c0_511 = arith.constant 0 : index
    %519 = vector.load %arg15[%c40_510, %c0_511] : memref<108x288xf32, #tpu.memory_space<vmem>>, vector<4x288xf32>
    tpu.vector_store %arg15[%c40_510, %c0_511], %518 {strides = array<i32>} : memref<108x288xf32, #tpu.memory_space<vmem>>, vector<4x288xf32>,
    %520 = vector.extract_strided_slice %515 {offsets = [0, 2], sizes = [4, 288], strides = [1, 1]} : vector<4x342xf32> to vector<4x288xf32>
    %c44_512 = arith.constant 44 : index
    %c0_513 = arith.constant 0 : index
    %521 = vector.load %arg15[%c44_512, %c0_513] : memref<108x288xf32, #tpu.memory_space<vmem>>, vector<4x288xf32>
    tpu.vector_store %arg15[%c44_512, %c0_513], %520 {strides = array<i32>} : memref<108x288xf32, #tpu.memory_space<vmem>>, vector<4x288xf32>,
    %522 = vector.extract_strided_slice %515 {offsets = [0, 18], sizes = [4, 288], strides = [1, 1]} : vector<4x342xf32> to vector<4x288xf32>
    %c48_514 = arith.constant 48 : index
    %c0_515 = arith.constant 0 : index
    %523 = vector.load %arg15[%c48_514, %c0_515] : memref<108x288xf32, #tpu.memory_space<vmem>>, vector<4x288xf32>
    tpu.vector_store %arg15[%c48_514, %c0_515], %522 {strides = array<i32>} : memref<108x288xf32, #tpu.memory_space<vmem>>, vector<4x288xf32>,
    %524 = vector.extract_strided_slice %515 {offsets = [0, 19], sizes = [4, 288], strides = [1, 1]} : vector<4x342xf32> to vector<4x288xf32>
    %c52_516 = arith.constant 52 : index
    %c0_517 = arith.constant 0 : index
    %525 = vector.load %arg15[%c52_516, %c0_517] : memref<108x288xf32, #tpu.memory_space<vmem>>, vector<4x288xf32>
    tpu.vector_store %arg15[%c52_516, %c0_517], %524 {strides = array<i32>} : memref<108x288xf32, #tpu.memory_space<vmem>>, vector<4x288xf32>,
    %526 = vector.extract_strided_slice %515 {offsets = [0, 20], sizes = [4, 288], strides = [1, 1]} : vector<4x342xf32> to vector<4x288xf32>
    %c56_518 = arith.constant 56 : index
    %c0_519 = arith.constant 0 : index
    %527 = vector.load %arg15[%c56_518, %c0_519] : memref<108x288xf32, #tpu.memory_space<vmem>>, vector<4x288xf32>
    tpu.vector_store %arg15[%c56_518, %c0_519], %526 {strides = array<i32>} : memref<108x288xf32, #tpu.memory_space<vmem>>, vector<4x288xf32>,
    %528 = vector.extract_strided_slice %515 {offsets = [0, 36], sizes = [4, 288], strides = [1, 1]} : vector<4x342xf32> to vector<4x288xf32>
    %c60_520 = arith.constant 60 : index
    %c0_521 = arith.constant 0 : index
    %529 = vector.load %arg15[%c60_520, %c0_521] : memref<108x288xf32, #tpu.memory_space<vmem>>, vector<4x288xf32>
    tpu.vector_store %arg15[%c60_520, %c0_521], %528 {strides = array<i32>} : memref<108x288xf32, #tpu.memory_space<vmem>>, vector<4x288xf32>,
    %530 = vector.extract_strided_slice %515 {offsets = [0, 37], sizes = [4, 288], strides = [1, 1]} : vector<4x342xf32> to vector<4x288xf32>
    %c64_522 = arith.constant 64 : index
    %c0_523 = arith.constant 0 : index
    %531 = vector.load %arg15[%c64_522, %c0_523] : memref<108x288xf32, #tpu.memory_space<vmem>>, vector<4x288xf32>
    tpu.vector_store %arg15[%c64_522, %c0_523], %530 {strides = array<i32>} : memref<108x288xf32, #tpu.memory_space<vmem>>, vector<4x288xf32>,
    %532 = vector.extract_strided_slice %515 {offsets = [0, 38], sizes = [4, 288], strides = [1, 1]} : vector<4x342xf32> to vector<4x288xf32>
    %c68_524 = arith.constant 68 : index
    %c0_525 = arith.constant 0 : index
    %533 = vector.load %arg15[%c68_524, %c0_525] : memref<108x288xf32, #tpu.memory_space<vmem>>, vector<4x288xf32>
    tpu.vector_store %arg15[%c68_524, %c0_525], %532 {strides = array<i32>} : memref<108x288xf32, #tpu.memory_space<vmem>>, vector<4x288xf32>,
    %c0_526 = arith.constant 0 : index
    %c0_527 = arith.constant 0 : index
    %c0_528 = arith.constant 0 : index
    %c0_529 = arith.constant 0 : index
    %534 = vector.load %arg11[%c0_526, %c0_527, %c0_528, %c0_529] : memref<1x1x4x342xbf16, #tpu.memory_space<vmem>>, vector<1x1x4x342xbf16>
    %535 = vector.shape_cast %534 : vector<1x1x4x342xbf16> to vector<4x342xbf16>
    %536 = arith.extf %535 : vector<4x342xbf16> to vector<4x342xf32>
    %537 = vector.extract_strided_slice %536 {offsets = [0, 0], sizes = [4, 288], strides = [1, 1]} : vector<4x342xf32> to vector<4x288xf32>
    %c72_530 = arith.constant 72 : index
    %c0_531 = arith.constant 0 : index
    %538 = vector.load %arg15[%c72_530, %c0_531] : memref<108x288xf32, #tpu.memory_space<vmem>>, vector<4x288xf32>
    tpu.vector_store %arg15[%c72_530, %c0_531], %537 {strides = array<i32>} : memref<108x288xf32, #tpu.memory_space<vmem>>, vector<4x288xf32>,
    %539 = vector.extract_strided_slice %536 {offsets = [0, 1], sizes = [4, 288], strides = [1, 1]} : vector<4x342xf32> to vector<4x288xf32>
    %c76_532 = arith.constant 76 : index
    %c0_533 = arith.constant 0 : index
    %540 = vector.load %arg15[%c76_532, %c0_533] : memref<108x288xf32, #tpu.memory_space<vmem>>, vector<4x288xf32>
    tpu.vector_store %arg15[%c76_532, %c0_533], %539 {strides = array<i32>} : memref<108x288xf32, #tpu.memory_space<vmem>>, vector<4x288xf32>,
    %541 = vector.extract_strided_slice %536 {offsets = [0, 2], sizes = [4, 288], strides = [1, 1]} : vector<4x342xf32> to vector<4x288xf32>
    %c80_534 = arith.constant 80 : index
    %c0_535 = arith.constant 0 : index
    %542 = vector.load %arg15[%c80_534, %c0_535] : memref<108x288xf32, #tpu.memory_space<vmem>>, vector<4x288xf32>
    tpu.vector_store %arg15[%c80_534, %c0_535], %541 {strides = array<i32>} : memref<108x288xf32, #tpu.memory_space<vmem>>, vector<4x288xf32>,
    %543 = vector.extract_strided_slice %536 {offsets = [0, 18], sizes = [4, 288], strides = [1, 1]} : vector<4x342xf32> to vector<4x288xf32>
    %c84_536 = arith.constant 84 : index
    %c0_537 = arith.constant 0 : index
    %544 = vector.load %arg15[%c84_536, %c0_537] : memref<108x288xf32, #tpu.memory_space<vmem>>, vector<4x288xf32>
    tpu.vector_store %arg15[%c84_536, %c0_537], %543 {strides = array<i32>} : memref<108x288xf32, #tpu.memory_space<vmem>>, vector<4x288xf32>,
    %545 = vector.extract_strided_slice %536 {offsets = [0, 19], sizes = [4, 288], strides = [1, 1]} : vector<4x342xf32> to vector<4x288xf32>
    %c88_538 = arith.constant 88 : index
    %c0_539 = arith.constant 0 : index
    %546 = vector.load %arg15[%c88_538, %c0_539] : memref<108x288xf32, #tpu.memory_space<vmem>>, vector<4x288xf32>
    tpu.vector_store %arg15[%c88_538, %c0_539], %545 {strides = array<i32>} : memref<108x288xf32, #tpu.memory_space<vmem>>, vector<4x288xf32>,
    %547 = vector.extract_strided_slice %536 {offsets = [0, 20], sizes = [4, 288], strides = [1, 1]} : vector<4x342xf32> to vector<4x288xf32>
    %c92_540 = arith.constant 92 : index
    %c0_541 = arith.constant 0 : index
    %548 = vector.load %arg15[%c92_540, %c0_541] : memref<108x288xf32, #tpu.memory_space<vmem>>, vector<4x288xf32>
    tpu.vector_store %arg15[%c92_540, %c0_541], %547 {strides = array<i32>} : memref<108x288xf32, #tpu.memory_space<vmem>>, vector<4x288xf32>,
    %549 = vector.extract_strided_slice %536 {offsets = [0, 36], sizes = [4, 288], strides = [1, 1]} : vector<4x342xf32> to vector<4x288xf32>
    %c96_542 = arith.constant 96 : index
    %c0_543 = arith.constant 0 : index
    %550 = vector.load %arg15[%c96_542, %c0_543] : memref<108x288xf32, #tpu.memory_space<vmem>>, vector<4x288xf32>
    tpu.vector_store %arg15[%c96_542, %c0_543], %549 {strides = array<i32>} : memref<108x288xf32, #tpu.memory_space<vmem>>, vector<4x288xf32>,
    %551 = vector.extract_strided_slice %536 {offsets = [0, 37], sizes = [4, 288], strides = [1, 1]} : vector<4x342xf32> to vector<4x288xf32>
    %c100_544 = arith.constant 100 : index
    %c0_545 = arith.constant 0 : index
    %552 = vector.load %arg15[%c100_544, %c0_545] : memref<108x288xf32, #tpu.memory_space<vmem>>, vector<4x288xf32>
    tpu.vector_store %arg15[%c100_544, %c0_545], %551 {strides = array<i32>} : memref<108x288xf32, #tpu.memory_space<vmem>>, vector<4x288xf32>,
    %553 = vector.extract_strided_slice %536 {offsets = [0, 38], sizes = [4, 288], strides = [1, 1]} : vector<4x342xf32> to vector<4x288xf32>
    %c104_546 = arith.constant 104 : index
    %c0_547 = arith.constant 0 : index
    %554 = vector.load %arg15[%c104_546, %c0_547] : memref<108x288xf32, #tpu.memory_space<vmem>>, vector<4x288xf32>
    tpu.vector_store %arg15[%c104_546, %c0_547], %553 {strides = array<i32>} : memref<108x288xf32, #tpu.memory_space<vmem>>, vector<4x288xf32>,
    %c0_548 = arith.constant 0 : index
    %c0_549 = arith.constant 0 : index
    %555 = vector.load %arg15[%c0_548, %c0_549] : memref<108x288xf32, #tpu.memory_space<vmem>>, vector<108x288xf32>
    %cst_550 = arith.constant dense<0.000000e+00> : vector<8x288xf32>
    %556 = tpu.matmul %0, %555, %cst_550 {dimension_numbers = #tpu.dot_dimension_numbers<[1], [0], [0], [1], [0, 0, 1, 1], [], []>} : vector<8x108xf32>, vector<108x288xf32>, vector<8x288xf32> -> vector<8x288xf32>
    %557 = vector.broadcast %1 : vector<8x1xf32> to vector<8x288xf32>
    %558 = arith.addf %556, %557 : vector<8x288xf32>
    %c0_551 = arith.constant 0 : index
    %c0_552 = arith.constant 0 : index
    %c7 = arith.constant 7 : index
    %c0_553 = arith.constant 0 : index
    %559 = vector.load %arg14[%c0_551, %c0_552, %c7, %c0_553] : memref<1x8x8x288xf32, #tpu.memory_space<vmem>>, vector<1x8x1x288xf32>
    %560 = vector.shape_cast %559 : vector<1x8x1x288xf32> to vector<8x288xf32>
    %561 = vector.shape_cast %558 : vector<8x288xf32> to vector<1x8x1x288xf32>
    tpu.vector_store %arg14[%c0_551, %c0_552, %c7, %c0_553], %561 {strides = array<i32>} : memref<1x8x8x288xf32, #tpu.memory_space<vmem>>, vector<1x8x1x288xf32>,
    return
  }
  func.func @transform_0(%arg0: i32, %arg1: i32) -> (i32, i32, i32, i32) {
    %c8_i32 = arith.constant 8 : i32
    %0 = arith.muli %arg1, %c8_i32 : i32
    %c0_i32 = arith.constant 0 : i32
    %1 = arith.addi %0, %c0_i32 : i32
    %c0_i32_0 = arith.constant 0 : i32
    %c0_i32_1 = arith.constant 0 : i32
    %c0_i32_2 = arith.constant 0 : i32
    return %arg0, %1, %c0_i32_0, %c0_i32_1 : i32, i32, i32, i32
  }
  func.func @transform_1(%arg0: i32, %arg1: i32) -> (i32, i32, i32, i32) {
    %c8_i32 = arith.constant 8 : i32
    %0 = arith.muli %arg1, %c8_i32 : i32
    %c1_i32 = arith.constant 1 : i32
    %1 = arith.addi %0, %c1_i32 : i32
    %c0_i32 = arith.constant 0 : i32
    %c0_i32_0 = arith.constant 0 : i32
    %c0_i32_1 = arith.constant 0 : i32
    return %arg0, %1, %c0_i32, %c0_i32_0 : i32, i32, i32, i32
  }
  func.func @transform_2(%arg0: i32, %arg1: i32) -> (i32, i32, i32, i32) {
    %c8_i32 = arith.constant 8 : i32
    %0 = arith.muli %arg1, %c8_i32 : i32
    %c2_i32 = arith.constant 2 : i32
    %1 = arith.addi %0, %c2_i32 : i32
    %c0_i32 = arith.constant 0 : i32
    %c0_i32_0 = arith.constant 0 : i32
    %c0_i32_1 = arith.constant 0 : i32
    return %arg0, %1, %c0_i32, %c0_i32_0 : i32, i32, i32, i32
  }
  func.func @transform_3(%arg0: i32, %arg1: i32) -> (i32, i32, i32, i32) {
    %c8_i32 = arith.constant 8 : i32
    %0 = arith.muli %arg1, %c8_i32 : i32
    %c3_i32 = arith.constant 3 : i32
    %1 = arith.addi %0, %c3_i32 : i32
    %c0_i32 = arith.constant 0 : i32
    %c0_i32_0 = arith.constant 0 : i32
    %c0_i32_1 = arith.constant 0 : i32
    return %arg0, %1, %c0_i32, %c0_i32_0 : i32, i32, i32, i32
  }
  func.func @transform_4(%arg0: i32, %arg1: i32) -> (i32, i32, i32, i32) {
    %c8_i32 = arith.constant 8 : i32
    %0 = arith.muli %arg1, %c8_i32 : i32
    %c4_i32 = arith.constant 4 : i32
    %1 = arith.addi %0, %c4_i32 : i32
    %c0_i32 = arith.constant 0 : i32
    %c0_i32_0 = arith.constant 0 : i32
    %c0_i32_1 = arith.constant 0 : i32
    return %arg0, %1, %c0_i32, %c0_i32_0 : i32, i32, i32, i32
  }
  func.func @transform_5(%arg0: i32, %arg1: i32) -> (i32, i32, i32, i32) {
    %c8_i32 = arith.constant 8 : i32
    %0 = arith.muli %arg1, %c8_i32 : i32
    %c5_i32 = arith.constant 5 : i32
    %1 = arith.addi %0, %c5_i32 : i32
    %c0_i32 = arith.constant 0 : i32
    %c0_i32_0 = arith.constant 0 : i32
    %c0_i32_1 = arith.constant 0 : i32
    return %arg0, %1, %c0_i32, %c0_i32_0 : i32, i32, i32, i32
  }
  func.func @transform_6(%arg0: i32, %arg1: i32) -> (i32, i32, i32, i32) {
    %c8_i32 = arith.constant 8 : i32
    %0 = arith.muli %arg1, %c8_i32 : i32
    %c6_i32 = arith.constant 6 : i32
    %1 = arith.addi %0, %c6_i32 : i32
    %c0_i32 = arith.constant 0 : i32
    %c0_i32_0 = arith.constant 0 : i32
    %c0_i32_1 = arith.constant 0 : i32
    return %arg0, %1, %c0_i32, %c0_i32_0 : i32, i32, i32, i32
  }
  func.func @transform_7(%arg0: i32, %arg1: i32) -> (i32, i32, i32, i32) {
    %c8_i32 = arith.constant 8 : i32
    %0 = arith.muli %arg1, %c8_i32 : i32
    %c7_i32 = arith.constant 7 : i32
    %1 = arith.addi %0, %c7_i32 : i32
    %c0_i32 = arith.constant 0 : i32
    %c0_i32_0 = arith.constant 0 : i32
    %c0_i32_1 = arith.constant 0 : i32
    return %arg0, %1, %c0_i32, %c0_i32_0 : i32, i32, i32, i32
  }
  func.func @transform_8(%arg0: i32, %arg1: i32) -> (i32, i32, i32, i32) {
    %c8_i32 = arith.constant 8 : i32
    %0 = arith.muli %arg1, %c8_i32 : i32
    %c8_i32_0 = arith.constant 8 : i32
    %1 = arith.addi %0, %c8_i32_0 : i32
    %c0_i32 = arith.constant 0 : i32
    %c0_i32_1 = arith.constant 0 : i32
    %c0_i32_2 = arith.constant 0 : i32
    return %arg0, %1, %c0_i32, %c0_i32_1 : i32, i32, i32, i32
  }
  func.func @transform_9(%arg0: i32, %arg1: i32) -> (i32, i32, i32, i32) {
    %c8_i32 = arith.constant 8 : i32
    %0 = arith.muli %arg1, %c8_i32 : i32
    %c9_i32 = arith.constant 9 : i32
    %1 = arith.addi %0, %c9_i32 : i32
    %c0_i32 = arith.constant 0 : i32
    %c0_i32_0 = arith.constant 0 : i32
    %c0_i32_1 = arith.constant 0 : i32
    return %arg0, %1, %c0_i32, %c0_i32_0 : i32, i32, i32, i32
  }
  func.func @transform_10(%arg0: i32, %arg1: i32) -> (i32, i32) {
    %c0_i32 = arith.constant 0 : i32
    %c0_i32_0 = arith.constant 0 : i32
    %c0_i32_1 = arith.constant 0 : i32
    return %c0_i32, %c0_i32_0 : i32, i32
  }
  func.func @transform_11(%arg0: i32, %arg1: i32) -> (i32, i32) {
    %c0_i32 = arith.constant 0 : i32
    %c0_i32_0 = arith.constant 0 : i32
    %c0_i32_1 = arith.constant 0 : i32
    return %c0_i32, %c0_i32_0 : i32, i32
  }
  func.func @transform_12(%arg0: i32, %arg1: i32) -> (i32, i32, i32, i32) {
    %c0_i32 = arith.constant 0 : i32
    %c0_i32_0 = arith.constant 0 : i32
    %c0_i32_1 = arith.constant 0 : i32
    return %arg0, %c0_i32, %arg1, %c0_i32_0 : i32, i32, i32, i32
  }
}

</mosaic_0001>

<bundles_post_ra>
// kernel: conv_block_3d.1
= control target key start
LH: loop header
LB: loop body
LE: loop exit
PB: predicated region body
PF: predicated region fallthrough
CT: control target
= control target key end

     0   :  { %s12212_s0 = inlined_call_operand.vmem [shape: bf16[2,18,4,342], index: 0, kind: input, shape index: {}, may-alias: {0,1,2,3,4,5,6,7,8,9}]   ;;  %s12213_s1 = inlined_call_operand.vmem [shape: bf16[2,18,4,342], index: 1, kind: input, shape index: {}, may-alias: {0,1,2,3,4,5,6,7,8,9}]   ;;  %s12214_s2 = inlined_call_operand.vmem [shape: bf16[2,18,4,342], index: 2, kind: input, shape index: {}, may-alias: {0,1,2,3,4,5,6,7,8,9}]   ;;  %s12215_s3 = inlined_call_operand.vmem [shape: bf16[2,18,4,342], index: 3, kind: input, shape index: {}, may-alias: {0,1,2,3,4,5,6,7,8,9}]   ;;  %s12216_s4 = inlined_call_operand.vmem [shape: bf16[2,18,4,342], index: 4, kind: input, shape index: {}, may-alias: {0,1,2,3,4,5,6,7,8,9}]   ;;  %s12217_s5 = inlined_call_operand.vmem [shape: bf16[2,18,4,342], index: 5, kind: input, shape index: {}, may-alias: {0,1,2,3,4,5,6,7,8,9}]   ;;  %s12218_s6 = inlined_call_operand.vmem [shape: bf16[2,18,4,342], index: 6, kind: input, shape index: {}, may-alias: {0,1,2,3,4,5,6,7,8,9}]   ;;  %s12219_s7 = inlined_call_operand.vmem [shape: bf16[2,18,4,342], index: 7, kind: input, shape index: {}, may-alias: {0,1,2,3,4,5,6,7,8,9}]   ;;  %s12220_s8 = inlined_call_operand.vmem [shape: bf16[2,18,4,342], index: 8, kind: input, shape index: {}, may-alias: {0,1,2,3,4,5,6,7,8,9}]   ;;  %s12221_s9 = inlined_call_operand.vmem [shape: bf16[2,18,4,342], index: 9, kind: input, shape index: {}, may-alias: {0,1,2,3,4,5,6,7,8,9}]   ;;  %s12222_s10 = inlined_call_operand.vmem [shape: f32[8,108], index: 10, kind: input, shape index: {}]   ;;  %s12223_s11 = inlined_call_operand.vmem [shape: f32[8,1], index: 11, kind: input, shape index: {}]   ;;  %s12224_s12 = inlined_call_operand.vmem [shape: f32[2,8,16,288], index: 12, kind: output, shape index: {}]  }
   0x1   :  { %12246 = sst [smem:[#allocation10_spill]] %s12212_s0 }
   0x2   :  { %12247 = sst [smem:[#allocation11_spill]] %s12213_s1 }
   0x3   :  { %s9171_s21 = smov 0   ;;  %s9173_s22 = smov 0  }
   0x4   :  { %s9175_s23 = smov 0   ;;  %s9177_s24 = smov 0  }
   0x5   :  { %s9179_s25 = smov 0   ;;  %s9181_s26 = smov 0  }
   0x6   :  { %s9183_s27 = smov 0  }
   0x7 LB: > { %12248 = sst [smem:[#allocation4_spill]] %s9070_s22  ;;  %s31_s28 = sadd.s32 1, %s9082_s25  ;;  %s9090_s27 = sphi %s9183_s27, %s22_s27   ;;  %s9086_s26 = sphi %s9181_s26, %s12280_s26   ;;  %s9082_s25 = sphi %s9179_s25, %s12279_s25   ;;  %s9078_s24 = sphi %s9177_s24, %s12278_s24   ;;  %s9074_s23 = sphi %s9175_s23, %s12277_s23   ;;  %s9070_s22 = sphi %s9173_s22, %s12276_s22   ;;  %s9066_s21 = sphi %s9171_s21, %s12275_s21  }
   0x8   : > { %12249 = sst [smem:[#allocation5_spill]] %s9082_s25  ;;  %p32_p0 = scmp.ge.s32.totalorder %s31_s28, 2 }
   0x9   : > { %12250 = sst [smem:[#allocation6_spill]] %s9086_s26  ;;  %s34_s29 = sadd.s32 1, %s9086_s26 }
   0xa   : > { %s6573_s30 = sadd.s32 4294967295, %s9090_s27   ;;  %p413_p1 = scmp.ne.s32.totalorder %s9070_s22, %s9066_s21 }
   0xb   : > { %s12282_s28 = smov (%p32_p0, %s31_s28), 0  ;;  %s12284_s29 = smov (!%p32_p0, %s34_s29), %s9086_s26 }
   0xc   : > { %12251 = sst [smem:[#allocation7_spill]] %s12282_s28  ;;  %s399_s13 = ssub.s32 %s9082_s25, %s12282_s28 }
   0xd   : > { %p414_p2 = scmp.eq.s32.totalorder %s6573_s30, 3  ;;  %p36_p3 = scmp.ge.s32.totalorder %s12284_s29, 2 }
   0xe   : > { %p6597_p4 = scmp.ge.s32.totalorder %s9090_s27, 1  ;;  %p602_p6 = scmp.lt.s32.totalorder %s9090_s27, 5 }
   0xf   : > { %p9217_p5 = por %p414_p2, %p413_p1  ;;  %s12286_s29 = smov (%p36_p3, %s12284_s29), 0 }
  0x10   : > { %12253 = sst [smem:[#allocation8_spill]] %s12286_s29  ;;  %p603_p7 = pnand %p6597_p4, %p602_p6 }
  0x11   : > { %s398_s15 = ssub.s32 %s9086_s26, %s12286_s29  ;;  %s403_s17 = sadd.s32 1, %s9070_s22  ;;  %v9092_v0 = vmov (!%p603_p7), 0   ;;  %vm886_vm0 = vcmask (!%p603_p7), 257024   ;;  %vm904_vm1 = vcmask (!%p603_p7), 261124   ;;  %v9099_v21 = vmov (!%p603_p7), 0.0|0.0   ;;  %v876_v37 = vld [vmem:[%s12223_s11] sm:$0xff] (!%p603_p7) }
  0x12   : > { %s400_s16 = sor.u32 %s399_s13, %s398_s15  ;;  %606 = sbr.rel (%p603_p7) target bundleno = 1006 (0x3ee), region = 68  ;;  %7792 = vset.pattern.permute.xlu0 (!%p603_p7), %v9092_v0  ;;  %7122 = vmatprep.subr.bf16.mxu1 (!%p603_p7), %v9099_v21  ;;  %vm9102_vm2 = vmmov (!%p603_p7), 0   ;;  %v9103_v38 = vmov (!%p603_p7), 0.0   ;;  %vm896_vm3 = vcmask (!%p603_p7), 1039360   ;;  %vm912_vm4 = vcmask (!%p603_p7), 1031168  }
  0x13   : > { %p401_p8 = scmp.eq.s32.totalorder %s400_s16, 0  ;;  %s9231_s19 = sshll.u32 (!%p603_p7), %s9074_s23, 3  ;;  %6872 = vmatprep.mubr.msk.f32.mxu1 (!%p603_p7), %vm9102_vm2, %v9103_v38  ;;  %1384 = vmatprep.mubr.f32.mxu0 (!%p603_p7), %v9103_v38  ;;  %vm927_vm5 = vcmask (!%p603_p7), 900096   ;;  %vm942_vm6 = vcmask (!%p603_p7), 891904   ;;  %vm957_vm7 = vcmask (!%p603_p7), 883712   ;;  %vm972_vm8 = vcmask (!%p603_p7), 752640  }
  0x14   : > { %p748_p9 = scmp.lt.s32.totalorder (!%p603_p7), %s9078_s24, 1  ;;  %p750_p10 = scmp.lt.s32.totalorder (!%p603_p7), %s9231_s19, 17  ;;  %vm987_vm9 = vcmask (!%p603_p7), 744448   ;;  %vm1002_vm10 = vcmask (!%p603_p7), 736256   ;;  %vm1310_vm11 = vcmask (!%p603_p7), 1043456   ;;  %vm9104_vm12 = vmmov (!%p603_p7), 1  }
  0x15   : > { %s9228_s18 = scalar_select %p401_p8, %s9070_s22, %s403_s17  }
  0x16   : > { %s759_s16 = sadd.s32 (!%p603_p7), 1, %s9231_s19  ;;  %s12255_s0 = sld [smem:[#allocation10_spill]] (!%p603_p7)  ;;  %vm9730_vm13 = vmpackc.low (!%p603_p7), %vm1310_vm11, %vm9104_vm12 }
  0x17   : > { %12254 = sst [smem:[#allocation9_spill]] %s9228_s18  ;;  %p762_p11 = scmp.lt.s32.totalorder (!%p603_p7), %s759_s16, 17 }
  0x18   : > { %s772_s22 = sadd.s32 (!%p603_p7), 2, %s9231_s19  ;;  %s12256_s1 = sld [smem:[#allocation11_spill]] (!%p603_p7) }
  0x19   : > { %s749_s20 = scalar_select %p748_p9, %s9078_s24, 1 }
  0x1a   : > { %s751_s30 = scalar_select %p750_p10, %s9231_s19, 17 }
  0x1b   : > { %s9237_s13 = smul.u32 54, %s749_s20  ;;  %s12288_s16 = smov (!%p762_p11, %s759_s16), 17 }
  0x1c   : > { %s7509_s15 = smul.u32 3, %s751_s30  ;;  %p775_p12 = scmp.lt.s32.totalorder %s772_s22, 17 }
  0x1d   : > { %s7511_s18 = smul.u32 3, %s12288_s16 }
  0x1e   : > { %s754_s17 = sadd.s32 %s9237_s13, %s7509_s15  ;;  %s12242_s15 = smov 126  }
  0x1f   : > { %s6599_s29 = sshll.u32 %s754_s17, 1  ;;  %s766_s20 = sadd.s32 %s7511_s18, %s9237_s13 }
  0x20   : > { %s756_s25 = scalar_lea.vmem %s12255_s0, %s6599_s29  ;;  %s6601_s30 = sshll.u32 %s766_s20, 1 }
  0x21   : > { %v877_v1 = vld [vmem:[%s756_s25] sm:$0x3f]  ;;  %s9250_s25 = scalar_lea.vmem %s12256_s1, %s6601_s30  ;;  %s12244_s29 = smov 127  }
  0x22   : > { %v878_v2 = vunpack.c.l.bf16 %v877_v1  ;;  %v879_v3 = vunpack.c.h.bf16 %v877_v1  ;;  %v1011_v9 = vld [vmem:[%s9250_s25] sm:$0x3f]  ;;  %s12290_s22 = smov (!%p775_p12, %s772_s22), 17  ;;  %s12240_s17 = smov 110  }
  0x23   : > { %v1012_v10 = vunpack.c.l.bf16 %v1011_v9  ;;  %v1013_v11 = vunpack.c.h.bf16 %v1011_v9  ;;  %s7512_s18 = smul.u32 3, %s12290_s22  ;;  %s12232_s22 = smov 108   ;;  %v1566_v25 = vld [vmem:[%s9250_s25] sm:$0x3f] }
  0x24   : > { %v888_v4 = vcombine.low %v878_v2, %v878_v2  ;;  %884 = vst [vmem:[#allocation2] sm:$0xf] %v878_v2  ;;  %v882_v5 = vcombine.high %v878_v2, %v878_v2  ;;  %887 = vst.msk [vmem:[#allocation2 + $0x10] sm:$0xf] %vm886_vm0, %v879_v3  ;;  %v889_v8 = vcombine.low %v879_v3, %v879_v3  ;;  %s12236_s30 = smov 90   ;;  %v9282_v26 = vunpack.c.l.bf16 %v1566_v25  ;;  %s785_s25 = sadd.s32 3, %s9231_s19 }
  0x25   : > { %1021 = vst [vmem:[#allocation2 + $0x68] sm:$0xf0] %v1012_v10  ;;  %v1016_v13 = vcombine.low %v1012_v10, %v1012_v10  ;;  %v1017_v14 = vcombine.low %v1013_v11, %v1013_v11  ;;  %s779_s16 = sadd.s32 %s7512_s18, %s9237_s13  ;;  %s12234_s18 = smov 109   ;;  %v1023_v22 = vcombine.high %v1012_v10, %v1012_v10  ;;  %v9306_v33 = vunpack.c.h.bf16 %v1566_v25 }
  0x26   : > { %v7592_v6 = vpack.i.bf16 %v878_v2, %v888_v4  ;;  %v7602_v7 = vpack.i.bf16 %v882_v5, %v878_v2  ;;  %885 = vst [vmem:[#allocation2 + $0x8] sm:$0xf] %v882_v5  ;;  %v7597_v12 = vpack.i.bf16 %v1012_v10, %v889_v8  ;;  %s6603_s20 = sshll.u32 %s779_s16, 1  ;;  %s12230_s16 = smov 92   ;;  %v1576_v27 = vcombine.low %v9282_v26, %v9282_v26 }
  0x27   : > { %1020 = vst [vmem:[#allocation2 + $0x60] sm:$0xf0] %v1016_v13  ;;  %1022 = vst.msk [vmem:[#allocation2 + $0x70] sm:$0xf0] %vm904_vm1, %v1017_v14  ;;  %s9262_s28 = scalar_lea.vmem %s12214_s2, %s6603_s20  ;;  %v7637_v18 = vpack.i.bf16 %v1016_v13, %v879_v3  ;;  %s12238_s20 = smov 91   ;;  %v7672_v23 = vpack.i.bf16 %v1013_v11, %v1023_v22  ;;  %v7677_v24 = vpack.i.bf16 %v1017_v14, %v1012_v10 }
  0x28   : > { %7593 = vrot.lane.b32.xlu0 %v7592_v6, %s12244_s29  ;;  %7603 = vrot.lane.b32.xlu1 %v7602_v7, %s12242_s15  ;;  %v1136_v15 = vld [vmem:[%s9262_s28] sm:$0x3f]  ;;  %p788_p13 = scmp.lt.s32.totalorder %s785_s25, 17  ;;  %v1577_v34 = vcombine.low %v9306_v33, %v9306_v33  ;;  %v9317_v36 = vcombine.high %v9282_v26, %v9282_v26  ;;  %s12263_s0 = smov 126  }
  0x29   : > { %v1137_v16 = vunpack.c.l.bf16 %v1136_v15  ;;  %v1138_v17 = vunpack.c.h.bf16 %v1136_v15  ;;  %v1690_v40 = vld [vmem:[%s9262_s28] sm:$0x3f]  ;;  %s12268_s1 = smov 127  }
  0x2a   : > { %s12292_s25 = smov (!%p788_p13, %s785_s25), 17  ;;  %v7793_v35 = vpack.i.bf16 %v1577_v34, %v9282_v26  ;;  %v7798_v39 = vpack.i.bf16 %v9306_v33, %v9317_v36  ;;  %v9337_v41 = vunpack.c.l.bf16 %v1690_v40  ;;  %v1692_v45 = vunpack.c.h.bf16 %v1690_v40 }
  0x2b   : > { %1143 = vst [vmem:[#allocation2 + $0xd8] sm:$0xf] %v1137_v16  ;;  %1145 = vst.msk [vmem:[#allocation2 + $0xe8] sm:$0xf] %vm886_vm0, %v1138_v17  ;;  %v1141_v19 = vcombine.high %v1137_v16, %v1137_v16  ;;  %v1146_v28 = vcombine.low %v1137_v16, %v1137_v16  ;;  %v1147_v29 = vcombine.low %v1138_v17, %v1138_v17  ;;  %s7513_s26 = smul.u32 3, %s12292_s25 }
  0x2c   : > { %7598 = vrot.lane.b32.xlu0 %v7597_v12, %s12244_s29  ;;  %7613 = vrot.lane.b32.xlu1 %v7597_v12, %s12240_s17  ;;  %v7727_v32 = vpack.i.bf16 %v9282_v26, %v1138_v17  ;;  %v1702_v44 = vcombine.high %v9337_v41, %v9337_v41  ;;  %v9353_v48 = vcombine.low %v9337_v41, %v9337_v41 }
  0x2d   : > { %1144 = vst [vmem:[#allocation2 + $0xe0] sm:$0xf] %v1141_v19  ;;  %v7782_v20 = vpack.i.bf16 %v1141_v19, %v1137_v16  ;;  %v7712_v30 = vpack.i.bf16 %v1137_v16, %v1146_v28  ;;  %v7717_v31 = vpack.i.bf16 %v1576_v27, %v1147_v29  ;;  %v9356_v50 = vcombine.low %v1692_v45, %v1692_v45 }
  0x2e   : > { %v7833_v47 = vpack.i.bf16 %v1702_v44, %v9337_v41  ;;  %v7843_v51 = vpack.i.bf16 %v9337_v41, %v9353_v48 }
  0x30   : > { %7608 = vrot.lane.b32.xlu0 %v7592_v6, %s12240_s17  ;;  %7628 = vrot.lane.b32.xlu1 %v7597_v12, %s12232_s22 }
  0x34   : > { %7618 = vrot.lane.b32.xlu0 %v7602_v7, %s12234_s18  ;;  %7638 = vrot.lane.b32.xlu1 %v7637_v18, %s12242_s15 }
  0x38   : > { %7623 = vrot.lane.b32.xlu0 %v7592_v6, %s12232_s22  ;;  %7643 = vrot.lane.b32.xlu1 %v7637_v18, %s12234_s18 }
  0x3c   : > { %7633 = vrot.lane.b32.xlu0 %v7602_v7, %s12230_s16  ;;  %7648 = vrot.lane.b32.xlu1 %v7637_v18, %s12230_s16 }
  0x40   : > { %7653 = vrot.lane.b32.xlu0 %v7592_v6, %s12238_s20  ;;  %7658 = vrot.lane.b32.xlu1 %v7597_v12, %s12238_s20 }
  0x44   : > { %7663 = vrot.lane.b32.xlu0 %v7602_v7, %s12236_s30  ;;  %7668 = vrot.lane.b32.xlu1 %v7637_v18, %s12236_s30 }
  0x48   : > { %7673 = vrot.lane.b32.xlu0 %v7672_v23, %s12244_s29  ;;  %7678 = vrot.lane.b32.xlu1 %v7677_v24, %s12242_s15 }
  0x4c   : > { %7683 = vrot.lane.b32.xlu0 %v7672_v23, %s12240_s17  ;;  %7688 = vrot.lane.b32.xlu1 %v7677_v24, %s12234_s18 }
  0x50   : > { %7693 = vrot.lane.b32.xlu0 %v7672_v23, %s12232_s22  ;;  %7698 = vrot.lane.b32.xlu1 %v7677_v24, %s12230_s16 }
  0x54   : > { %7703 = vrot.lane.b32.xlu0 %v7672_v23, %s12238_s20  ;;  %7708 = vrot.lane.b32.xlu1 %v7677_v24, %s12236_s30 }
  0x58   : > { %7713 = vrot.lane.b32.xlu0 %v7712_v30, %s12244_s29  ;;  %7718 = vrot.lane.b32.xlu1 %v7717_v31, %s12244_s29 }
  0x5c   : > { %7723 = vrot.lane.b32.xlu0 %v7782_v20, %s12242_s15  ;;  %7728 = vrot.lane.b32.xlu1 %v7727_v32, %s12242_s15 }
  0x60   : > { %7733 = vrot.lane.b32.xlu0 %v7712_v30, %s12240_s17  ;;  %7738 = vrot.lane.b32.xlu1 %v7717_v31, %s12240_s17 }
  0x64   : > { %7743 = vrot.lane.b32.xlu0 %v7782_v20, %s12234_s18  ;;  %7748 = vrot.lane.b32.xlu1 %v7727_v32, %s12234_s18  ;;  %s12258_s18 = smov 108  }
  0x68   : > { %7753 = vrot.lane.b32.xlu0 %v7712_v30, %s12232_s22  ;;  %7758 = vrot.lane.b32.xlu1 %v7717_v31, %s12232_s22  ;;  %s12257_s22 = smov 109  }
  0x6c   : > { %7763 = vrot.lane.b32.xlu0 %v7782_v20, %s12230_s16  ;;  %7768 = vrot.lane.b32.xlu1 %v7727_v32, %s12230_s16  ;;  %s792_s16 = sadd.s32 %s7513_s26, %s9237_s13 }
  0x6d   : > { %s6605_s25 = sshll.u32 %s792_s16, 1  ;;  %s12259_s16 = smov 92  }
  0x70   : > { %7773 = vrot.lane.b32.xlu0 %v7712_v30, %s12238_s20  ;;  %7778 = vrot.lane.b32.xlu1 %v7717_v31, %s12238_s20  ;;  %s9332_s20 = scalar_lea.vmem %s12215_s3, %s6605_s25  ;;  %s12261_s25 = smov 90  }
  0x71   : > { %v1815_v42 = vld [vmem:[%s9332_s20] sm:$0x3f] }
  0x72   : > { %v9341_v43 = vunpack.c.l.bf16 %v1815_v42  ;;  %v9379_v63 = vunpack.c.h.bf16 %v1815_v42 }
  0x74   : > { %7783 = vrot.lane.b32.xlu0 %v7782_v20, %s12236_s30  ;;  %7788 = vrot.lane.b32.xlu1 %v7727_v32, %s12236_s30  ;;  %v1825_v46 = vcombine.low %v9341_v43, %v9341_v43  ;;  %s12260_s30 = smov 91   ;;  %v7848_v52 = vpack.i.bf16 %v9341_v43, %v9356_v50  ;;  %v1826_v2 = vcombine.low %v9379_v63, %v9379_v63 }
  0x75   : > { %v9398_v10 = vcombine.high %v9341_v43, %v9341_v43 }
  0x76   : > { %v7838_v49 = vpack.i.bf16 %v1825_v46, %v1692_v45  ;;  %v9402_v11 = vpack.i.bf16 %v1826_v2, %v9341_v43 }
  0x77   : > { %v9414_v20 = vpack.i.bf16 %v9379_v63, %v9398_v10 }
  0x78   : > { %1304 = vperm.xlu0 %7792, %v876_v37   ;;  %7794 = vrot.lane.b32.xlu1 %v7793_v35, %s12244_s29 }
  0x7c   : > { %7799 = vrot.lane.b32.xlu1 %v7798_v39, %s12242_s15  ;;  %7804 = vrot.lane.b32.xlu0 %v7793_v35, %s12240_s17 }
  0x80   : > { %7809 = vrot.lane.b32.xlu1 %v7798_v39, %s12257_s22  ;;  %7814 = vrot.lane.b32.xlu0 %v7793_v35, %s12258_s18 }
  0x84   : > { %7819 = vrot.lane.b32.xlu1 %v7798_v39, %s12259_s16  ;;  %7824 = vrot.lane.b32.xlu0 %v7793_v35, %s12260_s30 }
  0x88   : > { %7829 = vrot.lane.b32.xlu1 %v7798_v39, %s12261_s25  ;;  %7834 = vrot.lane.b32.xlu0 %v7833_v47, %s12244_s29 }
  0x8c   : > { %7839 = vrot.lane.b32.xlu1 %v7838_v49, %s12244_s29  ;;  %7844 = vrot.lane.b32.xlu0 %v7843_v51, %s12242_s15 }
  0x90   : > { %7849 = vrot.lane.b32.xlu1 %v7848_v52, %s12242_s15  ;;  %7854 = vrot.lane.b32.xlu0 %v7833_v47, %s12240_s17 }
  0x94   : > { %7859 = vrot.lane.b32.xlu1 %v7838_v49, %s12240_s17  ;;  %7864 = vrot.lane.b32.xlu0 %v7843_v51, %s12257_s22 }
  0x98   : > { %7869 = vrot.lane.b32.xlu1 %v7848_v52, %s12257_s22  ;;  %7874 = vrot.lane.b32.xlu0 %v7833_v47, %s12258_s18 }
  0x9a   : > { %v7594_v53 = vpop.permute.xlu0 %7593  ;;  %v7604_v54 = vpop.permute.xlu1 %7603 }
  0x9b   : > { %v7596_v55 = vunpack.i.h.bf16 %v7594_v53  ;;  %v7595_v56 = vunpack.i.l.bf16 %v7594_v53  ;;  %v7606_v57 = vunpack.i.h.bf16 %v7604_v54  ;;  %v7605_v58 = vunpack.i.l.bf16 %v7604_v54 }
  0x9c   : > { %7879 = vrot.lane.b32.xlu1 %v7838_v49, %s12258_s18  ;;  %7884 = vrot.lane.b32.xlu0 %v7843_v51, %s12259_s16 }
  0x9d   : > { %v897_v59 = vsel %vm896_vm3, %v7595_v56, %v7596_v55  ;;  %v913_v60 = vsel %vm912_vm4, %v7605_v58, %v7606_v57 }
  0x9e   : > { %902 = vst [vmem:[#allocation2] sm:$0xf0] %v897_v59  ;;  %918 = vst [vmem:[#allocation2 + $0x18] sm:$0xf] %v913_v60  ;;  %v9375_v61 = vpop.permute.xlu0 %7598  ;;  %v9377_v62 = vpop.permute.xlu1 %7613 }
  0x9f   : > { %v7600_v0 = vunpack.i.l.bf16 %v9375_v61  ;;  %v7615_v1 = vunpack.i.l.bf16 %v9377_v62 }
  0xa0   : > { %7889 = vrot.lane.b32.xlu1 %v7848_v52, %s12259_s16  ;;  %7894 = vrot.lane.b32.xlu0 %v7833_v47, %s12260_s30 }
  0xa1   : > { %v898_v3 = vsel %vm896_vm3, %v7596_v55, %v7600_v0  ;;  %905 = vst.msk [vmem:[#allocation2 + $0x10] sm:$0xf0] %vm904_vm1, %v7600_v0  ;;  %935 = vst.msk [vmem:[#allocation2 + $0x28] sm:$0xf0] %vm904_vm1, %v7615_v1 }
  0xa2   : > { %903 = vst [vmem:[#allocation2 + $0x8] sm:$0xf0] %v898_v3  ;;  %v7609_v4 = vpop.permute.xlu0 %7608  ;;  %v9390_v5 = vpop.permute.xlu1 %7628 }
  0xa3   : > { %v7611_v6 = vunpack.i.h.bf16 %v7609_v4  ;;  %v7610_v7 = vunpack.i.l.bf16 %v7609_v4  ;;  %v7630_v8 = vunpack.i.l.bf16 %v9390_v5 }
  0xa4   : > { %7899 = vrot.lane.b32.xlu1 %v7838_v49, %s12260_s30  ;;  %7904 = vrot.lane.b32.xlu0 %v7843_v51, %s12261_s25 }
  0xa5   : > { %v9393_v9 = vld [vmem:[#allocation2] sm:$0xff]  ;;  %v928_v12 = vsel %vm927_vm5, %v7610_v7, %v7611_v6  ;;  %v929_v13 = vsel %vm927_vm5, %v7611_v6, %v7615_v1  ;;  %965 = vst.msk [vmem:[#allocation2 + $0x40] sm:$0xf0] %vm904_vm1, %v7630_v8 }
  0xa6   : > { %1573 = vst [vmem:[#allocation2] sm:$0xf] %v9282_v26  ;;  %933 = vst [vmem:[#allocation2 + $0x18] sm:$0xf0] %v928_v12  ;;  %v7619_v14 = vpop.permute.xlu0 %7618  ;;  %v9408_v15 = vpop.permute.xlu1 %7638 }
  0xa7   : > { %934 = vst [vmem:[#allocation2 + $0x20] sm:$0xf0] %v929_v13  ;;  %v7621_v16 = vunpack.i.h.bf16 %v7619_v14  ;;  %v7620_v17 = vunpack.i.l.bf16 %v7619_v14  ;;  %v7640_v18 = vunpack.i.l.bf16 %v9408_v15 }
  0xa8   : > { %v1262_v19 = vld [vmem:[#allocation2 + $0x10] sm:$0xff]  ;;  %7909 = vrot.lane.b32.xlu1 %v7848_v52, %s12261_s25  ;;  %7914 = vrot.lane.b32.xlu0 %v9402_v11, %s12244_s29  ;;  %v9451_v52 = vld [vmem:[%s9332_s20] sm:$0x3f] }
  0xa9   : > { %v1261_v22 = vld [vmem:[#allocation2 + $0x8] sm:$0xff]  ;;  %1575 = vst.msk [vmem:[#allocation2 + $0x10] sm:$0xf] %vm886_vm0, %v9306_v33  ;;  %v943_v23 = vsel %vm942_vm6, %v7620_v17, %v7621_v16  ;;  %v914_v24 = vsel %vm912_vm4, %v7606_v57, %v7640_v18  ;;  %920 = vst.msk [vmem:[#allocation2 + $0x28] sm:$0xf] %vm886_vm0, %v7640_v18  ;;  %v9464_v1 = vunpack.c.l.bf16 %v9451_v52  ;;  %v7601_v18 = vunpack.i.h.bf16 %v9375_v61 }
  0xaa   : > { %1574 = vst [vmem:[#allocation2 + $0x8] sm:$0xf] %v9317_v36  ;;  %948 = vst [vmem:[#allocation2 + $0x30] sm:$0xf] %v943_v23  ;;  %v7624_v25 = vpop.permute.xlu0 %7623  ;;  %v9424_v26 = vpop.permute.xlu1 %7643  ;;  %v2233_v33 = vld [vmem:[%s9262_s28] sm:$0x3f] }
  0xab   : > { %919 = vst [vmem:[#allocation2 + $0x20] sm:$0xf] %v914_v24  ;;  %v7626_v27 = vunpack.i.h.bf16 %v7624_v25  ;;  %v7625_v28 = vunpack.i.l.bf16 %v7624_v25  ;;  %v7645_v29 = vunpack.i.l.bf16 %v9424_v26  ;;  %v9438_v36 = vunpack.c.l.bf16 %v2233_v33  ;;  %s798_s28 = sadd.s32 4, %s9231_s19 }
  0xac   : > { %7919 = vrot.lane.b32.xlu1 %v9414_v20, %s12242_s15  ;;  %7924 = vrot.lane.b32.xlu0 %v9402_v11, %s12240_s17  ;;  %v9443_v45 = vunpack.c.h.bf16 %v2233_v33  ;;  %p9558_p0 = scmp.lt.s32.totalorder %s798_s28, 17 }
  0xad   : > { %v958_v30 = vsel %vm957_vm7, %v7625_v28, %v7626_v27  ;;  %v959_v31 = vsel %vm957_vm7, %v7626_v27, %v7630_v8  ;;  %v944_v32 = vsel %vm942_vm6, %v7621_v16, %v7645_v29  ;;  %950 = vst.msk [vmem:[#allocation2 + $0x40] sm:$0xf] %vm886_vm0, %v7645_v29  ;;  %v1263_v42 = vld [vmem:[#allocation2 + $0x18] sm:$0xff]  ;;  %v2243_v56 = vcombine.low %v9438_v36, %v9438_v36 }
  0xae   : > { %963 = vst [vmem:[#allocation2 + $0x30] sm:$0xf0] %v958_v30  ;;  %964 = vst [vmem:[#allocation2 + $0x38] sm:$0xf0] %v959_v31  ;;  %v7634_v34 = vpop.permute.xlu0 %7633  ;;  %v9436_v35 = vpop.permute.xlu1 %7648  ;;  %v7094_v60 = vpack.c.bf16 %v1263_v42, %v9393_v9  ;;  %v2244_v0 = vcombine.low %v9443_v45, %v9443_v45  ;;  %v9479_v8 = vcombine.high %v9438_v36, %v9438_v36  ;;  %v7616_v29 = vunpack.i.h.bf16 %v9377_v62  ;;  %s12294_s28 = smov (!%p9558_p0, %s798_s28), 17 }
  0xaf   : > { %949 = vst [vmem:[#allocation2 + $0x38] sm:$0xf] %v944_v32  ;;  %v7636_v37 = vunpack.i.h.bf16 %v7634_v34  ;;  %v7635_v39 = vunpack.i.l.bf16 %v7634_v34  ;;  %v7650_v40 = vunpack.i.l.bf16 %v9436_v35  ;;  %v9475_v7 = vpack.i.bf16 %v9438_v36, %v2243_v56  ;;  %s7514_s26 = smul.u32 3, %s12294_s28 }
  0xb0   : > { %v1265_v44 = vld [vmem:[#allocation2 + $0x28] sm:$0xff]  ;;  %7929 = vrot.lane.b32.xlu1 %v9414_v20, %s12257_s22  ;;  %7934 = vrot.lane.b32.xlu0 %v9402_v11, %s12258_s18  ;;  %v9485_v14 = vpack.i.bf16 %v9464_v1, %v2244_v0  ;;  %v9500_v23 = vpack.i.bf16 %v9479_v8, %v9438_v36  ;;  %v7646_v42 = vunpack.i.h.bf16 %v9424_v26 }
  0xb1   : > { %v973_v47 = vsel %vm972_vm8, %v7635_v39, %v7636_v37  ;;  %v974_v49 = vsel %vm972_vm8, %v7636_v37, %v7650_v40  ;;  %980 = vst.msk [vmem:[#allocation2 + $0x58] sm:$0xf] %vm886_vm0, %v7650_v40  ;;  %v7123_v51 = vpack.c.bf16 %v1265_v44, %v1262_v19  ;;  %v7641_v19 = vunpack.i.h.bf16 %v9408_v15  ;;  %s9610_s28 = sadd.s32 %s7514_s26, %s9237_s13 }
  0xb2   : > { %v1264_v46 = vld [vmem:[#allocation2 + $0x20] sm:$0xff]  ;;  %978 = vst [vmem:[#allocation2 + $0x48] sm:$0xf] %v973_v47  ;;  %979 = vst [vmem:[#allocation2 + $0x50] sm:$0xf] %v974_v49  ;;  %v7654_v53 = vpop.permute.xlu0 %7653  ;;  %v9453_v54 = vpop.permute.xlu1 %7658  ;;  %s6607_s26 = sshll.u32 %s9610_s28, 1 }
  0xb3   : > { %v7092_v55 = vpack.c.bf16 %v1264_v46, %v1261_v22  ;;  %v7656_v57 = vunpack.i.h.bf16 %v7654_v53  ;;  %v7655_v58 = vunpack.i.l.bf16 %v7654_v53  ;;  %v7660_v59 = vunpack.i.l.bf16 %v9453_v54  ;;  %7124 = vmatpush3.bf16.msra.mxu1 %v7123_v51  ;;  %s811_s28 = sadd.s32 5, %s9231_s19 }
  0xb4   : > { %7939 = vrot.lane.b32.xlu1 %v9414_v20, %s12259_s16  ;;  %7125 = vmatprep.subr.bf16.mxu1 %v9099_v21  ;;  %v1268_v30 = vld [vmem:[#allocation2 + $0x40] sm:$0xff]  ;;  %p9777_p1 = scmp.lt.s32.totalorder %s811_s28, 17 }
  0xb5   : > { %7093 = vmatprep.subr.bf16.mxu0 %v7092_v55  ;;  %v988_v2 = vsel %vm987_vm9, %v7655_v58, %v7656_v57  ;;  %v989_v3 = vsel %vm987_vm9, %v7656_v57, %v7660_v59  ;;  %995 = vst.msk [vmem:[#allocation2 + $0x58] sm:$0xf0] %vm904_vm1, %v7660_v59  ;;  %7944 = vrot.lane.b32.xlu0 %v9402_v11, %s12260_s30  ;;  %v1266_v61 = vld [vmem:[#allocation2 + $0x30] sm:$0xff] }
  0xb6   : > { %7095 = vmatpush1.bf16.msra.mxu0 %v7094_v60  ;;  %993 = vst [vmem:[#allocation2 + $0x48] sm:$0xf0] %v988_v2  ;;  %994 = vst [vmem:[#allocation2 + $0x50] sm:$0xf0] %v989_v3  ;;  %v7664_v4 = vpop.permute.xlu0 %7663  ;;  %v9470_v6 = vpop.permute.xlu1 %7668  ;;  %v9489_v11 = vcombine.low %v9464_v1, %v9464_v1  ;;  %v1267_v32 = vld [vmem:[#allocation2 + $0x38] sm:$0xff]  ;;  %s12296_s28 = smov (!%p9777_p1, %s811_s28), 17 }
  0xb7   : > { %v7666_v9 = vunpack.i.h.bf16 %v7664_v4  ;;  %v7665_v12 = vunpack.i.l.bf16 %v7664_v4  ;;  %v7670_v13 = vunpack.i.l.bf16 %v9470_v6  ;;  %v7631_v4 = vunpack.i.h.bf16 %v9390_v5 }
  0xb8   : > { %7949 = vrot.lane.b32.xlu1 %v9414_v20, %s12261_s25  ;;  %v9507_v31 = vpack.i.bf16 %v9489_v11, %v9443_v45 }
  0xb9   : > { %v1003_v16 = vsel %vm1002_vm10, %v7665_v12, %v7666_v9  ;;  %v1004_v17 = vsel %vm1002_vm10, %v7666_v9, %v7670_v13  ;;  %1010 = vst.msk [vmem:[#allocation2 + $0x70] sm:$0xf] %vm886_vm0, %v7670_v13  ;;  %7954 = vrot.lane.b32.xlu0 %v9475_v7, %s12244_s29  ;;  %v7651_v9 = vunpack.i.h.bf16 %v9436_v35 }
  0xba   : > { %1008 = vst [vmem:[#allocation2 + $0x60] sm:$0xf] %v1003_v16  ;;  %1009 = vst [vmem:[#allocation2 + $0x68] sm:$0xf] %v1004_v17  ;;  %v7674_v20 = vpop.permute.xlu0 %7673  ;;  %v7679_v22 = vpop.permute.xlu1 %7678 }
  0xbb   : > { %v7676_v24 = vunpack.i.h.bf16 %v7674_v20  ;;  %v7675_v25 = vunpack.i.l.bf16 %v7674_v20  ;;  %v7681_v27 = vunpack.i.h.bf16 %v7679_v22  ;;  %v7680_v28 = vunpack.i.l.bf16 %v7679_v22 }
  0xbc   : > { %v1271_v15 = vld [vmem:[#allocation2 + $0x58] sm:$0xff]  ;;  %7959 = vrot.lane.b32.xlu1 %v9485_v14, %s12244_s29 }
  0xbd   : > { %v1269_v33 = vld [vmem:[#allocation2 + $0x48] sm:$0xff]  ;;  %v1270_v34 = vld [vmem:[#allocation2 + $0x50] sm:$0xff]  ;;  %1037 = vst.msk [vmem:[#allocation2 + $0x88] sm:$0xf] %vm886_vm0, %v7676_v24  ;;  %v1030_v37 = vsel %vm896_vm3, %v7601_v18, %v7675_v25  ;;  %v1031_v39 = vsel %vm896_vm3, %v7675_v25, %v7676_v24  ;;  %v1044_v62 = vsel %vm912_vm4, %v7641_v19, %v7680_v28  ;;  %v1045_v40 = vsel %vm912_vm4, %v7680_v28, %v7681_v27 }
  0xbe   : > { %1051 = vst.msk [vmem:[#allocation2 + $0x88] sm:$0xf0] %vm904_vm1, %v7681_v27  ;;  %1035 = vst [vmem:[#allocation2 + $0x78] sm:$0xf] %v1030_v37  ;;  %v7684_v44 = vpop.permute.xlu0 %7683  ;;  %v7689_v46 = vpop.permute.xlu1 %7688  ;;  %v7126_v47 = vpack.c.bf16 %v1271_v15, %v1268_v30  ;;  %v7096_v49 = vpack.c.bf16 %v1270_v34, %v1267_v32  ;;  %v7098_v51 = vpack.c.bf16 %v1269_v33, %v1266_v61  ;;  %7964 = vrot.lane.b32.xlu0 %v9500_v23, %s12242_s15 }
  0xbf   : > { %1036 = vst [vmem:[#allocation2 + $0x80] sm:$0xf] %v1031_v39  ;;  %1049 = vst [vmem:[#allocation2 + $0x78] sm:$0xf0] %v1044_v62  ;;  %v7686_v53 = vunpack.i.h.bf16 %v7684_v44  ;;  %v7685_v55 = vunpack.i.l.bf16 %v7684_v44  ;;  %v7691_v56 = vunpack.i.h.bf16 %v7689_v46  ;;  %v7690_v57 = vunpack.i.l.bf16 %v7689_v46 }
  0xc0   : > { %1050 = vst [vmem:[#allocation2 + $0x80] sm:$0xf0] %v1045_v40  ;;  %v1274_v58 = vld [vmem:[#allocation2 + $0x70] sm:$0xff]  ;;  %7127 = vmatpush3.bf16.msra.mxu1 %v7126_v47  ;;  %7969 = vrot.lane.b32.xlu1 %v9507_v31, %s12242_s15  ;;  %s9642_s15 = scalar_lea.vmem %s12216_s4, %s6607_s26  ;;  %s7515_s26 = smul.u32 3, %s12296_s28 }
  0xc1   : > { %v9520_v26 = vld [vmem:[#allocation2 + $0x60] sm:$0xff]  ;;  %v9522_v59 = vld [vmem:[#allocation2 + $0x68] sm:$0xff]  ;;  %1701 = vst.msk [vmem:[#allocation2 + $0x70] sm:$0xf0] %vm904_vm1, %v9356_v50  ;;  %v1058_v60 = vsel %vm927_vm5, %v7616_v29, %v7685_v55  ;;  %v1059_v0 = vsel %vm927_vm5, %v7685_v55, %v7686_v53  ;;  %1079 = vst.msk [vmem:[#allocation2 + $0xa0] sm:$0xf0] %vm904_vm1, %v7691_v56  ;;  %v1072_v2 = vsel %vm942_vm6, %v7646_v42, %v7690_v57  ;;  %7097 = vmatprep.subr.bf16.mxu0 %v7096_v49 }
  0xc2   : > { %1065 = vst.msk [vmem:[#allocation2 + $0xa0] sm:$0xf] %vm886_vm0, %v7686_v53  ;;  %v1073_v3 = vsel %vm942_vm6, %v7690_v57, %v7691_v56  ;;  %1699 = vst [vmem:[#allocation2 + $0x60] sm:$0xf0] %v9353_v48  ;;  %7099 = vmatpush1.bf16.msra.mxu0 %v7098_v51  ;;  %v7694_v50 = vpop.permute.xlu0 %7693  ;;  %v7699_v12 = vpop.permute.xlu1 %7698  ;;  %7128 = vmatprep.subr.bf16.mxu1 %v9099_v21  ;;  %v7661_v48 = vunpack.i.h.bf16 %v9453_v54  ;;  %v7671_v54 = vunpack.i.h.bf16 %v9470_v6  ;;  %s9833_s28 = sadd.s32 %s7515_s26, %s9237_s13 }
  0xc3   : > { %1700 = vst [vmem:[#allocation2 + $0x68] sm:$0xf0] %v9337_v41  ;;  %1063 = vst [vmem:[#allocation2 + $0x90] sm:$0xf] %v1058_v60  ;;  %v7696_v13 = vunpack.i.h.bf16 %v7694_v50  ;;  %v7695_v16 = vunpack.i.l.bf16 %v7694_v50  ;;  %v7701_v17 = vunpack.i.h.bf16 %v7699_v12  ;;  %v7700_v5 = vunpack.i.l.bf16 %v7699_v12  ;;  %7974 = vrot.lane.b32.xlu0 %v9475_v7, %s12240_s17 }
  0xc4   : > { %1064 = vst [vmem:[#allocation2 + $0x98] sm:$0xf] %v1059_v0  ;;  %1077 = vst [vmem:[#allocation2 + $0x90] sm:$0xf0] %v1072_v2  ;;  %7979 = vrot.lane.b32.xlu1 %v9485_v14, %s12240_s17  ;;  %v2359_v50 = vunpack.c.h.bf16 %v9451_v52  ;;  %s12264_s17 = smov 110  }
  0xc5   : > { %1078 = vst [vmem:[#allocation2 + $0x98] sm:$0xf0] %v1073_v3  ;;  %v1277_v41 = vld [vmem:[#allocation2 + $0x88] sm:$0xff]  ;;  %1093 = vst.msk [vmem:[#allocation2 + $0xb8] sm:$0xf] %vm886_vm0, %v7696_v13  ;;  %v1086_v19 = vsel %vm957_vm7, %v7631_v4, %v7695_v16  ;;  %v1087_v20 = vsel %vm957_vm7, %v7695_v16, %v7696_v13  ;;  %v1100_v22 = vsel %vm972_vm8, %v7651_v9, %v7700_v5 }
  0xc6   : > { %v1275_v35 = vld [vmem:[#allocation2 + $0x78] sm:$0xff]  ;;  %1107 = vst.msk [vmem:[#allocation2 + $0xb8] sm:$0xf0] %vm904_vm1, %v7701_v17  ;;  %v1101_v24 = vsel %vm972_vm8, %v7700_v5, %v7701_v17  ;;  %1091 = vst [vmem:[#allocation2 + $0xa8] sm:$0xf] %v1086_v19  ;;  %v7704_v25 = vpop.permute.xlu0 %7703  ;;  %v7709_v27 = vpop.permute.xlu1 %7708  ;;  %v7129_v28 = vpack.c.bf16 %v1277_v41, %v1274_v58  ;;  %v2369_v41 = vcombine.high %v9464_v1, %v9464_v1 }
  0xc7   : > { %v1276_v18 = vld [vmem:[#allocation2 + $0x80] sm:$0xff]  ;;  %1092 = vst [vmem:[#allocation2 + $0xb0] sm:$0xf] %v1087_v20  ;;  %1105 = vst [vmem:[#allocation2 + $0xa8] sm:$0xf0] %v1100_v22  ;;  %v7102_v61 = vpack.c.bf16 %v1275_v35, %v9520_v26  ;;  %v7706_v30 = vunpack.i.h.bf16 %v7704_v25  ;;  %v7705_v15 = vunpack.i.l.bf16 %v7704_v25  ;;  %v7711_v32 = vunpack.i.h.bf16 %v7709_v27  ;;  %7984 = vrot.lane.b32.xlu0 %v9500_v23, %s12257_s22 }
  0xc8   : > { %1106 = vst [vmem:[#allocation2 + $0xb0] sm:$0xf0] %v1101_v24  ;;  %v7100_v29 = vpack.c.bf16 %v1276_v18, %v9522_v59  ;;  %v7710_v33 = vunpack.i.l.bf16 %v7709_v27  ;;  %7130 = vmatpush3.bf16.msra.mxu1 %v7129_v28  ;;  %7989 = vrot.lane.b32.xlu1 %v9507_v31, %s12257_s22  ;;  %v9607_v20 = vcombine.low %v2359_v50, %v2359_v50 }
  0xc9   : > { %1121 = vst.msk [vmem:[#allocation2 + $0xd0] sm:$0xf] %vm886_vm0, %v7706_v30  ;;  %v1114_v6 = vsel %vm987_vm9, %v7661_v48, %v7705_v15  ;;  %v1115_v34 = vsel %vm987_vm9, %v7705_v15, %v7706_v30  ;;  %7131 = vmatprep.subr.bf16.mxu1 %v9099_v21  ;;  %v1280_v47 = vld [vmem:[#allocation2 + $0xa0] sm:$0xff] }
  0xca   : > { %1135 = vst.msk [vmem:[#allocation2 + $0xd0] sm:$0xf0] %vm904_vm1, %v7711_v32  ;;  %v1128_v37 = vsel %vm1002_vm10, %v7671_v54, %v7710_v33  ;;  %v1129_v39 = vsel %vm1002_vm10, %v7710_v33, %v7711_v32  ;;  %7101 = vmatprep.subr.bf16.mxu0 %v7100_v29  ;;  %1119 = vst [vmem:[#allocation2 + $0xc0] sm:$0xf] %v1114_v6  ;;  %v7714_v62 = vpop.permute.xlu0 %7713  ;;  %v9568_v40 = vpop.permute.xlu1 %7718  ;;  %v9624_v32 = vpack.i.bf16 %v2359_v50, %v2369_v41 }
  0xcb   : > { %1120 = vst [vmem:[#allocation2 + $0xc8] sm:$0xf] %v1115_v34  ;;  %1133 = vst [vmem:[#allocation2 + $0xc0] sm:$0xf0] %v1128_v37  ;;  %7103 = vmatpush1.bf16.msra.mxu0 %v7102_v61  ;;  %v7716_v42 = vunpack.i.h.bf16 %v7714_v62  ;;  %v7715_v44 = vunpack.i.l.bf16 %v7714_v62  ;;  %v7720_v46 = vunpack.i.l.bf16 %v9568_v40  ;;  %7994 = vrot.lane.b32.xlu0 %v9475_v7, %s12258_s18  ;;  %v1278_v49 = vld [vmem:[#allocation2 + $0x90] sm:$0xff] }
  0xcc   : > { %1134 = vst [vmem:[#allocation2 + $0xc8] sm:$0xf0] %v1129_v39  ;;  %7999 = vrot.lane.b32.xlu1 %v9485_v14, %s12258_s18  ;;  %v1279_v53 = vld [vmem:[#allocation2 + $0x98] sm:$0xff] }
  0xcd   : > { %v1283_v51 = vld [vmem:[#allocation2 + $0xb8] sm:$0xff]  ;;  %v1154_v57 = vsel %vm896_vm3, %v7715_v44, %v7716_v42  ;;  %v1155_v58 = vsel %vm896_vm3, %v7716_v42, %v7720_v46  ;;  %1161 = vst.msk [vmem:[#allocation2 + $0xe8] sm:$0xf0] %vm904_vm1, %v7720_v46  ;;  %v2482_v42 = vld [vmem:[%s9642_s15] sm:$0x3f] }
  0xce   : > { %v1281_v55 = vld [vmem:[#allocation2 + $0xa8] sm:$0xff]  ;;  %v7132_v26 = vpack.c.bf16 %v1283_v51, %v1280_v47  ;;  %1159 = vst [vmem:[#allocation2 + $0xd8] sm:$0xf0] %v1154_v57  ;;  %1160 = vst [vmem:[#allocation2 + $0xe0] sm:$0xf0] %v1155_v58  ;;  %v7724_v59 = vpop.permute.xlu0 %7723  ;;  %v9585_v60 = vpop.permute.xlu1 %7728 }
  0xcf   : > { %v1282_v56 = vld [vmem:[#allocation2 + $0xb0] sm:$0xff]  ;;  %v7106_v2 = vpack.c.bf16 %v1281_v55, %v1278_v49  ;;  %v7726_v3 = vunpack.i.h.bf16 %v7724_v59  ;;  %v7725_v4 = vunpack.i.l.bf16 %v7724_v59  ;;  %v7730_v9 = vunpack.i.l.bf16 %v9585_v60  ;;  %8004 = vrot.lane.b32.xlu0 %v9500_v23, %s12259_s16  ;;  %v9654_v44 = vld [vmem:[%s9332_s20] sm:$0x3f]  ;;  %s6609_s20 = sshll.u32 %s9833_s28, 1 }
  0xd0   : > { %v7104_v0 = vpack.c.bf16 %v1282_v56, %v1279_v53  ;;  %7133 = vmatpush3.bf16.msra.mxu1 %v7132_v26  ;;  %8009 = vrot.lane.b32.xlu1 %v9507_v31, %s12259_s16  ;;  %v9658_v49 = vunpack.c.l.bf16 %v2482_v42  ;;  %v9665_v56 = vunpack.c.h.bf16 %v2482_v42  ;;  %v9668_v57 = vunpack.c.l.bf16 %v9654_v44 }
  0xd1   : > { %v1168_v12 = vsel %vm912_vm4, %v7725_v4, %v7726_v3  ;;  %v1169_v13 = vsel %vm912_vm4, %v7726_v3, %v7730_v9  ;;  %1175 = vst.msk [vmem:[#allocation2 + $0x100] sm:$0xf] %vm886_vm0, %v7730_v9  ;;  %7134 = vmatprep.subr.bf16.mxu1 %v9099_v21  ;;  %v1286_v35 = vld [vmem:[#allocation2 + $0xd0] sm:$0xff] }
  0xd2   : > { %7105 = vmatprep.subr.bf16.mxu0 %v7104_v0  ;;  %1173 = vst [vmem:[#allocation2 + $0xf0] sm:$0xf] %v1168_v12  ;;  %1174 = vst [vmem:[#allocation2 + $0xf8] sm:$0xf] %v1169_v13  ;;  %v7734_v16 = vpop.permute.xlu0 %7733  ;;  %v9598_v17 = vpop.permute.xlu1 %7738  ;;  %v1284_v18 = vld [vmem:[#allocation2 + $0xc0] sm:$0xff] }
  0xd3   : > { %7107 = vmatpush1.bf16.msra.mxu0 %v7106_v2  ;;  %v7736_v5 = vunpack.i.h.bf16 %v7734_v16  ;;  %v7735_v48 = vunpack.i.l.bf16 %v7734_v16  ;;  %v7740_v52 = vunpack.i.l.bf16 %v9598_v17  ;;  %8014 = vrot.lane.b32.xlu0 %v9475_v7, %s12260_s30  ;;  %v1285_v22 = vld [vmem:[#allocation2 + $0xc8] sm:$0xff]  ;;  %v2492_v2 = vcombine.low %v9658_v49, %v9658_v49 }
  0xd4   : > { %v1289_v19 = vld [vmem:[#allocation2 + $0xe8] sm:$0xff]  ;;  %8019 = vrot.lane.b32.xlu1 %v9485_v14, %s12260_s30  ;;  %v2493_v16 = vcombine.low %v9665_v56, %v9665_v56 }
  0xd5   : > { %v1287_v24 = vld [vmem:[#allocation2 + $0xd8] sm:$0xff]  ;;  %v1288_v54 = vld [vmem:[#allocation2 + $0xe0] sm:$0xff]  ;;  %1824 = vst.msk [vmem:[#allocation2 + $0xe8] sm:$0xf] %vm886_vm0, %v9379_v63  ;;  %v1182_v7 = vsel %vm927_vm5, %v7735_v48, %v7736_v5  ;;  %v1183_v25 = vsel %vm927_vm5, %v7736_v5, %v7740_v52  ;;  %v7135_v27 = vpack.c.bf16 %v1289_v19, %v1286_v35  ;;  %v2910_v5 = vcombine.low %v9668_v57, %v9668_v57 }
  0xd6   : > { %1189 = vst.msk [vmem:[#allocation2 + $0x100] sm:$0xf0] %vm904_vm1, %v7740_v52  ;;  %1822 = vst [vmem:[#allocation2 + $0xd8] sm:$0xf] %v9341_v43  ;;  %v7744_v14 = vpop.permute.xlu0 %7743  ;;  %v9619_v28 = vpop.permute.xlu1 %7748  ;;  %v7108_v29 = vpack.c.bf16 %v1288_v54, %v1285_v22  ;;  %v7110_v61 = vpack.c.bf16 %v1287_v24, %v1284_v18  ;;  %v9631_v43 = vpack.i.bf16 %v9607_v20, %v9464_v1 }
  0xd7   : > { %1823 = vst [vmem:[#allocation2 + $0xe0] sm:$0xf] %v9398_v10  ;;  %1187 = vst [vmem:[#allocation2 + $0xf0] sm:$0xf0] %v1182_v7  ;;  %v7746_v63 = vunpack.i.h.bf16 %v7744_v14  ;;  %v7745_v30 = vunpack.i.l.bf16 %v7744_v14  ;;  %v7750_v15 = vunpack.i.l.bf16 %v9619_v28  ;;  %7136 = vmatpush3.bf16.msra.mxu1 %v7135_v27  ;;  %8024 = vrot.lane.b32.xlu0 %v9500_v23, %s12261_s25 }
  0xd8   : > { %1188 = vst [vmem:[#allocation2 + $0xf8] sm:$0xf0] %v1183_v25  ;;  %8029 = vrot.lane.b32.xlu1 %v9507_v31, %s12261_s25  ;;  %7109 = vmatprep.subr.bf16.mxu0 %v7108_v29  ;;  %v9692_v25 = vpack.i.bf16 %v9658_v49, %v2492_v2 }
  0xd9   : > { %v1196_v10 = vsel %vm942_vm6, %v7745_v30, %v7746_v63  ;;  %v1197_v33 = vsel %vm942_vm6, %v7746_v63, %v7750_v15  ;;  %1203 = vst.msk [vmem:[#allocation2 + $0x118] sm:$0xf] %vm886_vm0, %v7750_v15  ;;  %7111 = vmatpush1.bf16.msra.mxu0 %v7110_v61  ;;  %7137 = vmatprep.subr.bf16.mxu1 %v9099_v21 }
  0xda   : > { %1201 = vst [vmem:[#allocation2 + $0x108] sm:$0xf] %v1196_v10  ;;  %1202 = vst [vmem:[#allocation2 + $0x110] sm:$0xf] %v1197_v33  ;;  %v7754_v23 = vpop.permute.xlu0 %7753  ;;  %v9637_v6 = vpop.permute.xlu1 %7758  ;;  %v9699_v61 = vcombine.high %v9658_v49, %v9658_v49  ;;  %v9703_v63 = vpack.i.bf16 %v2910_v5, %v2493_v16  ;;  %v7721_v10 = vunpack.i.h.bf16 %v9568_v40  ;;  %v9743_v5 = vld [vmem:[%s12222_s10] sm:$0xff] }
  0xdb   : > { %v7756_v31 = vunpack.i.h.bf16 %v7754_v23  ;;  %v7755_v34 = vunpack.i.l.bf16 %v7754_v23  ;;  %v7760_v37 = vunpack.i.l.bf16 %v9637_v6  ;;  %8034 = vrot.lane.b32.xlu0 %v9624_v32, %s12244_s29 }
  0xdc   : > { %8039 = vrot.lane.b32.xlu1 %v9631_v43, %s12263_s0 }
  0xdd   : > { %v1210_v39 = vsel %vm957_vm7, %v7755_v34, %v7756_v31  ;;  %v1211_v62 = vsel %vm957_vm7, %v7756_v31, %v7760_v37  ;;  %1217 = vst.msk [vmem:[#allocation2 + $0x118] sm:$0xf0] %vm904_vm1, %v7760_v37  ;;  %v1292_v12 = vld [vmem:[#allocation2 + $0x100] sm:$0xff]  ;;  %v9720_v31 = vpack.i.bf16 %v9668_v57, %v9665_v56 }
  0xde   : > { %1215 = vst [vmem:[#allocation2 + $0x108] sm:$0xf0] %v1210_v39  ;;  %1216 = vst [vmem:[#allocation2 + $0x110] sm:$0xf0] %v1211_v62  ;;  %v7764_v46 = vpop.permute.xlu0 %7763  ;;  %v9656_v47 = vpop.permute.xlu1 %7768  ;;  %v1290_v50 = vld [vmem:[#allocation2 + $0xf0] sm:$0xff]  ;;  %v7731_v62 = vunpack.i.h.bf16 %v9585_v60 }
  0xdf   : > { %v7766_v51 = vunpack.i.h.bf16 %v7764_v46  ;;  %v7765_v53 = vunpack.i.l.bf16 %v7764_v46  ;;  %v7770_v55 = vunpack.i.l.bf16 %v9656_v47  ;;  %8044 = vrot.lane.b32.xlu0 %v9624_v32, %s12264_s17  ;;  %v1291_v48 = vld [vmem:[#allocation2 + $0xf8] sm:$0xff] }
  0xe0   : > { %8049 = vrot.lane.b32.xlu1 %v9631_v43, %s12257_s22 }
  0xe1   : > { %v1224_v58 = vsel %vm972_vm8, %v7765_v53, %v7766_v51  ;;  %v1225_v26 = vsel %vm972_vm8, %v7766_v51, %v7770_v55  ;;  %1231 = vst.msk [vmem:[#allocation2 + $0x130] sm:$0xf] %vm886_vm0, %v7770_v55 }
  0xe2   : > { %1229 = vst [vmem:[#allocation2 + $0x120] sm:$0xf] %v1224_v58  ;;  %1230 = vst [vmem:[#allocation2 + $0x128] sm:$0xf] %v1225_v26  ;;  %v7774_v59 = vpop.permute.xlu0 %7773  ;;  %v9673_v0 = vpop.permute.xlu1 %7778 }
  0xe3   : > { %v7776_v3 = vunpack.i.h.bf16 %v7774_v59  ;;  %v7775_v4 = vunpack.i.l.bf16 %v7774_v59  ;;  %v7780_v9 = vunpack.i.l.bf16 %v9673_v0  ;;  %8054 = vrot.lane.b32.xlu0 %v9624_v32, %s12258_s18 }
  0xe4   : > { %v1295_v13 = vld [vmem:[#allocation2 + $0x118] sm:$0xff]  ;;  %8059 = vrot.lane.b32.xlu1 %v9631_v43, %s12259_s16 }
  0xe5   : > { %v1293_v52 = vld [vmem:[#allocation2 + $0x108] sm:$0xff]  ;;  %v1294_v41 = vld [vmem:[#allocation2 + $0x110] sm:$0xff]  ;;  %v1238_v35 = vsel %vm987_vm9, %v7775_v4, %v7776_v3  ;;  %v1239_v18 = vsel %vm987_vm9, %v7776_v3, %v7780_v9  ;;  %1245 = vst.msk [vmem:[#allocation2 + $0x130] sm:$0xf0] %vm904_vm1, %v7780_v9  ;;  %v7138_v19 = vpack.c.bf16 %v1295_v13, %v1292_v12  ;;  %v7751_v12 = vunpack.i.h.bf16 %v9619_v28 }
  0xe6   : > { %1243 = vst [vmem:[#allocation2 + $0x120] sm:$0xf0] %v1238_v35  ;;  %1244 = vst [vmem:[#allocation2 + $0x128] sm:$0xf0] %v1239_v18  ;;  %v7784_v22 = vpop.permute.xlu0 %7783  ;;  %v9689_v24 = vpop.permute.xlu1 %7788  ;;  %v7112_v54 = vpack.c.bf16 %v1294_v41, %v1291_v48  ;;  %v7114_v7 = vpack.c.bf16 %v1293_v52, %v1290_v50 }
  0xe7   : > { %v7786_v27 = vunpack.i.h.bf16 %v7784_v22  ;;  %v7785_v14 = vunpack.i.l.bf16 %v7784_v22  ;;  %v7790_v29 = vunpack.i.l.bf16 %v9689_v24  ;;  %7139 = vmatpush3.bf16.msra.mxu1 %v7138_v19  ;;  %8064 = vrot.lane.b32.xlu0 %v9624_v32, %s12260_s30 }
  0xe8   : > { %8069 = vrot.lane.b32.xlu1 %v9631_v43, %s12261_s25  ;;  %7113 = vmatprep.subr.bf16.mxu0 %v7112_v54  ;;  %v9714_v43 = vpack.i.bf16 %v9699_v61, %v9658_v49 }
  0xe9   : > { %v1252_v30 = vsel %vm1002_vm10, %v7785_v14, %v7786_v27  ;;  %v1253_v15 = vsel %vm1002_vm10, %v7786_v27, %v7790_v29  ;;  %1259 = vst.msk [vmem:[#allocation2 + $0x148] sm:$0xf] %vm886_vm0, %v7790_v29  ;;  %7115 = vmatpush1.bf16.msra.mxu0 %v7114_v7  ;;  %7140 = vmatprep.subr.bf16.mxu1 %v9099_v21  ;;  %v7791_v7 = vunpack.i.h.bf16 %v9689_v24 }
  0xea   : > { %1257 = vst [vmem:[#allocation2 + $0x138] sm:$0xf] %v1252_v30  ;;  %1258 = vst [vmem:[#allocation2 + $0x140] sm:$0xf] %v1253_v15  ;;  %v7795_v32 = vpop.permute.xlu1 %7794  ;;  %v7741_v30 = vunpack.i.h.bf16 %v9598_v17 }
  0xeb   : > { %v7797_v33 = vunpack.i.h.bf16 %v7795_v32  ;;  %v7796_v23 = vunpack.i.l.bf16 %v7795_v32  ;;  %8074 = vrot.lane.b32.xlu0 %v9692_v25, %s12244_s29 }
  0xec   : > { %8079 = vrot.lane.b32.xlu1 %v9703_v63, %s12244_s29  ;;  %v1298_v37 = vld [vmem:[#allocation2 + $0x130] sm:$0xff]  ;;  %s9881_s29 = scalar_lea.vmem %s12217_s5, %s6609_s20 }
  0xed   : > { %1591 = vst.msk [vmem:[#allocation2 + $0x10] sm:$0xf0] %vm904_vm1, %v7797_v33  ;;  %v1584_v40 = vsel %vm896_vm3, %v7721_v10, %v7796_v23  ;;  %v1585_v34 = vsel %vm896_vm3, %v7796_v23, %v7797_v33  ;;  %v1296_v51 = vld [vmem:[#allocation2 + $0x120] sm:$0xff]  ;;  %v1297_v58 = vld [vmem:[#allocation2 + $0x128] sm:$0xff] }
  0xee   : > { %1589 = vst [vmem:[#allocation2] sm:$0xf0] %v1584_v40  ;;  %1590 = vst [vmem:[#allocation2 + $0x8] sm:$0xf0] %v1585_v34  ;;  %v7800_v39 = vpop.permute.xlu1 %7799 }
  0xef   : > { %v7802_v42 = vunpack.i.h.bf16 %v7800_v39  ;;  %v7801_v46 = vunpack.i.l.bf16 %v7800_v39  ;;  %8084 = vrot.lane.b32.xlu0 %v9714_v43, %s12263_s0 }
  0xf0   : > { %8089 = vrot.lane.b32.xlu1 %v9720_v31, %s12263_s0  ;;  %v1301_v53 = vld [vmem:[#allocation2 + $0x148] sm:$0xf] }
  0xf1   : > { %v1598_v26 = vsel %vm912_vm4, %v7731_v62, %v7801_v46  ;;  %v1599_v60 = vsel %vm912_vm4, %v7801_v46, %v7802_v42  ;;  %1605 = vst.msk [vmem:[#allocation2 + $0x28] sm:$0xf] %vm886_vm0, %v7802_v42  ;;  %v7141_v59 = vpack.c.bf16 %v1301_v53, %v1298_v37  ;;  %v1300_v2 = vld [vmem:[#allocation2 + $0x140] sm:$0xf]  ;;  %v1299_v3 = vld [vmem:[#allocation2 + $0x138] sm:$0xf]  ;;  %v7761_v37 = vunpack.i.h.bf16 %v9637_v6 }
  0xf2   : > { %1603 = vst [vmem:[#allocation2 + $0x18] sm:$0xf] %v1598_v26  ;;  %1604 = vst [vmem:[#allocation2 + $0x20] sm:$0xf] %v1599_v60  ;;  %v7810_v4 = vpop.permute.xlu1 %7809  ;;  %v7116_v9 = vpack.c.bf16 %v1300_v2, %v1297_v58  ;;  %v7119_v50 = vpack.c.bf16 %v1299_v3, %v1296_v51  ;;  %v9820_v42 = vunpack.c.h.bf16 %v9654_v44  ;;  %v7781_v26 = vunpack.i.h.bf16 %v9673_v0 }
  0xf3   : > { %v7812_v13 = vunpack.i.h.bf16 %v7810_v4  ;;  %v7811_v16 = vunpack.i.l.bf16 %v7810_v4  ;;  %7143 = vmatpush3.bf16.msk.msra.mxu1 %vm9730_vm13, %v7141_v59  ;;  %8094 = vrot.lane.b32.xlu0 %v9692_v25, %s12264_s17  ;;  %v9842_v3 = vcombine.high %v9668_v57, %v9668_v57 }
  0xf4   : > { %v9747_v48 = vld [vmem:[#allocation2 + $0x10] sm:$0xff]  ;;  %8099 = vrot.lane.b32.xlu1 %v9703_v63, %s12264_s17  ;;  %7118 = vmatprep.subr.msk.bf16.mxu0 %vm9730_vm13, %v7116_v9  ;;  %v2911_v44 = vcombine.low %v9820_v42, %v9820_v42 }
  0xf5   : > { %v9754_v28 = vld [vmem:[#allocation2] sm:$0xff]  ;;  %v9756_v52 = vld [vmem:[#allocation2 + $0x8] sm:$0xff]  ;;  %2242 = vst.msk [vmem:[#allocation2 + $0x10] sm:$0xf] %vm886_vm0, %v9443_v45  ;;  %v1626_v41 = vsel %vm942_vm6, %v7751_v12, %v7811_v16  ;;  %v1627_v35 = vsel %vm942_vm6, %v7811_v16, %v7812_v13  ;;  %1633 = vst.msk [vmem:[#allocation2 + $0x40] sm:$0xf] %vm886_vm0, %v7812_v13  ;;  %7121 = vmatpush1.bf16.msk.msra.mxu0 %vm9730_vm13, %v7119_v50  ;;  %7174 = vmatprep.subr.bf16.mxu1 %v9099_v21  ;;  %v7771_v45 = vunpack.i.h.bf16 %v9656_v47 }
  0xf6   : > { %2240 = vst [vmem:[#allocation2] sm:$0xf] %v9438_v36  ;;  %2241 = vst [vmem:[#allocation2 + $0x8] sm:$0xf] %v9479_v8  ;;  %v7820_v18 = vpop.permute.xlu1 %7819  ;;  %6873 = vmatmul.mubr.msk.f32.vlgmr.msra.gmra.mrb[0].mxu1 %vm957_vm7, %v9743_v5 }
  0xf7   : > { %1631 = vst [vmem:[#allocation2 + $0x30] sm:$0xf] %v1626_v41  ;;  %1632 = vst [vmem:[#allocation2 + $0x38] sm:$0xf] %v1627_v35  ;;  %v7822_v19 = vunpack.i.h.bf16 %v7820_v18  ;;  %v7821_v22 = vunpack.i.l.bf16 %v7820_v18  ;;  %v9771_v54 = vpop.permute.xlu0 %1304  ;;  %8104 = vrot.lane.b32.xlu0 %v9714_v43, %s12257_s22  ;;  %6903 = vmatprep.mubr.msk.f32.mxu1 %vm9102_vm2, %v9103_v38  ;;  %v9868_v35 = vpack.i.bf16 %v2911_v44, %v9668_v57 }
  0xf8   : > { %8109 = vrot.lane.b32.xlu1 %v9720_v31, %s12257_s22  ;;  %6620 = vmatmul.mubr.msk.f32.vlgmr.msra.gmra.mrb[0].mxu0 %vm957_vm7, %v9743_v5 }
  0xf9   : > { %v1654_v36 = vsel %vm972_vm8, %v7771_v45, %v7821_v22  ;;  %v1655_v8 = vsel %vm972_vm8, %v7821_v22, %v7822_v19  ;;  %1661 = vst.msk [vmem:[#allocation2 + $0x58] sm:$0xf] %vm886_vm0, %v7822_v19  ;;  %2054 = vmatprep.mubr.f32.mxu0 %v9103_v38 }
  0xfa   : > { %1659 = vst [vmem:[#allocation2 + $0x48] sm:$0xf] %v1654_v36  ;;  %1660 = vst [vmem:[#allocation2 + $0x50] sm:$0xf] %v1655_v8  ;;  %v7830_v47 = vpop.permute.xlu1 %7829  ;;  %v3024_v8 = vld [vmem:[%s9642_s15] sm:$0x3f] }
  0xfb   : > { %v7832_v27 = vunpack.i.h.bf16 %v7830_v47  ;;  %v7831_v14 = vunpack.i.l.bf16 %v7830_v47  ;;  %v7805_v29 = vpop.permute.xlu0 %7804  ;;  %8114 = vrot.lane.b32.xlu0 %v9692_v25, %s12258_s18  ;;  %v9894_v47 = vld [vmem:[%s9881_s29] sm:$0x3f] }
  0xfc   : > { %v7807_v15 = vunpack.i.h.bf16 %v7805_v29  ;;  %v7806_v32 = vunpack.i.l.bf16 %v7805_v29  ;;  %8119 = vrot.lane.b32.xlu1 %v9703_v63, %s12258_s18 }
  0xfd   : > { %v1682_v24 = vsel %vm1002_vm10, %v7791_v7, %v7831_v14  ;;  %v1683_v10 = vsel %vm1002_vm10, %v7831_v14, %v7832_v27  ;;  %1689 = vst.msk [vmem:[#allocation2 + $0x70] sm:$0xf] %vm886_vm0, %v7832_v27 }
  0xfe   : > { %1687 = vst [vmem:[#allocation2 + $0x60] sm:$0xf] %v1682_v24  ;;  %1688 = vst [vmem:[#allocation2 + $0x68] sm:$0xf] %v1683_v10  ;;  %v1612_v33 = vsel %vm927_vm5, %v7741_v30, %v7806_v32  ;;  %v1613_v23 = vsel %vm927_vm5, %v7806_v32, %v7807_v15  ;;  %v9809_v17 = vpop.permute.xlu1 %7839 }
  0xff   : > { %1619 = vst.msk [vmem:[#allocation2 + $0x28] sm:$0xf0] %vm904_vm1, %v7807_v15  ;;  %1617 = vst [vmem:[#allocation2 + $0x18] sm:$0xf0] %v1612_v33  ;;  %v7841_v40 = vunpack.i.l.bf16 %v9809_v17  ;;  %v7815_v34 = vpop.permute.xlu0 %7814  ;;  %8124 = vrot.lane.b32.xlu0 %v9714_v43, %s12259_s16 }
 0x100   : > { %1618 = vst [vmem:[#allocation2 + $0x20] sm:$0xf0] %v1613_v23  ;;  %v7817_v39 = vunpack.i.h.bf16 %v7815_v34  ;;  %v7816_v62 = vunpack.i.l.bf16 %v7815_v34  ;;  %8129 = vrot.lane.b32.xlu1 %v9720_v31, %s12259_s16  ;;  %v9903_v23 = vunpack.c.l.bf16 %v3024_v8 }
 0x101   : > { %1716 = vst.msk [vmem:[#allocation2 + $0x88] sm:$0xf] %vm886_vm0, %v7841_v40 }
 0x102   : > { %v1640_v46 = vsel %vm957_vm7, %v7761_v37, %v7816_v62  ;;  %v1641_v51 = vsel %vm957_vm7, %v7816_v62, %v7817_v39  ;;  %1647 = vst.msk [vmem:[#allocation2 + $0x40] sm:$0xf0] %vm904_vm1, %v7817_v39  ;;  %v9825_v53 = vpop.permute.xlu1 %7849 }
 0x103   : > { %1645 = vst [vmem:[#allocation2 + $0x30] sm:$0xf0] %v1640_v46  ;;  %1646 = vst [vmem:[#allocation2 + $0x38] sm:$0xf0] %v1641_v51  ;;  %v7851_v6 = vunpack.i.l.bf16 %v9825_v53  ;;  %v7825_v58 = vpop.permute.xlu0 %7824  ;;  %8134 = vrot.lane.b32.xlu0 %v9692_v25, %s12260_s30 }
 0x104   : > { %v9836_v60 = vld [vmem:[#allocation2 + $0x70] sm:$0xff]  ;;  %v7827_v59 = vunpack.i.h.bf16 %v7825_v58  ;;  %v7826_v2 = vunpack.i.l.bf16 %v7825_v58  ;;  %8139 = vrot.lane.b32.xlu1 %v9703_v63, %s12260_s30 }
 0x105   : > { %v9844_v25 = vld [vmem:[#allocation2 + $0x60] sm:$0xff]  ;;  %v9846_v4 = vld [vmem:[#allocation2 + $0x68] sm:$0xff]  ;;  %2368 = vst.msk [vmem:[#allocation2 + $0x70] sm:$0xf0] %vm904_vm1, %v9607_v20  ;;  %1730 = vst.msk [vmem:[#allocation2 + $0x88] sm:$0xf0] %vm904_vm1, %v7851_v6 }
 0x106   : > { %v1944_v0 = vld [vmem:[#allocation2 + $0x28] sm:$0xff]  ;;  %2366 = vst [vmem:[#allocation2 + $0x60] sm:$0xf0] %v9489_v11  ;;  %2367 = vst [vmem:[#allocation2 + $0x68] sm:$0xf0] %v9464_v1  ;;  %v1942_v63 = vld [vmem:[#allocation2 + $0x18] sm:$0xff]  ;;  %v1668_v50 = vsel %vm987_vm9, %v7781_v26, %v7826_v2  ;;  %v1669_v12 = vsel %vm987_vm9, %v7826_v2, %v7827_v59  ;;  %v9858_v13 = vpop.permute.xlu1 %7859  ;;  %v3036_v2 = vcombine.high %v9903_v23, %v9903_v23 }
 0x107   : > { %v1943_v9 = vld [vmem:[#allocation2 + $0x20] sm:$0xff]  ;;  %1675 = vst.msk [vmem:[#allocation2 + $0x58] sm:$0xf0] %vm904_vm1, %v7827_v59  ;;  %v7175_v20 = vpack.c.bf16 %v1944_v0, %v9747_v48  ;;  %1673 = vst [vmem:[#allocation2 + $0x48] sm:$0xf0] %v1668_v50  ;;  %v7861_v16 = vunpack.i.l.bf16 %v9858_v13  ;;  %v7835_v11 = vpop.permute.xlu0 %7834  ;;  %v7146_v41 = vpack.c.bf16 %v1942_v63, %v9754_v28  ;;  %8144 = vrot.lane.b32.xlu0 %v9714_v43, %s12261_s25 }
 0x108   : > { %1674 = vst [vmem:[#allocation2 + $0x50] sm:$0xf0] %v1669_v12  ;;  %v7144_v1 = vpack.c.bf16 %v1943_v9, %v9756_v52  ;;  %v7837_v18 = vunpack.i.h.bf16 %v7835_v11  ;;  %v7836_v45 = vunpack.i.l.bf16 %v7835_v11  ;;  %8149 = vrot.lane.b32.xlu1 %v9720_v31, %s12261_s25  ;;  %v9874_v48 = vpack.i.bf16 %v9820_v42, %v9842_v3 }
 0x109   : > { %7176 = vmatpush3.bf16.msra.mxu1 %v7175_v20  ;;  %1744 = vst.msk [vmem:[#allocation2 + $0xa0] sm:$0xf] %vm886_vm0, %v7861_v16  ;;  %v1947_v27 = vld [vmem:[#allocation2 + $0x40] sm:$0xff]  ;;  %v3026_v12 = vunpack.c.h.bf16 %v3024_v8 }
 0x10a   : > { %7145 = vmatprep.subr.bf16.mxu0 %v7144_v1  ;;  %7177 = vmatprep.subr.bf16.mxu1 %v9099_v21  ;;  %v1709_v43 = vsel %vm896_vm3, %v7836_v45, %v7837_v18  ;;  %v1710_v31 = vsel %vm896_vm3, %v7837_v18, %v7841_v40  ;;  %v9885_v28 = vpop.permute.xlu1 %7869  ;;  %v1945_v7 = vld [vmem:[#allocation2 + $0x30] sm:$0xff]  ;;  %v1946_v29 = vld [vmem:[#allocation2 + $0x38] sm:$0xff]  ;;  %v9936_v18 = vpack.i.bf16 %v3036_v2, %v9903_v23 }
 0x10b   : > { %7147 = vmatpush1.bf16.msra.mxu0 %v7146_v41  ;;  %1714 = vst [vmem:[#allocation2 + $0x78] sm:$0xf] %v1709_v43  ;;  %1715 = vst [vmem:[#allocation2 + $0x80] sm:$0xf] %v1710_v31  ;;  %v7871_v52 = vunpack.i.l.bf16 %v9885_v28  ;;  %v7845_v19 = vpop.permute.xlu0 %7844  ;;  %8154 = vrot.lane.b32.xlu0 %v9868_v35, %s12268_s1 }
 0x10c   : > { %v7847_v22 = vunpack.i.h.bf16 %v7845_v19  ;;  %v7846_v36 = vunpack.i.l.bf16 %v7845_v19  ;;  %8159 = vrot.lane.b32.xlu1 %v9874_v48, %s12263_s0  ;;  %v1956_v40 = vld [vmem:[#allocation2 + $0x88] sm:$0xff] }
 0x10d   : > { %1758 = vst.msk [vmem:[#allocation2 + $0xa0] sm:$0xf0] %vm904_vm1, %v7871_v52  ;;  %v7181_v59 = vpack.c.bf16 %v1956_v40, %v9836_v60 }
 0x10e   : > { %v1950_v14 = vld [vmem:[#allocation2 + $0x58] sm:$0xff]  ;;  %v1948_v30 = vld [vmem:[#allocation2 + $0x48] sm:$0xff]  ;;  %v1723_v32 = vsel %vm912_vm4, %v7846_v36, %v7847_v22  ;;  %v1724_v24 = vsel %vm912_vm4, %v7847_v22, %v7851_v6  ;;  %v9901_v10 = vpop.permute.xlu1 %7879  ;;  %v9911_v6 = vunpack.c.l.bf16 %v9894_v47 }
 0x10f   : > { %v1949_v15 = vld [vmem:[#allocation2 + $0x50] sm:$0xff]  ;;  %v7178_v33 = vpack.c.bf16 %v1950_v14, %v1947_v27  ;;  %1728 = vst [vmem:[#allocation2 + $0x78] sm:$0xf0] %v1723_v32  ;;  %1729 = vst [vmem:[#allocation2 + $0x80] sm:$0xf0] %v1724_v24  ;;  %v7881_v34 = vunpack.i.l.bf16 %v9901_v10  ;;  %v7855_v37 = vpop.permute.xlu0 %7854  ;;  %v7150_v62 = vpack.c.bf16 %v1948_v30, %v1945_v7  ;;  %8164 = vrot.lane.b32.xlu0 %v9868_v35, %s12264_s17 }
 0x110   : > { %v7148_v39 = vpack.c.bf16 %v1949_v15, %v1946_v29  ;;  %v7857_v46 = vunpack.i.h.bf16 %v7855_v37  ;;  %v7856_v51 = vunpack.i.l.bf16 %v7855_v37  ;;  %8169 = vrot.lane.b32.xlu1 %v9874_v48, %s12257_s22  ;;  %v3159_v60 = vcombine.low %v9911_v6, %v9911_v6 }
 0x111   : > { %7179 = vmatpush3.bf16.msra.mxu1 %v7178_v33  ;;  %1772 = vst.msk [vmem:[#allocation2 + $0xb8] sm:$0xf] %vm886_vm0, %v7881_v34  ;;  %v9951_v7 = vcombine.low %v3026_v12, %v3026_v12 }
 0x112   : > { %7149 = vmatprep.subr.bf16.mxu0 %v7148_v39  ;;  %7180 = vmatprep.subr.bf16.mxu1 %v9099_v21  ;;  %v1737_v58 = vsel %vm927_vm5, %v7856_v51, %v7857_v46  ;;  %v1738_v44 = vsel %vm927_vm5, %v7857_v46, %v7861_v16  ;;  %v9917_v26 = vpop.permute.xlu1 %7889  ;;  %v9949_v8 = vpack.i.bf16 %v3159_v60, %v3026_v12  ;;  %v7852_v39 = vunpack.i.h.bf16 %v9825_v53 }
 0x113   : > { %7151 = vmatpush1.bf16.msra.mxu0 %v7150_v62  ;;  %1742 = vst [vmem:[#allocation2 + $0x90] sm:$0xf] %v1737_v58  ;;  %1743 = vst [vmem:[#allocation2 + $0x98] sm:$0xf] %v1738_v44  ;;  %v7891_v0 = vunpack.i.l.bf16 %v9917_v26  ;;  %v7865_v63 = vpop.permute.xlu0 %7864  ;;  %8174 = vrot.lane.b32.xlu0 %v9868_v35, %s12258_s18  ;;  %v9969_v24 = vpack.i.bf16 %v9911_v6, %v9951_v7 }
 0x114   : > { %v7867_v9 = vunpack.i.h.bf16 %v7865_v63  ;;  %v7866_v50 = vunpack.i.l.bf16 %v7865_v63  ;;  %8179 = vrot.lane.b32.xlu1 %v9874_v48, %s12259_s16  ;;  %v1959_v29 = vld [vmem:[#allocation2 + $0xa0] sm:$0xff] }
 0x115   : > { %7182 = vmatpush3.bf16.msra.mxu1 %v7181_v59  ;;  %1786 = vst.msk [vmem:[#allocation2 + $0xb8] sm:$0xf0] %vm904_vm1, %v7891_v0 }
 0x116   : > { %7183 = vmatprep.subr.bf16.mxu1 %v9099_v21  ;;  %v1954_v20 = vld [vmem:[#allocation2 + $0x78] sm:$0xff]  ;;  %v1955_v16 = vld [vmem:[#allocation2 + $0x80] sm:$0xff]  ;;  %v1751_v11 = vsel %vm942_vm6, %v7866_v50, %v7867_v9  ;;  %v1752_v1 = vsel %vm942_vm6, %v7867_v9, %v7871_v52  ;;  %v9933_v41 = vpop.permute.xlu1 %7899  ;;  %v9945_v52 = vcombine.low %v9903_v23, %v9903_v23  ;;  %v7872_v9 = vunpack.i.h.bf16 %v9885_v28 }
 0x117   : > { %1756 = vst [vmem:[#allocation2 + $0x90] sm:$0xf0] %v1751_v11  ;;  %1757 = vst [vmem:[#allocation2 + $0x98] sm:$0xf0] %v1752_v1  ;;  %v7901_v45 = vunpack.i.l.bf16 %v9933_v41  ;;  %v7875_v43 = vpop.permute.xlu0 %7874  ;;  %v7152_v31 = vpack.c.bf16 %v1955_v16, %v9846_v4  ;;  %v7154_v19 = vpack.c.bf16 %v1954_v20, %v9844_v25  ;;  %8184 = vrot.lane.b32.xlu0 %v9868_v35, %s12260_s30  ;;  %v7892_v28 = vunpack.i.h.bf16 %v9917_v26 }
 0x118   : > { %v7877_v22 = vunpack.i.h.bf16 %v7875_v43  ;;  %v7876_v36 = vunpack.i.l.bf16 %v7875_v43  ;;  %8189 = vrot.lane.b32.xlu1 %v9874_v48, %s12261_s25  ;;  %v9963_v48 = vpack.i.bf16 %v9903_v23, %v9945_v52  ;;  %v7842_v26 = vunpack.i.h.bf16 %v9809_v17 }
 0x119   : > { %1800 = vst.msk [vmem:[#allocation2 + $0xd0] sm:$0xf] %vm886_vm0, %v7901_v45  ;;  %7153 = vmatprep.subr.bf16.mxu0 %v7152_v31 }
 0x11a   : > { %v1765_v25 = vsel %vm957_vm7, %v7876_v36, %v7877_v22  ;;  %v1766_v4 = vsel %vm957_vm7, %v7877_v22, %v7881_v34  ;;  %v9956_v35 = vpop.permute.xlu1 %7909  ;;  %7155 = vmatpush1.bf16.msra.mxu0 %v7154_v19 }
 0x11b   : > { %1770 = vst [vmem:[#allocation2 + $0xa8] sm:$0xf] %v1765_v25  ;;  %1771 = vst [vmem:[#allocation2 + $0xb0] sm:$0xf] %v1766_v4  ;;  %v7911_v27 = vunpack.i.l.bf16 %v9956_v35  ;;  %v7885_v14 = vpop.permute.xlu0 %7884  ;;  %8194 = vrot.lane.b32.xlu0 %v9936_v18, %s12268_s1 }
 0x11c   : > { %v1962_v30 = vld [vmem:[#allocation2 + $0xb8] sm:$0xff]  ;;  %v7887_v15 = vunpack.i.h.bf16 %v7885_v14  ;;  %v7886_v32 = vunpack.i.l.bf16 %v7885_v14  ;;  %8199 = vrot.lane.b32.xlu1 %v9949_v8, %s12268_s1 }
 0x11d   : > { %1814 = vst.msk [vmem:[#allocation2 + $0xd0] sm:$0xf0] %vm904_vm1, %v7911_v27  ;;  %v7184_v33 = vpack.c.bf16 %v1962_v30, %v1959_v29 }
 0x11e   : > { %v1779_v40 = vsel %vm972_vm8, %v7886_v32, %v7887_v15  ;;  %v1780_v34 = vsel %vm972_vm8, %v7887_v15, %v7891_v0  ;;  %v7920_v37 = vpop.permute.xlu1 %7919  ;;  %v1957_v11 = vld [vmem:[#allocation2 + $0x90] sm:$0xff]  ;;  %v1958_v43 = vld [vmem:[#allocation2 + $0x98] sm:$0xff] }
 0x11f   : > { %1784 = vst [vmem:[#allocation2 + $0xa8] sm:$0xf0] %v1779_v40  ;;  %1785 = vst [vmem:[#allocation2 + $0xb0] sm:$0xf0] %v1780_v34  ;;  %v7922_v62 = vunpack.i.h.bf16 %v7920_v37  ;;  %v7921_v46 = vunpack.i.l.bf16 %v7920_v37  ;;  %v7895_v51 = vpop.permute.xlu0 %7894  ;;  %7185 = vmatpush3.bf16.msra.mxu1 %v7184_v33  ;;  %8204 = vrot.lane.b32.xlu0 %v9963_v48, %s12263_s0 }
 0x120   : > { %v7897_v58 = vunpack.i.h.bf16 %v7895_v51  ;;  %v7896_v44 = vunpack.i.l.bf16 %v7895_v51  ;;  %8209 = vrot.lane.b32.xlu1 %v9969_v24, %s12263_s0  ;;  %7186 = vmatprep.subr.bf16.mxu1 %v9099_v21 }
 0x121   : > { %v1847_v59 = vsel %vm912_vm4, %v7852_v39, %v7921_v46  ;;  %v1848_v53 = vsel %vm912_vm4, %v7921_v46, %v7922_v62  ;;  %1854 = vst.msk [vmem:[#allocation2 + $0x100] sm:$0xf] %vm886_vm0, %v7922_v62  ;;  %v7912_v39 = vunpack.i.h.bf16 %v9956_v35 }
 0x122   : > { %1852 = vst [vmem:[#allocation2 + $0xf0] sm:$0xf] %v1847_v59  ;;  %1853 = vst [vmem:[#allocation2 + $0xf8] sm:$0xf] %v1848_v53  ;;  %v1793_v2 = vsel %vm987_vm9, %v7896_v44, %v7897_v58  ;;  %v1794_v0 = vsel %vm987_vm9, %v7897_v58, %v7901_v45  ;;  %v7930_v63 = vpop.permute.xlu1 %7929  ;;  %v7862_v58 = vunpack.i.h.bf16 %v9858_v13 }
 0x123   : > { %1798 = vst [vmem:[#allocation2 + $0xc0] sm:$0xf] %v1793_v2  ;;  %1799 = vst [vmem:[#allocation2 + $0xc8] sm:$0xf] %v1794_v0  ;;  %v7932_v50 = vunpack.i.h.bf16 %v7930_v63  ;;  %v7931_v12 = vunpack.i.l.bf16 %v7930_v63  ;;  %v7905_v60 = vpop.permute.xlu0 %7904  ;;  %8214 = vrot.lane.b32.xlu0 %v9936_v18, %s12264_s17 }
 0x124   : > { %v7907_v20 = vunpack.i.h.bf16 %v7905_v60  ;;  %v7906_v16 = vunpack.i.l.bf16 %v7905_v60  ;;  %8219 = vrot.lane.b32.xlu1 %v9949_v8, %s12264_s17 }
 0x125   : > { %v1875_v1 = vsel %vm942_vm6, %v7872_v9, %v7931_v12  ;;  %v1876_v45 = vsel %vm942_vm6, %v7931_v12, %v7932_v50  ;;  %1882 = vst.msk [vmem:[#allocation2 + $0x118] sm:$0xf] %vm886_vm0, %v7932_v50  ;;  %v7882_v50 = vunpack.i.h.bf16 %v9901_v10 }
 0x126   : > { %v1960_v31 = vld [vmem:[#allocation2 + $0xa8] sm:$0xff]  ;;  %v1961_v19 = vld [vmem:[#allocation2 + $0xb0] sm:$0xff]  ;;  %1880 = vst [vmem:[#allocation2 + $0x108] sm:$0xf] %v1875_v1  ;;  %1881 = vst [vmem:[#allocation2 + $0x110] sm:$0xf] %v1876_v45  ;;  %v1807_v22 = vsel %vm1002_vm10, %v7906_v16, %v7907_v20  ;;  %v1808_v36 = vsel %vm1002_vm10, %v7907_v20, %v7911_v27  ;;  %v7940_v25 = vpop.permute.xlu1 %7939  ;;  %v10031_v1 = vunpack.c.h.bf16 %v9894_v47 }
 0x127   : > { %1812 = vst [vmem:[#allocation2 + $0xc0] sm:$0xf0] %v1807_v22  ;;  %1813 = vst [vmem:[#allocation2 + $0xc8] sm:$0xf0] %v1808_v36  ;;  %v7942_v4 = vunpack.i.h.bf16 %v7940_v25  ;;  %v7941_v14 = vunpack.i.l.bf16 %v7940_v25  ;;  %v7915_v29 = vpop.permute.xlu0 %7914  ;;  %v7156_v30 = vpack.c.bf16 %v1961_v19, %v1958_v43  ;;  %v7158_v15 = vpack.c.bf16 %v1960_v31, %v1957_v11  ;;  %8224 = vrot.lane.b32.xlu0 %v9963_v48, %s12257_s22  ;;  %v1965_v20 = vld [vmem:[#allocation2 + $0xd0] sm:$0xff] }
 0x128   : > { %v7917_v32 = vunpack.i.h.bf16 %v7915_v29  ;;  %v7916_v33 = vunpack.i.l.bf16 %v7915_v29  ;;  %8229 = vrot.lane.b32.xlu1 %v9969_v24, %s12257_s22 }
 0x129   : > { %v1903_v27 = vsel %vm972_vm8, %v7892_v28, %v7941_v14  ;;  %v1904_v40 = vsel %vm972_vm8, %v7941_v14, %v7942_v4  ;;  %1910 = vst.msk [vmem:[#allocation2 + $0x130] sm:$0xf] %vm886_vm0, %v7942_v4  ;;  %7157 = vmatprep.subr.bf16.mxu0 %v7156_v30  ;;  %v3160_v4 = vcombine.low %v10031_v1, %v10031_v1  ;;  %v7902_v14 = vunpack.i.h.bf16 %v9933_v41 }
 0x12a   : > { %1908 = vst [vmem:[#allocation2 + $0x120] sm:$0xf] %v1903_v27  ;;  %1909 = vst [vmem:[#allocation2 + $0x128] sm:$0xf] %v1904_v40  ;;  %v1833_v34 = vsel %vm896_vm3, %v7842_v26, %v7916_v33  ;;  %v1834_v37 = vsel %vm896_vm3, %v7916_v33, %v7917_v32  ;;  %v7950_v17 = vpop.permute.xlu1 %7949  ;;  %7159 = vmatpush1.bf16.msra.mxu0 %v7158_v15 }
 0x12b   : > { %1840 = vst.msk [vmem:[#allocation2 + $0xe8] sm:$0xf0] %vm904_vm1, %v7917_v32  ;;  %1838 = vst [vmem:[#allocation2 + $0xd8] sm:$0xf0] %v1833_v34  ;;  %v7952_v62 = vunpack.i.h.bf16 %v7950_v17  ;;  %v7951_v46 = vunpack.i.l.bf16 %v7950_v17  ;;  %v7925_v51 = vpop.permute.xlu0 %7924  ;;  %8234 = vrot.lane.b32.xlu0 %v9936_v18, %s12258_s18  ;;  %v10067_v26 = vpack.i.bf16 %v3160_v4, %v9911_v6 }
 0x12c   : > { %1839 = vst [vmem:[#allocation2 + $0xe0] sm:$0xf0] %v1834_v37  ;;  %v7927_v44 = vunpack.i.h.bf16 %v7925_v51  ;;  %v7926_v59 = vunpack.i.l.bf16 %v7925_v51  ;;  %8239 = vrot.lane.b32.xlu1 %v9949_v8, %s12258_s18 }
 0x12d   : > { %v1931_v53 = vsel %vm1002_vm10, %v7912_v39, %v7951_v46  ;;  %v1932_v2 = vsel %vm1002_vm10, %v7951_v46, %v7952_v62  ;;  %1938 = vst.msk [vmem:[#allocation2 + $0x148] sm:$0xf] %vm886_vm0, %v7952_v62 }
 0x12e   : > { %1936 = vst [vmem:[#allocation2 + $0x138] sm:$0xf] %v1931_v53  ;;  %1937 = vst [vmem:[#allocation2 + $0x140] sm:$0xf] %v1932_v2  ;;  %v1861_v35 = vsel %vm927_vm5, %v7862_v58, %v7926_v59  ;;  %v1862_v0 = vsel %vm927_vm5, %v7926_v59, %v7927_v44  ;;  %v10019_v13 = vpop.permute.xlu1 %7959  ;;  %v1963_v16 = vld [vmem:[#allocation2 + $0xc0] sm:$0xff]  ;;  %v1964_v45 = vld [vmem:[#allocation2 + $0xc8] sm:$0xff] }
 0x12f   : > { %1868 = vst.msk [vmem:[#allocation2 + $0x100] sm:$0xf0] %vm904_vm1, %v7927_v44  ;;  %1866 = vst [vmem:[#allocation2 + $0xf0] sm:$0xf0] %v1861_v35  ;;  %v7961_v63 = vunpack.i.l.bf16 %v10019_v13  ;;  %v7935_v9 = vpop.permute.xlu0 %7934  ;;  %8244 = vrot.lane.b32.xlu0 %v9963_v48, %s12259_s16 }
 0x130   : > { %1867 = vst [vmem:[#allocation2 + $0xf8] sm:$0xf0] %v1862_v0  ;;  %v7937_v12 = vunpack.i.h.bf16 %v7935_v9  ;;  %v7936_v60 = vunpack.i.l.bf16 %v7935_v9  ;;  %8249 = vrot.lane.b32.xlu1 %v9969_v24, %s12259_s16 }
 0x131   : > { %2258 = vst.msk [vmem:[#allocation2 + $0x10] sm:$0xf0] %vm904_vm1, %v7961_v63 }
 0x132   : > { %v1968_v11 = vld [vmem:[#allocation2 + $0xe8] sm:$0xff]  ;;  %v1966_v28 = vld [vmem:[#allocation2 + $0xd8] sm:$0xff]  ;;  %v1889_v10 = vsel %vm957_vm7, %v7882_v50, %v7936_v60  ;;  %v1890_v31 = vsel %vm957_vm7, %v7936_v60, %v7937_v12  ;;  %1896 = vst.msk [vmem:[#allocation2 + $0x118] sm:$0xf0] %vm904_vm1, %v7937_v12  ;;  %v10038_v19 = vpop.permute.xlu1 %7969  ;;  %v3567_v50 = vld [vmem:[%s9642_s15] sm:$0x3f] }
 0x133   : > { %v1967_v43 = vld [vmem:[#allocation2 + $0xe0] sm:$0xff]  ;;  %2491 = vst.msk [vmem:[#allocation2 + $0xe8] sm:$0xf] %vm886_vm0, %v9665_v56  ;;  %v7187_v22 = vpack.c.bf16 %v1968_v11, %v1965_v20  ;;  %2489 = vst [vmem:[#allocation2 + $0xd8] sm:$0xf] %v9658_v49  ;;  %v7971_v47 = vunpack.i.l.bf16 %v10038_v19  ;;  %v7945_v36 = vpop.permute.xlu0 %7944  ;;  %v7162_v56 = vpack.c.bf16 %v1966_v28, %v1963_v16  ;;  %8254 = vrot.lane.b32.xlu0 %v9936_v18, %s12260_s30  ;;  %v10113_v4 = vunpack.c.h.bf16 %v3567_v50  ;;  %s824_s15 = sadd.s32 6, %s9231_s19 }
 0x134   : > { %2490 = vst [vmem:[#allocation2 + $0xe0] sm:$0xf] %v9699_v61  ;;  %1894 = vst [vmem:[#allocation2 + $0x108] sm:$0xf0] %v1889_v10  ;;  %v7160_v25 = vpack.c.bf16 %v1967_v43, %v1964_v45  ;;  %v7947_v29 = vunpack.i.h.bf16 %v7945_v36  ;;  %v7946_v30 = vunpack.i.l.bf16 %v7945_v36  ;;  %8259 = vrot.lane.b32.xlu1 %v9949_v8, %s12260_s30  ;;  %v10052_v49 = vcombine.high %v9911_v6, %v9911_v6  ;;  %v1980_v2 = vld [vmem:[#allocation2 + $0x148] sm:$0xf] }
 0x135   : > { %1895 = vst [vmem:[#allocation2 + $0x110] sm:$0xf0] %v1890_v31  ;;  %7188 = vmatpush3.bf16.msra.mxu1 %v7187_v22  ;;  %2272 = vst.msk [vmem:[#allocation2 + $0x28] sm:$0xf] %vm886_vm0, %v7971_v47  ;;  %v1978_v28 = vld [vmem:[#allocation2 + $0x138] sm:$0xf]  ;;  %v10107_v36 = vunpack.c.l.bf16 %v3567_v50 }
 0x136   : > { %7161 = vmatprep.subr.bf16.mxu0 %v7160_v25  ;;  %7189 = vmatprep.subr.bf16.mxu1 %v9099_v21  ;;  %v1917_v61 = vsel %vm987_vm9, %v7902_v14, %v7946_v30  ;;  %v1918_v41 = vsel %vm987_vm9, %v7946_v30, %v7947_v29  ;;  %1924 = vst.msk [vmem:[#allocation2 + $0x130] sm:$0xf0] %vm904_vm1, %v7947_v29  ;;  %v10061_v18 = vpop.permute.xlu1 %7979  ;;  %v1969_v34 = vld [vmem:[#allocation2 + $0xf0] sm:$0xff]  ;;  %v1971_v37 = vld [vmem:[#allocation2 + $0x100] sm:$0xff]  ;;  %p10234_p2 = scmp.lt.s32.totalorder %s824_s15, 17 }
 0x137   : > { %7163 = vmatpush1.bf16.msra.mxu0 %v7162_v56  ;;  %1922 = vst [vmem:[#allocation2 + $0x120] sm:$0xf0] %v1917_v61  ;;  %1923 = vst [vmem:[#allocation2 + $0x128] sm:$0xf0] %v1918_v41  ;;  %v7981_v8 = vunpack.i.l.bf16 %v10061_v18  ;;  %v7955_v15 = vpop.permute.xlu0 %7954  ;;  %8264 = vrot.lane.b32.xlu0 %v9963_v48, %s12261_s25  ;;  %v10073_v27 = vpack.i.bf16 %v10031_v1, %v10052_v49  ;;  %v1970_v48 = vld [vmem:[#allocation2 + $0xf8] sm:$0xff] }
 0x138   : > { %v7957_v32 = vunpack.i.h.bf16 %v7955_v15  ;;  %v7956_v33 = vunpack.i.l.bf16 %v7955_v15  ;;  %8269 = vrot.lane.b32.xlu1 %v9969_v24, %s12261_s25  ;;  %v10075_v40 = vld [vmem:[#allocation2 + $0x10] sm:$0xff]  ;;  %v10121_v29 = vld [vmem:[%s9881_s29] sm:$0x3f]  ;;  %s12298_s15 = smov (!%p10234_p2, %s824_s15), 17 }
 0x139   : > { %v1974_v17 = vld [vmem:[#allocation2 + $0x118] sm:$0xff]  ;;  %2286 = vst.msk [vmem:[#allocation2 + $0x28] sm:$0xf0] %vm904_vm1, %v7981_v8  ;;  %s7516_s26 = smul.u32 3, %s12298_s15 }
 0x13a   : > { %2909 = vst.msk [vmem:[#allocation2 + $0x10] sm:$0xf] %vm886_vm0, %v9820_v42  ;;  %v2251_v24 = vsel %vm896_vm3, %v7956_v33, %v7957_v32  ;;  %v2252_v46 = vsel %vm896_vm3, %v7957_v32, %v7961_v63  ;;  %v10086_v51 = vpop.permute.xlu1 %7989  ;;  %v7190_v58 = vpack.c.bf16 %v1974_v17, %v1971_v37  ;;  %v1979_v63 = vld [vmem:[#allocation2 + $0x140] sm:$0xf]  ;;  %v3578_v17 = vcombine.low %v10113_v4, %v10113_v4 }
 0x13b   : > { %v1972_v39 = vld [vmem:[#allocation2 + $0x108] sm:$0xff]  ;;  %2256 = vst [vmem:[#allocation2] sm:$0xf0] %v2251_v24  ;;  %2257 = vst [vmem:[#allocation2 + $0x8] sm:$0xf0] %v2252_v46  ;;  %v7991_v44 = vunpack.i.l.bf16 %v10086_v51  ;;  %v7965_v59 = vpop.permute.xlu0 %7964  ;;  %8274 = vrot.lane.b32.xlu0 %v10067_v26, %s12268_s1  ;;  %v10168_v46 = vcombine.high %v10107_v36, %v10107_v36  ;;  %s10292_s28 = sadd.s32 %s7516_s26, %s9237_s13  ;;  %s850_s26 = sadd.s32 8, %s9231_s19 }
 0x13c   : > { %v1973_v62 = vld [vmem:[#allocation2 + $0x110] sm:$0xff]  ;;  %v7166_v42 = vpack.c.bf16 %v1972_v39, %v1969_v34  ;;  %v7967_v35 = vunpack.i.h.bf16 %v7965_v59  ;;  %v7966_v0 = vunpack.i.l.bf16 %v7965_v59  ;;  %8279 = vrot.lane.b32.xlu1 %v10073_v27, %s12263_s0  ;;  %7191 = vmatpush3.bf16.msra.mxu1 %v7190_v58  ;;  %s6611_s15 = sshll.u32 %s10292_s28, 1  ;;  %p10994_p4 = scmp.lt.s32.totalorder %s850_s26, 17 }
 0x13d   : > { %v7164_v53 = vpack.c.bf16 %v1973_v62, %v1970_v48  ;;  %v1977_v9 = vld [vmem:[#allocation2 + $0x130] sm:$0xff]  ;;  %2300 = vst.msk [vmem:[#allocation2 + $0x40] sm:$0xf] %vm886_vm0, %v7991_v44  ;;  %7192 = vmatprep.subr.bf16.mxu1 %v9099_v21  ;;  %v10145_v48 = vunpack.c.l.bf16 %v10121_v29  ;;  %s10325_s28 = scalar_lea.vmem %s12218_s6, %s6611_s15 }
 0x13e   : > { %v1975_v12 = vld [vmem:[#allocation2 + $0x120] sm:$0xff]  ;;  %v1976_v60 = vld [vmem:[#allocation2 + $0x128] sm:$0xff]  ;;  %v2265_v20 = vsel %vm912_vm4, %v7966_v0, %v7967_v35  ;;  %v2266_v16 = vsel %vm912_vm4, %v7967_v35, %v7971_v47  ;;  %v10102_v11 = vpop.permute.xlu1 %7999  ;;  %v7193_v45 = vpack.c.bf16 %v1980_v2, %v1977_v9  ;;  %s12302_s26 = smov (!%p10994_p4, %s850_s26), 17 }
 0x13f   : > { %7165 = vmatprep.subr.bf16.mxu0 %v7164_v53  ;;  %2270 = vst [vmem:[#allocation2 + $0x18] sm:$0xf] %v2265_v20  ;;  %2271 = vst [vmem:[#allocation2 + $0x20] sm:$0xf] %v2266_v16  ;;  %v8001_v43 = vunpack.i.l.bf16 %v10102_v11  ;;  %v7975_v10 = vpop.permute.xlu0 %7974  ;;  %v7168_v31 = vpack.c.bf16 %v1979_v63, %v1976_v60  ;;  %v7171_v22 = vpack.c.bf16 %v1978_v28, %v1975_v12  ;;  %8284 = vrot.lane.b32.xlu0 %v10067_v26, %s12264_s17 }
 0x140   : > { %7167 = vmatpush1.bf16.msra.mxu0 %v7166_v42  ;;  %v7977_v25 = vunpack.i.h.bf16 %v7975_v10  ;;  %v7976_v47 = vunpack.i.l.bf16 %v7975_v10  ;;  %8289 = vrot.lane.b32.xlu1 %v10073_v27, %s12257_s22  ;;  %v2611_v56 = vld [vmem:[#allocation2 + $0x28] sm:$0xff]  ;;  %v10173_v59 = vpack.i.bf16 %v10145_v48, %v3578_v17  ;;  %v10177_v53 = vcombine.low %v10145_v48, %v10145_v48 }
 0x141   : > { %7195 = vmatpush3.bf16.msk.msra.mxu1 %vm9730_vm13, %v7193_v45  ;;  %2314 = vst.msk [vmem:[#allocation2 + $0x40] sm:$0xf0] %vm904_vm1, %v8001_v43  ;;  %7170 = vmatprep.subr.msk.bf16.mxu0 %vm9730_vm13, %v7168_v31  ;;  %v7227_v14 = vpack.c.bf16 %v2611_v56, %v10075_v40  ;;  %v10189_v12 = vpack.i.bf16 %v10168_v46, %v10107_v36  ;;  %v7972_v10 = vunpack.i.h.bf16 %v10038_v19 }
 0x142   : > { %7226 = vmatprep.subr.bf16.mxu1 %v9099_v21  ;;  %v2279_v30 = vsel %vm927_vm5, %v7976_v47, %v7977_v25  ;;  %v2280_v61 = vsel %vm927_vm5, %v7977_v25, %v7981_v8  ;;  %v10127_v41 = vpop.permute.xlu1 %8009  ;;  %v2607_v15 = vld [vmem:[#allocation2 + $0x8] sm:$0xff]  ;;  %v2606_v32 = vld [vmem:[#allocation2] sm:$0xff]  ;;  %v3577_v8 = vcombine.low %v10107_v36, %v10107_v36  ;;  %v10195_v16 = vpack.i.bf16 %v10177_v53, %v10113_v4 }
 0x143   : > { %2284 = vst [vmem:[#allocation2 + $0x18] sm:$0xf0] %v2279_v30  ;;  %2285 = vst [vmem:[#allocation2 + $0x20] sm:$0xf0] %v2280_v61  ;;  %v8011_v33 = vunpack.i.l.bf16 %v10127_v41  ;;  %v7985_v40 = vpop.permute.xlu0 %7984  ;;  %8294 = vrot.lane.b32.xlu0 %v10067_v26, %s12258_s18 }
 0x144   : > { %7173 = vmatpush1.bf16.msk.msra.mxu0 %vm9730_vm13, %v7171_v22  ;;  %6904 = vmatmul.mubr.msk.f32.vlgmr.msra.gmra.mrb[2].mxu1 %vm957_vm7, %v9743_v5  ;;  %2908 = vst [vmem:[#allocation2 + $0x8] sm:$0xf] %v9842_v3  ;;  %2907 = vst [vmem:[#allocation2] sm:$0xf] %v9668_v57  ;;  %v7987_v34 = vunpack.i.h.bf16 %v7985_v40  ;;  %v7986_v37 = vunpack.i.l.bf16 %v7985_v40  ;;  %v10164_v24 = vpack.i.bf16 %v10107_v36, %v3577_v8  ;;  %v7992_v8 = vunpack.i.h.bf16 %v10086_v51 }
 0x145   : > { %8299 = vrot.lane.b32.xlu1 %v10073_v27, %s12259_s16  ;;  %7228 = vmatpush3.bf16.msra.mxu1 %v7227_v14  ;;  %2328 = vst.msk [vmem:[#allocation2 + $0x58] sm:$0xf] %vm886_vm0, %v8011_v33 }
 0x146   : > { %7229 = vmatprep.subr.bf16.mxu1 %v9099_v21  ;;  %v2293_v57 = vsel %vm942_vm6, %v7986_v37, %v7987_v34  ;;  %v2294_v3 = vsel %vm942_vm6, %v7987_v34, %v7991_v44  ;;  %v10155_v39 = vpop.permute.xlu1 %8019  ;;  %6934 = vmatprep.mubr.msk.f32.mxu1 %vm9102_vm2, %v9103_v38 }
 0x147   : > { %6632 = vmatmul.mubr.msk.f32.vlgmr.msra.gmra.mrb[2].mxu0 %vm957_vm7, %v9743_v5  ;;  %2298 = vst [vmem:[#allocation2 + $0x30] sm:$0xf] %v2293_v57  ;;  %2299 = vst [vmem:[#allocation2 + $0x38] sm:$0xf] %v2294_v3  ;;  %v8021_v62 = vunpack.i.l.bf16 %v10155_v39  ;;  %v7995_v5 = vpop.permute.xlu0 %7994  ;;  %8304 = vrot.lane.b32.xlu0 %v10067_v26, %s12260_s30 }
 0x148   : > { %2721 = vmatprep.mubr.f32.mxu0 %v9103_v38  ;;  %v7997_v58 = vunpack.i.h.bf16 %v7995_v5  ;;  %v7996_v44 = vunpack.i.l.bf16 %v7995_v5  ;;  %v2614_v14 = vld [vmem:[#allocation2 + $0x40] sm:$0xff] }
 0x149   : > { %8309 = vrot.lane.b32.xlu1 %v10073_v27, %s12261_s25  ;;  %2342 = vst.msk [vmem:[#allocation2 + $0x58] sm:$0xf0] %vm904_vm1, %v8021_v62 }
 0x14a   : > { %v2307_v26 = vsel %vm957_vm7, %v7996_v44, %v7997_v58  ;;  %v2308_v42 = vsel %vm957_vm7, %v7997_v58, %v8001_v43  ;;  %v10182_v2 = vpop.permute.xlu1 %8029  ;;  %v2610_v35 = vld [vmem:[#allocation2 + $0x20] sm:$0xff]  ;;  %v2609_v0 = vld [vmem:[#allocation2 + $0x18] sm:$0xff] }
 0x14b   : > { %2312 = vst [vmem:[#allocation2 + $0x30] sm:$0xf0] %v2307_v26  ;;  %2313 = vst [vmem:[#allocation2 + $0x38] sm:$0xf0] %v2308_v42  ;;  %v8031_v27 = vunpack.i.l.bf16 %v10182_v2  ;;  %v8005_v63 = vpop.permute.xlu0 %8004  ;;  %v7196_v9 = vpack.c.bf16 %v2610_v35, %v2607_v15  ;;  %v7198_v50 = vpack.c.bf16 %v2609_v0, %v2606_v32  ;;  %8314 = vrot.lane.b32.xlu0 %v10164_v24, %s12268_s1  ;;  %v8012_v42 = vunpack.i.h.bf16 %v10127_v41 }
 0x14c   : > { %v8007_v60 = vunpack.i.h.bf16 %v8005_v63  ;;  %v8006_v20 = vunpack.i.l.bf16 %v8005_v63 }
 0x14d   : > { %8319 = vrot.lane.b32.xlu1 %v10173_v59, %s12268_s1  ;;  %2356 = vst.msk [vmem:[#allocation2 + $0x70] sm:$0xf] %vm886_vm0, %v8031_v27  ;;  %7197 = vmatprep.subr.bf16.mxu0 %v7196_v9 }
 0x14e   : > { %v2321_v45 = vsel %vm972_vm8, %v8006_v20, %v8007_v60  ;;  %v2322_v28 = vsel %vm972_vm8, %v8007_v60, %v8011_v33  ;;  %v8040_v43 = vpop.permute.xlu1 %8039  ;;  %7199 = vmatpush1.bf16.msra.mxu0 %v7198_v50  ;;  %v8032_v20 = vunpack.i.h.bf16 %v10182_v2 }
 0x14f   : > { %2326 = vst [vmem:[#allocation2 + $0x48] sm:$0xf] %v2321_v45  ;;  %2327 = vst [vmem:[#allocation2 + $0x50] sm:$0xf] %v2322_v28  ;;  %v8042_v31 = vunpack.i.h.bf16 %v8040_v43  ;;  %v8041_v22 = vunpack.i.l.bf16 %v8040_v43  ;;  %v8015_v25 = vpop.permute.xlu0 %8014  ;;  %8324 = vrot.lane.b32.xlu0 %v10189_v12, %s12263_s0 }
 0x150   : > { %v8017_v47 = vunpack.i.h.bf16 %v8015_v25  ;;  %v8016_v56 = vunpack.i.l.bf16 %v8015_v25  ;;  %v2617_v30 = vld [vmem:[#allocation2 + $0x58] sm:$0xff] }
 0x151   : > { %8329 = vrot.lane.b32.xlu1 %v10195_v16, %s12263_s0  ;;  %v2390_v61 = vsel %vm912_vm4, %v7972_v10, %v8041_v22  ;;  %v2391_v15 = vsel %vm912_vm4, %v8041_v22, %v8042_v31  ;;  %2397 = vst.msk [vmem:[#allocation2 + $0x88] sm:$0xf0] %vm904_vm1, %v8042_v31  ;;  %v7230_v19 = vpack.c.bf16 %v2617_v30, %v2614_v14  ;;  %v7982_v14 = vunpack.i.h.bf16 %v10061_v18 }
 0x152   : > { %2395 = vst [vmem:[#allocation2 + $0x78] sm:$0xf0] %v2390_v61  ;;  %2396 = vst [vmem:[#allocation2 + $0x80] sm:$0xf0] %v2391_v15  ;;  %v2335_v32 = vsel %vm987_vm9, %v8016_v56, %v8017_v47  ;;  %v2336_v33 = vsel %vm987_vm9, %v8017_v47, %v8021_v62  ;;  %v8050_v40 = vpop.permute.xlu1 %8049  ;;  %v2613_v60 = vld [vmem:[#allocation2 + $0x38] sm:$0xff]  ;;  %v2612_v10 = vld [vmem:[#allocation2 + $0x30] sm:$0xff] }
 0x153   : > { %2340 = vst [vmem:[#allocation2 + $0x48] sm:$0xf0] %v2335_v32  ;;  %2341 = vst [vmem:[#allocation2 + $0x50] sm:$0xf0] %v2336_v33  ;;  %v8052_v34 = vunpack.i.h.bf16 %v8050_v40  ;;  %v8051_v37 = vunpack.i.l.bf16 %v8050_v40  ;;  %v8025_v17 = vpop.permute.xlu0 %8024  ;;  %7231 = vmatpush3.bf16.msra.mxu1 %v7230_v19  ;;  %8334 = vrot.lane.b32.xlu0 %v10164_v24, %s12264_s17 }
 0x154   : > { %v8027_v57 = vunpack.i.h.bf16 %v8025_v17  ;;  %v8026_v3 = vunpack.i.l.bf16 %v8025_v17  ;;  %7232 = vmatprep.subr.bf16.mxu1 %v9099_v21  ;;  %v10216_v62 = vld [vmem:[#allocation2 + $0x70] sm:$0xff]  ;;  %v8002_v17 = vunpack.i.h.bf16 %v10102_v11 }
 0x155   : > { %8339 = vrot.lane.b32.xlu1 %v10173_v59, %s12264_s17  ;;  %v2418_v51 = vsel %vm942_vm6, %v7992_v8, %v8051_v37  ;;  %v2419_v5 = vsel %vm942_vm6, %v8051_v37, %v8052_v34  ;;  %2425 = vst.msk [vmem:[#allocation2 + $0xa0] sm:$0xf0] %vm904_vm1, %v8052_v34  ;;  %3035 = vst.msk [vmem:[#allocation2 + $0x70] sm:$0xf0] %vm904_vm1, %v9951_v7  ;;  %v7962_v7 = vunpack.i.h.bf16 %v10019_v13 }
 0x156   : > { %2423 = vst [vmem:[#allocation2 + $0x90] sm:$0xf0] %v2418_v51  ;;  %2424 = vst [vmem:[#allocation2 + $0x98] sm:$0xf0] %v2419_v5  ;;  %v2349_v58 = vsel %vm1002_vm10, %v8026_v3, %v8027_v57  ;;  %v2350_v44 = vsel %vm1002_vm10, %v8027_v57, %v8031_v27  ;;  %v8060_v26 = vpop.permute.xlu1 %8059  ;;  %v3693_v51 = vunpack.c.h.bf16 %v10121_v29 }
 0x157   : > { %2354 = vst [vmem:[#allocation2 + $0x60] sm:$0xf] %v2349_v58  ;;  %2355 = vst [vmem:[#allocation2 + $0x68] sm:$0xf] %v2350_v44  ;;  %v8062_v35 = vunpack.i.h.bf16 %v8060_v26  ;;  %v8061_v0 = vunpack.i.l.bf16 %v8060_v26  ;;  %v8035_v63 = vpop.permute.xlu0 %8034  ;;  %8344 = vrot.lane.b32.xlu0 %v10189_v12, %s12257_s22 }
 0x158   : > { %v8037_v9 = vunpack.i.h.bf16 %v8035_v63  ;;  %v8036_v50 = vunpack.i.l.bf16 %v8035_v63  ;;  %v3703_v63 = vcombine.high %v10145_v48, %v10145_v48 }
 0x159   : > { %8349 = vrot.lane.b32.xlu1 %v10195_v16, %s12257_s22  ;;  %v2446_v41 = vsel %vm972_vm8, %v8012_v42, %v8061_v0  ;;  %v2447_v27 = vsel %vm972_vm8, %v8061_v0, %v8062_v35  ;;  %2453 = vst.msk [vmem:[#allocation2 + $0xb8] sm:$0xf0] %vm904_vm1, %v8062_v35 }
 0x15a   : > { %2451 = vst [vmem:[#allocation2 + $0xa8] sm:$0xf0] %v2446_v41  ;;  %2452 = vst [vmem:[#allocation2 + $0xb0] sm:$0xf0] %v2447_v27  ;;  %v2376_v13 = vsel %vm896_vm3, %v7962_v7, %v8036_v50  ;;  %v2377_v45 = vsel %vm896_vm3, %v8036_v50, %v8037_v9  ;;  %v8070_v28 = vpop.permute.xlu1 %8069  ;;  %v2616_v43 = vld [vmem:[#allocation2 + $0x50] sm:$0xff]  ;;  %v2615_v31 = vld [vmem:[#allocation2 + $0x48] sm:$0xff]  ;;  %v8022_v7 = vunpack.i.h.bf16 %v10155_v39  ;;  %v10289_v50 = vcombine.low %v3693_v51, %v3693_v51 }
 0x15b   : > { %2383 = vst.msk [vmem:[#allocation2 + $0x88] sm:$0xf] %vm886_vm0, %v8037_v9  ;;  %2381 = vst [vmem:[#allocation2 + $0x78] sm:$0xf] %v2376_v13  ;;  %v8072_v22 = vunpack.i.h.bf16 %v8070_v28  ;;  %v8071_v25 = vunpack.i.l.bf16 %v8070_v28  ;;  %v8045_v47 = vpop.permute.xlu0 %8044  ;;  %v7200_v2 = vpack.c.bf16 %v2616_v43, %v2613_v60  ;;  %v7202_v56 = vpack.c.bf16 %v2615_v31, %v2612_v10  ;;  %8354 = vrot.lane.b32.xlu0 %v10164_v24, %s12258_s18 }
 0x15c   : > { %2382 = vst [vmem:[#allocation2 + $0x80] sm:$0xf] %v2377_v45  ;;  %v8047_v30 = vunpack.i.h.bf16 %v8045_v47  ;;  %v8046_v61 = vunpack.i.l.bf16 %v8045_v47  ;;  %v10306_v60 = vpack.i.bf16 %v3693_v51, %v3703_v63  ;;  %v10313_v45 = vpack.i.bf16 %v10289_v50, %v10145_v48 }
 0x15d   : > { %8359 = vrot.lane.b32.xlu1 %v10173_v59, %s12258_s18  ;;  %v2474_v15 = vsel %vm1002_vm10, %v8032_v20, %v8071_v25  ;;  %v2475_v19 = vsel %vm1002_vm10, %v8071_v25, %v8072_v22  ;;  %2481 = vst.msk [vmem:[#allocation2 + $0xd0] sm:$0xf0] %vm904_vm1, %v8072_v22  ;;  %7201 = vmatprep.subr.bf16.mxu0 %v7200_v2 }
 0x15e   : > { %2479 = vst [vmem:[#allocation2 + $0xc0] sm:$0xf0] %v2474_v15  ;;  %2480 = vst [vmem:[#allocation2 + $0xc8] sm:$0xf0] %v2475_v19  ;;  %v2404_v18 = vsel %vm927_vm5, %v7982_v14, %v8046_v61  ;;  %v2405_v32 = vsel %vm927_vm5, %v8046_v61, %v8047_v30  ;;  %v10262_v33 = vpop.permute.xlu1 %8079  ;;  %7203 = vmatpush1.bf16.msra.mxu0 %v7202_v56  ;;  %v2619_v40 = vld [vmem:[#allocation2 + $0x68] sm:$0xff]  ;;  %v2618_v8 = vld [vmem:[#allocation2 + $0x60] sm:$0xff] }
 0x15f   : > { %2411 = vst.msk [vmem:[#allocation2 + $0xa0] sm:$0xf] %vm886_vm0, %v8047_v30  ;;  %2409 = vst [vmem:[#allocation2 + $0x90] sm:$0xf] %v2404_v18  ;;  %v8081_v34 = vunpack.i.l.bf16 %v10262_v33  ;;  %v8055_v37 = vpop.permute.xlu0 %8054  ;;  %8364 = vrot.lane.b32.xlu0 %v10189_v12, %s12259_s16 }
 0x160   : > { %2410 = vst [vmem:[#allocation2 + $0x98] sm:$0xf] %v2405_v32  ;;  %3034 = vst [vmem:[#allocation2 + $0x68] sm:$0xf0] %v9903_v23  ;;  %v8057_v57 = vunpack.i.h.bf16 %v8055_v37  ;;  %v8056_v3 = vunpack.i.l.bf16 %v8055_v37  ;;  %v3816_v32 = vld [vmem:[%s10325_s28] sm:$0x3f] }
 0x161   : > { %3033 = vst [vmem:[#allocation2 + $0x60] sm:$0xf0] %v9945_v52  ;;  %8369 = vrot.lane.b32.xlu1 %v10195_v16, %s12259_s16  ;;  %2507 = vst.msk [vmem:[#allocation2 + $0xe8] sm:$0xf0] %vm904_vm1, %v8081_v34  ;;  %v10347_v51 = vunpack.c.l.bf16 %v3816_v32 }
 0x162   : > { %v2623_v5 = vld [vmem:[#allocation2 + $0x88] sm:$0xff]  ;;  %v2432_v23 = vsel %vm957_vm7, %v8002_v17, %v8056_v3  ;;  %v2433_v52 = vsel %vm957_vm7, %v8056_v3, %v8057_v57  ;;  %2439 = vst.msk [vmem:[#allocation2 + $0xb8] sm:$0xf] %vm886_vm0, %v8057_v57  ;;  %v10278_v58 = vpop.permute.xlu1 %8089  ;;  %v2621_v26 = vld [vmem:[#allocation2 + $0x78] sm:$0xff] }
 0x163   : > { %v7233_v11 = vpack.c.bf16 %v2623_v5, %v10216_v62  ;;  %v2622_v44 = vld [vmem:[#allocation2 + $0x80] sm:$0xff]  ;;  %2437 = vst [vmem:[#allocation2 + $0xa8] sm:$0xf] %v2432_v23  ;;  %2438 = vst [vmem:[#allocation2 + $0xb0] sm:$0xf] %v2433_v52  ;;  %v8091_v29 = vunpack.i.l.bf16 %v10278_v58  ;;  %v8065_v42 = vpop.permute.xlu0 %8064  ;;  %v7206_v0 = vpack.c.bf16 %v2621_v26, %v2618_v8  ;;  %8374 = vrot.lane.b32.xlu0 %v10164_v24, %s12260_s30  ;;  %v10351_v52 = vunpack.c.h.bf16 %v3816_v32 }
 0x164   : > { %v7204_v35 = vpack.c.bf16 %v2622_v44, %v2619_v40  ;;  %v8067_v9 = vunpack.i.h.bf16 %v8065_v42  ;;  %v8066_v62 = vunpack.i.l.bf16 %v8065_v42  ;;  %v10336_v40 = vld [vmem:[%s9881_s29] sm:$0x3f]  ;;  %s837_s29 = sadd.s32 7, %s9231_s19 }
 0x165   : > { %8379 = vrot.lane.b32.xlu1 %v10173_v59, %s12260_s30  ;;  %7234 = vmatpush3.bf16.msra.mxu1 %v7233_v11  ;;  %2521 = vst.msk [vmem:[#allocation2 + $0x100] sm:$0xf] %vm886_vm0, %v8091_v29  ;;  %v10354_v11 = vunpack.c.l.bf16 %v10336_v40  ;;  %p10444_p3 = scmp.lt.s32.totalorder %s837_s29, 17 }
 0x166   : > { %7205 = vmatprep.subr.bf16.mxu0 %v7204_v35  ;;  %7235 = vmatprep.subr.bf16.mxu1 %v9099_v21  ;;  %v2460_v39 = vsel %vm987_vm9, %v8022_v7, %v8066_v62  ;;  %v2461_v24 = vsel %vm987_vm9, %v8066_v62, %v8067_v9  ;;  %2467 = vst.msk [vmem:[#allocation2 + $0xd0] sm:$0xf] %vm886_vm0, %v8067_v9  ;;  %v10301_v59 = vpop.permute.xlu1 %8099  ;;  %v2626_v43 = vld [vmem:[#allocation2 + $0xa0] sm:$0xff]  ;;  %v2624_v2 = vld [vmem:[#allocation2 + $0x90] sm:$0xff] }
 0x167   : > { %7207 = vmatpush1.bf16.msra.mxu0 %v7206_v0  ;;  %2465 = vst [vmem:[#allocation2 + $0xc0] sm:$0xf] %v2460_v39  ;;  %2466 = vst [vmem:[#allocation2 + $0xc8] sm:$0xf] %v2461_v24  ;;  %v8101_v41 = vunpack.i.l.bf16 %v10301_v59  ;;  %v8075_v27 = vpop.permute.xlu0 %8074  ;;  %8384 = vrot.lane.b32.xlu0 %v10189_v12, %s12261_s25  ;;  %v2625_v31 = vld [vmem:[#allocation2 + $0x98] sm:$0xff]  ;;  %v3826_v24 = vcombine.low %v10347_v51, %v10347_v51  ;;  %v10410_v32 = vpack.i.bf16 %v10354_v11, %v10351_v52  ;;  %s12300_s29 = smov (!%p10444_p3, %s837_s29), 17 }
 0x168   : > { %v8077_v20 = vunpack.i.h.bf16 %v8075_v27  ;;  %v8076_v13 = vunpack.i.l.bf16 %v8075_v27  ;;  %v2635_v28 = vld [vmem:[#allocation2 + $0xe8] sm:$0xff]  ;;  %s7517_s15 = smul.u32 3, %s12300_s29 }
 0x169   : > { %8389 = vrot.lane.b32.xlu1 %v10195_v16, %s12261_s25  ;;  %2535 = vst.msk [vmem:[#allocation2 + $0x100] sm:$0xf0] %vm904_vm1, %v8101_v41  ;;  %v2629_v10 = vld [vmem:[#allocation2 + $0xb8] sm:$0xff] }
 0x16a   : > { %3158 = vst.msk [vmem:[#allocation2 + $0xe8] sm:$0xf] %vm886_vm0, %v10031_v1  ;;  %v2500_v12 = vsel %vm896_vm3, %v8076_v13, %v8077_v20  ;;  %v2501_v22 = vsel %vm896_vm3, %v8077_v20, %v8081_v34  ;;  %v10320_v25 = vpop.permute.xlu1 %8109  ;;  %v7236_v16 = vpack.c.bf16 %v2629_v10, %v2626_v43  ;;  %v2628_v47 = vld [vmem:[#allocation2 + $0xb0] sm:$0xff]  ;;  %v2627_v56 = vld [vmem:[#allocation2 + $0xa8] sm:$0xff]  ;;  %v3827_v20 = vcombine.low %v10351_v52, %v10351_v52  ;;  %s10519_s29 = sadd.s32 %s7517_s15, %s9237_s13 }
 0x16b   : > { %2505 = vst [vmem:[#allocation2 + $0xd8] sm:$0xf0] %v2500_v12  ;;  %2506 = vst [vmem:[#allocation2 + $0xe0] sm:$0xf0] %v2501_v22  ;;  %v8111_v1 = vunpack.i.l.bf16 %v10320_v25  ;;  %v8085_v14 = vpop.permute.xlu0 %8084  ;;  %v7208_v30 = vpack.c.bf16 %v2628_v47, %v2625_v31  ;;  %v7210_v61 = vpack.c.bf16 %v2627_v56, %v2624_v2  ;;  %8394 = vrot.lane.b32.xlu0 %v10306_v60, %s12268_s1  ;;  %s6613_s20 = sshll.u32 %s10519_s29, 1 }
 0x16c   : > { %v8087_v15 = vunpack.i.h.bf16 %v8085_v14  ;;  %v8086_v19 = vunpack.i.l.bf16 %v8085_v14  ;;  %7237 = vmatpush3.bf16.msra.mxu1 %v7236_v16  ;;  %v10384_v31 = vpack.i.bf16 %v10347_v51, %v3826_v24  ;;  %v10388_v12 = vcombine.high %v10347_v51, %v10347_v51  ;;  %s10567_s29 = scalar_lea.vmem %s12219_s7, %s6613_s20 }
 0x16d   : > { %8399 = vrot.lane.b32.xlu1 %v10313_v45, %s12263_s0  ;;  %2549 = vst.msk [vmem:[#allocation2 + $0x118] sm:$0xf] %vm886_vm0, %v8111_v1  ;;  %7209 = vmatprep.subr.bf16.mxu0 %v7208_v30  ;;  %v2632_v18 = vld [vmem:[#allocation2 + $0xd0] sm:$0xff] }
 0x16e   : > { %7238 = vmatprep.subr.bf16.mxu1 %v9099_v21  ;;  %v2514_v8 = vsel %vm912_vm4, %v8086_v19, %v8087_v15  ;;  %v2515_v34 = vsel %vm912_vm4, %v8087_v15, %v8091_v29  ;;  %v10342_v37 = vpop.permute.xlu1 %8119  ;;  %7211 = vmatpush1.bf16.msra.mxu0 %v7210_v61  ;;  %v7239_v17 = vpack.c.bf16 %v2635_v28, %v2632_v18  ;;  %v2631_v44 = vld [vmem:[#allocation2 + $0xc8] sm:$0xff]  ;;  %v2630_v0 = vld [vmem:[#allocation2 + $0xc0] sm:$0xff] }
 0x16f   : > { %2519 = vst [vmem:[#allocation2 + $0xf0] sm:$0xf] %v2514_v8  ;;  %2520 = vst [vmem:[#allocation2 + $0xf8] sm:$0xf] %v2515_v34  ;;  %v8121_v57 = vunpack.i.l.bf16 %v10342_v37  ;;  %v8095_v3 = vpop.permute.xlu0 %8094  ;;  %8404 = vrot.lane.b32.xlu0 %v10306_v60, %s12264_s17 }
 0x170   : > { %v8097_v5 = vunpack.i.h.bf16 %v8095_v3  ;;  %v8096_v23 = vunpack.i.l.bf16 %v8095_v3  ;;  %7240 = vmatpush3.bf16.msra.mxu1 %v7239_v17  ;;  %v2638_v47 = vld [vmem:[#allocation2 + $0x100] sm:$0xff] }
 0x171   : > { %8409 = vrot.lane.b32.xlu1 %v10313_v45, %s12257_s22  ;;  %2563 = vst.msk [vmem:[#allocation2 + $0x118] sm:$0xf0] %vm904_vm1, %v8121_v57  ;;  %7241 = vmatprep.subr.bf16.mxu1 %v9099_v21 }
 0x172   : > { %v2528_v26 = vsel %vm927_vm5, %v8096_v23, %v8097_v5  ;;  %v2529_v29 = vsel %vm927_vm5, %v8097_v5, %v8101_v41  ;;  %v10360_v42 = vpop.permute.xlu1 %8129  ;;  %v2634_v35 = vld [vmem:[#allocation2 + $0xe0] sm:$0xff]  ;;  %v2633_v63 = vld [vmem:[#allocation2 + $0xd8] sm:$0xff] }
 0x173   : > { %2533 = vst [vmem:[#allocation2 + $0xf0] sm:$0xf0] %v2528_v26  ;;  %2534 = vst [vmem:[#allocation2 + $0xf8] sm:$0xf0] %v2529_v29  ;;  %v8131_v7 = vunpack.i.l.bf16 %v10360_v42  ;;  %v8105_v9 = vpop.permute.xlu0 %8104  ;;  %v7212_v62 = vpack.c.bf16 %v2634_v35, %v2631_v44  ;;  %v7214_v39 = vpack.c.bf16 %v2633_v63, %v2630_v0  ;;  %8414 = vrot.lane.b32.xlu0 %v10306_v60, %s12258_s18  ;;  %v8112_v63 = vunpack.i.h.bf16 %v10320_v25 }
 0x174   : > { %3157 = vst [vmem:[#allocation2 + $0xe0] sm:$0xf] %v10052_v49  ;;  %3156 = vst [vmem:[#allocation2 + $0xd8] sm:$0xf] %v9911_v6  ;;  %v8107_v41 = vunpack.i.h.bf16 %v8105_v9  ;;  %v8106_v27 = vunpack.i.l.bf16 %v8105_v9  ;;  %v4244_v49 = vcombine.low %v10354_v11, %v10354_v11 }
 0x175   : > { %8419 = vrot.lane.b32.xlu1 %v10313_v45, %s12259_s16  ;;  %2577 = vst.msk [vmem:[#allocation2 + $0x130] sm:$0xf] %vm886_vm0, %v8131_v7  ;;  %7213 = vmatprep.subr.bf16.mxu0 %v7212_v62 }
 0x176   : > { %v2542_v6 = vsel %vm942_vm6, %v8106_v27, %v8107_v41  ;;  %v2543_v13 = vsel %vm942_vm6, %v8107_v41, %v8111_v1  ;;  %v10378_v28 = vpop.permute.xlu1 %8139  ;;  %7215 = vmatpush1.bf16.msra.mxu0 %v7214_v39  ;;  %v10392_v56 = vpack.i.bf16 %v4244_v49, %v3827_v20 }
 0x177   : > { %2547 = vst [vmem:[#allocation2 + $0x108] sm:$0xf] %v2542_v6  ;;  %2548 = vst [vmem:[#allocation2 + $0x110] sm:$0xf] %v2543_v13  ;;  %v8141_v43 = vunpack.i.l.bf16 %v10378_v28  ;;  %v8115_v10 = vpop.permute.xlu0 %8114  ;;  %8424 = vrot.lane.b32.xlu0 %v10306_v60, %s12260_s30 }
 0x178   : > { %v8117_v22 = vunpack.i.h.bf16 %v8115_v10  ;;  %v8116_v16 = vunpack.i.l.bf16 %v8115_v10  ;;  %v2641_v2 = vld [vmem:[#allocation2 + $0x118] sm:$0xff] }
 0x179   : > { %8429 = vrot.lane.b32.xlu1 %v10313_v45, %s12261_s25  ;;  %2591 = vst.msk [vmem:[#allocation2 + $0x130] sm:$0xf0] %vm904_vm1, %v8141_v43  ;;  %v7242_v1 = vpack.c.bf16 %v2641_v2, %v2638_v47  ;;  %v10404_v45 = vpack.i.bf16 %v10388_v12, %v10347_v51 }
 0x17a   : > { %v2556_v60 = vsel %vm957_vm7, %v8116_v16, %v8117_v22  ;;  %v2557_v14 = vsel %vm957_vm7, %v8117_v22, %v8121_v57  ;;  %v10397_v30 = vpop.permute.xlu1 %8149  ;;  %v8092_v57 = vunpack.i.h.bf16 %v10278_v58  ;;  %v2637_v58 = vld [vmem:[#allocation2 + $0xf8] sm:$0xff]  ;;  %v2636_v0 = vld [vmem:[#allocation2 + $0xf0] sm:$0xff] }
 0x17b   : > { %2561 = vst [vmem:[#allocation2 + $0x108] sm:$0xf0] %v2556_v60  ;;  %2562 = vst [vmem:[#allocation2 + $0x110] sm:$0xf0] %v2557_v14  ;;  %v8151_v61 = vunpack.i.l.bf16 %v10397_v30  ;;  %v8125_v15 = vpop.permute.xlu0 %8124  ;;  %7243 = vmatpush3.bf16.msra.mxu1 %v7242_v1  ;;  %8434 = vrot.lane.b32.xlu0 %v10384_v31, %s12268_s1  ;;  %v8132_v14 = vunpack.i.h.bf16 %v10360_v42 }
 0x17c   : > { %v8127_v19 = vunpack.i.h.bf16 %v8125_v15  ;;  %v8126_v18 = vunpack.i.l.bf16 %v8125_v15  ;;  %7244 = vmatprep.subr.bf16.mxu1 %v9099_v21 }
 0x17d   : > { %8439 = vrot.lane.b32.xlu1 %v10392_v56, %s12268_s1  ;;  %2605 = vst.msk [vmem:[#allocation2 + $0x148] sm:$0xf] %vm886_vm0, %v8151_v61 }
 0x17e   : > { %v2570_v8 = vsel %vm972_vm8, %v8126_v18, %v8127_v19  ;;  %v2571_v34 = vsel %vm972_vm8, %v8127_v19, %v8131_v7  ;;  %v8160_v17 = vpop.permute.xlu1 %8159 }
 0x17f   : > { %2575 = vst [vmem:[#allocation2 + $0x120] sm:$0xf] %v2570_v8  ;;  %2576 = vst [vmem:[#allocation2 + $0x128] sm:$0xf] %v2571_v34  ;;  %v8162_v3 = vunpack.i.h.bf16 %v8160_v17  ;;  %v8161_v5 = vunpack.i.l.bf16 %v8160_v17  ;;  %v8135_v23 = vpop.permute.xlu0 %8134  ;;  %8444 = vrot.lane.b32.xlu0 %v10404_v45, %s12263_s0 }
 0x180   : > { %v8137_v44 = vunpack.i.h.bf16 %v8135_v23  ;;  %v8136_v26 = vunpack.i.l.bf16 %v8135_v23  ;;  %v2644_v41 = vld [vmem:[#allocation2 + $0x130] sm:$0xff]  ;;  %v8152_v23 = vunpack.i.h.bf16 %v10397_v30 }
 0x181   : > { %8449 = vrot.lane.b32.xlu1 %v10410_v32, %s12263_s0  ;;  %v2932_v29 = vsel %vm912_vm4, %v8092_v57, %v8161_v5  ;;  %v2933_v35 = vsel %vm912_vm4, %v8161_v5, %v8162_v3  ;;  %2939 = vst.msk [vmem:[#allocation2 + $0x28] sm:$0xf] %vm886_vm0, %v8162_v3  ;;  %v10461_v5 = vld [vmem:[%s12222_s10] sm:$0xff] }
 0x182   : > { %2937 = vst [vmem:[#allocation2 + $0x18] sm:$0xf] %v2932_v29  ;;  %2938 = vst [vmem:[#allocation2 + $0x20] sm:$0xf] %v2933_v35  ;;  %v2584_v7 = vsel %vm987_vm9, %v8136_v26, %v8137_v44  ;;  %v2585_v9 = vsel %vm987_vm9, %v8137_v44, %v8141_v43  ;;  %v8170_v62 = vpop.permute.xlu1 %8169  ;;  %v2640_v39 = vld [vmem:[#allocation2 + $0x110] sm:$0xff]  ;;  %v2639_v24 = vld [vmem:[#allocation2 + $0x108] sm:$0xff]  ;;  %v8102_v35 = vunpack.i.h.bf16 %v10301_v59 }
 0x183   : > { %2589 = vst [vmem:[#allocation2 + $0x120] sm:$0xf0] %v2584_v7  ;;  %2590 = vst [vmem:[#allocation2 + $0x128] sm:$0xf0] %v2585_v9  ;;  %v8172_v27 = vunpack.i.h.bf16 %v8170_v62  ;;  %v8171_v20 = vunpack.i.l.bf16 %v8170_v62  ;;  %v8145_v49 = vpop.permute.xlu0 %8144  ;;  %v7216_v6 = vpack.c.bf16 %v2640_v39, %v2637_v58  ;;  %v7218_v13 = vpack.c.bf16 %v2639_v24, %v2636_v0  ;;  %8454 = vrot.lane.b32.xlu0 %v10384_v31, %s12264_s17 }
 0x184   : > { %v8147_v25 = vunpack.i.h.bf16 %v8145_v49  ;;  %v8146_v10 = vunpack.i.l.bf16 %v8145_v49  ;;  %v2647_v43 = vld [vmem:[#allocation2 + $0x148] sm:$0xf] }
 0x185   : > { %8459 = vrot.lane.b32.xlu1 %v10392_v56, %s12264_s17  ;;  %v2960_v22 = vsel %vm942_vm6, %v8112_v63, %v8171_v20  ;;  %v2961_v16 = vsel %vm942_vm6, %v8171_v20, %v8172_v27  ;;  %2967 = vst.msk [vmem:[#allocation2 + $0x40] sm:$0xf] %vm886_vm0, %v8172_v27  ;;  %7217 = vmatprep.subr.bf16.mxu0 %v7216_v6 }
 0x186   : > { %v7245_v47 = vpack.c.bf16 %v2647_v43, %v2644_v41  ;;  %2965 = vst [vmem:[#allocation2 + $0x30] sm:$0xf] %v2960_v22  ;;  %2966 = vst [vmem:[#allocation2 + $0x38] sm:$0xf] %v2961_v16  ;;  %v2598_v2 = vsel %vm1002_vm10, %v8146_v10, %v8147_v25  ;;  %v2599_v1 = vsel %vm1002_vm10, %v8147_v25, %v8151_v61  ;;  %v8180_v60 = vpop.permute.xlu1 %8179  ;;  %7219 = vmatpush1.bf16.msra.mxu0 %v7218_v13 }
 0x187   : > { %2603 = vst [vmem:[#allocation2 + $0x138] sm:$0xf] %v2598_v2  ;;  %2604 = vst [vmem:[#allocation2 + $0x140] sm:$0xf] %v2599_v1  ;;  %v8182_v15 = vunpack.i.h.bf16 %v8180_v60  ;;  %v8181_v19 = vunpack.i.l.bf16 %v8180_v60  ;;  %v8155_v18 = vpop.permute.xlu0 %8154  ;;  %8464 = vrot.lane.b32.xlu0 %v10404_v45, %s12257_s22  ;;  %v8082_v61 = vunpack.i.h.bf16 %v10262_v33  ;;  %v8122_v13 = vunpack.i.h.bf16 %v10342_v37 }
 0x188   : > { %7247 = vmatpush3.bf16.msk.msra.mxu1 %vm9730_vm13, %v7245_v47  ;;  %v8157_v8 = vunpack.i.h.bf16 %v8155_v18  ;;  %v8156_v42 = vunpack.i.l.bf16 %v8155_v18  ;;  %v10500_v22 = vunpack.c.h.bf16 %v10336_v40 }
 0x189   : > { %8469 = vrot.lane.b32.xlu1 %v10410_v32, %s12257_s22  ;;  %7278 = vmatprep.subr.bf16.mxu1 %v9099_v21  ;;  %v2988_v34 = vsel %vm972_vm8, %v8132_v14, %v8181_v19  ;;  %v2989_v17 = vsel %vm972_vm8, %v8181_v19, %v8182_v15  ;;  %2995 = vst.msk [vmem:[#allocation2 + $0x58] sm:$0xf] %vm886_vm0, %v8182_v15 }
 0x18a   : > { %2993 = vst [vmem:[#allocation2 + $0x48] sm:$0xf] %v2988_v34  ;;  %2994 = vst [vmem:[#allocation2 + $0x50] sm:$0xf] %v2989_v17  ;;  %v2918_v57 = vsel %vm896_vm3, %v8082_v61, %v8156_v42  ;;  %v2919_v33 = vsel %vm896_vm3, %v8156_v42, %v8157_v8  ;;  %v8190_v3 = vpop.permute.xlu1 %8189  ;;  %v2643_v7 = vld [vmem:[#allocation2 + $0x128] sm:$0xff]  ;;  %v2642_v24 = vld [vmem:[#allocation2 + $0x120] sm:$0xff]  ;;  %v4245_v14 = vcombine.low %v10500_v22, %v10500_v22 }
 0x18b   : > { %2925 = vst.msk [vmem:[#allocation2 + $0x10] sm:$0xf0] %vm904_vm1, %v8157_v8  ;;  %6935 = vmatmul.mubr.msk.f32.vlgmr.msra.gmra.mrb[4].mxu1 %vm957_vm7, %v10461_v5  ;;  %2923 = vst [vmem:[#allocation2] sm:$0xf0] %v2918_v57  ;;  %v8192_v44 = vunpack.i.h.bf16 %v8190_v3  ;;  %v8191_v26 = vunpack.i.l.bf16 %v8190_v3  ;;  %v8165_v29 = vpop.permute.xlu0 %8164  ;;  %8474 = vrot.lane.b32.xlu0 %v10384_v31, %s12258_s18 }
 0x18c   : > { %2924 = vst [vmem:[#allocation2 + $0x8] sm:$0xf0] %v2919_v33  ;;  %6965 = vmatprep.mubr.msk.f32.mxu1 %vm9102_vm2, %v9103_v38  ;;  %v8167_v58 = vunpack.i.h.bf16 %v8165_v29  ;;  %v8166_v0 = vunpack.i.l.bf16 %v8165_v29 }
 0x18d   : > { %8479 = vrot.lane.b32.xlu1 %v10392_v56, %s12258_s18  ;;  %v3016_v30 = vsel %vm1002_vm10, %v8152_v23, %v8191_v26  ;;  %v3017_v63 = vsel %vm1002_vm10, %v8191_v26, %v8192_v44  ;;  %3023 = vst.msk [vmem:[#allocation2 + $0x70] sm:$0xf] %vm886_vm0, %v8192_v44  ;;  %v10554_v23 = vpack.i.bf16 %v4245_v14, %v10354_v11 }
 0x18e   : > { %3021 = vst [vmem:[#allocation2 + $0x60] sm:$0xf] %v3016_v30  ;;  %3022 = vst [vmem:[#allocation2 + $0x68] sm:$0xf] %v3017_v63  ;;  %v2946_v9 = vsel %vm927_vm5, %v8102_v35, %v8166_v0  ;;  %v2947_v62 = vsel %vm927_vm5, %v8166_v0, %v8167_v58  ;;  %v10485_v59 = vpop.permute.xlu1 %8199  ;;  %v2646_v39 = vld [vmem:[#allocation2 + $0x140] sm:$0xf] }
 0x18f   : > { %2953 = vst.msk [vmem:[#allocation2 + $0x28] sm:$0xf0] %vm904_vm1, %v8167_v58  ;;  %v2645_v41 = vld [vmem:[#allocation2 + $0x138] sm:$0xf]  ;;  %2951 = vst [vmem:[#allocation2 + $0x18] sm:$0xf0] %v2946_v9  ;;  %v8201_v27 = vunpack.i.l.bf16 %v10485_v59  ;;  %v8175_v20 = vpop.permute.xlu0 %8174  ;;  %v7220_v49 = vpack.c.bf16 %v2646_v39, %v2643_v7  ;;  %8484 = vrot.lane.b32.xlu0 %v10404_v45, %s12259_s16 }
 0x190   : > { %2952 = vst [vmem:[#allocation2 + $0x20] sm:$0xf0] %v2947_v62  ;;  %v7223_v6 = vpack.c.bf16 %v2645_v41, %v2642_v24  ;;  %v8177_v25 = vunpack.i.h.bf16 %v8175_v20  ;;  %v8176_v10 = vunpack.i.l.bf16 %v8175_v20  ;;  %v4358_v30 = vld [vmem:[%s10325_s28] sm:$0x3f] }
 0x191   : > { %8489 = vrot.lane.b32.xlu1 %v10410_v32, %s12259_s16  ;;  %3050 = vst.msk [vmem:[#allocation2 + $0x88] sm:$0xf] %vm886_vm0, %v8201_v27  ;;  %7222 = vmatprep.subr.msk.bf16.mxu0 %vm9730_vm13, %v7220_v49  ;;  %v10582_v63 = vld [vmem:[%s10567_s29] sm:$0x3f] }
 0x192   : > { %v3275_v43 = vld [vmem:[#allocation2 + $0x10] sm:$0xff]  ;;  %v2974_v16 = vsel %vm957_vm7, %v8122_v13, %v8176_v10  ;;  %v2975_v37 = vsel %vm957_vm7, %v8176_v10, %v8177_v25  ;;  %2981 = vst.msk [vmem:[#allocation2 + $0x40] sm:$0xf0] %vm904_vm1, %v8177_v25  ;;  %v10505_v47 = vpop.permute.xlu1 %8209  ;;  %7225 = vmatpush1.bf16.msk.msra.mxu0 %vm9730_vm13, %v7223_v6  ;;  %v3273_v1 = vld [vmem:[#allocation2] sm:$0xff]  ;;  %v10591_v13 = vunpack.c.l.bf16 %v4358_v30 }
 0x193   : > { %3576 = vst.msk [vmem:[#allocation2 + $0x10] sm:$0xf] %vm886_vm0, %v10113_v4  ;;  %v3274_v2 = vld [vmem:[#allocation2 + $0x8] sm:$0xff]  ;;  %2979 = vst [vmem:[#allocation2 + $0x30] sm:$0xf0] %v2974_v16  ;;  %v8211_v40 = vunpack.i.l.bf16 %v10505_v47  ;;  %v8185_v60 = vpop.permute.xlu0 %8184  ;;  %8494 = vrot.lane.b32.xlu0 %v10384_v31, %s12260_s30  ;;  %v8142_v4 = vunpack.i.h.bf16 %v10378_v28 }
 0x194   : > { %2980 = vst [vmem:[#allocation2 + $0x38] sm:$0xf0] %v2975_v37  ;;  %3575 = vst [vmem:[#allocation2 + $0x8] sm:$0xf] %v10168_v46  ;;  %v8187_v15 = vunpack.i.h.bf16 %v8185_v60  ;;  %v8186_v19 = vunpack.i.l.bf16 %v8185_v60  ;;  %v10526_v46 = vcombine.high %v10354_v11, %v10354_v11  ;;  %v10603_v60 = vunpack.c.l.bf16 %v10582_v63 }
 0x195   : > { %3574 = vst [vmem:[#allocation2] sm:$0xf] %v10107_v36  ;;  %8499 = vrot.lane.b32.xlu1 %v10392_v56, %s12260_s30  ;;  %v10528_v36 = vld [vmem:[#allocation2 + $0x70] sm:$0xff]  ;;  %3064 = vst.msk [vmem:[#allocation2 + $0x88] sm:$0xf0] %vm904_vm1, %v8211_v40  ;;  %6645 = vmatmul.mubr.msk.f32.vlgmr.msra.gmra.mrb[4].mxu0 %vm957_vm7, %v10461_v5  ;;  %v10537_v31 = vld [vmem:[#allocation2 + $0x68] sm:$0xff] }
 0x196   : > { %v3278_v28 = vld [vmem:[#allocation2 + $0x28] sm:$0xff]  ;;  %3702 = vst.msk [vmem:[#allocation2 + $0x70] sm:$0xf0] %vm904_vm1, %v10289_v50  ;;  %v10539_v56 = vld [vmem:[#allocation2 + $0x60] sm:$0xff]  ;;  %v3002_v18 = vsel %vm987_vm9, %v8142_v4, %v8186_v19  ;;  %v3003_v61 = vsel %vm987_vm9, %v8186_v19, %v8187_v15  ;;  %3009 = vst.msk [vmem:[#allocation2 + $0x58] sm:$0xf0] %vm904_vm1, %v8187_v15  ;;  %v10544_v8 = vpop.permute.xlu1 %8219  ;;  %3388 = vmatprep.mubr.f32.mxu0 %v9103_v38 }
 0x197   : > { %v7279_v42 = vpack.c.bf16 %v3278_v28, %v3275_v43  ;;  %v3277_v34 = vld [vmem:[#allocation2 + $0x20] sm:$0xff]  ;;  %v3276_v17 = vld [vmem:[#allocation2 + $0x18] sm:$0xff]  ;;  %3701 = vst [vmem:[#allocation2 + $0x68] sm:$0xf0] %v10145_v48  ;;  %3700 = vst [vmem:[#allocation2 + $0x60] sm:$0xf0] %v10177_v53  ;;  %v8221_v50 = vunpack.i.l.bf16 %v10544_v8  ;;  %v8195_v57 = vpop.permute.xlu0 %8194  ;;  %8504 = vrot.lane.b32.xlu0 %v10404_v45, %s12261_s25  ;;  %v10560_v53 = vpack.i.bf16 %v10500_v22, %v10526_v46 }
 0x198   : > { %3007 = vst [vmem:[#allocation2 + $0x48] sm:$0xf0] %v3002_v18  ;;  %3008 = vst [vmem:[#allocation2 + $0x50] sm:$0xf0] %v3003_v61  ;;  %v7248_v33 = vpack.c.bf16 %v3277_v34, %v3274_v2  ;;  %v7250_v3 = vpack.c.bf16 %v3276_v17, %v3273_v1  ;;  %v8197_v44 = vunpack.i.h.bf16 %v8195_v57  ;;  %v8196_v48 = vunpack.i.l.bf16 %v8195_v57 }
 0x199   : > { %8509 = vrot.lane.b32.xlu1 %v10410_v32, %s12261_s25  ;;  %7280 = vmatpush3.bf16.msra.mxu1 %v7279_v42  ;;  %3078 = vst.msk [vmem:[#allocation2 + $0xa0] sm:$0xf] %vm886_vm0, %v8221_v50  ;;  %v3281_v7 = vld [vmem:[#allocation2 + $0x40] sm:$0xff]  ;;  %v10612_v28 = vcombine.high %v10591_v13, %v10591_v13 }
 0x19a   : > { %7249 = vmatprep.subr.bf16.mxu0 %v7248_v33  ;;  %7281 = vmatprep.subr.bf16.mxu1 %v9099_v21  ;;  %v3043_v45 = vsel %vm896_vm3, %v8196_v48, %v8197_v44  ;;  %v3044_v32 = vsel %vm896_vm3, %v8197_v44, %v8201_v27  ;;  %v10573_v26 = vpop.permute.xlu1 %8229  ;;  %v3279_v49 = vld [vmem:[#allocation2 + $0x30] sm:$0xff] }
 0x19b   : > { %7251 = vmatpush1.bf16.msra.mxu0 %v7250_v3  ;;  %3048 = vst [vmem:[#allocation2 + $0x78] sm:$0xf] %v3043_v45  ;;  %3049 = vst [vmem:[#allocation2 + $0x80] sm:$0xf] %v3044_v32  ;;  %v8231_v29 = vunpack.i.l.bf16 %v10573_v26  ;;  %v8205_v35 = vpop.permute.xlu0 %8204  ;;  %8514 = vrot.lane.b32.xlu0 %v10554_v23, %s12268_s1  ;;  %v3280_v62 = vld [vmem:[#allocation2 + $0x38] sm:$0xff]  ;;  %v8553_v44 = vpack.i.bf16 %v10612_v28, %v10591_v13 }
 0x19c   : > { %v8207_v58 = vunpack.i.h.bf16 %v8205_v35  ;;  %v8206_v0 = vunpack.i.l.bf16 %v8205_v35  ;;  %v3290_v37 = vld [vmem:[#allocation2 + $0x88] sm:$0xff]  ;;  %v10638_v35 = vcombine.low %v10591_v13, %v10591_v13 }
 0x19d   : > { %8519 = vrot.lane.b32.xlu1 %v10560_v53, %s12263_s0  ;;  %3092 = vst.msk [vmem:[#allocation2 + $0xa0] sm:$0xf0] %vm904_vm1, %v8231_v29  ;;  %v3284_v9 = vld [vmem:[#allocation2 + $0x58] sm:$0xff]  ;;  %v7285_v19 = vpack.c.bf16 %v3290_v37, %v10528_v36 }
 0x19e   : > { %v3057_v39 = vsel %vm912_vm4, %v8206_v0, %v8207_v58  ;;  %v3058_v24 = vsel %vm912_vm4, %v8207_v58, %v8211_v40  ;;  %v10589_v41 = vpop.permute.xlu1 %8239  ;;  %v7282_v27 = vpack.c.bf16 %v3284_v9, %v3281_v7  ;;  %v10600_v40 = vunpack.c.h.bf16 %v4358_v30 }
 0x19f   : > { %v3283_v20 = vld [vmem:[#allocation2 + $0x50] sm:$0xff]  ;;  %v3282_v6 = vld [vmem:[#allocation2 + $0x48] sm:$0xff]  ;;  %3062 = vst [vmem:[#allocation2 + $0x78] sm:$0xf0] %v3057_v39  ;;  %3063 = vst [vmem:[#allocation2 + $0x80] sm:$0xf0] %v3058_v24  ;;  %v8241_v25 = vunpack.i.l.bf16 %v10589_v41  ;;  %v8215_v10 = vpop.permute.xlu0 %8214  ;;  %8524 = vrot.lane.b32.xlu0 %v10554_v23, %s12264_s17 }
 0x1a0   : > { %v7252_v43 = vpack.c.bf16 %v3283_v20, %v3280_v62  ;;  %v7254_v16 = vpack.c.bf16 %v3282_v6, %v3279_v49  ;;  %v8217_v2 = vunpack.i.h.bf16 %v8215_v10  ;;  %v8216_v1 = vunpack.i.l.bf16 %v8215_v10  ;;  %7283 = vmatpush3.bf16.msra.mxu1 %v7282_v27 }
 0x1a1   : > { %8529 = vrot.lane.b32.xlu1 %v10560_v53, %s12257_s22  ;;  %3106 = vst.msk [vmem:[#allocation2 + $0xb8] sm:$0xf] %vm886_vm0, %v8241_v25  ;;  %7284 = vmatprep.subr.bf16.mxu1 %v9099_v21  ;;  %v10627_v3 = vpack.i.bf16 %v10603_v60, %v10600_v40  ;;  %v10644_v30 = vcombine.low %v10600_v40, %v10600_v40 }
 0x1a2   : > { %7253 = vmatprep.subr.bf16.mxu0 %v7252_v43  ;;  %v3071_v14 = vsel %vm927_vm5, %v8216_v1, %v8217_v2  ;;  %v3072_v4 = vsel %vm927_vm5, %v8217_v2, %v8221_v50  ;;  %v10607_v15 = vpop.permute.xlu1 %8249  ;;  %v8563_v62 = vpack.i.bf16 %v10591_v13, %v10638_v35 }
 0x1a3   : > { %7255 = vmatpush1.bf16.msra.mxu0 %v7254_v16  ;;  %3076 = vst [vmem:[#allocation2 + $0x90] sm:$0xf] %v3071_v14  ;;  %3077 = vst [vmem:[#allocation2 + $0x98] sm:$0xf] %v3072_v4  ;;  %v8251_v18 = vunpack.i.l.bf16 %v10607_v15  ;;  %v8225_v61 = vpop.permute.xlu0 %8224  ;;  %8534 = vrot.lane.b32.xlu0 %v10554_v23, %s12258_s18  ;;  %v8212_v16 = vunpack.i.h.bf16 %v10505_v47 }
 0x1a4   : > { %v8227_v42 = vunpack.i.h.bf16 %v8225_v61  ;;  %v8226_v34 = vunpack.i.l.bf16 %v8225_v61  ;;  %7286 = vmatpush3.bf16.msra.mxu1 %v7285_v19  ;;  %v3293_v27 = vld [vmem:[#allocation2 + $0xa0] sm:$0xff] }
 0x1a5   : > { %8539 = vrot.lane.b32.xlu1 %v10560_v53, %s12259_s16  ;;  %3120 = vst.msk [vmem:[#allocation2 + $0xb8] sm:$0xf0] %vm904_vm1, %v8251_v18  ;;  %7287 = vmatprep.subr.bf16.mxu1 %v9099_v21 }
 0x1a6   : > { %v3085_v36 = vsel %vm942_vm6, %v8226_v34, %v8227_v42  ;;  %v3086_v17 = vsel %vm942_vm6, %v8227_v42, %v8231_v29  ;;  %v10623_v50 = vpop.permute.xlu1 %8259  ;;  %v3289_v57 = vld [vmem:[#allocation2 + $0x80] sm:$0xff]  ;;  %v3288_v33 = vld [vmem:[#allocation2 + $0x78] sm:$0xff]  ;;  %v8232_v34 = vunpack.i.h.bf16 %v10573_v26 }
 0x1a7   : > { %3090 = vst [vmem:[#allocation2 + $0x90] sm:$0xf0] %v3085_v36  ;;  %3091 = vst [vmem:[#allocation2 + $0x98] sm:$0xf0] %v3086_v17  ;;  %v8261_v48 = vunpack.i.l.bf16 %v10623_v50  ;;  %v8235_v45 = vpop.permute.xlu0 %8234  ;;  %v7256_v32 = vpack.c.bf16 %v3289_v57, %v10537_v31  ;;  %v7258_v29 = vpack.c.bf16 %v3288_v33, %v10539_v56  ;;  %8544 = vrot.lane.b32.xlu0 %v10554_v23, %s12260_s30 }
 0x1a8   : > { %v8237_v58 = vunpack.i.h.bf16 %v8235_v45  ;;  %v8236_v0 = vunpack.i.l.bf16 %v8235_v45  ;;  %v10648_v31 = vcombine.high %v10603_v60, %v10603_v60  ;;  %v10679_v33 = vpack.i.bf16 %v10644_v30, %v10591_v13 }
 0x1a9   : > { %8549 = vrot.lane.b32.xlu1 %v10560_v53, %s12261_s25  ;;  %3134 = vst.msk [vmem:[#allocation2 + $0xd0] sm:$0xf] %vm886_vm0, %v8261_v48  ;;  %7257 = vmatprep.subr.bf16.mxu0 %v7256_v32 }
 0x1aa   : > { %v3099_v56 = vsel %vm957_vm7, %v8236_v0, %v8237_v58  ;;  %v3100_v23 = vsel %vm957_vm7, %v8237_v58, %v8241_v25  ;;  %v10653_v7 = vpop.permute.xlu1 %8269  ;;  %7259 = vmatpush1.bf16.msra.mxu0 %v7258_v29  ;;  %v8568_v49 = vpack.i.bf16 %v10648_v31, %v10644_v30  ;;  %v8252_v58 = vunpack.i.h.bf16 %v10607_v15 }
 0x1ab   : > { %3104 = vst [vmem:[#allocation2 + $0xa8] sm:$0xf] %v3099_v56  ;;  %3105 = vst [vmem:[#allocation2 + $0xb0] sm:$0xf] %v3100_v23  ;;  %v8271_v53 = vunpack.i.l.bf16 %v10653_v7  ;;  %v8245_v9 = vpop.permute.xlu0 %8244  ;;  %8554 = vrot.lane.b32.xlu0 %v8553_v44, %s12268_s1  ;;  %v8202_v15 = vunpack.i.h.bf16 %v10485_v59 }
 0x1ac   : > { %v8247_v39 = vunpack.i.h.bf16 %v8245_v9  ;;  %v8246_v24 = vunpack.i.l.bf16 %v8245_v9  ;;  %v3296_v20 = vld [vmem:[#allocation2 + $0xb8] sm:$0xff] }
 0x1ad   : > { %8559 = vrot.lane.b32.xlu1 %v10627_v3, %s12268_s1  ;;  %3148 = vst.msk [vmem:[#allocation2 + $0xd0] sm:$0xf0] %vm904_vm1, %v8271_v53  ;;  %v7288_v6 = vpack.c.bf16 %v3296_v20, %v3293_v27 }
 0x1ae   : > { %v3113_v25 = vsel %vm972_vm8, %v8246_v24, %v8247_v39  ;;  %v3114_v10 = vsel %vm972_vm8, %v8247_v39, %v8251_v18  ;;  %v8280_v43 = vpop.permute.xlu1 %8279  ;;  %v3291_v9 = vld [vmem:[#allocation2 + $0x90] sm:$0xff] }
 0x1af   : > { %3118 = vst [vmem:[#allocation2 + $0xa8] sm:$0xf0] %v3113_v25  ;;  %3119 = vst [vmem:[#allocation2 + $0xb0] sm:$0xf0] %v3114_v10  ;;  %v8282_v37 = vunpack.i.h.bf16 %v8280_v43  ;;  %v8281_v2 = vunpack.i.l.bf16 %v8280_v43  ;;  %v8255_v1 = vpop.permute.xlu0 %8254  ;;  %7289 = vmatpush3.bf16.msra.mxu1 %v7288_v6  ;;  %8564 = vrot.lane.b32.xlu0 %v8563_v62, %s12263_s0 }
 0x1b0   : > { %v8257_v14 = vunpack.i.h.bf16 %v8255_v1  ;;  %v8256_v4 = vunpack.i.l.bf16 %v8255_v1  ;;  %7290 = vmatprep.subr.bf16.mxu1 %v9099_v21 }
 0x1b1   : > { %8569 = vrot.lane.b32.xlu1 %v8568_v49, %s12263_s0  ;;  %v3181_v19 = vsel %vm912_vm4, %v8212_v16, %v8281_v2  ;;  %v3182_v18 = vsel %vm912_vm4, %v8281_v2, %v8282_v37  ;;  %3188 = vst.msk [vmem:[#allocation2 + $0x100] sm:$0xf] %vm886_vm0, %v8282_v37  ;;  %v8272_v16 = vunpack.i.h.bf16 %v10653_v7 }
 0x1b2   : > { %3186 = vst [vmem:[#allocation2 + $0xf0] sm:$0xf] %v3181_v19  ;;  %3187 = vst [vmem:[#allocation2 + $0xf8] sm:$0xf] %v3182_v18  ;;  %v3127_v47 = vsel %vm987_vm9, %v8256_v4, %v8257_v14  ;;  %v3128_v61 = vsel %vm987_vm9, %v8257_v14, %v8261_v48  ;;  %v8290_v42 = vpop.permute.xlu1 %8289  ;;  %v10685_v48 = vpack.i.bf16 %v10600_v40, %v10612_v28  ;;  %v8222_v4 = vunpack.i.h.bf16 %v10544_v8 }
 0x1b3   : > { %3132 = vst [vmem:[#allocation2 + $0xc0] sm:$0xf] %v3127_v47  ;;  %3133 = vst [vmem:[#allocation2 + $0xc8] sm:$0xf] %v3128_v61  ;;  %v8292_v36 = vunpack.i.h.bf16 %v8290_v42  ;;  %v8291_v17 = vunpack.i.l.bf16 %v8290_v42  ;;  %v8265_v57 = vpop.permute.xlu0 %8264  ;;  %8574 = vrot.lane.b32.xlu0 %v8553_v44, %s12264_s17  ;;  %v3292_v44 = vld [vmem:[#allocation2 + $0x98] sm:$0xff]  ;;  %v10713_v14 = vpack.i.bf16 %v10603_v60, %v10591_v13  ;;  %v10722_v61 = vunpack.c.h.bf16 %v10582_v63 }
 0x1b4   : > { %v8267_v45 = vunpack.i.h.bf16 %v8265_v57  ;;  %v8266_v32 = vunpack.i.l.bf16 %v8265_v57  ;;  %v4493_v63 = vcombine.low %v10603_v60, %v10603_v60 }
 0x1b5   : > { %8579 = vrot.lane.b32.xlu1 %v10627_v3, %s12264_s17  ;;  %v3209_v26 = vsel %vm942_vm6, %v8232_v34, %v8291_v17  ;;  %v3210_v29 = vsel %vm942_vm6, %v8291_v17, %v8292_v36  ;;  %3216 = vst.msk [vmem:[#allocation2 + $0x118] sm:$0xf] %vm886_vm0, %v8292_v36  ;;  %v4494_v57 = vcombine.low %v10722_v61, %v10722_v61 }
 0x1b6   : > { %3214 = vst [vmem:[#allocation2 + $0x108] sm:$0xf] %v3209_v26  ;;  %3215 = vst [vmem:[#allocation2 + $0x110] sm:$0xf] %v3210_v29  ;;  %v3141_v0 = vsel %vm1002_vm10, %v8266_v32, %v8267_v45  ;;  %v3142_v56 = vsel %vm1002_vm10, %v8267_v45, %v8271_v53  ;;  %v3295_v23 = vld [vmem:[#allocation2 + $0xb0] sm:$0xff]  ;;  %v3294_v40 = vld [vmem:[#allocation2 + $0xa8] sm:$0xff]  ;;  %v10700_v53 = vpack.i.bf16 %v10648_v31, %v10638_v35  ;;  %v8242_v45 = vunpack.i.h.bf16 %v10589_v41 }
 0x1b7   : > { %v8300_v3 = vpop.permute.xlu1 %8299  ;;  %3146 = vst [vmem:[#allocation2 + $0xc0] sm:$0xf0] %v3141_v0  ;;  %3147 = vst [vmem:[#allocation2 + $0xc8] sm:$0xf0] %v3142_v56  ;;  %v8275_v39 = vpop.permute.xlu0 %8274  ;;  %v7260_v24 = vpack.c.bf16 %v3295_v23, %v3292_v44  ;;  %v7262_v27 = vpack.c.bf16 %v3294_v40, %v3291_v9  ;;  %8584 = vrot.lane.b32.xlu0 %v10679_v33, %s12257_s22  ;;  %v4901_v29 = vld [vmem:[%s10325_s28] sm:$0x3f]  ;;  %v1470_v23 = vlaneseq }
 0x1b8   : > { %v8302_v28 = vunpack.i.h.bf16 %v8300_v3  ;;  %v8301_v62 = vunpack.i.l.bf16 %v8300_v3  ;;  %v8277_v20 = vunpack.i.h.bf16 %v8275_v39  ;;  %v8276_v49 = vunpack.i.l.bf16 %v8275_v39  ;;  %v3299_v44 = vld [vmem:[#allocation2 + $0xd0] sm:$0xff]  ;;  %s744_s28 = sand.u32 1, %s9066_s21  }
 0x1b9   : > { %8589 = vrot.lane.b32.xlu1 %v10685_v48, %s12258_s18  ;;  %7261 = vmatprep.subr.bf16.mxu0 %v7260_v24  ;;  %v9105_v56 = vmov 1966171168   ;;  %vm10821_vm14 = vcmp.lt.s32.totalorder %v1470_v23, 288  ;;  %s10840_s21 = smul.u32 192, %s744_s28 }
 0x1ba   : > { %v3237_v6 = vsel %vm972_vm8, %v8252_v58, %v8301_v62  ;;  %v3238_v25 = vsel %vm972_vm8, %v8301_v62, %v8302_v28  ;;  %3244 = vst.msk [vmem:[#allocation2 + $0x130] sm:$0xf] %vm886_vm0, %v8302_v28  ;;  %v3167_v59 = vsel %vm896_vm3, %v8202_v15, %v8276_v49  ;;  %v3168_v10 = vsel %vm896_vm3, %v8276_v49, %v8277_v20  ;;  %s7518_s28 = smul.u32 3, %s12302_s26 }
 0x1bb   : > { %3242 = vst [vmem:[#allocation2 + $0x120] sm:$0xf] %v3237_v6  ;;  %3243 = vst [vmem:[#allocation2 + $0x128] sm:$0xf] %v3238_v25  ;;  %v8310_v43 = vpop.permute.xlu1 %8309  ;;  %7263 = vmatpush1.bf16.msra.mxu0 %v7262_v27  ;;  %v8285_v1 = vpop.permute.xlu0 %8284  ;;  %8594 = vrot.lane.b32.xlu0 %v10679_v33, %s12259_s16  ;;  %v1468_v3 = vunpack.c.l.s4 %v9105_v56  ;;  %v10755_v6 = vpack.i.bf16 %v4493_v63, %v4494_v57  ;;  %s10897_s20 = scalar_lea.vmem [#allocation3], %s10840_s21 }
 0x1bc   : > { %3174 = vst.msk [vmem:[#allocation2 + $0xe8] sm:$0xf0] %vm904_vm1, %v8277_v20  ;;  %3172 = vst [vmem:[#allocation2 + $0xd8] sm:$0xf0] %v3167_v59  ;;  %v8312_v37 = vunpack.i.h.bf16 %v8310_v43  ;;  %v8311_v2 = vunpack.i.l.bf16 %v8310_v43  ;;  %v8287_v19 = vunpack.i.h.bf16 %v8285_v1  ;;  %v8286_v18 = vunpack.i.l.bf16 %v8285_v1  ;;  %s11048_s21 = sadd.s32 %s7518_s28, %s9237_s13 }
 0x1bd   : > { %3173 = vst [vmem:[#allocation2 + $0xe0] sm:$0xf0] %v3168_v10  ;;  %8599 = vrot.lane.b32.xlu1 %v10700_v53, %s12257_s22  ;;  %v10761_v10 = vld [vmem:[%s10567_s29] sm:$0x3f]  ;;  %s6615_s26 = sshll.u32 %s11048_s21, 1 }
 0x1be   : > { %v3265_v7 = vsel %vm1002_vm10, %v8272_v16, %v8311_v2  ;;  %v3266_v47 = vsel %vm1002_vm10, %v8311_v2, %v8312_v37  ;;  %3272 = vst.msk [vmem:[#allocation2 + $0x148] sm:$0xf] %vm886_vm0, %v8312_v37  ;;  %v3195_v42 = vsel %vm927_vm5, %v8222_v4, %v8286_v18  ;;  %v3196_v8 = vsel %vm927_vm5, %v8286_v18, %v8287_v19  ;;  %v3298_v0 = vld [vmem:[#allocation2 + $0xc8] sm:$0xff]  ;;  %v3297_v39 = vld [vmem:[#allocation2 + $0xc0] sm:$0xff]  ;;  %s11083_s21 = scalar_lea.vmem %s12220_s8, %s6615_s26 }
 0x1bf   : > { %3270 = vst [vmem:[#allocation2 + $0x138] sm:$0xf] %v3265_v7  ;;  %3271 = vst [vmem:[#allocation2 + $0x140] sm:$0xf] %v3266_v47  ;;  %v10727_v34 = vpop.permute.xlu1 %8319  ;;  %v8295_v17 = vpop.permute.xlu0 %8294  ;;  %8604 = vrot.lane.b32.xlu0 %v10713_v14, %s12258_s18  ;;  %v10779_v2 = vunpack.c.l.bf16 %v10761_v10 }
 0x1c0   : > { %3202 = vst.msk [vmem:[#allocation2 + $0x100] sm:$0xf0] %vm904_vm1, %v8287_v19  ;;  %3200 = vst [vmem:[#allocation2 + $0xf0] sm:$0xf0] %v3195_v42  ;;  %v8321_v36 = vunpack.i.l.bf16 %v10727_v34  ;;  %v8297_v32 = vunpack.i.h.bf16 %v8295_v17  ;;  %v8296_v26 = vunpack.i.l.bf16 %v8295_v17  ;;  %v10785_v19 = vpack.i.bf16 %v10603_v60, %v10722_v61 }
 0x1c1   : > { %3201 = vst [vmem:[#allocation2 + $0xf8] sm:$0xf0] %v3196_v8  ;;  %8609 = vrot.lane.b32.xlu1 %v10700_v53, %s12259_s16 }
 0x1c2   : > { %3592 = vst.msk [vmem:[#allocation2 + $0x10] sm:$0xf0] %vm904_vm1, %v8321_v36  ;;  %v3223_v9 = vsel %vm957_vm7, %v8242_v45, %v8296_v26  ;;  %v3224_v41 = vsel %vm957_vm7, %v8296_v26, %v8297_v32  ;;  %3230 = vst.msk [vmem:[#allocation2 + $0x118] sm:$0xf0] %vm904_vm1, %v8297_v32 }
 0x1c3   : > { %v3302_v58 = vld [vmem:[#allocation2 + $0xe8] sm:$0xff]  ;;  %v10746_v40 = vpop.permute.xlu1 %8329  ;;  %v3300_v24 = vld [vmem:[#allocation2 + $0xd8] sm:$0xff]  ;;  %3228 = vst [vmem:[#allocation2 + $0x108] sm:$0xf0] %v3223_v9  ;;  %3229 = vst [vmem:[#allocation2 + $0x110] sm:$0xf0] %v3224_v41  ;;  %v8305_v15 = vpop.permute.xlu0 %8304  ;;  %8614 = vrot.lane.b32.xlu0 %v10685_v48, %s12260_s30  ;;  %v10768_v48 = vunpack.c.l.bf16 %v4901_v29 }
 0x1c4   : > { %v7291_v28 = vpack.c.bf16 %v3302_v58, %v3299_v44  ;;  %3825 = vst.msk [vmem:[#allocation2 + $0xe8] sm:$0xf] %vm886_vm0, %v10351_v52  ;;  %v3301_v62 = vld [vmem:[#allocation2 + $0xe0] sm:$0xff]  ;;  %v8331_v27 = vunpack.i.l.bf16 %v10746_v40  ;;  %v7266_v49 = vpack.c.bf16 %v3300_v24, %v3297_v39  ;;  %3823 = vst [vmem:[#allocation2 + $0xd8] sm:$0xf] %v10347_v51  ;;  %v8262_v52 = vunpack.i.h.bf16 %v10623_v50 }
 0x1c5   : > { %v7264_v20 = vpack.c.bf16 %v3301_v62, %v3298_v0  ;;  %3824 = vst [vmem:[#allocation2 + $0xe0] sm:$0xf] %v10388_v12  ;;  %v8307_v25 = vunpack.i.h.bf16 %v8305_v15  ;;  %v8306_v59 = vunpack.i.l.bf16 %v8305_v15  ;;  %8619 = vrot.lane.b32.xlu1 %v10679_v33, %s12261_s25  ;;  %v1469_v51 = vunpack.c.0.s8 %v1468_v3  ;;  %v3314_v62 = vld [vmem:[#allocation2 + $0x148] sm:$0xf] }
 0x1c6   : > { %7292 = vmatpush3.bf16.msra.mxu1 %v7291_v28  ;;  %3606 = vst.msk [vmem:[#allocation2 + $0x28] sm:$0xf] %vm886_vm0, %v8331_v27  ;;  %v1471_v12 = vshrl.u32 %v1470_v23, 7  ;;  %v10800_v63 = vcombine.high %v10768_v48, %v10768_v48 }
 0x1c7   : > { %7265 = vmatprep.subr.bf16.mxu0 %v7264_v20  ;;  %7293 = vmatprep.subr.bf16.mxu1 %v9099_v21  ;;  %v3251_v50 = vsel %vm987_vm9, %v8262_v52, %v8306_v59  ;;  %v3252_v43 = vsel %vm987_vm9, %v8306_v59, %v8307_v25  ;;  %3258 = vst.msk [vmem:[#allocation2 + $0x130] sm:$0xf0] %vm904_vm1, %v8307_v25  ;;  %v10773_v33 = vpop.permute.xlu1 %8339  ;;  %v8315_v37 = vpop.permute.xlu0 %8314  ;;  %v3305_v42 = vld [vmem:[#allocation2 + $0x100] sm:$0xff]  ;;  %v3303_v0 = vld [vmem:[#allocation2 + $0xf0] sm:$0xff] }
 0x1c8   : > { %7267 = vmatpush1.bf16.msra.mxu0 %v7266_v49  ;;  %3256 = vst [vmem:[#allocation2 + $0x120] sm:$0xf0] %v3251_v50  ;;  %3257 = vst [vmem:[#allocation2 + $0x128] sm:$0xf0] %v3252_v43  ;;  %v8341_v16 = vunpack.i.l.bf16 %v10773_v33  ;;  %8624 = vrot.lane.b32.xlu0 %v10755_v6, %s12268_s1  ;;  %v8317_v1 = vunpack.i.h.bf16 %v8315_v37  ;;  %v8316_v4 = vunpack.i.l.bf16 %v8315_v37  ;;  %v10792_v47 = vsub.s32 %v1469_v51, %v1471_v12  ;;  %v3304_v17 = vld [vmem:[#allocation2 + $0xf8] sm:$0xff] }
 0x1c9   : > { %8629 = vrot.lane.b32.xlu1 %v10713_v14, %s12260_s30  ;;  %v10787_v18 = vld [vmem:[#allocation2 + $0x10] sm:$0xff]  ;;  %v1457_v7 = vpop.f32.mrb[0].mxu1  ;;  %v3308_v8 = vld [vmem:[#allocation2 + $0x118] sm:$0xff]  ;;  %v10796_v14 = vunpack.c.h.bf16 %v4901_v29  ;;  %v3313_v25 = vld [vmem:[#allocation2 + $0x140] sm:$0xf] }
 0x1ca   : > { %3620 = vst.msk [vmem:[#allocation2 + $0x28] sm:$0xf0] %vm904_vm1, %v8341_v16  ;;  %v3585_v57 = vsel %vm896_vm3, %v8316_v4, %v8317_v1  ;;  %v3586_v45 = vsel %vm896_vm3, %v8317_v1, %v8321_v36  ;;  %v1458_v32 = vadd.f32 %v1457_v7, %v9771_v54  ;;  %v7294_v44 = vpack.c.bf16 %v3308_v8, %v3305_v42  ;;  %v3307_v58 = vld [vmem:[#allocation2 + $0x110] sm:$0xff]  ;;  %v6874_v29 = vpop.f32.mrb[1].mxu1 }
 0x1cb   : > { %4243 = vst.msk [vmem:[#allocation2 + $0x10] sm:$0xf] %vm886_vm0, %v10500_v22  ;;  %v10807_v26 = vpop.permute.xlu1 %8349  ;;  %v3306_v22 = vld [vmem:[#allocation2 + $0x108] sm:$0xff]  ;;  %3590 = vst [vmem:[#allocation2] sm:$0xf0] %v3585_v57  ;;  %v8325_v3 = vpop.permute.xlu0 %8324  ;;  %v7268_v41 = vpack.c.bf16 %v3307_v58, %v3304_v17  ;;  %v10834_v37 = vpack.i.bf16 %v10796_v14, %v10800_v63 }
 0x1cc   : > { %3591 = vst [vmem:[#allocation2 + $0x8] sm:$0xf0] %v3586_v45  ;;  %v8351_v56 = vunpack.i.l.bf16 %v10807_v26  ;;  %v1386_v9 = vpop.f32.mrb[0].mxu0  ;;  %v7270_v28 = vpack.c.bf16 %v3306_v22, %v3303_v0  ;;  %8634 = vrot.lane.b32.xlu0 %v10700_v53, %s12261_s25  ;;  %v8327_v36 = vunpack.i.h.bf16 %v8325_v3  ;;  %v8326_v39 = vunpack.i.l.bf16 %v8325_v3  ;;  %7295 = vmatpush3.bf16.msra.mxu1 %v7294_v44 }
 0x1cd   : > { %8639 = vrot.lane.b32.xlu1 %v10785_v19, %s12263_s0  ;;  %v1388_v24 = vpop.f32.mrb[1].mxu0  ;;  %v1466_v15 = vcombine.high %v1458_v32, %v1458_v32  ;;  %v1387_v20 = vadd.f32 %v1386_v9, %v9771_v54  ;;  %7269 = vmatprep.subr.bf16.mxu0 %v7268_v41  ;;  %v1487_v1 = vrot.slane %v1458_v32, %v10792_v47 }
 0x1ce   : > { %3634 = vst.msk [vmem:[#allocation2 + $0x40] sm:$0xf] %vm886_vm0, %v8351_v56  ;;  %v1389_v49 = vadd.f32 %v1388_v24, %v9771_v54  ;;  %7296 = vmatprep.subr.bf16.mxu1 %v9099_v21  ;;  %v3311_v52 = vld [vmem:[#allocation2 + $0x130] sm:$0xff]  ;;  %v3599_v59 = vsel %vm912_vm4, %v8326_v39, %v8327_v36  ;;  %v3600_v51 = vsel %vm912_vm4, %v8327_v36, %v8331_v27  ;;  %v3312_v27 = vld [vmem:[#allocation2 + $0x138] sm:$0xf] }
 0x1cf   : > { %v10830_v12 = vpop.permute.xlu1 %8359  ;;  %7271 = vmatpush1.bf16.msra.mxu0 %v7270_v28  ;;  %v7297_v50 = vpack.c.bf16 %v3314_v62, %v3311_v52  ;;  %v3310_v43 = vld [vmem:[#allocation2 + $0x128] sm:$0xff]  ;;  %v3309_v23 = vld [vmem:[#allocation2 + $0x120] sm:$0xff]  ;;  %3604 = vst [vmem:[#allocation2 + $0x18] sm:$0xf] %v3599_v59  ;;  %3605 = vst [vmem:[#allocation2 + $0x20] sm:$0xf] %v3600_v51  ;;  %v8335_v8 = vpop.permute.xlu0 %8334  ;;  %v1494_v58 = vrot.slane %v1466_v15, %v10792_v47  ;;  %v4911_v36 = vcombine.low %v10768_v48, %v10768_v48 }
 0x1d0   : > { %v1464_v4 = vcombine.low %v1387_v20, %v1389_v49  ;;  %v1465_v7 = vcombine.high %v1387_v20, %v1389_v49  ;;  %v8361_v42 = vunpack.i.l.bf16 %v10830_v12  ;;  %8644 = vrot.lane.b32.xlu0 %v10755_v6, %s12264_s17  ;;  %v8337_v17 = vunpack.i.h.bf16 %v8335_v8 }
 0x1d1   : > { %v8336_v57 = vunpack.i.l.bf16 %v8335_v8  ;;  %8649 = vrot.lane.b32.xlu1 %v10785_v19, %s12257_s22  ;;  %7299 = vmatpush3.bf16.msk.msra.mxu1 %vm9730_vm13, %v7297_v50  ;;  %v7272_v45 = vpack.c.bf16 %v3313_v25, %v3310_v43  ;;  %v7275_v32 = vpack.c.bf16 %v3312_v27, %v3309_v23  ;;  %v3945_v44 = vld [vmem:[#allocation2 + $0x28] sm:$0xff]  ;;  %v4912_v23 = vcombine.low %v10796_v14, %v10796_v14 }
 0x1d2   : > { %v1473_v0 = vrot.slane %v1464_v4, %v10792_v47  ;;  %v1480_v22 = vrot.slane %v1465_v7, %v10792_v47  ;;  %3648 = vst.msk [vmem:[#allocation2 + $0x40] sm:$0xf0] %vm904_vm1, %v8361_v42  ;;  %7330 = vmatprep.subr.bf16.mxu1 %v9099_v21  ;;  %v7331_v29 = vpack.c.bf16 %v3945_v44, %v10787_v18  ;;  %v10864_v62 = vld [vmem:[#allocation2] sm:$0xff] }
 0x1d3   : > { %v3613_v3 = vsel %vm927_vm5, %v8336_v57, %v8337_v17  ;;  %v3614_v9 = vsel %vm927_vm5, %v8337_v17, %v8341_v16  ;;  %7274 = vmatprep.subr.msk.bf16.mxu0 %vm9730_vm13, %v7272_v45  ;;  %v10860_v41 = vpop.permute.xlu1 %8369  ;;  %v10862_v28 = vld [vmem:[#allocation2 + $0x8] sm:$0xff]  ;;  %v8345_v16 = vpop.permute.xlu0 %8344  ;;  %4241 = vst [vmem:[#allocation2] sm:$0xf] %v10354_v11  ;;  %v5037_v57 = vcombine.high %v10779_v2, %v10779_v2 }
 0x1d4   : > { %v1495_v39 = vcombine.low %v1473_v0, %v1487_v1  ;;  %v1496_v18 = vcombine.high %v1473_v0, %v1487_v1  ;;  %v1497_v24 = vcombine.low %v1480_v22, %v1494_v58  ;;  %v1498_v15 = vcombine.high %v1480_v22, %v1494_v58  ;;  %3618 = vst [vmem:[#allocation2 + $0x18] sm:$0xf0] %v3613_v3 }
 0x1d5   : > { %3619 = vst [vmem:[#allocation2 + $0x20] sm:$0xf0] %v3614_v9  ;;  %7277 = vmatpush1.bf16.msk.msra.mxu0 %vm9730_vm13, %v7275_v32  ;;  %4242 = vst [vmem:[#allocation2 + $0x8] sm:$0xf] %v10526_v46  ;;  %v8371_v20 = vunpack.i.l.bf16 %v10860_v41  ;;  %v8347_v49 = vunpack.i.h.bf16 %v8345_v16  ;;  %v8346_v52 = vunpack.i.l.bf16 %v8345_v16  ;;  %6966 = vmatmul.mubr.msk.f32.vlgmr.msra.gmra.mrb[6].mxu1 %vm957_vm7, %v10461_v5  ;;  %v10942_v0 = vpack.i.bf16 %v4912_v23, %v10768_v48 }
 0x1d6   : > { %8659 = vrot.lane.b32.xlu1 %v10785_v19, %s12259_s16  ;;  %v1505_v25 = vrot.slane %v1495_v39, %v10792_v47  ;;  %v1512_v59 = vrot.slane %v1497_v24, %v10792_v47  ;;  %v1519_v51 = vrot.slane %v1496_v18, %v10792_v47  ;;  %v1526_v46 = vrot.slane %v1498_v15, %v10792_v47 }
 0x1d7   : > { %7332 = vmatpush3.bf16.msra.mxu1 %v7331_v29  ;;  %3662 = vst.msk [vmem:[#allocation2 + $0x58] sm:$0xf] %vm886_vm0, %v8371_v20  ;;  %v3627_v11 = vsel %vm942_vm6, %v8346_v52, %v8347_v49  ;;  %v3628_v50 = vsel %vm942_vm6, %v8347_v49, %v8351_v56  ;;  %v10890_v43 = vpop.permute.xlu1 %8379  ;;  %8654 = vrot.lane.b32.xlu0 %v10755_v6, %s12258_s18  ;;  %v8332_v24 = vunpack.i.h.bf16 %v10746_v40 }
 0x1d8   : > { %6658 = vmatmul.mubr.msk.f32.vlgmr.msra.gmra.mrb[6].mxu0 %vm957_vm7, %v10461_v5  ;;  %v1527_v1 = vcombine.high %v1505_v25, %v1505_v25  ;;  %v1528_v4 = vcombine.high %v1512_v59, %v1512_v59  ;;  %v1529_v7 = vcombine.high %v1519_v51, %v1519_v51  ;;  %v1530_v8 = vcombine.high %v1526_v46, %v1526_v46  ;;  %v8355_v5 = vpop.permute.xlu0 %8354 }
 0x1d9   : > { %1543 = vst.msk [vmem:[%s10897_s20] ss:$8 sm:$0x7] %vm10821_vm14, %v1505_v25  ;;  %6623 = vst.msk [vmem:[%s10897_s20 + $0x18] ss:$8 sm:$0x7] %vm10821_vm14, %v1519_v51  ;;  %7333 = vmatprep.subr.bf16.mxu1 %v9099_v21  ;;  %v8381_v56 = vunpack.i.l.bf16 %v10890_v43  ;;  %v8357_v27 = vunpack.i.h.bf16 %v8355_v5  ;;  %v8356_v17 = vunpack.i.l.bf16 %v8355_v5  ;;  %6996 = vmatprep.mubr.msk.f32.mxu1 %vm9102_vm2, %v9103_v38  ;;  %v10973_v23 = vpack.i.bf16 %v10779_v2, %v10768_v48 }
 0x1da   : > { %6626 = vst.msk [vmem:[%s10897_s20 + $0x60] ss:$8 sm:$0x7] %vm10821_vm14, %v1512_v59  ;;  %6627 = vst.msk [vmem:[%s10897_s20 + $0x78] ss:$8 sm:$0x7] %vm10821_vm14, %v1526_v46  ;;  %8669 = vrot.lane.b32.xlu1 %v10785_v19, %s12261_s25  ;;  %4055 = vmatprep.mubr.f32.mxu0 %v9103_v38 }
 0x1db   : > { %3632 = vst [vmem:[#allocation2 + $0x30] sm:$0xf] %v3627_v11  ;;  %3633 = vst [vmem:[#allocation2 + $0x38] sm:$0xf] %v3628_v50  ;;  %v3641_v19 = vsel %vm957_vm7, %v8356_v17, %v8357_v27  ;;  %v3642_v45 = vsel %vm957_vm7, %v8357_v27, %v8361_v42  ;;  %v10937_v32 = vpop.permute.xlu1 %8389  ;;  %v3943_v58 = vld [vmem:[#allocation2 + $0x18] sm:$0xff]  ;;  %8664 = vrot.lane.b32.xlu0 %v10755_v6, %s12260_s30  ;;  %v10952_v6 = vpack.i.bf16 %v5037_v57, %v4911_v36  ;;  %v3948_v59 = vld [vmem:[#allocation2 + $0x40] sm:$0xff] }
 0x1dc   : > { %6624 = vst.msk [vmem:[%s10897_s20 + $0x30] ss:$8 sm:$0x7] %vm10821_vm14, %v1527_v1  ;;  %6625 = vst.msk [vmem:[%s10897_s20 + $0x48] ss:$8 sm:$0x7] %vm10821_vm14, %v1529_v7  ;;  %v8391_v22 = vunpack.i.l.bf16 %v10937_v32  ;;  %v8365_v29 = vpop.permute.xlu0 %8364  ;;  %v7302_v9 = vpack.c.bf16 %v3943_v58, %v10864_v62  ;;  %v8352_v1 = vunpack.i.h.bf16 %v10807_v26 }
 0x1dd   : > { %6628 = vst.msk [vmem:[%s10897_s20 + $0x90] ss:$8 sm:$0x7] %vm10821_vm14, %v1528_v4  ;;  %6629 = vst.msk [vmem:[%s10897_s20 + $0xa8] ss:$8 sm:$0x7] %vm10821_vm14, %v1530_v8  ;;  %v8367_v42 = vunpack.i.h.bf16 %v8365_v29  ;;  %v8366_v39 = vunpack.i.l.bf16 %v8365_v29 }
 0x1de   : > { %3676 = vst.msk [vmem:[#allocation2 + $0x58] sm:$0xf0] %vm904_vm1, %v8381_v56  ;;  %v3944_v44 = vld [vmem:[#allocation2 + $0x20] sm:$0xff]  ;;  %3646 = vst [vmem:[#allocation2 + $0x30] sm:$0xf0] %v3641_v19  ;;  %8679 = vrot.lane.b32.xlu1 %v10834_v37, %s12263_s0 }
 0x1df   : > { %3647 = vst [vmem:[#allocation2 + $0x38] sm:$0xf0] %v3642_v45  ;;  %v7300_v3 = vpack.c.bf16 %v3944_v44, %v10862_v28  ;;  %3690 = vst.msk [vmem:[#allocation2 + $0x70] sm:$0xf] %vm886_vm0, %v8391_v22  ;;  %v3655_v18 = vsel %vm972_vm8, %v8366_v39, %v8367_v42  ;;  %v3656_v28 = vsel %vm972_vm8, %v8367_v42, %v8371_v20  ;;  %v8400_v62 = vpop.permute.xlu1 %8399  ;;  %8674 = vrot.lane.b32.xlu0 %v10942_v0, %s12268_s1 }
 0x1e0   : > { %3660 = vst [vmem:[#allocation2 + $0x48] sm:$0xf] %v3655_v18  ;;  %3661 = vst [vmem:[#allocation2 + $0x50] sm:$0xf] %v3656_v28  ;;  %v8402_v36 = vunpack.i.h.bf16 %v8400_v62  ;;  %v8401_v15 = vunpack.i.l.bf16 %v8400_v62  ;;  %v8375_v16 = vpop.permute.xlu0 %8374  ;;  %v8372_v44 = vunpack.i.h.bf16 %v10860_v41  ;;  %v8392_v18 = vunpack.i.h.bf16 %v10937_v32 }
 0x1e1   : > { %7301 = vmatprep.subr.bf16.mxu0 %v7300_v3  ;;  %v8377_v49 = vunpack.i.h.bf16 %v8375_v16  ;;  %v8376_v52 = vunpack.i.l.bf16 %v8375_v16 }
 0x1e2   : > { %7303 = vmatpush1.bf16.msra.mxu0 %v7302_v9  ;;  %8689 = vrot.lane.b32.xlu1 %v10952_v6, %s12268_s1  ;;  %v3724_v25 = vsel %vm912_vm4, %v8332_v24, %v8401_v15  ;;  %v3725_v20 = vsel %vm912_vm4, %v8401_v15, %v8402_v36  ;;  %3731 = vst.msk [vmem:[#allocation2 + $0x88] sm:$0xf0] %vm904_vm1, %v8402_v36 }
 0x1e3   : > { %3729 = vst [vmem:[#allocation2 + $0x78] sm:$0xf0] %v3724_v25  ;;  %3730 = vst [vmem:[#allocation2 + $0x80] sm:$0xf0] %v3725_v20  ;;  %v3669_v40 = vsel %vm987_vm9, %v8376_v52, %v8377_v49  ;;  %v3670_v46 = vsel %vm987_vm9, %v8377_v49, %v8381_v56  ;;  %v8410_v11 = vpop.permute.xlu1 %8409  ;;  %8684 = vrot.lane.b32.xlu0 %v10942_v0, %s12264_s17  ;;  %v8342_v20 = vunpack.i.h.bf16 %v10773_v33 }
 0x1e4   : > { %3674 = vst [vmem:[#allocation2 + $0x48] sm:$0xf0] %v3669_v40  ;;  %3675 = vst [vmem:[#allocation2 + $0x50] sm:$0xf0] %v3670_v46  ;;  %v8412_v4 = vunpack.i.h.bf16 %v8410_v11  ;;  %v8411_v7 = vunpack.i.l.bf16 %v8410_v11  ;;  %v8385_v8 = vpop.permute.xlu0 %8384 }
 0x1e5   : > { %v3951_v51 = vld [vmem:[#allocation2 + $0x58] sm:$0xff]  ;;  %v8387_v5 = vunpack.i.h.bf16 %v8385_v8  ;;  %v8386_v27 = vunpack.i.l.bf16 %v8385_v8  ;;  %v3946_v36 = vld [vmem:[#allocation2 + $0x30] sm:$0xff]  ;;  %v8362_v8 = vunpack.i.h.bf16 %v10830_v12 }
 0x1e6   : > { %v7334_v50 = vpack.c.bf16 %v3951_v51, %v3948_v59  ;;  %8699 = vrot.lane.b32.xlu1 %v10952_v6, %s12264_s17  ;;  %v10978_v56 = vld [vmem:[#allocation2 + $0x70] sm:$0xff]  ;;  %v3752_v17 = vsel %vm942_vm6, %v8352_v1, %v8411_v7  ;;  %v3753_v57 = vsel %vm942_vm6, %v8411_v7, %v8412_v4  ;;  %3759 = vst.msk [vmem:[#allocation2 + $0xa0] sm:$0xf0] %vm904_vm1, %v8412_v4  ;;  %v3947_v39 = vld [vmem:[#allocation2 + $0x38] sm:$0xff] }
 0x1e7   : > { %4369 = vst.msk [vmem:[#allocation2 + $0x70] sm:$0xf0] %vm904_vm1, %v10644_v30  ;;  %3757 = vst [vmem:[#allocation2 + $0x90] sm:$0xf0] %v3752_v17  ;;  %v3683_v26 = vsel %vm1002_vm10, %v8386_v27, %v8387_v5  ;;  %v3684_v19 = vsel %vm1002_vm10, %v8387_v5, %v8391_v22  ;;  %v8420_v45 = vpop.permute.xlu1 %8419  ;;  %8694 = vrot.lane.b32.xlu0 %v10973_v23, %s12263_s0  ;;  %v8322_v30 = vunpack.i.h.bf16 %v10727_v34  ;;  %v5027_v17 = vunpack.c.h.bf16 %v10761_v10 }
 0x1e8   : > { %7335 = vmatpush3.bf16.msra.mxu1 %v7334_v50  ;;  %3758 = vst [vmem:[#allocation2 + $0x98] sm:$0xf0] %v3753_v57  ;;  %3688 = vst [vmem:[#allocation2 + $0x60] sm:$0xf] %v3683_v26  ;;  %v8422_v58 = vunpack.i.h.bf16 %v8420_v45  ;;  %v8421_v29 = vunpack.i.l.bf16 %v8420_v45  ;;  %v8395_v3 = vpop.permute.xlu0 %8394 }
 0x1e9   : > { %7336 = vmatprep.subr.bf16.mxu1 %v9099_v21  ;;  %3689 = vst [vmem:[#allocation2 + $0x68] sm:$0xf] %v3684_v19  ;;  %v8397_v9 = vunpack.i.h.bf16 %v8395_v3  ;;  %v8396_v22 = vunpack.i.l.bf16 %v8395_v3  ;;  %v8382_v3 = vunpack.i.h.bf16 %v10890_v43 }
 0x1ea   : > { %8709 = vrot.lane.b32.xlu1 %v10942_v0, %s12258_s18  ;;  %v3780_v42 = vsel %vm972_vm8, %v8372_v44, %v8421_v29  ;;  %v3781_v41 = vsel %vm972_vm8, %v8421_v29, %v8422_v58  ;;  %3787 = vst.msk [vmem:[#allocation2 + $0xb8] sm:$0xf0] %vm904_vm1, %v8422_v58 }
 0x1eb   : > { %3785 = vst [vmem:[#allocation2 + $0xa8] sm:$0xf0] %v3780_v42  ;;  %3786 = vst [vmem:[#allocation2 + $0xb0] sm:$0xf0] %v3781_v41  ;;  %v3710_v34 = vsel %vm896_vm3, %v8322_v30, %v8396_v22  ;;  %v3711_v28 = vsel %vm896_vm3, %v8396_v22, %v8397_v9  ;;  %v8430_v62 = vpop.permute.xlu1 %8429  ;;  %v3950_v24 = vld [vmem:[#allocation2 + $0x50] sm:$0xff]  ;;  %v3949_v15 = vld [vmem:[#allocation2 + $0x48] sm:$0xff]  ;;  %8704 = vrot.lane.b32.xlu0 %v10834_v37, %s12257_s22 }
 0x1ec   : > { %3717 = vst.msk [vmem:[#allocation2 + $0x88] sm:$0xf] %vm886_vm0, %v8397_v9  ;;  %3715 = vst [vmem:[#allocation2 + $0x78] sm:$0xf] %v3710_v34  ;;  %v8432_v32 = vunpack.i.h.bf16 %v8430_v62  ;;  %v8431_v16 = vunpack.i.l.bf16 %v8430_v62  ;;  %v8405_v49 = vpop.permute.xlu0 %8404  ;;  %v7304_v52 = vpack.c.bf16 %v3950_v24, %v3947_v39  ;;  %v7306_v25 = vpack.c.bf16 %v3949_v15, %v3946_v36 }
 0x1ed   : > { %3716 = vst [vmem:[#allocation2 + $0x80] sm:$0xf] %v3711_v28  ;;  %v8407_v59 = vunpack.i.h.bf16 %v8405_v49  ;;  %v8406_v51 = vunpack.i.l.bf16 %v8405_v49  ;;  %v11073_v34 = vcombine.low %v10779_v2, %v10779_v2  ;;  %v11075_v28 = vcombine.low %v5027_v17, %v5027_v17 }
 0x1ee   : > { %8719 = vrot.lane.b32.xlu1 %v10942_v0, %s12260_s30  ;;  %v3808_v40 = vsel %vm1002_vm10, %v8392_v18, %v8431_v16  ;;  %v3809_v46 = vsel %vm1002_vm10, %v8431_v16, %v8432_v32  ;;  %3815 = vst.msk [vmem:[#allocation2 + $0xd0] sm:$0xf0] %vm904_vm1, %v8432_v32  ;;  %7305 = vmatprep.subr.bf16.mxu0 %v7304_v52 }
 0x1ef   : > { %3813 = vst [vmem:[#allocation2 + $0xc0] sm:$0xf0] %v3808_v40  ;;  %3814 = vst [vmem:[#allocation2 + $0xc8] sm:$0xf0] %v3809_v46  ;;  %v3738_v11 = vsel %vm927_vm5, %v8342_v20, %v8406_v51  ;;  %v3739_v50 = vsel %vm927_vm5, %v8406_v51, %v8407_v59  ;;  %v11025_v33 = vpop.permute.xlu1 %8439  ;;  %7307 = vmatpush1.bf16.msra.mxu0 %v7306_v25  ;;  %8714 = vrot.lane.b32.xlu0 %v10834_v37, %s12259_s16  ;;  %v3952_v1 = vld [vmem:[#allocation2 + $0x60] sm:$0xff] }
 0x1f0   : > { %3745 = vst.msk [vmem:[#allocation2 + $0xa0] sm:$0xf] %vm886_vm0, %v8407_v59  ;;  %v3953_v0 = vld [vmem:[#allocation2 + $0x68] sm:$0xff]  ;;  %3743 = vst [vmem:[#allocation2 + $0x90] sm:$0xf] %v3738_v11  ;;  %v8441_v4 = vunpack.i.l.bf16 %v11025_v33  ;;  %v8415_v7 = vpop.permute.xlu0 %8414 }
 0x1f1   : > { %3744 = vst [vmem:[#allocation2 + $0x98] sm:$0xf] %v3739_v50  ;;  %4368 = vst [vmem:[#allocation2 + $0x68] sm:$0xf0] %v10591_v13  ;;  %v8417_v5 = vunpack.i.h.bf16 %v8415_v7  ;;  %v8416_v27 = vunpack.i.l.bf16 %v8415_v7 }
 0x1f2   : > { %4367 = vst [vmem:[#allocation2 + $0x60] sm:$0xf0] %v10638_v35  ;;  %8729 = vrot.lane.b32.xlu1 %v10952_v6, %s12258_s18  ;;  %3841 = vst.msk [vmem:[#allocation2 + $0xe8] sm:$0xf0] %vm904_vm1, %v8441_v4 }
 0x1f3   : > { %v3957_v57 = vld [vmem:[#allocation2 + $0x88] sm:$0xff]  ;;  %v3766_v26 = vsel %vm957_vm7, %v8362_v8, %v8416_v27  ;;  %v3767_v13 = vsel %vm957_vm7, %v8416_v27, %v8417_v5  ;;  %3773 = vst.msk [vmem:[#allocation2 + $0xb8] sm:$0xf] %vm886_vm0, %v8417_v5  ;;  %v11041_v35 = vpop.permute.xlu1 %8449  ;;  %v3955_v45 = vld [vmem:[#allocation2 + $0x78] sm:$0xff]  ;;  %8724 = vrot.lane.b32.xlu0 %v10973_v23, %s12257_s22 }
 0x1f4   : > { %v7337_v12 = vpack.c.bf16 %v3957_v57, %v10978_v56  ;;  %v3956_v19 = vld [vmem:[#allocation2 + $0x80] sm:$0xff]  ;;  %3771 = vst [vmem:[#allocation2 + $0xa8] sm:$0xf] %v3766_v26  ;;  %3772 = vst [vmem:[#allocation2 + $0xb0] sm:$0xf] %v3767_v13  ;;  %v8451_v10 = vunpack.i.l.bf16 %v11041_v35  ;;  %v8425_v44 = vpop.permute.xlu0 %8424  ;;  %v7310_v29 = vpack.c.bf16 %v3955_v45, %v3952_v1  ;;  %v11054_v56 = vpack.i.bf16 %v10779_v2, %v5027_v17 }
 0x1f5   : > { %v7308_v58 = vpack.c.bf16 %v3956_v19, %v3953_v0  ;;  %v8427_v30 = vunpack.i.h.bf16 %v8425_v44  ;;  %v8426_v9 = vunpack.i.l.bf16 %v8425_v44  ;;  %v5150_v1 = vld [vmem:[%s11083_s21] sm:$0x3f] }
 0x1f6   : > { %8739 = vrot.lane.b32.xlu1 %v10952_v6, %s12260_s30  ;;  %7338 = vmatpush3.bf16.msra.mxu1 %v7337_v12  ;;  %3855 = vst.msk [vmem:[#allocation2 + $0x100] sm:$0xf] %vm886_vm0, %v8451_v10  ;;  %v11110_v17 = vunpack.c.l.bf16 %v5150_v1  ;;  %v11117_v12 = vld [vmem:[%s10567_s29] sm:$0x3f]  ;;  %s863_s29 = sadd.s32 9, %s9231_s19 }
 0x1f7   : > { %7309 = vmatprep.subr.bf16.mxu0 %v7308_v58  ;;  %7339 = vmatprep.subr.bf16.mxu1 %v9099_v21  ;;  %v3794_v22 = vsel %vm987_vm9, %v8382_v3, %v8426_v9  ;;  %v3795_v43 = vsel %vm987_vm9, %v8426_v9, %v8427_v30  ;;  %3801 = vst.msk [vmem:[#allocation2 + $0xd0] sm:$0xf] %vm886_vm0, %v8427_v30  ;;  %v11063_v42 = vpop.permute.xlu1 %8459  ;;  %v3960_v24 = vld [vmem:[#allocation2 + $0xa0] sm:$0xff]  ;;  %v3958_v20 = vld [vmem:[#allocation2 + $0x90] sm:$0xff]  ;;  %p11241_p6 = scmp.lt.s32.totalorder %s863_s29, 17 }
 0x1f8   : > { %7311 = vmatpush1.bf16.msra.mxu0 %v7310_v29  ;;  %8734 = vrot.lane.b32.xlu0 %v10973_v23, %s12259_s16  ;;  %3799 = vst [vmem:[#allocation2 + $0xc0] sm:$0xf] %v3794_v22  ;;  %3800 = vst [vmem:[#allocation2 + $0xc8] sm:$0xf] %v3795_v43  ;;  %v8461_v6 = vunpack.i.l.bf16 %v11063_v42  ;;  %v8435_v41 = vpop.permute.xlu0 %8434  ;;  %v3959_v15 = vld [vmem:[#allocation2 + $0x98] sm:$0xff]  ;;  %v5160_v43 = vcombine.low %v11110_v17, %v11110_v17 }
 0x1f9   : > { %v8437_v39 = vunpack.i.h.bf16 %v8435_v41  ;;  %v8436_v18 = vunpack.i.l.bf16 %v8435_v41  ;;  %v3969_v62 = vld [vmem:[#allocation2 + $0xe8] sm:$0xff]  ;;  %s12304_s29 = smov (!%p11241_p6, %s863_s29), 17 }
 0x1fa   : > { %8749 = vrot.lane.b32.xlu1 %v11054_v56, %s12268_s1  ;;  %3869 = vst.msk [vmem:[#allocation2 + $0x100] sm:$0xf0] %vm904_vm1, %v8461_v6  ;;  %v3963_v36 = vld [vmem:[#allocation2 + $0xb8] sm:$0xff]  ;;  %s7519_s19 = smul.u32 3, %s12304_s29 }
 0x1fb   : > { %4492 = vst.msk [vmem:[#allocation2 + $0xe8] sm:$0xf] %vm886_vm0, %v10722_v61  ;;  %v3834_v32 = vsel %vm896_vm3, %v8436_v18, %v8437_v39  ;;  %v3835_v16 = vsel %vm896_vm3, %v8437_v39, %v8441_v4  ;;  %v11087_v49 = vpop.permute.xlu1 %8469  ;;  %v7340_v52 = vpack.c.bf16 %v3963_v36, %v3960_v24  ;;  %v3962_v25 = vld [vmem:[#allocation2 + $0xb0] sm:$0xff]  ;;  %v3961_v59 = vld [vmem:[#allocation2 + $0xa8] sm:$0xff]  ;;  %v11093_v61 = vpack.i.bf16 %v11073_v34, %v11075_v28 }
 0x1fc   : > { %8744 = vrot.lane.b32.xlu0 %v10834_v37, %s12261_s25  ;;  %3839 = vst [vmem:[#allocation2 + $0xd8] sm:$0xf0] %v3834_v32  ;;  %3840 = vst [vmem:[#allocation2 + $0xe0] sm:$0xf0] %v3835_v16  ;;  %v8471_v51 = vunpack.i.l.bf16 %v11087_v49  ;;  %v8445_v40 = vpop.permute.xlu0 %8444  ;;  %v7312_v46 = vpack.c.bf16 %v3962_v25, %v3959_v15  ;;  %v7314_v11 = vpack.c.bf16 %v3961_v59, %v3958_v20  ;;  %v11133_v39 = vunpack.c.l.bf16 %v11117_v12  ;;  %s11369_s26 = sadd.s32 %s7519_s19, %s9237_s13 }
 0x1fd   : > { %v8447_v50 = vunpack.i.h.bf16 %v8445_v40  ;;  %v8446_v0 = vunpack.i.l.bf16 %v8445_v40  ;;  %7341 = vmatpush3.bf16.msra.mxu1 %v7340_v52  ;;  %v11135_v18 = vunpack.c.h.bf16 %v5150_v1  ;;  %s6617_s13 = sshll.u32 %s11369_s26, 1 }
 0x1fe   : > { %8759 = vrot.lane.b32.xlu1 %v10973_v23, %s12261_s25  ;;  %3883 = vst.msk [vmem:[#allocation2 + $0x118] sm:$0xf] %vm886_vm0, %v8471_v51  ;;  %7313 = vmatprep.subr.bf16.mxu0 %v7312_v46  ;;  %v3966_v37 = vld [vmem:[#allocation2 + $0xd0] sm:$0xff]  ;;  %v11148_v25 = vpack.i.bf16 %v11133_v39, %v5160_v43  ;;  %s872_s15 = scalar_lea.vmem %s12221_s9, %s6617_s13 }
 0x1ff   : > { %7342 = vmatprep.subr.bf16.mxu1 %v9099_v21  ;;  %v3848_v4 = vsel %vm912_vm4, %v8446_v0, %v8447_v50  ;;  %v3849_v7 = vsel %vm912_vm4, %v8447_v50, %v8451_v10  ;;  %v11105_v8 = vpop.permute.xlu1 %8479  ;;  %7315 = vmatpush1.bf16.msra.mxu0 %v7314_v11  ;;  %v7343_v5 = vpack.c.bf16 %v3969_v62, %v3966_v37  ;;  %v3965_v13 = vld [vmem:[#allocation2 + $0xc8] sm:$0xff]  ;;  %v3964_v58 = vld [vmem:[#allocation2 + $0xc0] sm:$0xff] }
 0x200   : > { %8754 = vrot.lane.b32.xlu0 %v11093_v61, %s12263_s0  ;;  %3853 = vst [vmem:[#allocation2 + $0xf0] sm:$0xf] %v3848_v4  ;;  %3854 = vst [vmem:[#allocation2 + $0xf8] sm:$0xf] %v3849_v7  ;;  %v8481_v23 = vunpack.i.l.bf16 %v11105_v8  ;;  %v8455_v27 = vpop.permute.xlu0 %8454  ;;  %v5161_v20 = vcombine.low %v11135_v18, %v11135_v18  ;;  %v11164_v11 = vcombine.high %v11110_v17, %v11110_v17 }
 0x201   : > { %v8457_v57 = vunpack.i.h.bf16 %v8455_v27  ;;  %v8456_v26 = vunpack.i.l.bf16 %v8455_v27  ;;  %7344 = vmatpush3.bf16.msra.mxu1 %v7343_v5  ;;  %v3972_v16 = vld [vmem:[#allocation2 + $0x100] sm:$0xff] }
 0x202   : > { %8769 = vrot.lane.b32.xlu1 %v11093_v61, %s12257_s22  ;;  %3897 = vst.msk [vmem:[#allocation2 + $0x118] sm:$0xf0] %vm904_vm1, %v8481_v23  ;;  %7345 = vmatprep.subr.bf16.mxu1 %v9099_v21  ;;  %v11177_v5 = vpack.i.bf16 %v11135_v18, %v11164_v11 }
 0x203   : > { %v3862_v19 = vsel %vm927_vm5, %v8456_v26, %v8457_v57  ;;  %v3863_v45 = vsel %vm927_vm5, %v8457_v57, %v8461_v6  ;;  %v11121_v10 = vpop.permute.xlu1 %8489  ;;  %v3968_v44 = vld [vmem:[#allocation2 + $0xe0] sm:$0xff]  ;;  %v3967_v29 = vld [vmem:[#allocation2 + $0xd8] sm:$0xff] }
 0x204   : > { %8764 = vrot.lane.b32.xlu0 %v11054_v56, %s12264_s17  ;;  %3867 = vst [vmem:[#allocation2 + $0xf0] sm:$0xf0] %v3862_v19  ;;  %3868 = vst [vmem:[#allocation2 + $0xf8] sm:$0xf0] %v3863_v45  ;;  %v8491_v3 = vunpack.i.l.bf16 %v11121_v10  ;;  %v8465_v30 = vpop.permute.xlu0 %8464  ;;  %v7316_v9 = vpack.c.bf16 %v3968_v44, %v3965_v13  ;;  %v7318_v22 = vpack.c.bf16 %v3967_v29, %v3964_v58 }
 0x205   : > { %4491 = vst [vmem:[#allocation2 + $0xe0] sm:$0xf] %v10648_v31  ;;  %4490 = vst [vmem:[#allocation2 + $0xd8] sm:$0xf] %v10603_v60  ;;  %v8467_v6 = vunpack.i.h.bf16 %v8465_v30  ;;  %v8466_v41 = vunpack.i.l.bf16 %v8465_v30 }
 0x206   : > { %8779 = vrot.lane.b32.xlu1 %v11093_v61, %s12259_s16  ;;  %3911 = vst.msk [vmem:[#allocation2 + $0x130] sm:$0xf] %vm886_vm0, %v8491_v3  ;;  %7317 = vmatprep.subr.bf16.mxu0 %v7316_v9 }
 0x207   : > { %v3876_v31 = vsel %vm942_vm6, %v8466_v41, %v8467_v6  ;;  %v3877_v60 = vsel %vm942_vm6, %v8467_v6, %v8471_v51  ;;  %v11140_v62 = vpop.permute.xlu1 %8499  ;;  %7319 = vmatpush1.bf16.msra.mxu0 %v7318_v22 }
 0x208   : > { %8774 = vrot.lane.b32.xlu0 %v11054_v56, %s12258_s18  ;;  %3881 = vst [vmem:[#allocation2 + $0x108] sm:$0xf] %v3876_v31  ;;  %3882 = vst [vmem:[#allocation2 + $0x110] sm:$0xf] %v3877_v60  ;;  %v8501_v24 = vunpack.i.l.bf16 %v11140_v62  ;;  %v8475_v36 = vpop.permute.xlu0 %8474 }
 0x209   : > { %v8477_v15 = vunpack.i.h.bf16 %v8475_v36  ;;  %v8476_v32 = vunpack.i.l.bf16 %v8475_v36  ;;  %v3975_v52 = vld [vmem:[#allocation2 + $0x118] sm:$0xff] }
 0x20a   : > { %8789 = vrot.lane.b32.xlu1 %v11093_v61, %s12261_s25  ;;  %3925 = vst.msk [vmem:[#allocation2 + $0x130] sm:$0xf0] %vm904_vm1, %v8501_v24  ;;  %v7346_v59 = vpack.c.bf16 %v3975_v52, %v3972_v16  ;;  %v11160_v61 = vpack.i.bf16 %v5161_v20, %v11110_v17 }
 0x20b   : > { %v3890_v51 = vsel %vm957_vm7, %v8476_v32, %v8477_v15  ;;  %v3891_v40 = vsel %vm957_vm7, %v8477_v15, %v8481_v23  ;;  %v11155_v46 = vpop.permute.xlu1 %8509  ;;  %v8452_v23 = vunpack.i.h.bf16 %v11041_v35  ;;  %v3971_v58 = vld [vmem:[#allocation2 + $0xf8] sm:$0xff]  ;;  %v3970_v29 = vld [vmem:[#allocation2 + $0xf0] sm:$0xff]  ;;  %v11187_v35 = vcombine.high %v11133_v39, %v11133_v39 }
 0x20c   : > { %8784 = vrot.lane.b32.xlu0 %v11054_v56, %s12260_s30  ;;  %3895 = vst [vmem:[#allocation2 + $0x108] sm:$0xf0] %v3890_v51  ;;  %3896 = vst [vmem:[#allocation2 + $0x110] sm:$0xf0] %v3891_v40  ;;  %v8511_v50 = vunpack.i.l.bf16 %v11155_v46  ;;  %v8485_v0 = vpop.permute.xlu0 %8484  ;;  %7347 = vmatpush3.bf16.msra.mxu1 %v7346_v59 }
 0x20d   : > { %v8487_v1 = vunpack.i.h.bf16 %v8485_v0  ;;  %v8486_v37 = vunpack.i.l.bf16 %v8485_v0  ;;  %7348 = vmatprep.subr.bf16.mxu1 %v9099_v21  ;;  %v11201_v51 = vpack.i.bf16 %v11187_v35, %v11110_v17 }
 0x20e   : > { %8799 = vrot.lane.b32.xlu1 %v11148_v25, %s12268_s1  ;;  %3939 = vst.msk [vmem:[#allocation2 + $0x148] sm:$0xf] %vm886_vm0, %v8511_v50 }
 0x20f   : > { %v3904_v56 = vsel %vm972_vm8, %v8486_v37, %v8487_v1  ;;  %v3905_v4 = vsel %vm972_vm8, %v8487_v1, %v8491_v3  ;;  %v8520_v7 = vpop.permute.xlu1 %8519  ;;  %v8472_v3 = vunpack.i.h.bf16 %v11087_v49 }
 0x210   : > { %8794 = vrot.lane.b32.xlu0 %v11160_v61, %s12268_s1  ;;  %3909 = vst [vmem:[#allocation2 + $0x120] sm:$0xf] %v3904_v56  ;;  %3910 = vst [vmem:[#allocation2 + $0x128] sm:$0xf] %v3905_v4  ;;  %v8522_v27 = vunpack.i.h.bf16 %v8520_v7  ;;  %v8521_v57 = vunpack.i.l.bf16 %v8520_v7  ;;  %v8495_v26 = vpop.permute.xlu0 %8494  ;;  %v8492_v56 = vunpack.i.h.bf16 %v11121_v10 }
 0x211   : > { %v8497_v13 = vunpack.i.h.bf16 %v8495_v26  ;;  %v8496_v19 = vunpack.i.l.bf16 %v8495_v26  ;;  %v3978_v41 = vld [vmem:[#allocation2 + $0x130] sm:$0xff] }
 0x212   : > { %8809 = vrot.lane.b32.xlu1 %v11160_v61, %s12264_s17  ;;  %v4266_v45 = vsel %vm912_vm4, %v8452_v23, %v8521_v57  ;;  %v4267_v44 = vsel %vm912_vm4, %v8521_v57, %v8522_v27  ;;  %4273 = vst.msk [vmem:[#allocation2 + $0x28] sm:$0xf] %vm886_vm0, %v8522_v27  ;;  %v8442_v57 = vunpack.i.h.bf16 %v11025_v33 }
 0x213   : > { %4271 = vst [vmem:[#allocation2 + $0x18] sm:$0xf] %v4266_v45  ;;  %4272 = vst [vmem:[#allocation2 + $0x20] sm:$0xf] %v4267_v44  ;;  %v3918_v30 = vsel %vm987_vm9, %v8496_v19, %v8497_v13  ;;  %v3919_v9 = vsel %vm987_vm9, %v8497_v13, %v8501_v24  ;;  %v8530_v22 = vpop.permute.xlu1 %8529  ;;  %v3974_v43 = vld [vmem:[#allocation2 + $0x110] sm:$0xff]  ;;  %v3973_v6 = vld [vmem:[#allocation2 + $0x108] sm:$0xff] }
 0x214   : > { %8804 = vrot.lane.b32.xlu0 %v11177_v5, %s12263_s0  ;;  %3923 = vst [vmem:[#allocation2 + $0x120] sm:$0xf0] %v3918_v30  ;;  %3924 = vst [vmem:[#allocation2 + $0x128] sm:$0xf0] %v3919_v9  ;;  %v8532_v31 = vunpack.i.h.bf16 %v8530_v22  ;;  %v8531_v60 = vunpack.i.l.bf16 %v8530_v22  ;;  %v8505_v36 = vpop.permute.xlu0 %8504  ;;  %v7320_v15 = vpack.c.bf16 %v3974_v43, %v3971_v58  ;;  %v7322_v49 = vpack.c.bf16 %v3973_v6, %v3970_v29  ;;  %v11227_v22 = vld [vmem:[%s12222_s10] sm:$0xff] }
 0x215   : > { %v8507_v32 = vunpack.i.h.bf16 %v8505_v36  ;;  %v8506_v16 = vunpack.i.l.bf16 %v8505_v36  ;;  %v3981_v24 = vld [vmem:[#allocation2 + $0x148] sm:$0xf]  ;;  %v8462_v43 = vunpack.i.h.bf16 %v11063_v42  ;;  %v8512_v6 = vunpack.i.h.bf16 %v11155_v46 }
 0x216   : > { %8819 = vrot.lane.b32.xlu1 %v11160_v61, %s12258_s18  ;;  %v4294_v52 = vsel %vm942_vm6, %v8472_v3, %v8531_v60  ;;  %v4295_v20 = vsel %vm942_vm6, %v8531_v60, %v8532_v31  ;;  %4301 = vst.msk [vmem:[#allocation2 + $0x40] sm:$0xf] %vm886_vm0, %v8532_v31  ;;  %7321 = vmatprep.subr.bf16.mxu0 %v7320_v15 }
 0x217   : > { %v7349_v59 = vpack.c.bf16 %v3981_v24, %v3978_v41  ;;  %4299 = vst [vmem:[#allocation2 + $0x30] sm:$0xf] %v4294_v52  ;;  %4300 = vst [vmem:[#allocation2 + $0x38] sm:$0xf] %v4295_v20  ;;  %v3932_v40 = vsel %vm1002_vm10, %v8506_v16, %v8507_v32  ;;  %v3933_v0 = vsel %vm1002_vm10, %v8507_v32, %v8511_v50  ;;  %v8540_v1 = vpop.permute.xlu1 %8539  ;;  %v2127_v37 = vpop.f32.mrb[2].mxu1  ;;  %7323 = vmatpush1.bf16.msra.mxu0 %v7322_v49 }
 0x218   : > { %8814 = vrot.lane.b32.xlu0 %v11177_v5, %s12257_s22  ;;  %3937 = vst [vmem:[#allocation2 + $0x138] sm:$0xf] %v3932_v40  ;;  %3938 = vst [vmem:[#allocation2 + $0x140] sm:$0xf] %v3933_v0  ;;  %v8542_v4 = vunpack.i.h.bf16 %v8540_v1  ;;  %v8541_v7 = vunpack.i.l.bf16 %v8540_v1  ;;  %v2128_v23 = vadd.f32 %v2127_v37, %v9771_v54  ;;  %v8515_v27 = vpop.permute.xlu0 %8514  ;;  %v6905_v50 = vpop.f32.mrb[3].mxu1 }
 0x219   : > { %7351 = vmatpush3.bf16.msk.msra.mxu1 %vm9730_vm13, %v7349_v59  ;;  %v8517_v26 = vunpack.i.h.bf16 %v8515_v27  ;;  %v8516_v13 = vunpack.i.l.bf16 %v8515_v27 }
 0x21a   : > { %8829 = vrot.lane.b32.xlu1 %v11148_v25, %s12264_s17  ;;  %v2056_v10 = vpop.f32.mrb[2].mxu0  ;;  %7382 = vmatprep.subr.bf16.mxu1 %v9099_v21  ;;  %v4322_v19 = vsel %vm972_vm8, %v8492_v56, %v8541_v7  ;;  %v4323_v45 = vsel %vm972_vm8, %v8541_v7, %v8542_v4  ;;  %4329 = vst.msk [vmem:[#allocation2 + $0x58] sm:$0xf] %vm886_vm0, %v8542_v4 }
 0x21b   : > { %v2136_v44 = vcombine.high %v2128_v23, %v2128_v23  ;;  %v2058_v58 = vpop.f32.mrb[3].mxu0  ;;  %4327 = vst [vmem:[#allocation2 + $0x48] sm:$0xf] %v4322_v19  ;;  %4328 = vst [vmem:[#allocation2 + $0x50] sm:$0xf] %v4323_v45  ;;  %v4252_v33 = vsel %vm896_vm3, %v8442_v57, %v8516_v13  ;;  %v4253_v29 = vsel %vm896_vm3, %v8516_v13, %v8517_v26  ;;  %v8550_v9 = vpop.permute.xlu1 %8549  ;;  %v3977_v52 = vld [vmem:[#allocation2 + $0x128] sm:$0xff]  ;;  %v8482_v19 = vunpack.i.h.bf16 %v11105_v8 }
 0x21c   : > { %4259 = vst.msk [vmem:[#allocation2 + $0x10] sm:$0xf0] %vm904_vm1, %v8517_v26  ;;  %v2057_v3 = vadd.f32 %v2056_v10, %v9771_v54  ;;  %v2059_v30 = vadd.f32 %v2058_v58, %v9771_v54  ;;  %6997 = vmatmul.mubr.msk.f32.vlgmr.msra.gmra.mrb[8].mxu1 %vm957_vm7, %v11227_v22  ;;  %4257 = vst [vmem:[#allocation2] sm:$0xf0] %v4252_v33  ;;  %v8552_v41 = vunpack.i.h.bf16 %v8550_v9  ;;  %v8551_v31 = vunpack.i.l.bf16 %v8550_v9  ;;  %v8525_v60 = vpop.permute.xlu0 %8524  ;;  %v3976_v56 = vld [vmem:[#allocation2 + $0x120] sm:$0xff] }
 0x21d   : > { %4258 = vst [vmem:[#allocation2 + $0x8] sm:$0xf0] %v4253_v29  ;;  %8824 = vrot.lane.b32.xlu0 %v11201_v51, %s12263_s0  ;;  %7027 = vmatprep.mubr.msk.f32.mxu1 %vm9102_vm2, %v9103_v38  ;;  %v8527_v49 = vunpack.i.h.bf16 %v8525_v60  ;;  %v8526_v32 = vunpack.i.l.bf16 %v8525_v60  ;;  %v2157_v42 = vrot.slane %v2128_v23, %v10792_v47  ;;  %v2164_v46 = vrot.slane %v2136_v44, %v10792_v47 }
 0x21e   : > { %v2134_v36 = vcombine.low %v2057_v3, %v2059_v30  ;;  %v2135_v15 = vcombine.high %v2057_v3, %v2059_v30  ;;  %8839 = vrot.lane.b32.xlu1 %v11148_v25, %s12258_s18  ;;  %v4350_v16 = vsel %vm1002_vm10, %v8512_v6, %v8551_v31  ;;  %v4351_v24 = vsel %vm1002_vm10, %v8551_v31, %v8552_v41 }
 0x21f   : > { %4357 = vst.msk [vmem:[#allocation2 + $0x70] sm:$0xf] %vm886_vm0, %v8552_v41  ;;  %4355 = vst [vmem:[#allocation2 + $0x60] sm:$0xf] %v4350_v16  ;;  %v4280_v40 = vsel %vm927_vm5, %v8462_v43, %v8526_v32  ;;  %v4281_v0 = vsel %vm927_vm5, %v8526_v32, %v8527_v49  ;;  %v11255_v1 = vpop.permute.xlu1 %8559  ;;  %v3980_v37 = vld [vmem:[#allocation2 + $0x140] sm:$0xf]  ;;  %v11277_v33 = vunpack.c.h.bf16 %v11117_v12 }
 0x220   : > { %v2143_v20 = vrot.slane %v2134_v36, %v10792_v47  ;;  %v2150_v59 = vrot.slane %v2135_v15, %v10792_v47  ;;  %4356 = vst [vmem:[#allocation2 + $0x68] sm:$0xf] %v4351_v24  ;;  %4287 = vst.msk [vmem:[#allocation2 + $0x28] sm:$0xf0] %vm904_vm1, %v8527_v49  ;;  %v3979_v4 = vld [vmem:[#allocation2 + $0x138] sm:$0xf]  ;;  %v8561_v7 = vunpack.i.l.bf16 %v11255_v1  ;;  %v8535_v23 = vpop.permute.xlu0 %8534  ;;  %v7324_v27 = vpack.c.bf16 %v3980_v37, %v3977_v52 }
 0x221   : > { %4285 = vst [vmem:[#allocation2 + $0x18] sm:$0xf0] %v4280_v40  ;;  %4286 = vst [vmem:[#allocation2 + $0x20] sm:$0xf0] %v4281_v0  ;;  %v7327_v50 = vpack.c.bf16 %v3979_v4, %v3976_v56  ;;  %8834 = vrot.lane.b32.xlu0 %v11201_v51, %s12257_s22  ;;  %v8537_v45 = vunpack.i.h.bf16 %v8535_v23  ;;  %v8536_v44 = vunpack.i.l.bf16 %v8535_v23 }
 0x222   : > { %v2165_v57 = vcombine.low %v2143_v20, %v2157_v42  ;;  %v2166_v26 = vcombine.high %v2143_v20, %v2157_v42  ;;  %v2167_v13 = vcombine.low %v2150_v59, %v2164_v46  ;;  %v2168_v10 = vcombine.high %v2150_v59, %v2164_v46  ;;  %8849 = vrot.lane.b32.xlu1 %v11160_v61, %s12260_s30 }
 0x223   : > { %4384 = vst.msk [vmem:[#allocation2 + $0x88] sm:$0xf] %vm886_vm0, %v8561_v7  ;;  %7326 = vmatprep.subr.msk.bf16.mxu0 %vm9730_vm13, %v7324_v27  ;;  %v11274_v58 = vld [vmem:[#allocation2 + $0x10] sm:$0xff]  ;;  %v11283_v30 = vpop.permute.xlu1 %8569  ;;  %v11291_v9 = vld [vmem:[#allocation2] sm:$0xff]  ;;  %v4308_v43 = vsel %vm957_vm7, %v8482_v19, %v8536_v44  ;;  %v4309_v6 = vsel %vm957_vm7, %v8536_v44, %v8537_v45  ;;  %v11347_v20 = vpack.i.bf16 %v11133_v39, %v11277_v33 }
 0x224   : > { %v2175_v61 = vrot.slane %v2165_v57, %v10792_v47  ;;  %v2182_v29 = vrot.slane %v2167_v13, %v10792_v47  ;;  %v2189_v8 = vrot.slane %v2166_v26, %v10792_v47  ;;  %v2196_v3 = vrot.slane %v2168_v10, %v10792_v47  ;;  %7329 = vmatpush1.bf16.msk.msra.mxu0 %vm9730_vm13, %v7327_v50  ;;  %v11289_v12 = vld [vmem:[#allocation2 + $0x8] sm:$0xff]  ;;  %v8545_v31 = vpop.permute.xlu0 %8544  ;;  %v5692_v57 = vld [vmem:[%s11083_s21] sm:$0x3f] }
 0x225   : > { %4910 = vst.msk [vmem:[#allocation2 + $0x10] sm:$0xf] %vm886_vm0, %v10796_v14  ;;  %v8571_v41 = vunpack.i.l.bf16 %v11283_v30  ;;  %8844 = vrot.lane.b32.xlu0 %v11177_v5, %s12259_s16  ;;  %4909 = vst [vmem:[#allocation2 + $0x8] sm:$0xf] %v10800_v63  ;;  %v8502_v63 = vunpack.i.h.bf16 %v11140_v62  ;;  %v8547_v49 = vunpack.i.h.bf16 %v8545_v31  ;;  %v8546_v32 = vunpack.i.l.bf16 %v8545_v31 }
 0x226   : > { %4315 = vst.msk [vmem:[#allocation2 + $0x40] sm:$0xf0] %vm904_vm1, %v8537_v45  ;;  %4908 = vst [vmem:[#allocation2] sm:$0xf] %v10768_v48  ;;  %v2197_v14 = vcombine.high %v2175_v61, %v2175_v61  ;;  %v2198_v60 = vcombine.high %v2182_v29, %v2182_v29  ;;  %v2199_v36 = vcombine.high %v2189_v8, %v2189_v8  ;;  %8859 = vrot.lane.b32.xlu1 %v11201_v51, %s12259_s16  ;;  %v11315_v48 = vld [vmem:[#allocation2 + $0x70] sm:$0xff]  ;;  %v11328_v16 = vld [vmem:[#allocation2 + $0x60] sm:$0xff] }
 0x227   : > { %v2200_v15 = vcombine.high %v2196_v3, %v2196_v3  ;;  %6635 = vst.msk [vmem:[%s10897_s20 + $0x1] ss:$8 sm:$0x7] %vm10821_vm14, %v2175_v61  ;;  %6636 = vst.msk [vmem:[%s10897_s20 + $0x19] ss:$8 sm:$0x7] %vm10821_vm14, %v2189_v8  ;;  %6671 = vmatmul.mubr.msk.f32.vlgmr.msra.gmra.mrb[8].mxu0 %vm957_vm7, %v11227_v22  ;;  %v11342_v62 = vpop.permute.xlu1 %8579  ;;  %v5578_v59 = vcombine.low %v11133_v39, %v11133_v39  ;;  %v4336_v40 = vsel %vm987_vm9, %v8502_v63, %v8546_v32 }
 0x228   : > { %6639 = vst.msk [vmem:[%s10897_s20 + $0x61] ss:$8 sm:$0x7] %vm10821_vm14, %v2182_v29  ;;  %6640 = vst.msk [vmem:[%s10897_s20 + $0x79] ss:$8 sm:$0x7] %vm10821_vm14, %v2196_v3  ;;  %4722 = vmatprep.mubr.f32.mxu0 %v9103_v38  ;;  %v4337_v0 = vsel %vm987_vm9, %v8546_v32, %v8547_v49  ;;  %v8581_v37 = vunpack.i.l.bf16 %v11342_v62  ;;  %v8555_v56 = vpop.permute.xlu0 %8554 }
 0x229   : > { %4313 = vst [vmem:[#allocation2 + $0x30] sm:$0xf0] %v4308_v43  ;;  %4314 = vst [vmem:[#allocation2 + $0x38] sm:$0xf0] %v4309_v6  ;;  %v4612_v42 = vld [vmem:[#allocation2 + $0x28] sm:$0xff]  ;;  %v4611_v24 = vld [vmem:[#allocation2 + $0x20] sm:$0xff]  ;;  %8854 = vrot.lane.b32.xlu0 %v11177_v5, %s12261_s25  ;;  %v8556_v4 = vunpack.i.l.bf16 %v8555_v56 }
 0x22a   : > { %4398 = vst.msk [vmem:[#allocation2 + $0x88] sm:$0xf0] %vm904_vm1, %v8571_v41  ;;  %5036 = vst.msk [vmem:[#allocation2 + $0x70] sm:$0xf0] %vm904_vm1, %v11075_v28  ;;  %v11326_v46 = vld [vmem:[#allocation2 + $0x68] sm:$0xff]  ;;  %v7383_v28 = vpack.c.bf16 %v4612_v42, %v11274_v58  ;;  %v4610_v52 = vld [vmem:[#allocation2 + $0x18] sm:$0xff]  ;;  %8869 = vrot.lane.b32.xlu1 %v11201_v51, %s12261_s25  ;;  %v7352_v23 = vpack.c.bf16 %v4611_v24, %v11289_v12  ;;  %v11395_v58 = vunpack.c.h.bf16 %v5692_v57 }
 0x22b   : > { %6637 = vst.msk [vmem:[%s10897_s20 + $0x31] ss:$8 sm:$0x7] %vm10821_vm14, %v2197_v14  ;;  %6638 = vst.msk [vmem:[%s10897_s20 + $0x49] ss:$8 sm:$0x7] %vm10821_vm14, %v2199_v36  ;;  %v7354_v27 = vpack.c.bf16 %v4610_v52, %v11291_v9  ;;  %v11379_v50 = vpop.permute.xlu1 %8589 }
 0x22c   : > { %6641 = vst.msk [vmem:[%s10897_s20 + $0x91] ss:$8 sm:$0x7] %vm10821_vm14, %v2198_v60  ;;  %6642 = vst.msk [vmem:[%s10897_s20 + $0xa9] ss:$8 sm:$0x7] %vm10821_vm14, %v2200_v15  ;;  %7384 = vmatpush3.bf16.msra.mxu1 %v7383_v28  ;;  %7353 = vmatprep.subr.bf16.mxu0 %v7352_v23  ;;  %v8592_v26 = vunpack.i.h.bf16 %v11379_v50  ;;  %v8591_v13 = vunpack.i.l.bf16 %v11379_v50  ;;  %v8565_v10 = vpop.permute.xlu0 %8564  ;;  %v11414_v32 = vcombine.low %v11395_v58, %v11395_v58 }
 0x22d   : > { %5035 = vst [vmem:[#allocation2 + $0x68] sm:$0xf0] %v10779_v2  ;;  %5034 = vst [vmem:[#allocation2 + $0x60] sm:$0xf0] %v11073_v34  ;;  %v5579_v2 = vcombine.low %v11277_v33, %v11277_v33  ;;  %v8557_v34 = vunpack.i.h.bf16 %v8555_v56  ;;  %7385 = vmatprep.subr.bf16.mxu1 %v9099_v21  ;;  %7355 = vmatpush1.bf16.msra.mxu0 %v7354_v27  ;;  %v8567_v45 = vunpack.i.h.bf16 %v8565_v10  ;;  %v4615_v8 = vld [vmem:[#allocation2 + $0x40] sm:$0xff] }
 0x22e   : > { %4343 = vst.msk [vmem:[#allocation2 + $0x58] sm:$0xf0] %vm904_vm1, %v8547_v49  ;;  %4341 = vst [vmem:[#allocation2 + $0x48] sm:$0xf0] %v4336_v40  ;;  %8864 = vrot.lane.b32.xlu0 %v11148_v25, %s12260_s30  ;;  %8879 = vrot.lane.b32.xlu1 %v11347_v20, %s12263_s0  ;;  %v4434_v44 = vsel %vm957_vm7, %v8591_v13, %v8592_v26  ;;  %v11410_v49 = vunpack.c.l.bf16 %v5692_v57  ;;  %v11416_v42 = vld [vmem:[%s872_s15] sm:$0x3f] }
 0x22f   : > { %4342 = vst [vmem:[#allocation2 + $0x50] sm:$0xf0] %v4337_v0  ;;  %4412 = vst.msk [vmem:[#allocation2 + $0xa0] sm:$0xf] %vm886_vm0, %v8581_v37  ;;  %v4377_v5 = vsel %vm896_vm3, %v8556_v4, %v8557_v34  ;;  %v4378_v51 = vsel %vm896_vm3, %v8557_v34, %v8561_v7  ;;  %v11386_v19 = vpack.i.bf16 %v5578_v59, %v5579_v2  ;;  %v8566_v7 = vunpack.i.l.bf16 %v8565_v10  ;;  %v11401_v29 = vpop.permute.xlu1 %8599 }
 0x230   : > { %4382 = vst [vmem:[#allocation2 + $0x78] sm:$0xf] %v4377_v5  ;;  %4383 = vst [vmem:[#allocation2 + $0x80] sm:$0xf] %v4378_v51  ;;  %v4392_v25 = vsel %vm912_vm4, %v8567_v45, %v8571_v41  ;;  %v4614_v12 = vld [vmem:[#allocation2 + $0x38] sm:$0xff]  ;;  %v8575_v9 = vpop.permute.xlu0 %8574  ;;  %v4613_v31 = vld [vmem:[#allocation2 + $0x30] sm:$0xff]  ;;  %v8601_v28 = vunpack.i.l.bf16 %v11401_v29  ;;  %v11436_v34 = vpack.i.bf16 %v11414_v32, %v11410_v49  ;;  %v5704_v57 = vcombine.high %v11410_v49, %v11410_v49 }
 0x231   : > { %4440 = vst.msk [vmem:[#allocation2 + $0xb8] sm:$0xf] %vm886_vm0, %v8592_v26  ;;  %4439 = vst [vmem:[#allocation2 + $0xb0] sm:$0xf] %v4434_v44  ;;  %v4391_v61 = vsel %vm912_vm4, %v8566_v7, %v8567_v45  ;;  %v8577_v41 = vunpack.i.h.bf16 %v8575_v9  ;;  %v8576_v60 = vunpack.i.l.bf16 %v8575_v9  ;;  %v4624_v63 = vld [vmem:[#allocation2 + $0x88] sm:$0xff] }
 0x232   : > { %4396 = vst [vmem:[#allocation2 + $0x78] sm:$0xf0] %v4391_v61  ;;  %4397 = vst [vmem:[#allocation2 + $0x80] sm:$0xf0] %v4392_v25  ;;  %8874 = vrot.lane.b32.xlu0 %v11386_v19, %s12268_s1  ;;  %8889 = vrot.lane.b32.xlu1 %v11347_v20, %s12257_s22  ;;  %v7389_v0 = vpack.c.bf16 %v4624_v63, %v11315_v48 }
 0x233   : > { %v4405_v24 = vsel %vm927_vm5, %v8576_v60, %v8577_v41  ;;  %v4406_v52 = vsel %vm927_vm5, %v8577_v41, %v8581_v37  ;;  %v11423_v59 = vpop.permute.xlu1 %8609  ;;  %v11432_v37 = vunpack.c.l.bf16 %v11416_v42 }
 0x234   : > { %4410 = vst [vmem:[#allocation2 + $0x90] sm:$0xf] %v4405_v24  ;;  %4411 = vst [vmem:[#allocation2 + $0x98] sm:$0xf] %v4406_v52  ;;  %v8585_v40 = vpop.permute.xlu0 %8584  ;;  %v8611_v4 = vunpack.i.l.bf16 %v11423_v59 }
 0x235   : > { %v4618_v3 = vld [vmem:[#allocation2 + $0x58] sm:$0xff]  ;;  %v4616_v14 = vld [vmem:[#allocation2 + $0x48] sm:$0xff]  ;;  %v8587_v56 = vunpack.i.h.bf16 %v8585_v40  ;;  %v8586_v2 = vunpack.i.l.bf16 %v8585_v40  ;;  %v11495_v63 = vpack.i.bf16 %v11432_v37, %v11410_v49 }
 0x236   : > { %v7386_v43 = vpack.c.bf16 %v4618_v3, %v4615_v8  ;;  %v4617_v6 = vld [vmem:[#allocation2 + $0x50] sm:$0xff]  ;;  %v7358_v15 = vpack.c.bf16 %v4616_v14, %v4613_v31  ;;  %8884 = vrot.lane.b32.xlu0 %v11386_v19, %s12264_s17  ;;  %8899 = vrot.lane.b32.xlu1 %v11347_v20, %s12259_s16  ;;  %v11457_v8 = vcombine.low %v11410_v49, %v11410_v49 }
 0x237   : > { %v7356_v36 = vpack.c.bf16 %v4617_v6, %v4614_v12  ;;  %v4419_v48 = vsel %vm942_vm6, %v8601_v28, %v8586_v2  ;;  %v4420_v23 = vsel %vm942_vm6, %v8586_v2, %v8587_v56  ;;  %4426 = vst.msk [vmem:[#allocation2 + $0xa0] sm:$0xf0] %vm904_vm1, %v8587_v56  ;;  %v11442_v27 = vpop.permute.xlu1 %8619  ;;  %v11461_v3 = vcombine.high %v11432_v37, %v11432_v37 }
 0x238   : > { %7387 = vmatpush3.bf16.msra.mxu1 %v7386_v43  ;;  %4424 = vst [vmem:[#allocation2 + $0x90] sm:$0xf0] %v4419_v48  ;;  %4425 = vst [vmem:[#allocation2 + $0x98] sm:$0xf0] %v4420_v23  ;;  %v8622_v26 = vunpack.i.h.bf16 %v11442_v27  ;;  %v8621_v10 = vunpack.i.l.bf16 %v11442_v27  ;;  %v8595_v45 = vpop.permute.xlu0 %8594  ;;  %v11477_v43 = vpack.i.bf16 %v11395_v58, %v5704_v57  ;;  %v8602_v23 = vunpack.i.h.bf16 %v11401_v29 }
 0x239   : > { %7357 = vmatprep.subr.bf16.mxu0 %v7356_v36  ;;  %7388 = vmatprep.subr.bf16.mxu1 %v9099_v21  ;;  %v4623_v5 = vld [vmem:[#allocation2 + $0x80] sm:$0xff]  ;;  %v4622_v51 = vld [vmem:[#allocation2 + $0x78] sm:$0xff]  ;;  %v8597_v61 = vunpack.i.h.bf16 %v8595_v45  ;;  %v8596_v25 = vunpack.i.l.bf16 %v8595_v45  ;;  %v11484_v31 = vpack.i.bf16 %v11461_v3, %v11457_v8  ;;  %v8562_v45 = vunpack.i.h.bf16 %v11255_v1 }
 0x23a   : > { %7359 = vmatpush1.bf16.msra.mxu0 %v7358_v15  ;;  %v7360_v7 = vpack.c.bf16 %v4623_v5, %v11326_v46  ;;  %v7362_v44 = vpack.c.bf16 %v4622_v51, %v11328_v16  ;;  %8894 = vrot.lane.b32.xlu0 %v11386_v19, %s12258_s18  ;;  %v4476_v46 = vsel %vm1002_vm10, %v8621_v10, %v8622_v26 }
 0x23b   : > { %8909 = vrot.lane.b32.xlu1 %v11347_v20, %s12261_s25  ;;  %4482 = vst.msk [vmem:[#allocation2 + $0xd0] sm:$0xf0] %vm904_vm1, %v8622_v26  ;;  %4481 = vst [vmem:[#allocation2 + $0xc8] sm:$0xf0] %v4476_v46  ;;  %v4447_v16 = vsel %vm972_vm8, %v8611_v4, %v8596_v25  ;;  %v4448_v20 = vsel %vm972_vm8, %v8596_v25, %v8597_v61  ;;  %v11470_v12 = vpop.permute.xlu1 %8629 }
 0x23c   : > { %7390 = vmatpush3.bf16.msra.mxu1 %v7389_v0  ;;  %7361 = vmatprep.subr.bf16.mxu0 %v7360_v7  ;;  %4454 = vst.msk [vmem:[#allocation2 + $0xb8] sm:$0xf0] %vm904_vm1, %v8597_v61  ;;  %4452 = vst [vmem:[#allocation2 + $0xa8] sm:$0xf0] %v4447_v16  ;;  %v11472_v9 = vpop.permute.xlu0 %8604  ;;  %v8631_v14 = vunpack.i.l.bf16 %v11470_v12 }
 0x23d   : > { %7391 = vmatprep.subr.bf16.mxu1 %v9099_v21  ;;  %4453 = vst [vmem:[#allocation2 + $0xb0] sm:$0xf0] %v4448_v20  ;;  %v8606_v6 = vunpack.i.l.bf16 %v11472_v9 }
 0x23e   : > { %7363 = vmatpush1.bf16.msra.mxu0 %v7362_v44  ;;  %8904 = vrot.lane.b32.xlu0 %v11386_v19, %s12260_s30  ;;  %v8572_v19 = vunpack.i.h.bf16 %v11283_v30 }
 0x23f   : > { %8919 = vrot.lane.b32.xlu1 %v11436_v34, %s12263_s0  ;;  %v4433_v41 = vsel %vm957_vm7, %v8606_v6, %v8591_v13  ;;  %v8640_v60 = vpop.permute.xlu1 %8639  ;;  %v4627_v13 = vld [vmem:[#allocation2 + $0xa0] sm:$0xff]  ;;  %v4626_v4 = vld [vmem:[#allocation2 + $0x98] sm:$0xff]  ;;  %v4625_v16 = vld [vmem:[#allocation2 + $0x90] sm:$0xff]  ;;  %v8612_v6 = vunpack.i.h.bf16 %v11423_v59 }
 0x240   : > { %4438 = vst [vmem:[#allocation2 + $0xa8] sm:$0xf] %v4433_v41  ;;  %v8642_v58 = vunpack.i.h.bf16 %v8640_v60  ;;  %v8641_v36 = vunpack.i.l.bf16 %v8640_v60  ;;  %v8615_v15 = vpop.permute.xlu0 %8614 }
 0x241   : > { %v8617_v28 = vunpack.i.h.bf16 %v8615_v15  ;;  %v8616_v24 = vunpack.i.l.bf16 %v8615_v15 }
 0x242   : > { %8914 = vrot.lane.b32.xlu0 %v11477_v43, %s12268_s1  ;;  %v4515_v50 = vsel %vm912_vm4, %v8642_v58, %v8572_v19  ;;  %v4516_v30 = vsel %vm912_vm4, %v8572_v19, %v8641_v36  ;;  %4522 = vst.msk [vmem:[#allocation2 + $0x100] sm:$0xf] %vm886_vm0, %v8641_v36 }
 0x243   : > { %8929 = vrot.lane.b32.xlu1 %v11484_v31, %s12263_s0  ;;  %v4630_v52 = vld [vmem:[#allocation2 + $0xb8] sm:$0xff]  ;;  %4520 = vst [vmem:[#allocation2 + $0xf0] sm:$0xf] %v4515_v50  ;;  %4521 = vst [vmem:[#allocation2 + $0xf8] sm:$0xf] %v4516_v30  ;;  %v4461_v40 = vsel %vm987_vm9, %v8631_v14, %v8616_v24  ;;  %v4462_v0 = vsel %vm987_vm9, %v8616_v24, %v8617_v28  ;;  %v8650_v56 = vpop.permute.xlu1 %8649 }
 0x244   : > { %4468 = vst.msk [vmem:[#allocation2 + $0xd0] sm:$0xf] %vm886_vm0, %v8617_v28  ;;  %v7392_v2 = vpack.c.bf16 %v4630_v52, %v4627_v13  ;;  %v4629_v48 = vld [vmem:[#allocation2 + $0xb0] sm:$0xff]  ;;  %4466 = vst [vmem:[#allocation2 + $0xc0] sm:$0xf] %v4461_v40  ;;  %v8652_v5 = vunpack.i.h.bf16 %v8650_v56  ;;  %v8651_v51 = vunpack.i.l.bf16 %v8650_v56  ;;  %v8625_v57 = vpop.permute.xlu0 %8624  ;;  %v8582_v52 = vunpack.i.h.bf16 %v11342_v62 }
 0x245   : > { %4467 = vst [vmem:[#allocation2 + $0xc8] sm:$0xf] %v4462_v0  ;;  %v7364_v26 = vpack.c.bf16 %v4629_v48, %v4626_v4  ;;  %v8627_v7 = vunpack.i.h.bf16 %v8625_v57  ;;  %v8626_v44 = vunpack.i.l.bf16 %v8625_v57 }
 0x246   : > { %8924 = vrot.lane.b32.xlu0 %v11495_v63, %s12268_s1  ;;  %7393 = vmatpush3.bf16.msra.mxu1 %v7392_v2  ;;  %v4543_v61 = vsel %vm942_vm6, %v8652_v5, %v8602_v23  ;;  %v4544_v29 = vsel %vm942_vm6, %v8602_v23, %v8651_v51  ;;  %4550 = vst.msk [vmem:[#allocation2 + $0x118] sm:$0xf] %vm886_vm0, %v8651_v51 }
 0x247   : > { %8939 = vrot.lane.b32.xlu1 %v11436_v34, %s12257_s22  ;;  %7365 = vmatprep.subr.bf16.mxu0 %v7364_v26  ;;  %4548 = vst [vmem:[#allocation2 + $0x108] sm:$0xf] %v4543_v61  ;;  %4549 = vst [vmem:[#allocation2 + $0x110] sm:$0xf] %v4544_v29  ;;  %v4501_v25 = vsel %vm896_vm3, %v8627_v7, %v8562_v45  ;;  %v4502_v1 = vsel %vm896_vm3, %v8562_v45, %v8626_v44  ;;  %v4628_v20 = vld [vmem:[#allocation2 + $0xa8] sm:$0xff] }
 0x248   : > { %7394 = vmatprep.subr.bf16.mxu1 %v9099_v21  ;;  %4508 = vst.msk [vmem:[#allocation2 + $0xe8] sm:$0xf0] %vm904_vm1, %v8626_v44  ;;  %v8660_v46 = vpop.permute.xlu1 %8659  ;;  %4506 = vst [vmem:[#allocation2 + $0xd8] sm:$0xf0] %v4501_v25  ;;  %v8635_v60 = vpop.permute.xlu0 %8634  ;;  %v7366_v19 = vpack.c.bf16 %v4628_v20, %v4625_v16 }
 0x249   : > { %4507 = vst [vmem:[#allocation2 + $0xe0] sm:$0xf0] %v4502_v1  ;;  %v8662_v14 = vunpack.i.h.bf16 %v8660_v46  ;;  %v8661_v41 = vunpack.i.l.bf16 %v8660_v46  ;;  %v8636_v58 = vunpack.i.l.bf16 %v8635_v60  ;;  %v8637_v24 = vunpack.i.h.bf16 %v8635_v60 }
 0x24a   : > { %8934 = vrot.lane.b32.xlu0 %v11477_v43, %s12264_s17  ;;  %7367 = vmatpush1.bf16.msra.mxu0 %v7366_v19 }
 0x24b   : > { %8949 = vrot.lane.b32.xlu1 %v11436_v34, %s12259_s16  ;;  %v4571_v36 = vsel %vm972_vm8, %v8662_v14, %v8612_v6  ;;  %v4572_v15 = vsel %vm972_vm8, %v8612_v6, %v8661_v41  ;;  %4578 = vst.msk [vmem:[#allocation2 + $0x130] sm:$0xf] %vm886_vm0, %v8661_v41  ;;  %v4475_v59 = vsel %vm1002_vm10, %v8636_v58, %v8621_v10  ;;  %v4633_v56 = vld [vmem:[#allocation2 + $0xd0] sm:$0xff]  ;;  %v8632_v14 = vunpack.i.h.bf16 %v11470_v12 }
 0x24c   : > { %4576 = vst [vmem:[#allocation2 + $0x120] sm:$0xf] %v4571_v36  ;;  %4577 = vst [vmem:[#allocation2 + $0x128] sm:$0xf] %v4572_v15  ;;  %v8670_v28 = vpop.permute.xlu1 %8669  ;;  %v8645_v13 = vpop.permute.xlu0 %8644  ;;  %v4632_v5 = vld [vmem:[#allocation2 + $0xc8] sm:$0xff] }
 0x24d   : > { %4480 = vst [vmem:[#allocation2 + $0xc0] sm:$0xf0] %v4475_v59  ;;  %v8672_v50 = vunpack.i.h.bf16 %v8670_v28  ;;  %v8671_v30 = vunpack.i.l.bf16 %v8670_v28  ;;  %v8647_v40 = vunpack.i.h.bf16 %v8645_v13  ;;  %v8646_v0 = vunpack.i.l.bf16 %v8645_v13 }
 0x24e   : > { %8944 = vrot.lane.b32.xlu0 %v11477_v43, %s12258_s18 }
 0x24f   : > { %8959 = vrot.lane.b32.xlu1 %v11484_v31, %s12257_s22  ;;  %v4599_v27 = vsel %vm1002_vm10, %v8672_v50, %v8637_v24  ;;  %v4600_v10 = vsel %vm1002_vm10, %v8637_v24, %v8671_v30  ;;  %4606 = vst.msk [vmem:[#allocation2 + $0x148] sm:$0xf] %vm886_vm0, %v8671_v30  ;;  %v4636_v2 = vld [vmem:[#allocation2 + $0xe8] sm:$0xff]  ;;  %v4529_v4 = vsel %vm927_vm5, %v8647_v40, %v8582_v52  ;;  %v4634_v57 = vld [vmem:[#allocation2 + $0xd8] sm:$0xff] }
 0x250   : > { %4604 = vst [vmem:[#allocation2 + $0x138] sm:$0xf] %v4599_v27  ;;  %4605 = vst [vmem:[#allocation2 + $0x140] sm:$0xf] %v4600_v10  ;;  %v4530_v48 = vsel %vm927_vm5, %v8582_v52, %v8646_v0  ;;  %v11540_v62 = vpop.permute.xlu1 %8679  ;;  %v7395_v23 = vpack.c.bf16 %v4636_v2, %v4633_v56  ;;  %v4635_v51 = vld [vmem:[#allocation2 + $0xe0] sm:$0xff]  ;;  %v8655_v7 = vpop.permute.xlu0 %8654 }
 0x251   : > { %4536 = vst.msk [vmem:[#allocation2 + $0x100] sm:$0xf0] %vm904_vm1, %v8646_v0  ;;  %4534 = vst [vmem:[#allocation2 + $0xf0] sm:$0xf0] %v4529_v4  ;;  %v8682_v26 = vunpack.i.h.bf16 %v11540_v62  ;;  %v8681_v45 = vunpack.i.l.bf16 %v11540_v62  ;;  %v7368_v44 = vpack.c.bf16 %v4635_v51, %v4632_v5  ;;  %v8657_v61 = vunpack.i.h.bf16 %v8655_v7 }
 0x252   : > { %5159 = vst.msk [vmem:[#allocation2 + $0xe8] sm:$0xf] %vm886_vm0, %v11135_v18  ;;  %4535 = vst [vmem:[#allocation2 + $0xf8] sm:$0xf0] %v4530_v48  ;;  %8954 = vrot.lane.b32.xlu0 %v11495_v63, %s12264_s17  ;;  %v8607_v18 = vunpack.i.h.bf16 %v11472_v9  ;;  %v8656_v29 = vunpack.i.l.bf16 %v8655_v7  ;;  %7396 = vmatpush3.bf16.msra.mxu1 %v7395_v23 }
 0x253   : > { %5158 = vst [vmem:[#allocation2 + $0xe0] sm:$0xf] %v11164_v11  ;;  %5157 = vst [vmem:[#allocation2 + $0xd8] sm:$0xf] %v11110_v17  ;;  %8969 = vrot.lane.b32.xlu1 %v11484_v31, %s12259_s16  ;;  %v4934_v25 = vsel %vm912_vm4, %v8681_v45, %v8682_v26  ;;  %7369 = vmatprep.subr.bf16.mxu0 %v7368_v44  ;;  %v11559_v11 = vunpack.c.h.bf16 %v11416_v42  ;;  %v5827_v42 = vcombine.low %v11432_v37, %v11432_v37 }
 0x254   : > { %4940 = vst.msk [vmem:[#allocation2 + $0x28] sm:$0xf] %vm886_vm0, %v8682_v26  ;;  %7397 = vmatprep.subr.bf16.mxu1 %v9099_v21  ;;  %4939 = vst [vmem:[#allocation2 + $0x20] sm:$0xf] %v4934_v25  ;;  %v4557_v17 = vsel %vm957_vm7, %v8657_v61, %v8607_v18  ;;  %v4558_v9 = vsel %vm957_vm7, %v8607_v18, %v8656_v29  ;;  %v11564_v1 = vpop.permute.xlu1 %8689  ;;  %v4631_v46 = vld [vmem:[#allocation2 + $0xc0] sm:$0xff]  ;;  %v8665_v16 = vpop.permute.xlu0 %8664 }
 0x255   : > { %4564 = vst.msk [vmem:[#allocation2 + $0x118] sm:$0xf0] %vm904_vm1, %v8656_v29  ;;  %4562 = vst [vmem:[#allocation2 + $0x108] sm:$0xf0] %v4557_v17  ;;  %v7370_v20 = vpack.c.bf16 %v4634_v57, %v4631_v46  ;;  %v5828_v6 = vcombine.low %v11559_v11, %v11559_v11  ;;  %v8667_v41 = vunpack.i.h.bf16 %v8665_v16  ;;  %v8666_v60 = vunpack.i.l.bf16 %v8665_v16 }
 0x256   : > { %4563 = vst [vmem:[#allocation2 + $0x110] sm:$0xf0] %v4558_v9  ;;  %8964 = vrot.lane.b32.xlu0 %v11495_v63, %s12258_s18  ;;  %v8691_v19 = vunpack.i.l.bf16 %v11564_v1  ;;  %v11589_v24 = vpack.i.bf16 %v11432_v37, %v11559_v11  ;;  %v4648_v51 = vld [vmem:[#allocation2 + $0x148] sm:$0xf] }
 0x257   : > { %8979 = vrot.lane.b32.xlu1 %v11436_v34, %s12261_s25  ;;  %7371 = vmatpush1.bf16.msra.mxu0 %v7370_v20  ;;  %v4585_v58 = vsel %vm987_vm9, %v8667_v41, %v8632_v14  ;;  %v4586_v36 = vsel %vm987_vm9, %v8632_v14, %v8666_v60  ;;  %4592 = vst.msk [vmem:[#allocation2 + $0x130] sm:$0xf0] %vm904_vm1, %v8666_v60  ;;  %v4647_v61 = vld [vmem:[#allocation2 + $0x140] sm:$0xf]  ;;  %v4646_v20 = vld [vmem:[#allocation2 + $0x138] sm:$0xf] }
 0x258   : > { %v11579_v15 = vpop.permute.xlu1 %8699  ;;  %4590 = vst [vmem:[#allocation2 + $0x120] sm:$0xf0] %v4585_v58  ;;  %4591 = vst [vmem:[#allocation2 + $0x128] sm:$0xf0] %v4586_v36  ;;  %v8675_v59 = vpop.permute.xlu0 %8674  ;;  %v11583_v12 = vpack.i.bf16 %v5827_v42, %v5828_v6  ;;  %v4639_v50 = vld [vmem:[#allocation2 + $0x100] sm:$0xff] }
 0x259   : > { %v8677_v34 = vunpack.i.h.bf16 %v8675_v59  ;;  %v8676_v28 = vunpack.i.l.bf16 %v8675_v59  ;;  %v4638_v13 = vld [vmem:[#allocation2 + $0xf8] sm:$0xff]  ;;  %v8701_v52 = vunpack.i.l.bf16 %v11579_v15 }
 0x25a   : > { %8974 = vrot.lane.b32.xlu0 %v11477_v43, %s12260_s30 }
 0x25b   : > { %8989 = vrot.lane.b32.xlu1 %v11495_v63, %s12260_s30  ;;  %v4919_v40 = vsel %vm896_vm3, %v8691_v19, %v8676_v28  ;;  %v4920_v43 = vsel %vm896_vm3, %v8676_v28, %v8677_v34  ;;  %4926 = vst.msk [vmem:[#allocation2 + $0x10] sm:$0xf0] %vm904_vm1, %v8677_v34  ;;  %v4637_v63 = vld [vmem:[#allocation2 + $0xf0] sm:$0xff] }
 0x25c   : > { %v4642_v30 = vld [vmem:[#allocation2 + $0x118] sm:$0xff]  ;;  %v11595_v0 = vpop.permute.xlu1 %8709  ;;  %v4640_v56 = vld [vmem:[#allocation2 + $0x108] sm:$0xff]  ;;  %4924 = vst [vmem:[#allocation2] sm:$0xf0] %v4919_v40  ;;  %4925 = vst [vmem:[#allocation2 + $0x8] sm:$0xf0] %v4920_v43  ;;  %v8685_v48 = vpop.permute.xlu0 %8684 }
 0x25d   : > { %v7398_v27 = vpack.c.bf16 %v4642_v30, %v4639_v50  ;;  %v4641_v10 = vld [vmem:[#allocation2 + $0x110] sm:$0xff]  ;;  %v8712_v2 = vunpack.i.h.bf16 %v11595_v0  ;;  %v8711_v4 = vunpack.i.l.bf16 %v11595_v0  ;;  %v7374_v5 = vpack.c.bf16 %v4640_v56, %v4637_v63 }
 0x25e   : > { %v7372_v23 = vpack.c.bf16 %v4641_v10, %v4638_v13  ;;  %8984 = vrot.lane.b32.xlu0 %v11583_v12, %s12268_s1  ;;  %v8687_v57 = vunpack.i.h.bf16 %v8685_v48  ;;  %v8686_v26 = vunpack.i.l.bf16 %v8685_v48  ;;  %v2794_v44 = vpop.f32.mrb[4].mxu1  ;;  %v4645_v18 = vld [vmem:[#allocation2 + $0x130] sm:$0xff] }
 0x25f   : > { %8999 = vrot.lane.b32.xlu1 %v11589_v24, %s12263_s0  ;;  %7399 = vmatpush3.bf16.msra.mxu1 %v7398_v27  ;;  %v4976_v7 = vsel %vm957_vm7, %v8711_v4, %v8712_v2  ;;  %4982 = vst.msk [vmem:[#allocation2 + $0x40] sm:$0xf0] %vm904_vm1, %v8712_v2  ;;  %v7401_v9 = vpack.c.bf16 %v4648_v51, %v4645_v18  ;;  %v4644_v46 = vld [vmem:[#allocation2 + $0x128] sm:$0xff]  ;;  %v4643_v16 = vld [vmem:[#allocation2 + $0x120] sm:$0xff]  ;;  %v6936_v42 = vpop.f32.mrb[5].mxu1 }
 0x260   : > { %7373 = vmatprep.subr.bf16.mxu0 %v7372_v23  ;;  %7400 = vmatprep.subr.bf16.mxu1 %v9099_v21  ;;  %4981 = vst [vmem:[#allocation2 + $0x38] sm:$0xf0] %v4976_v7  ;;  %v4947_v29 = vsel %vm927_vm5, %v8701_v52, %v8686_v26  ;;  %v4948_v25 = vsel %vm927_vm5, %v8686_v26, %v8687_v57  ;;  %4954 = vst.msk [vmem:[#allocation2 + $0x28] sm:$0xf0] %vm904_vm1, %v8687_v57  ;;  %v11611_v17 = vpop.permute.xlu1 %8719  ;;  %v11615_v41 = vpop.permute.xlu0 %8694  ;;  %v8692_v7 = vunpack.i.h.bf16 %v11564_v1 }
 0x261   : > { %7375 = vmatpush1.bf16.msra.mxu0 %v7374_v5  ;;  %4952 = vst [vmem:[#allocation2 + $0x18] sm:$0xf0] %v4947_v29  ;;  %4953 = vst [vmem:[#allocation2 + $0x20] sm:$0xf0] %v4948_v25  ;;  %v8722_v6 = vunpack.i.h.bf16 %v11611_v17  ;;  %v8721_v14 = vunpack.i.l.bf16 %v11611_v17  ;;  %v7376_v60 = vpack.c.bf16 %v4647_v61, %v4644_v46  ;;  %v7379_v19 = vpack.c.bf16 %v4646_v20, %v4643_v16 }
 0x262   : > { %8994 = vrot.lane.b32.xlu0 %v11484_v31, %s12261_s25  ;;  %v8696_v58 = vunpack.i.l.bf16 %v11615_v41  ;;  %v5276_v59 = vld [vmem:[#allocation2 + $0x10] sm:$0xff] }
 0x263   : > { %9009 = vrot.lane.b32.xlu1 %v11589_v24, %s12257_s22  ;;  %7403 = vmatpush3.bf16.msk.msra.mxu1 %vm9730_vm13, %v7401_v9  ;;  %v5004_v36 = vsel %vm987_vm9, %v8721_v14, %v8722_v6  ;;  %5010 = vst.msk [vmem:[#allocation2 + $0x58] sm:$0xf0] %vm904_vm1, %v8722_v6  ;;  %v5275_v28 = vld [vmem:[#allocation2 + $0x8] sm:$0xff]  ;;  %v5274_v50 = vld [vmem:[#allocation2] sm:$0xff]  ;;  %s7520_s22 = smul.u32 (%p9217_p5), 3, %s9074_s23 }
 0x264   : > { %7378 = vmatprep.subr.msk.bf16.mxu0 %vm9730_vm13, %v7376_v60  ;;  %7434 = vmatprep.subr.bf16.mxu1 %v9099_v21  ;;  %5009 = vst [vmem:[#allocation2 + $0x50] sm:$0xf0] %v5004_v36  ;;  %v4933_v31 = vsel %vm912_vm4, %v8696_v58, %v8681_v45  ;;  %v11632_v34 = vpop.permute.xlu1 %8729  ;;  %5577 = vst.msk [vmem:[#allocation2 + $0x10] sm:$0xf] %vm886_vm0, %v11277_v33  ;;  %v11639_v13 = vpop.permute.xlu0 %8704 }
 0x265   : > { %7381 = vmatpush1.bf16.msk.msra.mxu0 %vm9730_vm13, %v7379_v19  ;;  %4938 = vst [vmem:[#allocation2 + $0x18] sm:$0xf] %v4933_v31  ;;  %v8731_v30 = vunpack.i.l.bf16 %v11632_v34  ;;  %5576 = vst [vmem:[#allocation2 + $0x8] sm:$0xf] %v11187_v35  ;;  %v8707_v62 = vunpack.i.h.bf16 %v11639_v13  ;;  %v8706_v33 = vunpack.i.l.bf16 %v11639_v13 }
 0x266   : > { %7028 = vmatmul.mubr.msk.f32.vlgmr.msra.gmra.mrb[10].mxu1 %vm957_vm7, %v11227_v22  ;;  %9004 = vrot.lane.b32.xlu0 %v11583_v12, %s12264_s17  ;;  %5575 = vst [vmem:[#allocation2] sm:$0xf] %v11133_v39  ;;  %v2795_v39 = vadd.f32 %v2794_v44, %v9771_v54 }
 0x267   : > { %9019 = vrot.lane.b32.xlu1 %v11589_v24, %s12259_s16  ;;  %7058 = vmatprep.mubr.msk.f32.mxu1 %vm9102_vm2, %v9103_v38  ;;  %v4975_v45 = vsel %vm957_vm7, %v8731_v30, %v8711_v4  ;;  %v5279_v35 = vld [vmem:[#allocation2 + $0x28] sm:$0xff]  ;;  %v4962_v52 = vsel %vm942_vm6, %v8706_v33, %v8707_v62  ;;  %4968 = vst.msk [vmem:[#allocation2 + $0x40] sm:$0xf] %vm886_vm0, %v8707_v62 }
 0x268   : > { %6684 = vmatmul.mubr.msk.f32.vlgmr.msra.gmra.mrb[10].mxu0 %vm957_vm7, %v11227_v22  ;;  %4980 = vst [vmem:[#allocation2 + $0x30] sm:$0xf0] %v4975_v45  ;;  %v11661_v40 = vpop.permute.xlu1 %8739  ;;  %v7435_v43 = vpack.c.bf16 %v5279_v35, %v5276_v59  ;;  %v5278_v27 = vld [vmem:[#allocation2 + $0x20] sm:$0xff]  ;;  %4967 = vst [vmem:[#allocation2 + $0x38] sm:$0xf] %v4962_v52  ;;  %v8715_v10 = vpop.permute.xlu0 %8714  ;;  %v2803_v5 = vcombine.high %v2795_v39, %v2795_v39  ;;  %v2824_v46 = vrot.slane %v2795_v39, %v10792_v47 }
 0x269   : > { %5389 = vmatprep.mubr.f32.mxu0 %v9103_v38  ;;  %v8741_v0 = vunpack.i.l.bf16 %v11661_v40  ;;  %v7404_v63 = vpack.c.bf16 %v5278_v27, %v5275_v28  ;;  %v8717_v22 = vunpack.i.h.bf16 %v8715_v10  ;;  %v8716_v56 = vunpack.i.l.bf16 %v8715_v10  ;;  %v2723_v2 = vpop.f32.mrb[4].mxu0 }
 0x26a   : > { %9014 = vrot.lane.b32.xlu0 %v11583_v12, %s12258_s18  ;;  %7436 = vmatpush3.bf16.msra.mxu1 %v7435_v43  ;;  %v2724_v48 = vadd.f32 %v2723_v2, %v9771_v54  ;;  %v2725_v23 = vpop.f32.mrb[5].mxu0  ;;  %v2831_v1 = vrot.slane %v2803_v5, %v10792_v47  ;;  %s7521_s18 = smul.u32 (%p9217_p5), 48, %s9078_s24 }
 0x26b   : > { %9029 = vrot.lane.b32.xlu1 %v11589_v24, %s12261_s25  ;;  %v5003_v4 = vsel %vm987_vm9, %v8741_v0, %v8721_v14  ;;  %7405 = vmatprep.subr.bf16.mxu0 %v7404_v63  ;;  %v4990_v51 = vsel %vm972_vm8, %v8716_v56, %v8717_v22  ;;  %4996 = vst.msk [vmem:[#allocation2 + $0x58] sm:$0xf] %vm886_vm0, %v8717_v22 }
 0x26c   : > { %7437 = vmatprep.subr.bf16.mxu1 %v9099_v21  ;;  %5008 = vst [vmem:[#allocation2 + $0x48] sm:$0xf0] %v5003_v4  ;;  %v2726_v57 = vadd.f32 %v2725_v23, %v9771_v54  ;;  %v8750_v26 = vpop.permute.xlu1 %8749  ;;  %v5277_v24 = vld [vmem:[#allocation2 + $0x18] sm:$0xff]  ;;  %4995 = vst [vmem:[#allocation2 + $0x50] sm:$0xf] %v4990_v51  ;;  %v8725_v61 = vpop.permute.xlu0 %8724  ;;  %s6244_s14 = sadd.s32 (%p9217_p5), %s7521_s18, %s7520_s22 }
 0x26d   : > { %v8752_v44 = vunpack.i.h.bf16 %v8750_v26  ;;  %v8751_v18 = vunpack.i.l.bf16 %v8750_v26  ;;  %v7406_v29 = vpack.c.bf16 %v5277_v24, %v5274_v50  ;;  %v8726_v9 = vunpack.i.l.bf16 %v8725_v61  ;;  %s6721_s23 = sshll.u32 (%p9217_p5), %s6244_s14, 3 }
 0x26e   : > { %9024 = vrot.lane.b32.xlu0 %v11583_v12, %s12260_s30  ;;  %v2801_v25 = vcombine.low %v2724_v48, %v2726_v57  ;;  %v2802_v17 = vcombine.high %v2724_v48, %v2726_v57  ;;  %v8727_v31 = vunpack.i.h.bf16 %v8725_v61  ;;  %v5282_v39 = vld [vmem:[#allocation2 + $0x40] sm:$0xff]  ;;  %s12156_s30 = scalar_lea.vmem (%p9217_p5), %s12224_s12, %s6721_s23 }
 0x26f   : > { %v5044_v16 = vsel %vm896_vm3, %v8752_v44, %v8692_v7  ;;  %v5045_v20 = vsel %vm896_vm3, %v8692_v7, %v8751_v18  ;;  %5051 = vst.msk [vmem:[#allocation2 + $0x88] sm:$0xf] %vm886_vm0, %v8751_v18  ;;  %7407 = vmatpush1.bf16.msra.mxu0 %v7406_v29  ;;  %v4961_v12 = vsel %vm942_vm6, %v8726_v9, %v8706_v33  ;;  %v5281_v57 = vld [vmem:[#allocation2 + $0x38] sm:$0xff] }
 0x270   : > { %v2810_v42 = vrot.slane %v2801_v25, %v10792_v47  ;;  %v2817_v6 = vrot.slane %v2802_v17, %v10792_v47  ;;  %5049 = vst [vmem:[#allocation2 + $0x78] sm:$0xf] %v5044_v16  ;;  %5050 = vst [vmem:[#allocation2 + $0x80] sm:$0xf] %v5045_v20  ;;  %v11686_v14 = vpop.permute.xlu1 %8759  ;;  %v8735_v60 = vpop.permute.xlu0 %8734  ;;  %v8697_v17 = vunpack.i.h.bf16 %v11615_v41 }
 0x271   : > { %4966 = vst [vmem:[#allocation2 + $0x30] sm:$0xf] %v4961_v12  ;;  %v8761_v28 = vunpack.i.l.bf16 %v11686_v14  ;;  %v8736_v50 = vunpack.i.l.bf16 %v8735_v60  ;;  %v8737_v26 = vunpack.i.h.bf16 %v8735_v60 }
 0x272   : > { %v2832_v19 = vcombine.low %v2810_v42, %v2824_v46  ;;  %v2833_v58 = vcombine.high %v2810_v42, %v2824_v46  ;;  %v2834_v36 = vcombine.low %v2817_v6, %v2831_v1  ;;  %v2835_v59 = vcombine.high %v2817_v6, %v2831_v1  ;;  %v5285_v30 = vld [vmem:[#allocation2 + $0x58] sm:$0xff] }
 0x273   : > { %v4989_v52 = vsel %vm972_vm8, %v8736_v50, %v8716_v56  ;;  %v7438_v10 = vpack.c.bf16 %v5285_v30, %v5282_v39  ;;  %v5284_v63 = vld [vmem:[#allocation2 + $0x50] sm:$0xff]  ;;  %v8762_v6 = vunpack.i.h.bf16 %v11686_v14 }
 0x274   : > { %v2842_v13 = vrot.slane %v2832_v19, %v10792_v47  ;;  %v2849_v62 = vrot.slane %v2834_v36, %v10792_v47  ;;  %v2856_v33 = vrot.slane %v2833_v58, %v10792_v47  ;;  %v2863_v45 = vrot.slane %v2835_v59, %v10792_v47  ;;  %v8770_v35 = vpop.permute.xlu1 %8769  ;;  %v8745_v0 = vpop.permute.xlu0 %8744  ;;  %4994 = vst [vmem:[#allocation2 + $0x48] sm:$0xf] %v4989_v52 }
 0x275   : > { %v8772_v43 = vunpack.i.h.bf16 %v8770_v35  ;;  %v8771_v27 = vunpack.i.l.bf16 %v8770_v35  ;;  %v8747_v5 = vunpack.i.h.bf16 %v8745_v0  ;;  %v8746_v51 = vunpack.i.l.bf16 %v8745_v0  ;;  %7439 = vmatpush3.bf16.msra.mxu1 %v7438_v10 }
 0x276   : > { %v2864_v22 = vcombine.high %v2842_v13, %v2842_v13  ;;  %v2865_v2 = vcombine.high %v2849_v62, %v2849_v62  ;;  %v2866_v4 = vcombine.high %v2856_v33, %v2856_v33  ;;  %v2867_v48 = vcombine.high %v2863_v45, %v2863_v45  ;;  %6648 = vst.msk [vmem:[%s10897_s20 + $0x2] ss:$8 sm:$0x7] %vm10821_vm14, %v2842_v13 }
 0x277   : > { %6649 = vst.msk [vmem:[%s10897_s20 + $0x1a] ss:$8 sm:$0x7] %vm10821_vm14, %v2856_v33  ;;  %6652 = vst.msk [vmem:[%s10897_s20 + $0x62] ss:$8 sm:$0x7] %vm10821_vm14, %v2849_v62  ;;  %v5086_v56 = vsel %vm942_vm6, %v8772_v43, %v8727_v31  ;;  %v5087_v23 = vsel %vm942_vm6, %v8727_v31, %v8771_v27  ;;  %v7408_v24 = vpack.c.bf16 %v5284_v63, %v5281_v57  ;;  %7440 = vmatprep.subr.bf16.mxu1 %v9099_v21 }
 0x278   : > { %6653 = vst.msk [vmem:[%s10897_s20 + $0x7a] ss:$8 sm:$0x7] %vm10821_vm14, %v2863_v45  ;;  %6650 = vst.msk [vmem:[%s10897_s20 + $0x32] ss:$8 sm:$0x7] %vm10821_vm14, %v2864_v22  ;;  %v8780_v7 = vpop.permute.xlu1 %8779  ;;  %v5017_v44 = vsel %vm1002_vm10, %v8761_v28, %v8746_v51  ;;  %v5018_v18 = vsel %vm1002_vm10, %v8746_v51, %v8747_v5  ;;  %v8755_v25 = vpop.permute.xlu0 %8754  ;;  %v8702_v59 = vunpack.i.h.bf16 %v11579_v15  ;;  %v8732_v52 = vunpack.i.h.bf16 %v11632_v34 }
 0x279   : > { %5093 = vst.msk [vmem:[#allocation2 + $0xa0] sm:$0xf0] %vm904_vm1, %v8771_v27  ;;  %5091 = vst [vmem:[#allocation2 + $0x90] sm:$0xf0] %v5086_v56  ;;  %v8782_v61 = vunpack.i.h.bf16 %v8780_v7  ;;  %v8781_v29 = vunpack.i.l.bf16 %v8780_v7  ;;  %7409 = vmatprep.subr.bf16.mxu0 %v7408_v24  ;;  %v8757_v9 = vunpack.i.h.bf16 %v8755_v25  ;;  %v8756_v46 = vunpack.i.l.bf16 %v8755_v25  ;;  %v5280_v58 = vld [vmem:[#allocation2 + $0x30] sm:$0xff] }
 0x27a   : > { %6651 = vst.msk [vmem:[%s10897_s20 + $0x4a] ss:$8 sm:$0x7] %vm10821_vm14, %v2866_v4  ;;  %6654 = vst.msk [vmem:[%s10897_s20 + $0x92] ss:$8 sm:$0x7] %vm10821_vm14, %v2865_v2 }
 0x27b   : > { %6655 = vst.msk [vmem:[%s10897_s20 + $0xaa] ss:$8 sm:$0x7] %vm10821_vm14, %v2867_v48  ;;  %5092 = vst [vmem:[#allocation2 + $0x98] sm:$0xf0] %v5087_v23  ;;  %v5114_v16 = vsel %vm972_vm8, %v8782_v61, %v8737_v26  ;;  %v5115_v20 = vsel %vm972_vm8, %v8737_v26, %v8781_v29  ;;  %v5058_v1 = vsel %vm912_vm4, %v8757_v9, %v8697_v17  ;;  %v5283_v36 = vld [vmem:[#allocation2 + $0x48] sm:$0xff] }
 0x27c   : > { %5024 = vst.msk [vmem:[#allocation2 + $0x70] sm:$0xf] %vm886_vm0, %v8747_v5  ;;  %5022 = vst [vmem:[#allocation2 + $0x60] sm:$0xf] %v5017_v44  ;;  %v5059_v42 = vsel %vm912_vm4, %v8697_v17, %v8756_v46  ;;  %v8790_v41 = vpop.permute.xlu1 %8789  ;;  %v8765_v19 = vpop.permute.xlu0 %8764  ;;  %v7410_v50 = vpack.c.bf16 %v5283_v36, %v5280_v58 }
 0x27d   : > { %5023 = vst [vmem:[#allocation2 + $0x68] sm:$0xf] %v5018_v18  ;;  %5121 = vst.msk [vmem:[#allocation2 + $0xb8] sm:$0xf0] %vm904_vm1, %v8781_v29  ;;  %v8792_v12 = vunpack.i.h.bf16 %v8790_v41  ;;  %v8791_v60 = vunpack.i.l.bf16 %v8790_v41  ;;  %v8767_v31 = vunpack.i.h.bf16 %v8765_v19  ;;  %v8766_v28 = vunpack.i.l.bf16 %v8765_v19 }
 0x27e   : > { %5119 = vst [vmem:[#allocation2 + $0xa8] sm:$0xf0] %v5114_v16  ;;  %5120 = vst [vmem:[#allocation2 + $0xb0] sm:$0xf0] %v5115_v20  ;;  %7411 = vmatpush1.bf16.msra.mxu0 %v7410_v50 }
 0x27f   : > { %5065 = vst.msk [vmem:[#allocation2 + $0x88] sm:$0xf0] %vm904_vm1, %v8756_v46  ;;  %5063 = vst [vmem:[#allocation2 + $0x78] sm:$0xf0] %v5058_v1  ;;  %v5142_v30 = vsel %vm1002_vm10, %v8792_v12, %v8762_v6  ;;  %v5143_v13 = vsel %vm1002_vm10, %v8762_v6, %v8791_v60  ;;  %v5072_v14 = vsel %vm927_vm5, %v8767_v31, %v8702_v59 }
 0x280   : > { %5064 = vst [vmem:[#allocation2 + $0x80] sm:$0xf0] %v5059_v42  ;;  %5149 = vst.msk [vmem:[#allocation2 + $0xd0] sm:$0xf0] %vm904_vm1, %v8791_v60  ;;  %v5073_v62 = vsel %vm927_vm5, %v8702_v59, %v8766_v28  ;;  %v11740_v33 = vpop.permute.xlu1 %8799  ;;  %v8775_v45 = vpop.permute.xlu0 %8774 }
 0x281   : > { %5147 = vst [vmem:[#allocation2 + $0xc0] sm:$0xf0] %v5142_v30  ;;  %5148 = vst [vmem:[#allocation2 + $0xc8] sm:$0xf0] %v5143_v13  ;;  %v8777_v43 = vunpack.i.h.bf16 %v8775_v45  ;;  %v8776_v27 = vunpack.i.l.bf16 %v8775_v45  ;;  %v8801_v26 = vunpack.i.l.bf16 %v11740_v33 }
 0x282   : > { %5079 = vst.msk [vmem:[#allocation2 + $0xa0] sm:$0xf] %vm886_vm0, %v8766_v28  ;;  %5077 = vst [vmem:[#allocation2 + $0x90] sm:$0xf] %v5072_v14 }
 0x283   : > { %v5288_v15 = vld [vmem:[#allocation2 + $0x70] sm:$0xff]  ;;  %5078 = vst [vmem:[#allocation2 + $0x98] sm:$0xf] %v5073_v62  ;;  %v5286_v39 = vld [vmem:[#allocation2 + $0x60] sm:$0xff]  ;;  %v5100_v10 = vsel %vm957_vm7, %v8777_v43, %v8732_v52  ;;  %v5101_v63 = vsel %vm957_vm7, %v8732_v52, %v8776_v27  ;;  %5107 = vst.msk [vmem:[#allocation2 + $0xb8] sm:$0xf] %vm886_vm0, %v8776_v27 }
 0x284   : > { %5703 = vst.msk [vmem:[#allocation2 + $0x70] sm:$0xf0] %vm904_vm1, %v11414_v32  ;;  %v5287_v35 = vld [vmem:[#allocation2 + $0x68] sm:$0xff]  ;;  %5701 = vst [vmem:[#allocation2 + $0x60] sm:$0xf0] %v11457_v8  ;;  %v8810_v22 = vpop.permute.xlu1 %8809  ;;  %v8785_v56 = vpop.permute.xlu0 %8784  ;;  %v8742_v8 = vunpack.i.h.bf16 %v11661_v40 }
 0x285   : > { %5702 = vst [vmem:[#allocation2 + $0x68] sm:$0xf0] %v11410_v49  ;;  %5105 = vst [vmem:[#allocation2 + $0xa8] sm:$0xf] %v5100_v10  ;;  %v8812_v34 = vunpack.i.h.bf16 %v8810_v22  ;;  %v8811_v48 = vunpack.i.l.bf16 %v8810_v22  ;;  %v8787_v5 = vunpack.i.h.bf16 %v8785_v56  ;;  %v8786_v51 = vunpack.i.l.bf16 %v8785_v56 }
 0x286   : > { %v5291_v0 = vld [vmem:[#allocation2 + $0x88] sm:$0xff]  ;;  %v5289_v4 = vld [vmem:[#allocation2 + $0x78] sm:$0xff]  ;;  %5106 = vst [vmem:[#allocation2 + $0xb0] sm:$0xf] %v5101_v63 }
 0x287   : > { %v7441_v2 = vpack.c.bf16 %v5291_v0, %v5288_v15  ;;  %v5290_v32 = vld [vmem:[#allocation2 + $0x80] sm:$0xff]  ;;  %v7414_v49 = vpack.c.bf16 %v5289_v4, %v5286_v39  ;;  %v5197_v57 = vsel %vm927_vm5, %v8811_v48, %v8812_v34  ;;  %5203 = vst.msk [vmem:[#allocation2 + $0x100] sm:$0xf0] %vm904_vm1, %v8812_v34  ;;  %v5128_v24 = vsel %vm987_vm9, %v8787_v5, %v8742_v8 }
 0x288   : > { %v7412_v23 = vpack.c.bf16 %v5290_v32, %v5287_v35  ;;  %5202 = vst [vmem:[#allocation2 + $0xf8] sm:$0xf0] %v5197_v57  ;;  %v5129_v7 = vsel %vm987_vm9, %v8742_v8, %v8786_v51  ;;  %5135 = vst.msk [vmem:[#allocation2 + $0xd0] sm:$0xf] %vm886_vm0, %v8786_v51  ;;  %v8820_v40 = vpop.permute.xlu1 %8819  ;;  %v8795_v61 = vpop.permute.xlu0 %8794 }
 0x289   : > { %7442 = vmatpush3.bf16.msra.mxu1 %v7441_v2  ;;  %5133 = vst [vmem:[#allocation2 + $0xc0] sm:$0xf] %v5128_v24  ;;  %5134 = vst [vmem:[#allocation2 + $0xc8] sm:$0xf] %v5129_v7  ;;  %v8822_v44 = vunpack.i.h.bf16 %v8820_v40  ;;  %v8821_v18 = vunpack.i.l.bf16 %v8820_v40  ;;  %v8797_v29 = vunpack.i.h.bf16 %v8795_v61  ;;  %v8796_v25 = vunpack.i.l.bf16 %v8795_v61  ;;  %v5294_v9 = vld [vmem:[#allocation2 + $0xa0] sm:$0xff]  ;;  %v5292_v12 = vld [vmem:[#allocation2 + $0x90] sm:$0xff] }
 0x28a   : > { %7413 = vmatprep.subr.bf16.mxu0 %v7412_v23  ;;  %7443 = vmatprep.subr.bf16.mxu1 %v9099_v21  ;;  %v5297_v46 = vld [vmem:[#allocation2 + $0xb8] sm:$0xff] }
 0x28b   : > { %7415 = vmatpush1.bf16.msra.mxu0 %v7414_v49  ;;  %v5225_v17 = vsel %vm957_vm7, %v8821_v18, %v8822_v44  ;;  %5231 = vst.msk [vmem:[#allocation2 + $0x118] sm:$0xf0] %vm904_vm1, %v8822_v44  ;;  %v5293_v16 = vld [vmem:[#allocation2 + $0x98] sm:$0xff]  ;;  %v5168_v20 = vsel %vm896_vm3, %v8801_v26, %v8796_v25  ;;  %v5169_v1 = vsel %vm896_vm3, %v8796_v25, %v8797_v29  ;;  %5175 = vst.msk [vmem:[#allocation2 + $0xe8] sm:$0xf0] %vm904_vm1, %v8797_v29 }
 0x28c   : > { %5230 = vst [vmem:[#allocation2 + $0x110] sm:$0xf0] %v5225_v17  ;;  %v11763_v42 = vpop.permute.xlu1 %8829  ;;  %v7444_v41 = vpack.c.bf16 %v5297_v46, %v5294_v9  ;;  %v5295_v60 = vld [vmem:[#allocation2 + $0xa8] sm:$0xff]  ;;  %5173 = vst [vmem:[#allocation2 + $0xd8] sm:$0xf0] %v5168_v20  ;;  %v8805_v58 = vpop.permute.xlu0 %8804 }
 0x28d   : > { %v5296_v6 = vld [vmem:[#allocation2 + $0xb0] sm:$0xff]  ;;  %5174 = vst [vmem:[#allocation2 + $0xe0] sm:$0xf0] %v5169_v1  ;;  %v8831_v19 = vunpack.i.l.bf16 %v11763_v42  ;;  %v7418_v59 = vpack.c.bf16 %v5295_v60, %v5292_v12  ;;  %v8807_v31 = vunpack.i.h.bf16 %v8805_v58  ;;  %v8806_v28 = vunpack.i.l.bf16 %v8805_v58 }
 0x28e   : > { %v7416_v36 = vpack.c.bf16 %v5296_v6, %v5293_v16  ;;  %7445 = vmatpush3.bf16.msra.mxu1 %v7444_v41 }
 0x28f   : > { %v5196_v50 = vsel %vm927_vm5, %v8831_v19, %v8811_v48  ;;  %7446 = vmatprep.subr.bf16.mxu1 %v9099_v21  ;;  %v5183_v30 = vsel %vm912_vm4, %v8806_v28, %v8807_v31  ;;  %5189 = vst.msk [vmem:[#allocation2 + $0x100] sm:$0xf] %vm886_vm0, %v8807_v31  ;;  %v5300_v39 = vld [vmem:[#allocation2 + $0xd0] sm:$0xff] }
 0x290   : > { %7417 = vmatprep.subr.bf16.mxu0 %v7416_v36  ;;  %5201 = vst [vmem:[#allocation2 + $0xf0] sm:$0xf0] %v5196_v50  ;;  %v11770_v13 = vpop.permute.xlu1 %8839  ;;  %5188 = vst [vmem:[#allocation2 + $0xf8] sm:$0xf] %v5183_v30  ;;  %v8815_v62 = vpop.permute.xlu0 %8814  ;;  %v5299_v43 = vld [vmem:[#allocation2 + $0xc8] sm:$0xff]  ;;  %v5298_v22 = vld [vmem:[#allocation2 + $0xc0] sm:$0xff] }
 0x291   : > { %7419 = vmatpush1.bf16.msra.mxu0 %v7418_v59  ;;  %v8841_v14 = vunpack.i.l.bf16 %v11770_v13  ;;  %v8817_v15 = vunpack.i.h.bf16 %v8815_v62  ;;  %v8816_v45 = vunpack.i.l.bf16 %v8815_v62 }
 0x292   : > { %v5303_v52 = vld [vmem:[#allocation2 + $0xe8] sm:$0xff] }
 0x293   : > { %v5224_v35 = vsel %vm957_vm7, %v8841_v14, %v8821_v18  ;;  %v5211_v27 = vsel %vm942_vm6, %v8816_v45, %v8817_v15  ;;  %5217 = vst.msk [vmem:[#allocation2 + $0x118] sm:$0xf] %vm886_vm0, %v8817_v15  ;;  %v7447_v10 = vpack.c.bf16 %v5303_v52, %v5300_v39  ;;  %5826 = vst.msk [vmem:[#allocation2 + $0xe8] sm:$0xf] %vm886_vm0, %v11559_v11  ;;  %v5301_v2 = vld [vmem:[#allocation2 + $0xd8] sm:$0xff] }
 0x294   : > { %5229 = vst [vmem:[#allocation2 + $0x108] sm:$0xf0] %v5224_v35  ;;  %v11776_v0 = vpop.permute.xlu1 %8849  ;;  %v5302_v63 = vld [vmem:[#allocation2 + $0xe0] sm:$0xff]  ;;  %5216 = vst [vmem:[#allocation2 + $0x110] sm:$0xf] %v5211_v27  ;;  %v8825_v34 = vpop.permute.xlu0 %8824  ;;  %v7422_v56 = vpack.c.bf16 %v5301_v2, %v5298_v22 }
 0x295   : > { %v8852_v32 = vunpack.i.h.bf16 %v11776_v0  ;;  %v8851_v4 = vunpack.i.l.bf16 %v11776_v0  ;;  %v7420_v48 = vpack.c.bf16 %v5302_v63, %v5299_v43  ;;  %5825 = vst [vmem:[#allocation2 + $0xe0] sm:$0xf] %v11461_v3  ;;  %5824 = vst [vmem:[#allocation2 + $0xd8] sm:$0xf] %v11432_v37  ;;  %v8826_v23 = vunpack.i.l.bf16 %v8825_v34  ;;  %7448 = vmatpush3.bf16.msra.mxu1 %v7447_v10 }
 0x296   : > { %7449 = vmatprep.subr.bf16.mxu1 %v9099_v21  ;;  %v5306_v5 = vld [vmem:[#allocation2 + $0x100] sm:$0xff]  ;;  %v8827_v20 = vunpack.i.h.bf16 %v8825_v34  ;;  %v8802_v34 = vunpack.i.h.bf16 %v11740_v33 }
 0x297   : > { %v5253_v11 = vsel %vm987_vm9, %v8851_v4, %v8852_v32  ;;  %5259 = vst.msk [vmem:[#allocation2 + $0x130] sm:$0xf0] %vm904_vm1, %v8852_v32  ;;  %7421 = vmatprep.subr.bf16.mxu0 %v7420_v48  ;;  %v5182_v49 = vsel %vm912_vm4, %v8826_v23, %v8806_v28  ;;  %v5305_v40 = vld [vmem:[#allocation2 + $0xf8] sm:$0xff] }
 0x298   : > { %5258 = vst [vmem:[#allocation2 + $0x128] sm:$0xf0] %v5253_v11  ;;  %v11790_v8 = vpop.permute.xlu1 %8859  ;;  %7423 = vmatpush1.bf16.msra.mxu0 %v7422_v56  ;;  %5187 = vst [vmem:[#allocation2 + $0xf0] sm:$0xf] %v5182_v49  ;;  %v8835_v3 = vpop.permute.xlu0 %8834  ;;  %v8832_v49 = vunpack.i.h.bf16 %v11763_v42 }
 0x299   : > { %v8836_v37 = vunpack.i.l.bf16 %v8835_v3  ;;  %v8861_v57 = vunpack.i.l.bf16 %v11790_v8  ;;  %v8837_v30 = vunpack.i.h.bf16 %v8835_v3  ;;  %v8862_v10 = vunpack.i.h.bf16 %v11790_v8 }
 0x29a   : > { %v5309_v51 = vld [vmem:[#allocation2 + $0x118] sm:$0xff] }
 0x29b   : > { %v5210_v26 = vsel %vm942_vm6, %v8836_v37, %v8816_v45  ;;  %v7450_v7 = vpack.c.bf16 %v5309_v51, %v5306_v5  ;;  %v5308_v44 = vld [vmem:[#allocation2 + $0x110] sm:$0xff] }
 0x29c   : > { %v11794_v24 = vpop.permute.xlu1 %8869  ;;  %5215 = vst [vmem:[#allocation2 + $0x108] sm:$0xf] %v5210_v26  ;;  %v8845_v18 = vpop.permute.xlu0 %8844  ;;  %v7424_v61 = vpack.c.bf16 %v5308_v44, %v5305_v40 }
 0x29d   : > { %v8847_v29 = vunpack.i.h.bf16 %v8845_v18  ;;  %v8846_v25 = vunpack.i.l.bf16 %v8845_v18  ;;  %7451 = vmatpush3.bf16.msra.mxu1 %v7450_v7  ;;  %v8871_v17 = vunpack.i.l.bf16 %v11794_v24  ;;  %v8872_v37 = vunpack.i.h.bf16 %v11794_v24 }
 0x29e   : > { %7425 = vmatprep.subr.bf16.mxu0 %v7424_v61  ;;  %7452 = vmatprep.subr.bf16.mxu1 %v9099_v21 }
 0x29f   : > { %v5238_v9 = vsel %vm972_vm8, %v8861_v57, %v8846_v25  ;;  %v5239_v46 = vsel %vm972_vm8, %v8846_v25, %v8847_v29  ;;  %5245 = vst.msk [vmem:[#allocation2 + $0x130] sm:$0xf] %vm886_vm0, %v8847_v29  ;;  %v5304_v28 = vld [vmem:[#allocation2 + $0xf0] sm:$0xff] }
 0x2a0   : > { %v8880_v16 = vpop.permute.xlu1 %8879  ;;  %5243 = vst [vmem:[#allocation2 + $0x120] sm:$0xf] %v5238_v9  ;;  %5244 = vst [vmem:[#allocation2 + $0x128] sm:$0xf] %v5239_v46  ;;  %v8855_v6 = vpop.permute.xlu0 %8854 }
 0x2a1   : > { %v8882_v1 = vunpack.i.h.bf16 %v8880_v16  ;;  %v8881_v41 = vunpack.i.l.bf16 %v8880_v16  ;;  %v8857_v12 = vunpack.i.h.bf16 %v8855_v6  ;;  %v8856_v60 = vunpack.i.l.bf16 %v8855_v6 }
 0x2a3   : > { %v5600_v19 = vsel %vm912_vm4, %v8882_v1, %v8827_v20  ;;  %v5601_v58 = vsel %vm912_vm4, %v8827_v20, %v8881_v41  ;;  %5607 = vst.msk [vmem:[#allocation2 + $0x28] sm:$0xf] %vm886_vm0, %v8881_v41  ;;  %v5266_v36 = vsel %vm1002_vm10, %v8871_v17, %v8856_v60  ;;  %v5267_v59 = vsel %vm1002_vm10, %v8856_v60, %v8857_v12  ;;  %v5307_v50 = vld [vmem:[#allocation2 + $0x108] sm:$0xff] }
 0x2a4   : > { %5605 = vst [vmem:[#allocation2 + $0x18] sm:$0xf] %v5600_v19  ;;  %5606 = vst [vmem:[#allocation2 + $0x20] sm:$0xf] %v5601_v58  ;;  %v8890_v31 = vpop.permute.xlu1 %8889  ;;  %v11807_v15 = vpop.permute.xlu0 %8864  ;;  %v7426_v45 = vpack.c.bf16 %v5307_v50, %v5304_v28 }
 0x2a5   : > { %5273 = vst.msk [vmem:[#allocation2 + $0x148] sm:$0xf] %vm886_vm0, %v8857_v12  ;;  %5271 = vst [vmem:[#allocation2 + $0x138] sm:$0xf] %v5266_v36  ;;  %v8892_v14 = vunpack.i.h.bf16 %v8890_v31  ;;  %v8891_v62 = vunpack.i.l.bf16 %v8890_v31  ;;  %v8866_v35 = vunpack.i.l.bf16 %v11807_v15 }
 0x2a6   : > { %5272 = vst [vmem:[#allocation2 + $0x140] sm:$0xf] %v5267_v59  ;;  %7427 = vmatpush1.bf16.msra.mxu0 %v7426_v45  ;;  %v5312_v18 = vld [vmem:[#allocation2 + $0x130] sm:$0xff] }
 0x2a7   : > { %v5628_v39 = vsel %vm942_vm6, %v8892_v14, %v8837_v30  ;;  %v5629_v52 = vsel %vm942_vm6, %v8837_v30, %v8891_v62  ;;  %5635 = vst.msk [vmem:[#allocation2 + $0x40] sm:$0xf] %vm886_vm0, %v8891_v62  ;;  %v5252_v43 = vsel %vm987_vm9, %v8866_v35, %v8851_v4  ;;  %v5311_v41 = vld [vmem:[#allocation2 + $0x128] sm:$0xff]  ;;  %v8842_v62 = vunpack.i.h.bf16 %v11770_v13 }
 0x2a8   : > { %5633 = vst [vmem:[#allocation2 + $0x30] sm:$0xf] %v5628_v39  ;;  %5634 = vst [vmem:[#allocation2 + $0x38] sm:$0xf] %v5629_v52  ;;  %v8900_v27 = vpop.permute.xlu1 %8899  ;;  %v3461_v2 = vpop.f32.mrb[6].mxu1 }
 0x2a9   : > { %5257 = vst [vmem:[#allocation2 + $0x120] sm:$0xf0] %v5252_v43  ;;  %v8902_v63 = vunpack.i.h.bf16 %v8900_v27  ;;  %v8901_v22 = vunpack.i.l.bf16 %v8900_v27  ;;  %v8875_v32 = vpop.permute.xlu0 %8874  ;;  %v3462_v48 = vadd.f32 %v3461_v2, %v9771_v54  ;;  %v6967_v11 = vpop.f32.mrb[7].mxu1 }
 0x2aa   : > { %v8877_v56 = vunpack.i.h.bf16 %v8875_v32  ;;  %v8876_v23 = vunpack.i.l.bf16 %v8875_v32 }
 0x2ab   : > { %v5656_v0 = vsel %vm972_vm8, %v8902_v63, %v8862_v10  ;;  %v5657_v4 = vsel %vm972_vm8, %v8862_v10, %v8901_v22  ;;  %5663 = vst.msk [vmem:[#allocation2 + $0x58] sm:$0xf] %vm886_vm0, %v8901_v22  ;;  %v3390_v8 = vpop.f32.mrb[6].mxu0  ;;  %v3470_v33 = vcombine.high %v3462_v48, %v3462_v48  ;;  %v3491_v29 = vrot.slane %v3462_v48, %v10792_v47  ;;  %v11849_v63 = vld [vmem:[%s12222_s10] sm:$0xff] }
 0x2ac   : > { %v5315_v3 = vld [vmem:[#allocation2 + $0x148] sm:$0xf]  ;;  %5661 = vst [vmem:[#allocation2 + $0x48] sm:$0xf] %v5656_v0  ;;  %5662 = vst [vmem:[#allocation2 + $0x50] sm:$0xf] %v5657_v4  ;;  %v5586_v5 = vsel %vm896_vm3, %v8877_v56, %v8802_v34  ;;  %v5587_v51 = vsel %vm896_vm3, %v8802_v34, %v8876_v23  ;;  %v3391_v26 = vadd.f32 %v3390_v8, %v9771_v54 }
 0x2ad   : > { %5593 = vst.msk [vmem:[#allocation2 + $0x10] sm:$0xf0] %vm904_vm1, %v8876_v23  ;;  %v3392_v42 = vpop.f32.mrb[7].mxu0  ;;  %v8910_v57 = vpop.permute.xlu1 %8909  ;;  %5591 = vst [vmem:[#allocation2] sm:$0xf0] %v5586_v5  ;;  %v7453_v9 = vpack.c.bf16 %v5315_v3, %v5312_v18  ;;  %v3498_v6 = vrot.slane %v3470_v33, %v10792_v47 }
 0x2ae   : > { %5592 = vst [vmem:[#allocation2 + $0x8] sm:$0xf0] %v5587_v51  ;;  %v3393_v7 = vadd.f32 %v3392_v42, %v9771_v54  ;;  %v8912_v40 = vunpack.i.h.bf16 %v8910_v57  ;;  %v8911_v44 = vunpack.i.l.bf16 %v8910_v57  ;;  %v8885_v24 = vpop.permute.xlu0 %8884  ;;  %v5314_v61 = vld [vmem:[#allocation2 + $0x140] sm:$0xf]  ;;  %v5313_v14 = vld [vmem:[#allocation2 + $0x138] sm:$0xf] }
 0x2af   : > { %v8887_v25 = vunpack.i.h.bf16 %v8885_v24  ;;  %v8886_v17 = vunpack.i.l.bf16 %v8885_v24  ;;  %7455 = vmatpush3.bf16.msk.msra.mxu1 %vm9730_vm13, %v7453_v9  ;;  %v7428_v19 = vpack.c.bf16 %v5314_v61, %v5311_v41 }
 0x2b0   : > { %v3468_v46 = vcombine.low %v3391_v26, %v3393_v7  ;;  %v3469_v16 = vcombine.high %v3391_v26, %v3393_v7  ;;  %v5684_v20 = vsel %vm1002_vm10, %v8912_v40, %v8872_v37  ;;  %v5685_v1 = vsel %vm1002_vm10, %v8872_v37, %v8911_v44  ;;  %5691 = vst.msk [vmem:[#allocation2 + $0x70] sm:$0xf] %vm886_vm0, %v8911_v44  ;;  %v5310_v36 = vld [vmem:[#allocation2 + $0x120] sm:$0xff] }
 0x2b1   : > { %5689 = vst [vmem:[#allocation2 + $0x60] sm:$0xf] %v5684_v20  ;;  %5690 = vst [vmem:[#allocation2 + $0x68] sm:$0xf] %v5685_v1  ;;  %v5614_v12 = vsel %vm927_vm5, %v8887_v25, %v8832_v49  ;;  %v5615_v60 = vsel %vm927_vm5, %v8832_v49, %v8886_v17  ;;  %v8920_v58 = vpop.permute.xlu1 %8919  ;;  %7486 = vmatprep.subr.bf16.mxu1 %v9099_v21  ;;  %7430 = vmatprep.subr.msk.bf16.mxu0 %vm9730_vm13, %v7428_v19  ;;  %v8867_v49 = vunpack.i.h.bf16 %v11807_v15 }
 0x2b2   : > { %5621 = vst.msk [vmem:[#allocation2 + $0x28] sm:$0xf0] %vm904_vm1, %v8886_v17  ;;  %v3477_v59 = vrot.slane %v3468_v46, %v10792_v47  ;;  %v3484_v31 = vrot.slane %v3469_v16, %v10792_v47  ;;  %5619 = vst [vmem:[#allocation2 + $0x18] sm:$0xf0] %v5614_v12  ;;  %v8922_v28 = vunpack.i.h.bf16 %v8920_v58  ;;  %v8921_v50 = vunpack.i.l.bf16 %v8920_v58  ;;  %v8895_v30 = vpop.permute.xlu0 %8894  ;;  %7059 = vmatmul.mubr.msk.f32.vlgmr.msra.gmra.mrb[12].mxu1 %vm957_vm7, %v11849_v63 }
 0x2b3   : > { %5620 = vst [vmem:[#allocation2 + $0x20] sm:$0xf0] %v5615_v60  ;;  %v8897_v45 = vunpack.i.h.bf16 %v8895_v30  ;;  %v8896_v35 = vunpack.i.l.bf16 %v8895_v30  ;;  %v7431_v39 = vpack.c.bf16 %v5313_v14, %v5310_v36  ;;  %7089 = vmatprep.mubr.msk.f32.mxu1 %vm9102_vm2, %v9103_v38 }
 0x2b4   : > { %v3499_v52 = vcombine.low %v3477_v59, %v3491_v29  ;;  %v3500_v43 = vcombine.high %v3477_v59, %v3491_v29  ;;  %v3501_v27 = vcombine.low %v3484_v31, %v3498_v6  ;;  %v3502_v10 = vcombine.high %v3484_v31, %v3498_v6  ;;  %5732 = vst.msk [vmem:[#allocation2 + $0x88] sm:$0xf0] %vm904_vm1, %v8922_v28  ;;  %v5943_v15 = vld [vmem:[#allocation2 + $0x10] sm:$0xff]  ;;  %v5941_v18 = vld [vmem:[#allocation2] sm:$0xff] }
 0x2b5   : > { %v5726_v13 = vsel %vm912_vm4, %v8921_v50, %v8922_v28  ;;  %v5642_v22 = vsel %vm957_vm7, %v8897_v45, %v8842_v62  ;;  %v5643_v2 = vsel %vm957_vm7, %v8842_v62, %v8896_v35  ;;  %5649 = vst.msk [vmem:[#allocation2 + $0x40] sm:$0xf0] %vm904_vm1, %v8896_v35  ;;  %7433 = vmatpush1.bf16.msk.msra.mxu0 %vm9730_vm13, %v7431_v39  ;;  %v11859_v32 = vpop.permute.xlu1 %8929  ;;  %v5942_v42 = vld [vmem:[#allocation2 + $0x8] sm:$0xff] }
 0x2b6   : > { %v3509_v34 = vrot.slane %v3499_v52, %v10792_v47  ;;  %v3516_v48 = vrot.slane %v3501_v27, %v10792_v47  ;;  %v3523_v56 = vrot.slane %v3500_v43, %v10792_v47  ;;  %v3530_v23 = vrot.slane %v3502_v10, %v10792_v47  ;;  %5731 = vst [vmem:[#allocation2 + $0x80] sm:$0xf0] %v5726_v13  ;;  %v8905_v11 = vpop.permute.xlu0 %8904 }
 0x2b7   : > { %5647 = vst [vmem:[#allocation2 + $0x30] sm:$0xf0] %v5642_v22  ;;  %5648 = vst [vmem:[#allocation2 + $0x38] sm:$0xf0] %v5643_v2  ;;  %v8931_v0 = vunpack.i.l.bf16 %v11859_v32  ;;  %v8907_v4 = vunpack.i.h.bf16 %v8905_v11  ;;  %v8906_v8 = vunpack.i.l.bf16 %v8905_v11  ;;  %v5955_v22 = vld [vmem:[#allocation2 + $0x70] sm:$0xff] }
 0x2b8   : > { %v3531_v3 = vcombine.high %v3509_v34, %v3509_v34  ;;  %v3532_v37 = vcombine.high %v3516_v48, %v3516_v48  ;;  %v3533_v33 = vcombine.high %v3523_v56, %v3523_v56  ;;  %v3534_v5 = vcombine.high %v3530_v23, %v3530_v23  ;;  %6661 = vst.msk [vmem:[%s10897_s20 + $0x3] ss:$8 sm:$0x7] %vm10821_vm14, %v3509_v34 }
 0x2b9   : > { %6662 = vst.msk [vmem:[%s10897_s20 + $0x1b] ss:$8 sm:$0x7] %vm10821_vm14, %v3523_v56  ;;  %6665 = vst.msk [vmem:[%s10897_s20 + $0x63] ss:$8 sm:$0x7] %vm10821_vm14, %v3516_v48  ;;  %6697 = vmatmul.mubr.msk.f32.vlgmr.msra.gmra.mrb[12].mxu0 %vm957_vm7, %v11849_v63  ;;  %v5725_v57 = vsel %vm912_vm4, %v8931_v0, %v8921_v50  ;;  %v5670_v26 = vsel %vm987_vm9, %v8907_v4, %v8867_v49  ;;  %v5671_v7 = vsel %vm987_vm9, %v8867_v49, %v8906_v8  ;;  %v8940_v40 = vpop.permute.xlu1 %8939 }
 0x2ba   : > { %6666 = vst.msk [vmem:[%s10897_s20 + $0x7b] ss:$8 sm:$0x7] %vm10821_vm14, %v3530_v23  ;;  %v5946_v51 = vld [vmem:[#allocation2 + $0x28] sm:$0xff]  ;;  %v5945_v24 = vld [vmem:[#allocation2 + $0x20] sm:$0xff]  ;;  %v5944_v61 = vld [vmem:[#allocation2 + $0x18] sm:$0xff]  ;;  %6056 = vmatprep.mubr.f32.mxu0 %v9103_v38  ;;  %v8942_v29 = vunpack.i.h.bf16 %v8940_v40  ;;  %v8941_v25 = vunpack.i.l.bf16 %v8940_v40  ;;  %v8915_v17 = vpop.permute.xlu0 %8914 }
 0x2bb   : > { %5677 = vst.msk [vmem:[#allocation2 + $0x58] sm:$0xf0] %vm904_vm1, %v8906_v8  ;;  %v7487_v44 = vpack.c.bf16 %v5946_v51, %v5943_v15  ;;  %5730 = vst [vmem:[#allocation2 + $0x78] sm:$0xf0] %v5725_v57  ;;  %v7456_v9 = vpack.c.bf16 %v5945_v24, %v5942_v42  ;;  %v7458_v38 = vpack.c.bf16 %v5944_v61, %v5941_v18  ;;  %v8917_v46 = vunpack.i.h.bf16 %v8915_v17  ;;  %v5954_v23 = vld [vmem:[#allocation2 + $0x68] sm:$0xff]  ;;  %v5953_v15 = vld [vmem:[#allocation2 + $0x60] sm:$0xff] }
 0x2bc   : > { %6663 = vst.msk [vmem:[%s10897_s20 + $0x33] ss:$8 sm:$0x7] %vm10821_vm14, %v3531_v3  ;;  %6664 = vst.msk [vmem:[%s10897_s20 + $0x4b] ss:$8 sm:$0x7] %vm10821_vm14, %v3533_v33  ;;  %v8916_v16 = vunpack.i.l.bf16 %v8915_v17  ;;  %v5754_v20 = vsel %vm942_vm6, %v8941_v25, %v8942_v29 }
 0x2bd   : > { %6667 = vst.msk [vmem:[%s10897_s20 + $0x93] ss:$8 sm:$0x7] %vm10821_vm14, %v3532_v37  ;;  %6668 = vst.msk [vmem:[%s10897_s20 + $0xab] ss:$8 sm:$0x7] %vm10821_vm14, %v3534_v5  ;;  %7488 = vmatpush3.bf16.msra.mxu1 %v7487_v44  ;;  %7457 = vmatprep.subr.bf16.mxu0 %v7456_v9  ;;  %v8950_v41 = vpop.permute.xlu1 %8949 }
 0x2be   : > { %5675 = vst [vmem:[#allocation2 + $0x48] sm:$0xf0] %v5670_v26  ;;  %5676 = vst [vmem:[#allocation2 + $0x50] sm:$0xf0] %v5671_v7  ;;  %7489 = vmatprep.subr.bf16.mxu1 %v9099_v21  ;;  %v5712_v1 = vsel %vm896_vm3, %v8916_v16, %v8917_v46  ;;  %7459 = vmatpush1.bf16.msra.mxu0 %v7458_v38  ;;  %v8952_v6 = vunpack.i.h.bf16 %v8950_v41  ;;  %v8951_v12 = vunpack.i.l.bf16 %v8950_v41  ;;  %v11905_v60 = vpop.permute.xlu0 %8924  ;;  %v5949_v36 = vld [vmem:[#allocation2 + $0x40] sm:$0xff]  ;;  %v5948_v31 = vld [vmem:[#allocation2 + $0x38] sm:$0xff]  ;;  %v8932_v41 = vunpack.i.h.bf16 %v11859_v32 }
 0x2bf   : > { %5760 = vst.msk [vmem:[#allocation2 + $0xa0] sm:$0xf0] %vm904_vm1, %v8942_v29  ;;  %5759 = vst [vmem:[#allocation2 + $0x98] sm:$0xf0] %v5754_v20  ;;  %v8926_v19 = vunpack.i.l.bf16 %v11905_v60  ;;  %v5947_v62 = vld [vmem:[#allocation2 + $0x30] sm:$0xff] }
 0x2c0   : > { %5718 = vst.msk [vmem:[#allocation2 + $0x88] sm:$0xf] %vm886_vm0, %v8917_v46  ;;  %5717 = vst [vmem:[#allocation2 + $0x80] sm:$0xf] %v5712_v1  ;;  %v5782_v58 = vsel %vm972_vm8, %v8951_v12, %v8952_v6 }
 0x2c1   : > { %5788 = vst.msk [vmem:[#allocation2 + $0xb8] sm:$0xf0] %vm904_vm1, %v8952_v6  ;;  %5787 = vst [vmem:[#allocation2 + $0xb0] sm:$0xf0] %v5782_v58  ;;  %v5711_v28 = vsel %vm896_vm3, %v8926_v19, %v8916_v16  ;;  %v11911_v50 = vpop.permute.xlu1 %8959 }
 0x2c2   : > { %v5952_v59 = vld [vmem:[#allocation2 + $0x58] sm:$0xff]  ;;  %5716 = vst [vmem:[#allocation2 + $0x78] sm:$0xf] %v5711_v28  ;;  %v8961_v35 = vunpack.i.l.bf16 %v11911_v50  ;;  %v8935_v39 = vpop.permute.xlu0 %8934 }
 0x2c3   : > { %v7490_v30 = vpack.c.bf16 %v5952_v59, %v5949_v36  ;;  %v8937_v27 = vunpack.i.h.bf16 %v8935_v39  ;;  %v8936_v10 = vunpack.i.l.bf16 %v8935_v39 }
 0x2c4   : > { %v5753_v13 = vsel %vm942_vm6, %v8961_v35, %v8941_v25 }
 0x2c5   : > { %v5951_v14 = vld [vmem:[#allocation2 + $0x50] sm:$0xff]  ;;  %v5950_v45 = vld [vmem:[#allocation2 + $0x48] sm:$0xff]  ;;  %7491 = vmatpush3.bf16.msra.mxu1 %v7490_v30  ;;  %5758 = vst [vmem:[#allocation2 + $0x90] sm:$0xf0] %v5753_v13  ;;  %v5740_v34 = vsel %vm927_vm5, %v8936_v10, %v8937_v27  ;;  %5746 = vst.msk [vmem:[#allocation2 + $0xa0] sm:$0xf] %vm886_vm0, %v8937_v27  ;;  %v11918_v48 = vpop.permute.xlu1 %8969 }
 0x2c6   : > { %v7460_v52 = vpack.c.bf16 %v5951_v14, %v5948_v31  ;;  %v7462_v43 = vpack.c.bf16 %v5950_v45, %v5947_v62  ;;  %7492 = vmatprep.subr.bf16.mxu1 %v9099_v21  ;;  %5745 = vst [vmem:[#allocation2 + $0x98] sm:$0xf] %v5740_v34  ;;  %v8971_v49 = vunpack.i.l.bf16 %v11918_v48  ;;  %v8945_v0 = vpop.permute.xlu0 %8944  ;;  %v8962_v62 = vunpack.i.h.bf16 %v11911_v50 }
 0x2c7   : > { %v5958_v2 = vld [vmem:[#allocation2 + $0x88] sm:$0xff]  ;;  %v5957_v11 = vld [vmem:[#allocation2 + $0x80] sm:$0xff]  ;;  %v8947_v8 = vunpack.i.h.bf16 %v8945_v0  ;;  %v8946_v3 = vunpack.i.l.bf16 %v8945_v0 }
 0x2c8   : > { %7461 = vmatprep.subr.bf16.mxu0 %v7460_v52  ;;  %v7493_v56 = vpack.c.bf16 %v5958_v2, %v5955_v22  ;;  %v7464_v4 = vpack.c.bf16 %v5957_v11, %v5954_v23  ;;  %v5781_v37 = vsel %vm972_vm8, %v8971_v49, %v8951_v12  ;;  %v8927_v52 = vunpack.i.h.bf16 %v11905_v60 }
 0x2c9   : > { %7463 = vmatpush1.bf16.msra.mxu0 %v7462_v43  ;;  %5786 = vst [vmem:[#allocation2 + $0xa8] sm:$0xf0] %v5781_v37  ;;  %v5768_v33 = vsel %vm957_vm7, %v8946_v3, %v8947_v8  ;;  %5774 = vst.msk [vmem:[#allocation2 + $0xb8] sm:$0xf] %vm886_vm0, %v8947_v8  ;;  %v11925_v5 = vpop.permute.xlu1 %8979  ;;  %v5956_v51 = vld [vmem:[#allocation2 + $0x78] sm:$0xff]  ;;  %v8972_v60 = vunpack.i.h.bf16 %v11918_v48 }
 0x2ca   : > { %7494 = vmatpush3.bf16.msra.mxu1 %v7493_v56  ;;  %7465 = vmatprep.subr.bf16.mxu0 %v7464_v4  ;;  %5773 = vst [vmem:[#allocation2 + $0xb0] sm:$0xf] %v5768_v33  ;;  %v8982_v42 = vunpack.i.h.bf16 %v11925_v5  ;;  %v8981_v57 = vunpack.i.l.bf16 %v11925_v5  ;;  %v11929_v26 = vpop.permute.xlu0 %8954  ;;  %v7466_v7 = vpack.c.bf16 %v5956_v51, %v5953_v15 }
 0x2cb   : > { %7495 = vmatprep.subr.bf16.mxu1 %v9099_v21  ;;  %v8956_v40 = vunpack.i.l.bf16 %v11929_v26 }
 0x2cc   : > { %v5810_v44 = vsel %vm1002_vm10, %v8981_v57, %v8982_v42  ;;  %5816 = vst.msk [vmem:[#allocation2 + $0xd0] sm:$0xf0] %vm904_vm1, %v8982_v42  ;;  %v5961_v25 = vld [vmem:[#allocation2 + $0xa0] sm:$0xff] }
 0x2cd   : > { %7467 = vmatpush1.bf16.msra.mxu0 %v7466_v7  ;;  %5815 = vst [vmem:[#allocation2 + $0xc8] sm:$0xf0] %v5810_v44  ;;  %v5739_v24 = vsel %vm927_vm5, %v8956_v40, %v8936_v10  ;;  %v11937_v18 = vpop.permute.xlu1 %8989  ;;  %v5960_v20 = vld [vmem:[#allocation2 + $0x98] sm:$0xff]  ;;  %v8957_v7 = vunpack.i.h.bf16 %v11929_v26 }
 0x2ce   : > { %5744 = vst [vmem:[#allocation2 + $0x90] sm:$0xf] %v5739_v24  ;;  %v11939_v61 = vpop.permute.xlu0 %8964  ;;  %v8991_v9 = vunpack.i.l.bf16 %v11937_v18 }
 0x2cf   : > { %v8966_v29 = vunpack.i.l.bf16 %v11939_v61 }
 0x2d0   : > { %v5964_v17 = vld [vmem:[#allocation2 + $0xb8] sm:$0xff] }
 0x2d1   : > { %v5767_v38 = vsel %vm957_vm7, %v8966_v29, %v8946_v3  ;;  %v9000_v46 = vpop.permute.xlu1 %8999  ;;  %v7496_v16 = vpack.c.bf16 %v5964_v17, %v5961_v25  ;;  %v5963_v1 = vld [vmem:[#allocation2 + $0xb0] sm:$0xff] }
 0x2d2   : > { %5772 = vst [vmem:[#allocation2 + $0xa8] sm:$0xf] %v5767_v38  ;;  %v9002_v6 = vunpack.i.h.bf16 %v9000_v46  ;;  %v9001_v12 = vunpack.i.l.bf16 %v9000_v46  ;;  %v8975_v19 = vpop.permute.xlu0 %8974  ;;  %v7468_v58 = vpack.c.bf16 %v5963_v1, %v5960_v20  ;;  %v8967_v20 = vunpack.i.h.bf16 %v11939_v61 }
 0x2d3   : > { %v8977_v36 = vunpack.i.h.bf16 %v8975_v19  ;;  %v8976_v59 = vunpack.i.l.bf16 %v8975_v19  ;;  %7497 = vmatpush3.bf16.msra.mxu1 %v7496_v16  ;;  %v8992_v61 = vunpack.i.h.bf16 %v11937_v18 }
 0x2d4   : > { %v5849_v31 = vsel %vm912_vm4, %v9002_v6, %v8932_v41  ;;  %v5850_v28 = vsel %vm912_vm4, %v8932_v41, %v9001_v12  ;;  %5856 = vst.msk [vmem:[#allocation2 + $0x100] sm:$0xf] %vm886_vm0, %v9001_v12  ;;  %7469 = vmatprep.subr.bf16.mxu0 %v7468_v58  ;;  %7498 = vmatprep.subr.bf16.mxu1 %v9099_v21 }
 0x2d5   : > { %5854 = vst [vmem:[#allocation2 + $0xf0] sm:$0xf] %v5849_v31  ;;  %5855 = vst [vmem:[#allocation2 + $0xf8] sm:$0xf] %v5850_v28  ;;  %v5795_v32 = vsel %vm987_vm9, %v8991_v9, %v8976_v59  ;;  %v5796_v30 = vsel %vm987_vm9, %v8976_v59, %v8977_v36  ;;  %v9010_v14 = vpop.permute.xlu1 %9009  ;;  %v5959_v34 = vld [vmem:[#allocation2 + $0x90] sm:$0xff] }
 0x2d6   : > { %5802 = vst.msk [vmem:[#allocation2 + $0xd0] sm:$0xf] %vm886_vm0, %v8977_v36  ;;  %5800 = vst [vmem:[#allocation2 + $0xc0] sm:$0xf] %v5795_v32  ;;  %v9012_v45 = vunpack.i.h.bf16 %v9010_v14  ;;  %v9011_v35 = vunpack.i.l.bf16 %v9010_v14  ;;  %v8985_v39 = vpop.permute.xlu0 %8984 }
 0x2d7   : > { %5801 = vst [vmem:[#allocation2 + $0xc8] sm:$0xf] %v5796_v30  ;;  %v8987_v43 = vunpack.i.h.bf16 %v8985_v39  ;;  %v8986_v27 = vunpack.i.l.bf16 %v8985_v39 }
 0x2d8   : > { %v5877_v10 = vsel %vm942_vm6, %v9012_v45, %v8962_v62  ;;  %v5878_v13 = vsel %vm942_vm6, %v8962_v62, %v9011_v35  ;;  %5884 = vst.msk [vmem:[#allocation2 + $0x118] sm:$0xf] %vm886_vm0, %v9011_v35 }
 0x2d9   : > { %5882 = vst [vmem:[#allocation2 + $0x108] sm:$0xf] %v5877_v10  ;;  %5883 = vst [vmem:[#allocation2 + $0x110] sm:$0xf] %v5878_v13  ;;  %v5835_v22 = vsel %vm896_vm3, %v8987_v43, %v8927_v52  ;;  %v5836_v50 = vsel %vm896_vm3, %v8927_v52, %v8986_v27  ;;  %v9020_v2 = vpop.permute.xlu1 %9019  ;;  %v5962_v56 = vld [vmem:[#allocation2 + $0xa8] sm:$0xff] }
 0x2da   : > { %5842 = vst.msk [vmem:[#allocation2 + $0xe8] sm:$0xf0] %vm904_vm1, %v8986_v27  ;;  %5840 = vst [vmem:[#allocation2 + $0xd8] sm:$0xf0] %v5835_v22  ;;  %v9022_v23 = vunpack.i.h.bf16 %v9020_v2  ;;  %v9021_v11 = vunpack.i.l.bf16 %v9020_v2  ;;  %v8995_v49 = vpop.permute.xlu0 %8994  ;;  %v7470_v0 = vpack.c.bf16 %v5962_v56, %v5959_v34 }
 0x2db   : > { %5841 = vst [vmem:[#allocation2 + $0xe0] sm:$0xf0] %v5836_v50  ;;  %v8996_v4 = vunpack.i.l.bf16 %v8995_v49  ;;  %v8997_v33 = vunpack.i.h.bf16 %v8995_v49 }
 0x2dc   : > { %v5905_v8 = vsel %vm972_vm8, %v9022_v23, %v8972_v60  ;;  %v5906_v3 = vsel %vm972_vm8, %v8972_v60, %v9021_v11  ;;  %5912 = vst.msk [vmem:[#allocation2 + $0x130] sm:$0xf] %vm886_vm0, %v9021_v11  ;;  %7471 = vmatpush1.bf16.msra.mxu0 %v7470_v0 }
 0x2dd   : > { %5910 = vst [vmem:[#allocation2 + $0x120] sm:$0xf] %v5905_v8  ;;  %5911 = vst [vmem:[#allocation2 + $0x128] sm:$0xf] %v5906_v3  ;;  %v5809_v48 = vsel %vm1002_vm10, %v8996_v4, %v8981_v57  ;;  %v9030_v37 = vpop.permute.xlu1 %9029  ;;  %v5967_v25 = vld [vmem:[#allocation2 + $0xd0] sm:$0xff] }
 0x2de   : > { %5814 = vst [vmem:[#allocation2 + $0xc0] sm:$0xf0] %v5809_v48  ;;  %v9032_v15 = vunpack.i.h.bf16 %v9030_v37  ;;  %v9031_v51 = vunpack.i.l.bf16 %v9030_v37  ;;  %v9005_v42 = vpop.permute.xlu0 %9004  ;;  %v5966_v26 = vld [vmem:[#allocation2 + $0xc8] sm:$0xff] }
 0x2df   : > { %v9007_v40 = vunpack.i.h.bf16 %v9005_v42  ;;  %v9006_v44 = vunpack.i.l.bf16 %v9005_v42 }
 0x2e0   : > { %v5933_v24 = vsel %vm1002_vm10, %v9032_v15, %v8997_v33  ;;  %v5934_v29 = vsel %vm1002_vm10, %v8997_v33, %v9031_v51  ;;  %5940 = vst.msk [vmem:[#allocation2 + $0x148] sm:$0xf] %vm886_vm0, %v9031_v51 }
 0x2e1   : > { %v5970_v5 = vld [vmem:[#allocation2 + $0xe8] sm:$0xff]  ;;  %5938 = vst [vmem:[#allocation2 + $0x138] sm:$0xf] %v5933_v24  ;;  %5939 = vst [vmem:[#allocation2 + $0x140] sm:$0xf] %v5934_v29  ;;  %v5863_v57 = vsel %vm927_vm5, %v9007_v40, %v8957_v7  ;;  %v5864_v17 = vsel %vm927_vm5, %v8957_v7, %v9006_v44  ;;  %v5968_v58 = vld [vmem:[#allocation2 + $0xd8] sm:$0xff] }
 0x2e2   : > { %5870 = vst.msk [vmem:[#allocation2 + $0x100] sm:$0xf0] %vm904_vm1, %v9006_v44  ;;  %v7499_v9 = vpack.c.bf16 %v5970_v5, %v5967_v25  ;;  %v5969_v38 = vld [vmem:[#allocation2 + $0xe0] sm:$0xff]  ;;  %5868 = vst [vmem:[#allocation2 + $0xf0] sm:$0xf0] %v5863_v57  ;;  %v9015_v46 = vpop.permute.xlu0 %9014 }
 0x2e3   : > { %5869 = vst [vmem:[#allocation2 + $0xf8] sm:$0xf0] %v5864_v17  ;;  %v7472_v16 = vpack.c.bf16 %v5969_v38, %v5966_v26  ;;  %v9017_v1 = vunpack.i.h.bf16 %v9015_v46  ;;  %v9016_v41 = vunpack.i.l.bf16 %v9015_v46 }
 0x2e4   : > { %7500 = vmatpush3.bf16.msra.mxu1 %v7499_v9 }
 0x2e5   : > { %7473 = vmatprep.subr.bf16.mxu0 %v7472_v16  ;;  %7501 = vmatprep.subr.bf16.mxu1 %v9099_v21  ;;  %v5891_v6 = vsel %vm957_vm7, %v9017_v1, %v8967_v20  ;;  %v5892_v12 = vsel %vm957_vm7, %v8967_v20, %v9016_v41  ;;  %5898 = vst.msk [vmem:[#allocation2 + $0x118] sm:$0xf0] %vm904_vm1, %v9016_v41  ;;  %v5965_v19 = vld [vmem:[#allocation2 + $0xc0] sm:$0xff] }
 0x2e6   : > { %5896 = vst [vmem:[#allocation2 + $0x108] sm:$0xf0] %v5891_v6  ;;  %5897 = vst [vmem:[#allocation2 + $0x110] sm:$0xf0] %v5892_v12  ;;  %v9025_v36 = vpop.permute.xlu0 %9024  ;;  %v7474_v59 = vpack.c.bf16 %v5968_v58, %v5965_v19 }
 0x2e7   : > { %v9027_v31 = vunpack.i.h.bf16 %v9025_v36  ;;  %v9026_v28 = vunpack.i.l.bf16 %v9025_v36  ;;  %v5982_v10 = vld [vmem:[#allocation2 + $0x148] sm:$0xf] }
 0x2e8   : > { %7475 = vmatpush1.bf16.msra.mxu0 %v7474_v59  ;;  %v5981_v50 = vld [vmem:[#allocation2 + $0x140] sm:$0xf]  ;;  %v5980_v60 = vld [vmem:[#allocation2 + $0x138] sm:$0xf] }
 0x2e9   : > { %v5919_v32 = vsel %vm987_vm9, %v9027_v31, %v8992_v61  ;;  %v5920_v30 = vsel %vm987_vm9, %v8992_v61, %v9026_v28  ;;  %5926 = vst.msk [vmem:[#allocation2 + $0x130] sm:$0xf0] %vm904_vm1, %v9026_v28  ;;  %v5973_v14 = vld [vmem:[#allocation2 + $0x100] sm:$0xff]  ;;  %v5971_v52 = vld [vmem:[#allocation2 + $0xf0] sm:$0xff] }
 0x2ea   : > { %5924 = vst [vmem:[#allocation2 + $0x120] sm:$0xf0] %v5919_v32  ;;  %5925 = vst [vmem:[#allocation2 + $0x128] sm:$0xf0] %v5920_v30  ;;  %v5972_v45 = vld [vmem:[#allocation2 + $0xf8] sm:$0xff] }
 0x2ec   : > { %v5976_v62 = vld [vmem:[#allocation2 + $0x118] sm:$0xff] }
 0x2ed   : > { %v7502_v35 = vpack.c.bf16 %v5976_v62, %v5973_v14  ;;  %v5975_v39 = vld [vmem:[#allocation2 + $0x110] sm:$0xff]  ;;  %v5974_v43 = vld [vmem:[#allocation2 + $0x108] sm:$0xff] }
 0x2ee   : > { %v7476_v27 = vpack.c.bf16 %v5975_v39, %v5972_v45  ;;  %v7478_v18 = vpack.c.bf16 %v5974_v43, %v5971_v52 }
 0x2ef   : > { %7503 = vmatpush3.bf16.msra.mxu1 %v7502_v35  ;;  %v4128_v13 = vpop.f32.mrb[8].mxu1 }
 0x2f0   : > { %7477 = vmatprep.subr.bf16.mxu0 %v7476_v27  ;;  %7504 = vmatprep.subr.bf16.mxu1 %v9099_v21  ;;  %v5979_v22 = vld [vmem:[#allocation2 + $0x130] sm:$0xff]  ;;  %v6998_v23 = vpop.f32.mrb[9].mxu1  ;;  %v4129_v21 = vadd.f32 %v4128_v13, %v9771_v54 }
 0x2f1   : > { %7479 = vmatpush1.bf16.msra.mxu0 %v7478_v18  ;;  %v7505_v2 = vpack.c.bf16 %v5982_v10, %v5979_v22  ;;  %v5978_v34 = vld [vmem:[#allocation2 + $0x128] sm:$0xff]  ;;  %v5977_v56 = vld [vmem:[#allocation2 + $0x120] sm:$0xff] }
 0x2f2   : > { %v7480_v11 = vpack.c.bf16 %v5981_v50, %v5978_v34  ;;  %v7483_v49 = vpack.c.bf16 %v5980_v60, %v5977_v56  ;;  %v4137_v3 = vcombine.high %v4129_v21, %v4129_v21  ;;  %v4158_v55 = vrot.slane %v4129_v21, %v10792_v47 }
 0x2f3   : > { %7507 = vmatpush3.bf16.msk.msra.mxu1 %vm9730_vm13, %v7505_v2 }
 0x2f4   : > { %7482 = vmatprep.subr.msk.bf16.mxu0 %vm9730_vm13, %v7480_v11  ;;  %v4165_v15 = vrot.slane %v4137_v3, %v10792_v47 }
 0x2f5   : > { %7485 = vmatpush1.bf16.msk.msra.mxu0 %vm9730_vm13, %v7483_v49 }
 0x2f6   : > { %7090 = vmatmul.mubr.msk.f32.vlgmr.msra.gmra.mrb[14].mxu1 %vm957_vm7, %v11849_v63 }
 0x2f8   : > { %6710 = vmatmul.mubr.msk.f32.vlgmr.msra.gmra.mrb[14].mxu0 %vm957_vm7, %v11849_v63 }
 0x2fa   : > { %v4057_v0 = vpop.f32.mrb[8].mxu0 }
 0x2fb   : > { %v4058_v4 = vadd.f32 %v4057_v0, %v9771_v54  ;;  %v4059_v8 = vpop.f32.mrb[9].mxu0 }
 0x2fc   : > { %v4060_v48 = vadd.f32 %v4059_v8, %v9771_v54 }
 0x2fe   : > { %v4135_v37 = vcombine.low %v4058_v4, %v4060_v48  ;;  %v4136_v33 = vcombine.high %v4058_v4, %v4060_v48 }
 0x300   : > { %v4144_v51 = vrot.slane %v4135_v37, %v10792_v47  ;;  %v4151_v63 = vrot.slane %v4136_v33, %v10792_v47 }
 0x302   : > { %v4166_v42 = vcombine.low %v4144_v51, %v4158_v55  ;;  %v4167_v7 = vcombine.high %v4144_v51, %v4158_v55  ;;  %v4168_v40 = vcombine.low %v4151_v63, %v4165_v15  ;;  %v4169_v44 = vcombine.high %v4151_v63, %v4165_v15 }
 0x304   : > { %v4176_v24 = vrot.slane %v4166_v42, %v10792_v47  ;;  %v4183_v29 = vrot.slane %v4168_v40, %v10792_v47  ;;  %v4190_v25 = vrot.slane %v4167_v7, %v10792_v47  ;;  %v4197_v5 = vrot.slane %v4169_v44, %v10792_v47 }
 0x306   : > { %v4198_v57 = vcombine.high %v4176_v24, %v4176_v24  ;;  %v4199_v17 = vcombine.high %v4183_v29, %v4183_v29  ;;  %v4200_v9 = vcombine.high %v4190_v25, %v4190_v25  ;;  %v4201_v26 = vcombine.high %v4197_v5, %v4197_v5  ;;  %6674 = vst.msk [vmem:[%s10897_s20 + $0x4] ss:$8 sm:$0x7] %vm10821_vm14, %v4176_v24 }
 0x307   : > { %6675 = vst.msk [vmem:[%s10897_s20 + $0x1c] ss:$8 sm:$0x7] %vm10821_vm14, %v4190_v25  ;;  %6678 = vst.msk [vmem:[%s10897_s20 + $0x64] ss:$8 sm:$0x7] %vm10821_vm14, %v4183_v29 }
 0x308   : > { %6679 = vst.msk [vmem:[%s10897_s20 + $0x7c] ss:$8 sm:$0x7] %vm10821_vm14, %v4197_v5  ;;  %6676 = vst.msk [vmem:[%s10897_s20 + $0x34] ss:$8 sm:$0x7] %vm10821_vm14, %v4198_v57 }
 0x309   : > { %6677 = vst.msk [vmem:[%s10897_s20 + $0x4c] ss:$8 sm:$0x7] %vm10821_vm14, %v4200_v9  ;;  %6680 = vst.msk [vmem:[%s10897_s20 + $0x94] ss:$8 sm:$0x7] %vm10821_vm14, %v4199_v17 }
 0x30a   : > { %6681 = vst.msk [vmem:[%s10897_s20 + $0xac] ss:$8 sm:$0x7] %vm10821_vm14, %v4201_v26 }
 0x339   : > { %v4795_v38 = vpop.f32.mrb[10].mxu1 }
 0x33a   : > { %v4796_v46 = vadd.f32 %v4795_v38, %v9771_v54  ;;  %v7029_v16 = vpop.f32.mrb[11].mxu1 }
 0x33b   : > { %v4724_v20 = vpop.f32.mrb[10].mxu0 }
 0x33c   : > { %v4725_v1 = vadd.f32 %v4724_v20, %v9771_v54  ;;  %v4726_v41 = vpop.f32.mrb[11].mxu0  ;;  %v4804_v6 = vcombine.high %v4796_v46, %v4796_v46  ;;  %v4825_v36 = vrot.slane %v4796_v46, %v10792_v47 }
 0x33d   : > { %v4727_v12 = vadd.f32 %v4726_v41, %v9771_v54 }
 0x33e   : > { %v4832_v59 = vrot.slane %v4804_v6, %v10792_v47 }
 0x33f   : > { %v4802_v19 = vcombine.low %v4725_v1, %v4727_v12  ;;  %v4803_v58 = vcombine.high %v4725_v1, %v4727_v12 }
 0x341   : > { %v4811_v61 = vrot.slane %v4802_v19, %v10792_v47  ;;  %v4818_v31 = vrot.slane %v4803_v58, %v10792_v47 }
 0x343   : > { %v4833_v28 = vcombine.low %v4811_v61, %v4825_v36  ;;  %v4834_v32 = vcombine.high %v4811_v61, %v4825_v36  ;;  %v4835_v30 = vcombine.low %v4818_v31, %v4832_v59  ;;  %v4836_v14 = vcombine.high %v4818_v31, %v4832_v59 }
 0x345   : > { %v4843_v62 = vrot.slane %v4833_v28, %v10792_v47  ;;  %v4850_v45 = vrot.slane %v4835_v30, %v10792_v47  ;;  %v4857_v35 = vrot.slane %v4834_v32, %v10792_v47  ;;  %v4864_v39 = vrot.slane %v4836_v14, %v10792_v47 }
 0x347   : > { %v4865_v52 = vcombine.high %v4843_v62, %v4843_v62  ;;  %v4866_v43 = vcombine.high %v4850_v45, %v4850_v45  ;;  %v4867_v27 = vcombine.high %v4857_v35, %v4857_v35  ;;  %v4868_v18 = vcombine.high %v4864_v39, %v4864_v39  ;;  %6687 = vst.msk [vmem:[%s10897_s20 + $0x5] ss:$8 sm:$0x7] %vm10821_vm14, %v4843_v62 }
 0x348   : > { %6688 = vst.msk [vmem:[%s10897_s20 + $0x1d] ss:$8 sm:$0x7] %vm10821_vm14, %v4857_v35  ;;  %6691 = vst.msk [vmem:[%s10897_s20 + $0x65] ss:$8 sm:$0x7] %vm10821_vm14, %v4850_v45 }
 0x349   : > { %6692 = vst.msk [vmem:[%s10897_s20 + $0x7d] ss:$8 sm:$0x7] %vm10821_vm14, %v4864_v39  ;;  %6689 = vst.msk [vmem:[%s10897_s20 + $0x35] ss:$8 sm:$0x7] %vm10821_vm14, %v4865_v52 }
 0x34a   : > { %6690 = vst.msk [vmem:[%s10897_s20 + $0x4d] ss:$8 sm:$0x7] %vm10821_vm14, %v4867_v27  ;;  %6693 = vst.msk [vmem:[%s10897_s20 + $0x95] ss:$8 sm:$0x7] %vm10821_vm14, %v4866_v43 }
 0x34b   : > { %6694 = vst.msk [vmem:[%s10897_s20 + $0xad] ss:$8 sm:$0x7] %vm10821_vm14, %v4868_v18 }
 0x385   : > { %v5462_v10 = vpop.f32.mrb[12].mxu1 }
 0x386   : > { %v7060_v13 = vpop.f32.mrb[13].mxu1  ;;  %v5463_v22 = vadd.f32 %v5462_v10, %v9771_v54 }
 0x388   : > { %v5471_v56 = vcombine.high %v5463_v22, %v5463_v22  ;;  %v5492_v49 = vrot.slane %v5463_v22, %v10792_v47 }
 0x38a   : > { %v5499_v21 = vrot.slane %v5471_v56, %v10792_v47 }
 0x38c   : > { %v5391_v50 = vpop.f32.mrb[12].mxu0 }
 0x38d   : > { %v5392_v2 = vadd.f32 %v5391_v50, %v9771_v54  ;;  %v5393_v34 = vpop.f32.mrb[13].mxu0 }
 0x38e   : > { %v5394_v60 = vadd.f32 %v5393_v34, %v9771_v54 }
 0x390   : > { %v5469_v23 = vcombine.low %v5392_v2, %v5394_v60  ;;  %v5470_v11 = vcombine.high %v5392_v2, %v5394_v60 }
 0x392   : > { %v5478_v0 = vrot.slane %v5469_v23, %v10792_v47  ;;  %v5485_v4 = vrot.slane %v5470_v11, %v10792_v47 }
 0x394   : > { %v5500_v8 = vcombine.low %v5478_v0, %v5492_v49  ;;  %v5501_v3 = vcombine.high %v5478_v0, %v5492_v49  ;;  %v5502_v48 = vcombine.low %v5485_v4, %v5499_v21  ;;  %v5503_v37 = vcombine.high %v5485_v4, %v5499_v21 }
 0x396   : > { %v5510_v33 = vrot.slane %v5500_v8, %v10792_v47  ;;  %v5517_v55 = vrot.slane %v5502_v48, %v10792_v47  ;;  %v5524_v15 = vrot.slane %v5501_v3, %v10792_v47  ;;  %v5531_v51 = vrot.slane %v5503_v37, %v10792_v47 }
 0x398   : > { %v5532_v63 = vcombine.high %v5510_v33, %v5510_v33  ;;  %v5533_v42 = vcombine.high %v5517_v55, %v5517_v55  ;;  %v5534_v7 = vcombine.high %v5524_v15, %v5524_v15  ;;  %v5535_v40 = vcombine.high %v5531_v51, %v5531_v51  ;;  %6700 = vst.msk [vmem:[%s10897_s20 + $0x6] ss:$8 sm:$0x7] %vm10821_vm14, %v5510_v33 }
 0x399   : > { %6701 = vst.msk [vmem:[%s10897_s20 + $0x1e] ss:$8 sm:$0x7] %vm10821_vm14, %v5524_v15  ;;  %6704 = vst.msk [vmem:[%s10897_s20 + $0x66] ss:$8 sm:$0x7] %vm10821_vm14, %v5517_v55 }
 0x39a   : > { %6705 = vst.msk [vmem:[%s10897_s20 + $0x7e] ss:$8 sm:$0x7] %vm10821_vm14, %v5531_v51  ;;  %6702 = vst.msk [vmem:[%s10897_s20 + $0x36] ss:$8 sm:$0x7] %vm10821_vm14, %v5532_v63 }
 0x39b   : > { %6703 = vst.msk [vmem:[%s10897_s20 + $0x4e] ss:$8 sm:$0x7] %vm10821_vm14, %v5534_v7  ;;  %6706 = vst.msk [vmem:[%s10897_s20 + $0x96] ss:$8 sm:$0x7] %vm10821_vm14, %v5533_v42 }
 0x39c   : > { %6707 = vst.msk [vmem:[%s10897_s20 + $0xae] ss:$8 sm:$0x7] %vm10821_vm14, %v5535_v40 }
 0x3c9   : > { %v6129_v44 = vpop.f32.mrb[14].mxu1 }
 0x3ca   : > { %v6130_v24 = vadd.f32 %v6129_v44, %v9771_v54  ;;  %v7091_v29 = vpop.f32.mrb[15].mxu1 }
 0x3cb   : > { %v6058_v25 = vpop.f32.mrb[14].mxu0 }
 0x3cc   : > { %v6059_v5 = vadd.f32 %v6058_v25, %v9771_v54  ;;  %v6060_v57 = vpop.f32.mrb[15].mxu0  ;;  %v6138_v17 = vcombine.high %v6130_v24, %v6130_v24  ;;  %v6159_v46 = vrot.slane %v6130_v24, %v10792_v47 }
 0x3cd   : > { %v6061_v9 = vadd.f32 %v6060_v57, %v9771_v54 }
 0x3ce   : > { %v6166_v16 = vrot.slane %v6138_v17, %v10792_v47 }
 0x3cf   : > { %v6136_v26 = vcombine.low %v6059_v5, %v6061_v9  ;;  %v6137_v38 = vcombine.high %v6059_v5, %v6061_v9 }
 0x3d1   : > { %v6145_v20 = vrot.slane %v6136_v26, %v10792_v47  ;;  %v6152_v1 = vrot.slane %v6137_v38, %v10792_v47 }
 0x3d3   : > { %v6167_v41 = vcombine.low %v6145_v20, %v6159_v46  ;;  %v6168_v6 = vcombine.high %v6145_v20, %v6159_v46  ;;  %v6169_v12 = vcombine.low %v6152_v1, %v6166_v16  ;;  %v6170_v54 = vcombine.high %v6152_v1, %v6166_v16 }
 0x3d5   : > { %v6177_v19 = vrot.slane %v6167_v41, %v10792_v47  ;;  %v6184_v58 = vrot.slane %v6169_v12, %v10792_v47  ;;  %v6191_v36 = vrot.slane %v6168_v6, %v10792_v47  ;;  %v6198_v59 = vrot.slane %v6170_v54, %v10792_v47  ;;  %6241 = sbr.rel (!%p9217_p5) target bundleno = 1006 (0x3ee), region = 72 }
 0x3d7   : > { %v6199_v61 = vcombine.high %v6177_v19, %v6177_v19  ;;  %v6200_v31 = vcombine.high %v6184_v58, %v6184_v58  ;;  %v6201_v28 = vcombine.high %v6191_v36, %v6191_v36  ;;  %v6202_v32 = vcombine.high %v6198_v59, %v6198_v59  ;;  %6713 = vst.msk [vmem:[%s10897_s20 + $0x7] ss:$8 sm:$0x7] %vm10821_vm14, %v6177_v19 }
 0x3d8   : > { %6714 = vst.msk [vmem:[%s10897_s20 + $0x1f] ss:$8 sm:$0x7] %vm10821_vm14, %v6191_v36  ;;  %6717 = vst.msk [vmem:[%s10897_s20 + $0x67] ss:$8 sm:$0x7] %vm10821_vm14, %v6184_v58 }
 0x3d9   : > { %6718 = vst.msk [vmem:[%s10897_s20 + $0x7f] ss:$8 sm:$0x7] %vm10821_vm14, %v6198_v59  ;;  %6715 = vst.msk [vmem:[%s10897_s20 + $0x37] ss:$8 sm:$0x7] %vm10821_vm14, %v6199_v61 }
 0x3da   : > { %6716 = vst.msk [vmem:[%s10897_s20 + $0x4f] ss:$8 sm:$0x7] %vm10821_vm14, %v6201_v28  ;;  %6719 = vst.msk [vmem:[%s10897_s20 + $0x97] ss:$8 sm:$0x7] %vm10821_vm14, %v6200_v31 }
 0x3db   : > { %6720 = vst.msk [vmem:[%s10897_s20 + $0xaf] ss:$8 sm:$0x7] %vm10821_vm14, %v6202_v32 }
 0x3de   : > { %v6259_v47 = vld [vmem:[%s10897_s20] sm:$0xff]  ;;  %v6261_v53 = vld [vmem:[%s10897_s20 + $0x8] sm:$0xff]  ;;  %v6263_v30 = vld [vmem:[%s10897_s20 + $0x10] sm:$0xff] }
 0x3df   : > { %v6265_v14 = vld [vmem:[%s10897_s20 + $0x18] sm:$0xff]  ;;  %v6267_v62 = vld [vmem:[%s10897_s20 + $0x20] sm:$0xff]  ;;  %v6269_v45 = vld [vmem:[%s10897_s20 + $0x28] sm:$0xff]  ;;  %6260 = vst [vmem:[%s12156_s30] sm:$0xff] %v6259_v47 }
 0x3e0   : > { %v6271_v35 = vld [vmem:[%s10897_s20 + $0x30] sm:$0xff]  ;;  %v6273_v39 = vld [vmem:[%s10897_s20 + $0x38] sm:$0xff]  ;;  %v6275_v52 = vld [vmem:[%s10897_s20 + $0x40] sm:$0xff]  ;;  %6262 = vst [vmem:[%s12156_s30 + $0x8] sm:$0xff] %v6261_v53 }
 0x3e1   : > { %v6277_v43 = vld [vmem:[%s10897_s20 + $0x48] sm:$0xff]  ;;  %v6279_v27 = vld [vmem:[%s10897_s20 + $0x50] sm:$0xff]  ;;  %v6281_v18 = vld [vmem:[%s10897_s20 + $0x58] sm:$0xff]  ;;  %6264 = vst [vmem:[%s12156_s30 + $0x10] sm:$0xff] %v6263_v30 }
 0x3e2   : > { %v6283_v10 = vld [vmem:[%s10897_s20 + $0x60] sm:$0xff]  ;;  %v6285_v13 = vld [vmem:[%s10897_s20 + $0x68] sm:$0xff]  ;;  %v6287_v22 = vld [vmem:[%s10897_s20 + $0x70] sm:$0xff]  ;;  %6266 = vst [vmem:[%s12156_s30 + $0x30] sm:$0xff] %v6265_v14 }
 0x3e3   : > { %v6289_v50 = vld [vmem:[%s10897_s20 + $0x78] sm:$0xff]  ;;  %v6291_v2 = vld [vmem:[%s10897_s20 + $0x80] sm:$0xff]  ;;  %v6293_v34 = vld [vmem:[%s10897_s20 + $0x88] sm:$0xff]  ;;  %6268 = vst [vmem:[%s12156_s30 + $0x38] sm:$0xff] %v6267_v62 }
 0x3e4   : > { %6270 = vst [vmem:[%s12156_s30 + $0x40] sm:$0xff] %v6269_v45  ;;  %6272 = vst [vmem:[%s12156_s30 + $0x60] sm:$0xff] %v6271_v35  ;;  %v6295_v56 = vld [vmem:[%s10897_s20 + $0x90] sm:$0xff]  ;;  %v6297_v60 = vld [vmem:[%s10897_s20 + $0x98] sm:$0xff] }
 0x3e5   : > { %6274 = vst [vmem:[%s12156_s30 + $0x68] sm:$0xff] %v6273_v39  ;;  %6276 = vst [vmem:[%s12156_s30 + $0x70] sm:$0xff] %v6275_v52  ;;  %v6299_v23 = vld [vmem:[%s10897_s20 + $0xa0] sm:$0xff]  ;;  %v6301_v11 = vld [vmem:[%s10897_s20 + $0xa8] sm:$0xff] }
 0x3e6   : > { %6278 = vst [vmem:[%s12156_s30 + $0x90] sm:$0xff] %v6277_v43  ;;  %6280 = vst [vmem:[%s12156_s30 + $0x98] sm:$0xff] %v6279_v27  ;;  %v6303_v49 = vld [vmem:[%s10897_s20 + $0xb0] sm:$0xff]  ;;  %v6305_v21 = vld [vmem:[%s10897_s20 + $0xb8] sm:$0xff] }
 0x3e7   : > { %6282 = vst [vmem:[%s12156_s30 + $0xa0] sm:$0xff] %v6281_v18  ;;  %6284 = vst [vmem:[%s12156_s30 + $0xc0] sm:$0xff] %v6283_v10 }
 0x3e8   : > { %6286 = vst [vmem:[%s12156_s30 + $0xc8] sm:$0xff] %v6285_v13  ;;  %6288 = vst [vmem:[%s12156_s30 + $0xd0] sm:$0xff] %v6287_v22 }
 0x3e9   : > { %6290 = vst [vmem:[%s12156_s30 + $0xf0] sm:$0xff] %v6289_v50  ;;  %6292 = vst [vmem:[%s12156_s30 + $0xf8] sm:$0xff] %v6291_v2 }
 0x3ea   : > { %6294 = vst [vmem:[%s12156_s30 + $0x100] sm:$0xff] %v6293_v34  ;;  %6296 = vst [vmem:[%s12156_s30 + $0x120] sm:$0xff] %v6295_v56 }
 0x3eb   : > { %6298 = vst [vmem:[%s12156_s30 + $0x128] sm:$0xff] %v6297_v60  ;;  %6300 = vst [vmem:[%s12156_s30 + $0x130] sm:$0xff] %v6299_v23 }
 0x3ec   : > { %6302 = vst [vmem:[%s12156_s30 + $0x150] sm:$0xff] %v6301_v11  ;;  %6304 = vst [vmem:[%s12156_s30 + $0x158] sm:$0xff] %v6303_v49 }
 0x3ed   : > { %6306 = vst [vmem:[%s12156_s30 + $0x160] sm:$0xff] %v6305_v21 }
 0x3ee PF: > { %s22_s27 = sadd.s32 1, %s9090_s27   ;;  %s12275_s21 = sld [smem:[#allocation4_spill]] }
 0x3ef   : > { %p19_p5 = scmp.ge.s32.totalorder %s22_s27, 6   ;;  %s12276_s22 = sld [smem:[#allocation9_spill]] }
 0x3f0   : > { %s12277_s23 = sld [smem:[#allocation5_spill]]  ;;  %s12278_s24 = sld [smem:[#allocation6_spill]] }
 0x3f1   : > { %s12279_s25 = sld [smem:[#allocation7_spill]]  ;;  %s12280_s26 = sld [smem:[#allocation8_spill]] }
 0x3f2   :  { %21 = sbr.rel (!%p19_p5) target bundleno = 7 (0x7), region = 211 }

</bundles_post_ra>
